<compile_context>
chip_gen: v7x
topology: tpu7x:2x2x1
jax: 0.10.0
libtpu: 0.0.40
codegen_flags: <defaults>
</compile_context>

<pallas_src>
import functools

import jax
import jax.numpy as jnp
from jax.experimental import pallas as pl
from jax.experimental.pallas import tpu as pltpu


def _round_up(x, m):
    return (x + m - 1) // m * m


# ------------------------------------------------------------------
# Tiled GEMM with fused bias + optional ReLU (bf16 in, f32 accumulate)
# ------------------------------------------------------------------
def _mm_kernel(x_ref, w_ref, b_ref, o_ref, acc_ref, *, relu):
    @pl.when(pl.program_id(2) == 0)
    def _():
        acc_ref[...] = jnp.zeros_like(acc_ref)

    acc_ref[...] += jnp.dot(x_ref[...], w_ref[...],
                            preferred_element_type=jnp.float32)

    @pl.when(pl.program_id(2) == pl.num_programs(2) - 1)
    def _():
        r = acc_ref[...] + b_ref[...]
        if relu:
            r = jnp.maximum(r, 0.0)
        o_ref[...] = r.astype(o_ref.dtype)


def _pick_bk(kp, bm, bn):
    """K-tile: whole Kp if the (double-buffered) tiles fit, else a 128-divisor."""
    budget = 12 * 1024 * 1024            # safe vs 16 MiB scoped VMEM on v5e

    def footprint(bk):
        return 2 * 2 * (bm * bk + bk * bn) + 4 * bm * bn   # bf16 dbl-buf + f32 acc

    if footprint(kp) <= budget:
        return kp
    for bk in (2048, 1024, 512, 256, 128):
        if kp % bk == 0 and footprint(bk) <= budget:
            return bk
    return 128


def matmul_bias(x, w_pad, b_pad, n_out, relu=False, out_dtype=jnp.float32):
    """x: (M, K); w_pad: (Kp, Np) bf16 pre-padded; b_pad: (1, Np) f32.

    Returns (M, n_out) in out_dtype with bias (+ReLU) fused into the epilogue.
    """
    M, K = x.shape
    Kp, Np = w_pad.shape
    assert K <= Kp and n_out <= Np

    if M >= 4096:
        bm = 512
    elif M >= 1024:
        bm = 256
    else:
        bm = _round_up(M, 16)            # bf16 needs sublane multiples of 16
    Mp = _round_up(M, bm)
    bn = 256 if (Np >= 256 and Np % 256 == 0) else 128
    bk = _pick_bk(Kp, bm, bn)

    xp = jnp.pad(x, ((0, Mp - M), (0, Kp - K))).astype(jnp.bfloat16)

    grid = (Mp // bm, Np // bn, Kp // bk)
    out = pl.pallas_call(
        functools.partial(_mm_kernel, relu=relu),
        out_shape=jax.ShapeDtypeStruct((Mp, Np), out_dtype),
        grid_spec=pltpu.PrefetchScalarGridSpec(
            num_scalar_prefetch=0,
            grid=grid,
            in_specs=[
                pl.BlockSpec((bm, bk), lambda i, j, k: (i, k)),
                pl.BlockSpec((bk, bn), lambda i, j, k: (k, j)),
                pl.BlockSpec((1, bn), lambda i, j, k: (0, j)),
            ],
            out_specs=pl.BlockSpec((bm, bn), lambda i, j, k: (i, j)),
            scratch_shapes=[pltpu.VMEM((bm, bn), jnp.float32)],
        ),
        compiler_params=pltpu.CompilerParams(
            dimension_semantics=("parallel", "parallel", "arbitrary")),
    )(xp, w_pad, b_pad)
    return out[:M, :n_out]


# ------------------------------------------------------------------
# Valid-padding strided conv + ReLU via bf16 im2col + Pallas GEMM
# (feature maps in this model are tiny -- <=2 MB -- so the im2col expansion is
#  negligible next to the 12 MB fc1 weight stream; done in bf16 to halve it)
# ------------------------------------------------------------------
def conv2d_relu(x, layer, k, stride, cout):
    N, H, W_, Cin = x.shape
    OH = (H - k) // stride + 1
    OW = (W_ - k) // stride + 1
    cols = [x[:, dy:dy + (OH - 1) * stride + 1:stride,
              dx:dx + (OW - 1) * stride + 1:stride, :]
            for dy in range(k) for dx in range(k)]
    patches = jnp.concatenate(cols, axis=-1).reshape(N * OH * OW, k * k * Cin)
    out = matmul_bias(patches, layer['w'], layer['b'], cout,
                      relu=True, out_dtype=jnp.bfloat16)
    return out.reshape(N, OH, OW, cout)


# ------------------------------------------------------------------
# Fused classifier tail: Linear(1164,100)+ReLU -> (100,50)+ReLU
#                        -> (50,10)+ReLU -> (10,1), one kernel launch.
# All weights pre-padded to 128 multiples; zero padding keeps the chain exact.
# ------------------------------------------------------------------
def _head_kernel(h_ref, w2_ref, b2_ref, w3_ref, b3_ref, w4_ref, b4_ref,
                 w5_ref, b5_ref, o10_ref, o1_ref):
    h = h_ref[...]
    a = jnp.dot(h, w2_ref[...], preferred_element_type=jnp.float32) + b2_ref[...]
    a = jnp.maximum(a, 0.0)
    b = jnp.dot(a.astype(jnp.bfloat16), w3_ref[...],
                preferred_element_type=jnp.float32) + b3_ref[...]
    b = jnp.maximum(b, 0.0)
    c = jnp.dot(b.astype(jnp.bfloat16), w4_ref[...],
                preferred_element_type=jnp.float32) + b4_ref[...]
    c = jnp.maximum(c, 0.0)
    o10_ref[...] = c.astype(o10_ref.dtype)
    d = jnp.dot(c.astype(jnp.bfloat16), w5_ref[...],
                preferred_element_type=jnp.float32) + b5_ref[...]
    o1_ref[...] = d.astype(o1_ref.dtype)


def mlp_head(h, params):
    """h: (B, 1164) bf16 -> (out10 (B,10) f32, out1 (B,1) f32)."""
    B, F = h.shape
    w2, b2 = params['fc2']['w'], params['fc2']['b']
    w3, b3 = params['fc3']['w'], params['fc3']['b']
    w4, b4 = params['fc4']['w'], params['fc4']['b']
    w5, b5 = params['fc5']['w'], params['fc5']['b']
    Kp = w2.shape[0]
    Mp = _round_up(B, 16)
    hp = jnp.pad(h, ((0, Mp - B), (0, Kp - F))).astype(jnp.bfloat16)

    def fullspec(shape):
        return pl.BlockSpec(shape, lambda i: (0, 0))

    o10, o1 = pl.pallas_call(
        _head_kernel,
        out_shape=(jax.ShapeDtypeStruct((Mp, 128), jnp.float32),
                   jax.ShapeDtypeStruct((Mp, 128), jnp.float32)),
        grid_spec=pltpu.PrefetchScalarGridSpec(
            num_scalar_prefetch=0,
            grid=(1,),
            in_specs=[fullspec(hp.shape),
                      fullspec(w2.shape), fullspec(b2.shape),
                      fullspec(w3.shape), fullspec(b3.shape),
                      fullspec(w4.shape), fullspec(b4.shape),
                      fullspec(w5.shape), fullspec(b5.shape)],
            out_specs=[fullspec((Mp, 128)), fullspec((Mp, 128))],
        ),
        compiler_params=pltpu.CompilerParams(
            dimension_semantics=("arbitrary",)),
    )(hp, w2, b2, w3, b3, w4, b4, w5, b5)
    return o10[:B, :10], o1[:B, :1]


# ------------------------------------------------------------------
# Parameter construction: weights stored once in padded bf16 GEMM layout
# ------------------------------------------------------------------
def _prep_gemm(wmat, b):
    """wmat: (K, N) f32, b: (N,) f32 -> padded bf16 weight + f32 bias row."""
    K, N = wmat.shape
    Kp, Np = _round_up(K, 128), _round_up(N, 128)
    wp = jnp.pad(wmat, ((0, Kp - K), (0, Np - N))).astype(jnp.bfloat16)
    bp = jnp.pad(b, (0, Np - N)).astype(jnp.float32).reshape(1, Np)
    return dict(w=wp, b=bp)


def _prep_conv(key, cin, cout, k, bn_scale=None, bn_shift=None):
    k1, k2 = jax.random.split(key)
    w = jax.random.normal(k1, (cout, cin, k, k), jnp.float32) * jnp.sqrt(2.0 / (cin * k * k))
    b = 0.01 * jax.random.normal(k2, (cout,), jnp.float32)
    if bn_scale is not None:
        # fold eval-mode BatchNorm2d (y = x*scale + shift) into the conv
        b = b + jnp.einsum('ockl,c->o', w, bn_shift)
        w = w * bn_scale[None, :, None, None]
    wmat = jnp.transpose(w, (2, 3, 1, 0)).reshape(k * k * cin, cout)
    return _prep_gemm(wmat, b)


def _prep_linear(key, fin, fout):
    k1, k2 = jax.random.split(key)
    w = jax.random.normal(k1, (fin, fout), jnp.float32) / jnp.sqrt(fin)
    b = jax.random.normal(k2, (fout,), jnp.float32) / jnp.sqrt(fin)
    return _prep_gemm(w, b)


def init_params(key):
    keys = jax.random.split(key, 16)
    # BatchNorm2d(3): eval-mode running stats, folded exactly into conv1.
    # TODO(synk): training-mode BatchNorm (batch statistics) not implemented.
    gamma = 1.0 + 0.1 * jax.random.normal(keys[0], (3,), jnp.float32)
    beta = 0.1 * jax.random.normal(keys[1], (3,), jnp.float32)
    mean = 0.1 * jax.random.normal(keys[2], (3,), jnp.float32)
    var = 1.0 + 0.1 * jax.random.uniform(keys[3], (3,), jnp.float32)
    scale = gamma / jnp.sqrt(var + 1e-5)
    shift = beta - mean * scale

    params = {
        'conv1': _prep_conv(keys[4], 3, 24, 5, bn_scale=scale, bn_shift=shift),
        'conv2': _prep_conv(keys[5], 24, 36, 5),
        'conv3': _prep_conv(keys[6], 36, 48, 5),
        'conv4': _prep_conv(keys[7], 48, 64, 3),
        'conv5': _prep_conv(keys[8], 64, 64, 3),
        'fc1': _prep_linear(keys[9], 64 * 9 * 9, 1164),
        'fc2': _prep_linear(keys[10], 1164, 100),
        'fc3': _prep_linear(keys[11], 100, 50),
        'fc4': _prep_linear(keys[12], 50, 10),
        'fc5': _prep_linear(keys[13], 10, 1),     # layer7
    }
    return params


# ------------------------------------------------------------------
# Forward pass (matches Nvidia.forward)
# ------------------------------------------------------------------
def nvidia_forward(params, x_nchw, type_='teacher'):
    x = jnp.transpose(x_nchw, (0, 2, 3, 1)).astype(jnp.bfloat16)   # NCHW -> NHWC, bf16
    x = conv2d_relu(x, params['conv1'], k=5, stride=2, cout=24)    # layer1 (BN folded)
    x = conv2d_relu(x, params['conv2'], k=5, stride=2, cout=36)    # layer2
    x = conv2d_relu(x, params['conv3'], k=5, stride=2, cout=48)    # layer3
    x = conv2d_relu(x, params['conv4'], k=3, stride=1, cout=64)    # layer4
    x = conv2d_relu(x, params['conv5'], k=3, stride=1, cout=64)    # layer5

    n = x.shape[0]
    flat = jnp.transpose(x, (0, 3, 1, 2)).reshape(n, -1)           # torch NCHW flatten

    # layer6 first linear (big, weight-streaming GEMM), rest fused in one kernel
    h = matmul_bias(flat, params['fc1']['w'], params['fc1']['b'], 1164,
                    relu=True, out_dtype=jnp.bfloat16)
    out10, out2 = mlp_head(h, params)                              # layer6 tail + layer7

    if type_ == 'teacher':
        return out2
    return out2, out10


if __name__ == "__main__":
    key = jax.random.PRNGKey(0)
    kparam, kx = jax.random.split(key)
    params = init_params(kparam)
    # 128x128 input is what the architecture implies: five valid convs reduce
    # 128 -> 62 -> 29 -> 13 -> 11 -> 9, matching Linear(64*9*9, 1164).
    x = jax.random.normal(kx, (2, 3, 128, 128), jnp.float32)

    fwd = jax.jit(functools.partial(nvidia_forward, type_='teacher'))
    out = fwd(params, x)
    out = jax.block_until_ready(out)

    assert out.shape == (2, 1), out.shape
    assert bool(jnp.all(jnp.isfinite(out)))
    print("KERNEL_OK")
</pallas_src>

<mosaic_0001>
module attributes {stable_mosaic.version = 11 : i64} {
  func.func @_mm_kernel(%arg0: i32, %arg1: i32, %arg2: i32, %arg3: memref<512x128xbf16, #tpu.memory_space<vmem>>, %arg4: memref<128x128xbf16, #tpu.memory_space<vmem>>, %arg5: memref<1x128xf32, #tpu.memory_space<vmem>>, %arg6: memref<512x128xbf16, #tpu.memory_space<vmem>>, %arg7: memref<512x128xf32, #tpu.memory_space<vmem>>) attributes {dimension_semantics = [#tpu.dimension_semantics<parallel>, #tpu.dimension_semantics<parallel>, #tpu.dimension_semantics<arbitrary>], iteration_bounds = array<i64: 16, 1, 1>, scalar_prefetch = 0 : i64, scratch_operands = 1 : i64, tpu.core_type = #tpu.core_type<tc>, window_params = [{transform_indices = @transform_0, window_bounds = array<i64: 512, 128>}, {transform_indices = @transform_1, window_bounds = array<i64: 128, 128>}, {transform_indices = @transform_2, window_bounds = array<i64: 1, 128>}, {transform_indices = @transform_3, window_bounds = array<i64: 512, 128>}]} {
    %c0_i32 = arith.constant 0 : i32
    %0 = arith.cmpi eq, %arg2, %c0_i32 : i32
    %1 = arith.extui %0 : i1 to i32
    %c0_i32_0 = arith.constant 0 : i32
    %2 = arith.cmpi ne, %1, %c0_i32_0 : i32
    scf.if %2 {
      %cst_10 = arith.constant 0.000000e+00 : f32
      %12 = vector.broadcast %cst_10 : f32 to vector<512x128xf32>
      %c0_11 = arith.constant 0 : index
      %c0_12 = arith.constant 0 : index
      %13 = vector.load %arg7[%c0_11, %c0_12] : memref<512x128xf32, #tpu.memory_space<vmem>>, vector<512x128xf32>
      tpu.vector_store %arg7[%c0_11, %c0_12], %12 {strides = array<i32>} : memref<512x128xf32, #tpu.memory_space<vmem>>, vector<512x128xf32>,
    } else {
    }
    %c0 = arith.constant 0 : index
    %c0_1 = arith.constant 0 : index
    %3 = vector.load %arg7[%c0, %c0_1] : memref<512x128xf32, #tpu.memory_space<vmem>>, vector<512x128xf32>
    %c0_2 = arith.constant 0 : index
    %c0_3 = arith.constant 0 : index
    %4 = vector.load %arg3[%c0_2, %c0_3] : memref<512x128xbf16, #tpu.memory_space<vmem>>, vector<512x128xbf16>
    %c0_4 = arith.constant 0 : index
    %c0_5 = arith.constant 0 : index
    %5 = vector.load %arg4[%c0_4, %c0_5] : memref<128x128xbf16, #tpu.memory_space<vmem>>, vector<128x128xbf16>
    %cst = arith.constant dense<0.000000e+00> : vector<512x128xf32>
    %6 = tpu.matmul %4, %5, %cst {dimension_numbers = #tpu.dot_dimension_numbers<[1], [0], [0], [1], [0, 0, 1, 1], [], []>} : vector<512x128xbf16>, vector<128x128xbf16>, vector<512x128xf32> -> vector<512x128xf32>
    %7 = arith.addf %3, %6 : vector<512x128xf32>
    %c0_6 = arith.constant 0 : index
    %c0_7 = arith.constant 0 : index
    %8 = vector.load %arg7[%c0_6, %c0_7] : memref<512x128xf32, #tpu.memory_space<vmem>>, vector<512x128xf32>
    tpu.vector_store %arg7[%c0_6, %c0_7], %7 {strides = array<i32>} : memref<512x128xf32, #tpu.memory_space<vmem>>, vector<512x128xf32>,
    %c0_i32_8 = arith.constant 0 : i32
    %9 = arith.cmpi eq, %arg2, %c0_i32_8 : i32
    %10 = arith.extui %9 : i1 to i32
    %c0_i32_9 = arith.constant 0 : i32
    %11 = arith.cmpi ne, %10, %c0_i32_9 : i32
    scf.if %11 {
      %c0_10 = arith.constant 0 : index
      %c0_11 = arith.constant 0 : index
      %12 = vector.load %arg7[%c0_10, %c0_11] : memref<512x128xf32, #tpu.memory_space<vmem>>, vector<512x128xf32>
      %c0_12 = arith.constant 0 : index
      %c0_13 = arith.constant 0 : index
      %13 = vector.load %arg5[%c0_12, %c0_13] : memref<1x128xf32, #tpu.memory_space<vmem>>, vector<1x128xf32>
      %14 = vector.broadcast %13 : vector<1x128xf32> to vector<512x128xf32>
      %15 = arith.addf %12, %14 : vector<512x128xf32>
      %cst_14 = arith.constant 0.000000e+00 : f32
      %16 = vector.broadcast %cst_14 : f32 to vector<512x128xf32>
      %17 = arith.maximumf %15, %16 : vector<512x128xf32>
      %18 = arith.truncf %17 : vector<512x128xf32> to vector<512x128xbf16>
      %c0_15 = arith.constant 0 : index
      %c0_16 = arith.constant 0 : index
      %19 = vector.load %arg6[%c0_15, %c0_16] : memref<512x128xbf16, #tpu.memory_space<vmem>>, vector<512x128xbf16>
      tpu.vector_store %arg6[%c0_15, %c0_16], %18 {strides = array<i32>} : memref<512x128xbf16, #tpu.memory_space<vmem>>, vector<512x128xbf16>,
    } else {
    }
    return
  }
  func.func @transform_0(%arg0: i32, %arg1: i32, %arg2: i32) -> (i32, i32) {
    %c0_i32 = arith.constant 0 : i32
    return %arg0, %arg2 : i32, i32
  }
  func.func @transform_1(%arg0: i32, %arg1: i32, %arg2: i32) -> (i32, i32) {
    %c0_i32 = arith.constant 0 : i32
    return %arg2, %arg1 : i32, i32
  }
  func.func @transform_2(%arg0: i32, %arg1: i32, %arg2: i32) -> (i32, i32) {
    %c0_i32 = arith.constant 0 : i32
    %c0_i32_0 = arith.constant 0 : i32
    return %c0_i32, %arg1 : i32, i32
  }
  func.func @transform_3(%arg0: i32, %arg1: i32, %arg2: i32) -> (i32, i32) {
    %c0_i32 = arith.constant 0 : i32
    return %arg0, %arg1 : i32, i32
  }
}

module attributes {stable_mosaic.version = 11 : i64} {
  func.func @_mm_kernel(%arg0: i32, %arg1: i32, %arg2: i32, %arg3: memref<256x640xbf16, #tpu.memory_space<vmem>>, %arg4: memref<640x128xbf16, #tpu.memory_space<vmem>>, %arg5: memref<1x128xf32, #tpu.memory_space<vmem>>, %arg6: memref<256x128xbf16, #tpu.memory_space<vmem>>, %arg7: memref<256x128xf32, #tpu.memory_space<vmem>>) attributes {dimension_semantics = [#tpu.dimension_semantics<parallel>, #tpu.dimension_semantics<parallel>, #tpu.dimension_semantics<arbitrary>], iteration_bounds = array<i64: 7, 1, 1>, scalar_prefetch = 0 : i64, scratch_operands = 1 : i64, tpu.core_type = #tpu.core_type<tc>, window_params = [{transform_indices = @transform_0, window_bounds = array<i64: 256, 640>}, {transform_indices = @transform_1, window_bounds = array<i64: 640, 128>}, {transform_indices = @transform_2, window_bounds = array<i64: 1, 128>}, {transform_indices = @transform_3, window_bounds = array<i64: 256, 128>}]} {
    %c0_i32 = arith.constant 0 : i32
    %0 = arith.cmpi eq, %arg2, %c0_i32 : i32
    %1 = arith.extui %0 : i1 to i32
    %c0_i32_0 = arith.constant 0 : i32
    %2 = arith.cmpi ne, %1, %c0_i32_0 : i32
    scf.if %2 {
      %cst_10 = arith.constant 0.000000e+00 : f32
      %12 = vector.broadcast %cst_10 : f32 to vector<256x128xf32>
      %c0_11 = arith.constant 0 : index
      %c0_12 = arith.constant 0 : index
      %13 = vector.load %arg7[%c0_11, %c0_12] : memref<256x128xf32, #tpu.memory_space<vmem>>, vector<256x128xf32>
      tpu.vector_store %arg7[%c0_11, %c0_12], %12 {strides = array<i32>} : memref<256x128xf32, #tpu.memory_space<vmem>>, vector<256x128xf32>,
    } else {
    }
    %c0 = arith.constant 0 : index
    %c0_1 = arith.constant 0 : index
    %3 = vector.load %arg7[%c0, %c0_1] : memref<256x128xf32, #tpu.memory_space<vmem>>, vector<256x128xf32>
    %c0_2 = arith.constant 0 : index
    %c0_3 = arith.constant 0 : index
    %4 = vector.load %arg3[%c0_2, %c0_3] : memref<256x640xbf16, #tpu.memory_space<vmem>>, vector<256x640xbf16>
    %c0_4 = arith.constant 0 : index
    %c0_5 = arith.constant 0 : index
    %5 = vector.load %arg4[%c0_4, %c0_5] : memref<640x128xbf16, #tpu.memory_space<vmem>>, vector<640x128xbf16>
    %cst = arith.constant dense<0.000000e+00> : vector<256x128xf32>
    %6 = tpu.matmul %4, %5, %cst {dimension_numbers = #tpu.dot_dimension_numbers<[1], [0], [0], [1], [0, 0, 1, 1], [], []>} : vector<256x640xbf16>, vector<640x128xbf16>, vector<256x128xf32> -> vector<256x128xf32>
    %7 = arith.addf %3, %6 : vector<256x128xf32>
    %c0_6 = arith.constant 0 : index
    %c0_7 = arith.constant 0 : index
    %8 = vector.load %arg7[%c0_6, %c0_7] : memref<256x128xf32, #tpu.memory_space<vmem>>, vector<256x128xf32>
    tpu.vector_store %arg7[%c0_6, %c0_7], %7 {strides = array<i32>} : memref<256x128xf32, #tpu.memory_space<vmem>>, vector<256x128xf32>,
    %c0_i32_8 = arith.constant 0 : i32
    %9 = arith.cmpi eq, %arg2, %c0_i32_8 : i32
    %10 = arith.extui %9 : i1 to i32
    %c0_i32_9 = arith.constant 0 : i32
    %11 = arith.cmpi ne, %10, %c0_i32_9 : i32
    scf.if %11 {
      %c0_10 = arith.constant 0 : index
      %c0_11 = arith.constant 0 : index
      %12 = vector.load %arg7[%c0_10, %c0_11] : memref<256x128xf32, #tpu.memory_space<vmem>>, vector<256x128xf32>
      %c0_12 = arith.constant 0 : index
      %c0_13 = arith.constant 0 : index
      %13 = vector.load %arg5[%c0_12, %c0_13] : memref<1x128xf32, #tpu.memory_space<vmem>>, vector<1x128xf32>
      %14 = vector.broadcast %13 : vector<1x128xf32> to vector<256x128xf32>
      %15 = arith.addf %12, %14 : vector<256x128xf32>
      %cst_14 = arith.constant 0.000000e+00 : f32
      %16 = vector.broadcast %cst_14 : f32 to vector<256x128xf32>
      %17 = arith.maximumf %15, %16 : vector<256x128xf32>
      %18 = arith.truncf %17 : vector<256x128xf32> to vector<256x128xbf16>
      %c0_15 = arith.constant 0 : index
      %c0_16 = arith.constant 0 : index
      %19 = vector.load %arg6[%c0_15, %c0_16] : memref<256x128xbf16, #tpu.memory_space<vmem>>, vector<256x128xbf16>
      tpu.vector_store %arg6[%c0_15, %c0_16], %18 {strides = array<i32>} : memref<256x128xbf16, #tpu.memory_space<vmem>>, vector<256x128xbf16>,
    } else {
    }
    return
  }
  func.func @transform_0(%arg0: i32, %arg1: i32, %arg2: i32) -> (i32, i32) {
    %c0_i32 = arith.constant 0 : i32
    return %arg0, %arg2 : i32, i32
  }
  func.func @transform_1(%arg0: i32, %arg1: i32, %arg2: i32) -> (i32, i32) {
    %c0_i32 = arith.constant 0 : i32
    return %arg2, %arg1 : i32, i32
  }
  func.func @transform_2(%arg0: i32, %arg1: i32, %arg2: i32) -> (i32, i32) {
    %c0_i32 = arith.constant 0 : i32
    %c0_i32_0 = arith.constant 0 : i32
    return %c0_i32, %arg1 : i32, i32
  }
  func.func @transform_3(%arg0: i32, %arg1: i32, %arg2: i32) -> (i32, i32) {
    %c0_i32 = arith.constant 0 : i32
    return %arg0, %arg1 : i32, i32
  }
}

module attributes {stable_mosaic.version = 11 : i64} {
  func.func @_mm_kernel(%arg0: i32, %arg1: i32, %arg2: i32, %arg3: memref<352x1024xbf16, #tpu.memory_space<vmem>>, %arg4: memref<1024x128xbf16, #tpu.memory_space<vmem>>, %arg5: memref<1x128xf32, #tpu.memory_space<vmem>>, %arg6: memref<352x128xbf16, #tpu.memory_space<vmem>>, %arg7: memref<352x128xf32, #tpu.memory_space<vmem>>) attributes {dimension_semantics = [#tpu.dimension_semantics<parallel>, #tpu.dimension_semantics<parallel>, #tpu.dimension_semantics<arbitrary>], iteration_bounds = array<i64: 1, 1, 1>, scalar_prefetch = 0 : i64, scratch_operands = 1 : i64, tpu.core_type = #tpu.core_type<tc>, window_params = [{transform_indices = @transform_0, window_bounds = array<i64: 352, 1024>}, {transform_indices = @transform_1, window_bounds = array<i64: 1024, 128>}, {transform_indices = @transform_2, window_bounds = array<i64: 1, 128>}, {transform_indices = @transform_3, window_bounds = array<i64: 352, 128>}]} {
    %c0_i32 = arith.constant 0 : i32
    %0 = arith.cmpi eq, %arg2, %c0_i32 : i32
    %1 = arith.extui %0 : i1 to i32
    %c0_i32_0 = arith.constant 0 : i32
    %2 = arith.cmpi ne, %1, %c0_i32_0 : i32
    scf.if %2 {
      %cst_10 = arith.constant 0.000000e+00 : f32
      %12 = vector.broadcast %cst_10 : f32 to vector<352x128xf32>
      %c0_11 = arith.constant 0 : index
      %c0_12 = arith.constant 0 : index
      %13 = vector.load %arg7[%c0_11, %c0_12] : memref<352x128xf32, #tpu.memory_space<vmem>>, vector<352x128xf32>
      tpu.vector_store %arg7[%c0_11, %c0_12], %12 {strides = array<i32>} : memref<352x128xf32, #tpu.memory_space<vmem>>, vector<352x128xf32>,
    } else {
    }
    %c0 = arith.constant 0 : index
    %c0_1 = arith.constant 0 : index
    %3 = vector.load %arg7[%c0, %c0_1] : memref<352x128xf32, #tpu.memory_space<vmem>>, vector<352x128xf32>
    %c0_2 = arith.constant 0 : index
    %c0_3 = arith.constant 0 : index
    %4 = vector.load %arg3[%c0_2, %c0_3] : memref<352x1024xbf16, #tpu.memory_space<vmem>>, vector<352x1024xbf16>
    %c0_4 = arith.constant 0 : index
    %c0_5 = arith.constant 0 : index
    %5 = vector.load %arg4[%c0_4, %c0_5] : memref<1024x128xbf16, #tpu.memory_space<vmem>>, vector<1024x128xbf16>
    %cst = arith.constant dense<0.000000e+00> : vector<352x128xf32>
    %6 = tpu.matmul %4, %5, %cst {dimension_numbers = #tpu.dot_dimension_numbers<[1], [0], [0], [1], [0, 0, 1, 1], [], []>} : vector<352x1024xbf16>, vector<1024x128xbf16>, vector<352x128xf32> -> vector<352x128xf32>
    %7 = arith.addf %3, %6 : vector<352x128xf32>
    %c0_6 = arith.constant 0 : index
    %c0_7 = arith.constant 0 : index
    %8 = vector.load %arg7[%c0_6, %c0_7] : memref<352x128xf32, #tpu.memory_space<vmem>>, vector<352x128xf32>
    tpu.vector_store %arg7[%c0_6, %c0_7], %7 {strides = array<i32>} : memref<352x128xf32, #tpu.memory_space<vmem>>, vector<352x128xf32>,
    %c0_i32_8 = arith.constant 0 : i32
    %9 = arith.cmpi eq, %arg2, %c0_i32_8 : i32
    %10 = arith.extui %9 : i1 to i32
    %c0_i32_9 = arith.constant 0 : i32
    %11 = arith.cmpi ne, %10, %c0_i32_9 : i32
    scf.if %11 {
      %c0_10 = arith.constant 0 : index
      %c0_11 = arith.constant 0 : index
      %12 = vector.load %arg7[%c0_10, %c0_11] : memref<352x128xf32, #tpu.memory_space<vmem>>, vector<352x128xf32>
      %c0_12 = arith.constant 0 : index
      %c0_13 = arith.constant 0 : index
      %13 = vector.load %arg5[%c0_12, %c0_13] : memref<1x128xf32, #tpu.memory_space<vmem>>, vector<1x128xf32>
      %14 = vector.broadcast %13 : vector<1x128xf32> to vector<352x128xf32>
      %15 = arith.addf %12, %14 : vector<352x128xf32>
      %cst_14 = arith.constant 0.000000e+00 : f32
      %16 = vector.broadcast %cst_14 : f32 to vector<352x128xf32>
      %17 = arith.maximumf %15, %16 : vector<352x128xf32>
      %18 = arith.truncf %17 : vector<352x128xf32> to vector<352x128xbf16>
      %c0_15 = arith.constant 0 : index
      %c0_16 = arith.constant 0 : index
      %19 = vector.load %arg6[%c0_15, %c0_16] : memref<352x128xbf16, #tpu.memory_space<vmem>>, vector<352x128xbf16>
      tpu.vector_store %arg6[%c0_15, %c0_16], %18 {strides = array<i32>} : memref<352x128xbf16, #tpu.memory_space<vmem>>, vector<352x128xbf16>,
    } else {
    }
    return
  }
  func.func @transform_0(%arg0: i32, %arg1: i32, %arg2: i32) -> (i32, i32) {
    %c0_i32 = arith.constant 0 : i32
    return %arg0, %arg2 : i32, i32
  }
  func.func @transform_1(%arg0: i32, %arg1: i32, %arg2: i32) -> (i32, i32) {
    %c0_i32 = arith.constant 0 : i32
    return %arg2, %arg1 : i32, i32
  }
  func.func @transform_2(%arg0: i32, %arg1: i32, %arg2: i32) -> (i32, i32) {
    %c0_i32 = arith.constant 0 : i32
    %c0_i32_0 = arith.constant 0 : i32
    return %c0_i32, %arg1 : i32, i32
  }
  func.func @transform_3(%arg0: i32, %arg1: i32, %arg2: i32) -> (i32, i32) {
    %c0_i32 = arith.constant 0 : i32
    return %arg0, %arg1 : i32, i32
  }
}

module attributes {stable_mosaic.version = 11 : i64} {
  func.func @_mm_kernel(%arg0: i32, %arg1: i32, %arg2: i32, %arg3: memref<256x512xbf16, #tpu.memory_space<vmem>>, %arg4: memref<512x128xbf16, #tpu.memory_space<vmem>>, %arg5: memref<1x128xf32, #tpu.memory_space<vmem>>, %arg6: memref<256x128xbf16, #tpu.memory_space<vmem>>, %arg7: memref<256x128xf32, #tpu.memory_space<vmem>>) attributes {dimension_semantics = [#tpu.dimension_semantics<parallel>, #tpu.dimension_semantics<parallel>, #tpu.dimension_semantics<arbitrary>], iteration_bounds = array<i64: 1, 1, 1>, scalar_prefetch = 0 : i64, scratch_operands = 1 : i64, tpu.core_type = #tpu.core_type<tc>, window_params = [{transform_indices = @transform_0, window_bounds = array<i64: 256, 512>}, {transform_indices = @transform_1, window_bounds = array<i64: 512, 128>}, {transform_indices = @transform_2, window_bounds = array<i64: 1, 128>}, {transform_indices = @transform_3, window_bounds = array<i64: 256, 128>}]} {
    %c0_i32 = arith.constant 0 : i32
    %0 = arith.cmpi eq, %arg2, %c0_i32 : i32
    %1 = arith.extui %0 : i1 to i32
    %c0_i32_0 = arith.constant 0 : i32
    %2 = arith.cmpi ne, %1, %c0_i32_0 : i32
    scf.if %2 {
      %cst_10 = arith.constant 0.000000e+00 : f32
      %12 = vector.broadcast %cst_10 : f32 to vector<256x128xf32>
      %c0_11 = arith.constant 0 : index
      %c0_12 = arith.constant 0 : index
      %13 = vector.load %arg7[%c0_11, %c0_12] : memref<256x128xf32, #tpu.memory_space<vmem>>, vector<256x128xf32>
      tpu.vector_store %arg7[%c0_11, %c0_12], %12 {strides = array<i32>} : memref<256x128xf32, #tpu.memory_space<vmem>>, vector<256x128xf32>,
    } else {
    }
    %c0 = arith.constant 0 : index
    %c0_1 = arith.constant 0 : index
    %3 = vector.load %arg7[%c0, %c0_1] : memref<256x128xf32, #tpu.memory_space<vmem>>, vector<256x128xf32>
    %c0_2 = arith.constant 0 : index
    %c0_3 = arith.constant 0 : index
    %4 = vector.load %arg3[%c0_2, %c0_3] : memref<256x512xbf16, #tpu.memory_space<vmem>>, vector<256x512xbf16>
    %c0_4 = arith.constant 0 : index
    %c0_5 = arith.constant 0 : index
    %5 = vector.load %arg4[%c0_4, %c0_5] : memref<512x128xbf16, #tpu.memory_space<vmem>>, vector<512x128xbf16>
    %cst = arith.constant dense<0.000000e+00> : vector<256x128xf32>
    %6 = tpu.matmul %4, %5, %cst {dimension_numbers = #tpu.dot_dimension_numbers<[1], [0], [0], [1], [0, 0, 1, 1], [], []>} : vector<256x512xbf16>, vector<512x128xbf16>, vector<256x128xf32> -> vector<256x128xf32>
    %7 = arith.addf %3, %6 : vector<256x128xf32>
    %c0_6 = arith.constant 0 : index
    %c0_7 = arith.constant 0 : index
    %8 = vector.load %arg7[%c0_6, %c0_7] : memref<256x128xf32, #tpu.memory_space<vmem>>, vector<256x128xf32>
    tpu.vector_store %arg7[%c0_6, %c0_7], %7 {strides = array<i32>} : memref<256x128xf32, #tpu.memory_space<vmem>>, vector<256x128xf32>,
    %c0_i32_8 = arith.constant 0 : i32
    %9 = arith.cmpi eq, %arg2, %c0_i32_8 : i32
    %10 = arith.extui %9 : i1 to i32
    %c0_i32_9 = arith.constant 0 : i32
    %11 = arith.cmpi ne, %10, %c0_i32_9 : i32
    scf.if %11 {
      %c0_10 = arith.constant 0 : index
      %c0_11 = arith.constant 0 : index
      %12 = vector.load %arg7[%c0_10, %c0_11] : memref<256x128xf32, #tpu.memory_space<vmem>>, vector<256x128xf32>
      %c0_12 = arith.constant 0 : index
      %c0_13 = arith.constant 0 : index
      %13 = vector.load %arg5[%c0_12, %c0_13] : memref<1x128xf32, #tpu.memory_space<vmem>>, vector<1x128xf32>
      %14 = vector.broadcast %13 : vector<1x128xf32> to vector<256x128xf32>
      %15 = arith.addf %12, %14 : vector<256x128xf32>
      %cst_14 = arith.constant 0.000000e+00 : f32
      %16 = vector.broadcast %cst_14 : f32 to vector<256x128xf32>
      %17 = arith.maximumf %15, %16 : vector<256x128xf32>
      %18 = arith.truncf %17 : vector<256x128xf32> to vector<256x128xbf16>
      %c0_15 = arith.constant 0 : index
      %c0_16 = arith.constant 0 : index
      %19 = vector.load %arg6[%c0_15, %c0_16] : memref<256x128xbf16, #tpu.memory_space<vmem>>, vector<256x128xbf16>
      tpu.vector_store %arg6[%c0_15, %c0_16], %18 {strides = array<i32>} : memref<256x128xbf16, #tpu.memory_space<vmem>>, vector<256x128xbf16>,
    } else {
    }
    return
  }
  func.func @transform_0(%arg0: i32, %arg1: i32, %arg2: i32) -> (i32, i32) {
    %c0_i32 = arith.constant 0 : i32
    return %arg0, %arg2 : i32, i32
  }
  func.func @transform_1(%arg0: i32, %arg1: i32, %arg2: i32) -> (i32, i32) {
    %c0_i32 = arith.constant 0 : i32
    return %arg2, %arg1 : i32, i32
  }
  func.func @transform_2(%arg0: i32, %arg1: i32, %arg2: i32) -> (i32, i32) {
    %c0_i32 = arith.constant 0 : i32
    %c0_i32_0 = arith.constant 0 : i32
    return %c0_i32, %arg1 : i32, i32
  }
  func.func @transform_3(%arg0: i32, %arg1: i32, %arg2: i32) -> (i32, i32) {
    %c0_i32 = arith.constant 0 : i32
    return %arg0, %arg1 : i32, i32
  }
}

module attributes {stable_mosaic.version = 11 : i64} {
  func.func @_mm_kernel(%arg0: i32, %arg1: i32, %arg2: i32, %arg3: memref<176x640xbf16, #tpu.memory_space<vmem>>, %arg4: memref<640x128xbf16, #tpu.memory_space<vmem>>, %arg5: memref<1x128xf32, #tpu.memory_space<vmem>>, %arg6: memref<176x128xbf16, #tpu.memory_space<vmem>>, %arg7: memref<176x128xf32, #tpu.memory_space<vmem>>) attributes {dimension_semantics = [#tpu.dimension_semantics<parallel>, #tpu.dimension_semantics<parallel>, #tpu.dimension_semantics<arbitrary>], iteration_bounds = array<i64: 1, 1, 1>, scalar_prefetch = 0 : i64, scratch_operands = 1 : i64, tpu.core_type = #tpu.core_type<tc>, window_params = [{transform_indices = @transform_0, window_bounds = array<i64: 176, 640>}, {transform_indices = @transform_1, window_bounds = array<i64: 640, 128>}, {transform_indices = @transform_2, window_bounds = array<i64: 1, 128>}, {transform_indices = @transform_3, window_bounds = array<i64: 176, 128>}]} {
    %c0_i32 = arith.constant 0 : i32
    %0 = arith.cmpi eq, %arg2, %c0_i32 : i32
    %1 = arith.extui %0 : i1 to i32
    %c0_i32_0 = arith.constant 0 : i32
    %2 = arith.cmpi ne, %1, %c0_i32_0 : i32
    scf.if %2 {
      %cst_10 = arith.constant 0.000000e+00 : f32
      %12 = vector.broadcast %cst_10 : f32 to vector<176x128xf32>
      %c0_11 = arith.constant 0 : index
      %c0_12 = arith.constant 0 : index
      %13 = vector.load %arg7[%c0_11, %c0_12] : memref<176x128xf32, #tpu.memory_space<vmem>>, vector<176x128xf32>
      tpu.vector_store %arg7[%c0_11, %c0_12], %12 {strides = array<i32>} : memref<176x128xf32, #tpu.memory_space<vmem>>, vector<176x128xf32>,
    } else {
    }
    %c0 = arith.constant 0 : index
    %c0_1 = arith.constant 0 : index
    %3 = vector.load %arg7[%c0, %c0_1] : memref<176x128xf32, #tpu.memory_space<vmem>>, vector<176x128xf32>
    %c0_2 = arith.constant 0 : index
    %c0_3 = arith.constant 0 : index
    %4 = vector.load %arg3[%c0_2, %c0_3] : memref<176x640xbf16, #tpu.memory_space<vmem>>, vector<176x640xbf16>
    %c0_4 = arith.constant 0 : index
    %c0_5 = arith.constant 0 : index
    %5 = vector.load %arg4[%c0_4, %c0_5] : memref<640x128xbf16, #tpu.memory_space<vmem>>, vector<640x128xbf16>
    %cst = arith.constant dense<0.000000e+00> : vector<176x128xf32>
    %6 = tpu.matmul %4, %5, %cst {dimension_numbers = #tpu.dot_dimension_numbers<[1], [0], [0], [1], [0, 0, 1, 1], [], []>} : vector<176x640xbf16>, vector<640x128xbf16>, vector<176x128xf32> -> vector<176x128xf32>
    %7 = arith.addf %3, %6 : vector<176x128xf32>
    %c0_6 = arith.constant 0 : index
    %c0_7 = arith.constant 0 : index
    %8 = vector.load %arg7[%c0_6, %c0_7] : memref<176x128xf32, #tpu.memory_space<vmem>>, vector<176x128xf32>
    tpu.vector_store %arg7[%c0_6, %c0_7], %7 {strides = array<i32>} : memref<176x128xf32, #tpu.memory_space<vmem>>, vector<176x128xf32>,
    %c0_i32_8 = arith.constant 0 : i32
    %9 = arith.cmpi eq, %arg2, %c0_i32_8 : i32
    %10 = arith.extui %9 : i1 to i32
    %c0_i32_9 = arith.constant 0 : i32
    %11 = arith.cmpi ne, %10, %c0_i32_9 : i32
    scf.if %11 {
      %c0_10 = arith.constant 0 : index
      %c0_11 = arith.constant 0 : index
      %12 = vector.load %arg7[%c0_10, %c0_11] : memref<176x128xf32, #tpu.memory_space<vmem>>, vector<176x128xf32>
      %c0_12 = arith.constant 0 : index
      %c0_13 = arith.constant 0 : index
      %13 = vector.load %arg5[%c0_12, %c0_13] : memref<1x128xf32, #tpu.memory_space<vmem>>, vector<1x128xf32>
      %14 = vector.broadcast %13 : vector<1x128xf32> to vector<176x128xf32>
      %15 = arith.addf %12, %14 : vector<176x128xf32>
      %cst_14 = arith.constant 0.000000e+00 : f32
      %16 = vector.broadcast %cst_14 : f32 to vector<176x128xf32>
      %17 = arith.maximumf %15, %16 : vector<176x128xf32>
      %18 = arith.truncf %17 : vector<176x128xf32> to vector<176x128xbf16>
      %c0_15 = arith.constant 0 : index
      %c0_16 = arith.constant 0 : index
      %19 = vector.load %arg6[%c0_15, %c0_16] : memref<176x128xbf16, #tpu.memory_space<vmem>>, vector<176x128xbf16>
      tpu.vector_store %arg6[%c0_15, %c0_16], %18 {strides = array<i32>} : memref<176x128xbf16, #tpu.memory_space<vmem>>, vector<176x128xbf16>,
    } else {
    }
    return
  }
  func.func @transform_0(%arg0: i32, %arg1: i32, %arg2: i32) -> (i32, i32) {
    %c0_i32 = arith.constant 0 : i32
    return %arg0, %arg2 : i32, i32
  }
  func.func @transform_1(%arg0: i32, %arg1: i32, %arg2: i32) -> (i32, i32) {
    %c0_i32 = arith.constant 0 : i32
    return %arg2, %arg1 : i32, i32
  }
  func.func @transform_2(%arg0: i32, %arg1: i32, %arg2: i32) -> (i32, i32) {
    %c0_i32 = arith.constant 0 : i32
    %c0_i32_0 = arith.constant 0 : i32
    return %c0_i32, %arg1 : i32, i32
  }
  func.func @transform_3(%arg0: i32, %arg1: i32, %arg2: i32) -> (i32, i32) {
    %c0_i32 = arith.constant 0 : i32
    return %arg0, %arg1 : i32, i32
  }
}

module attributes {stable_mosaic.version = 11 : i64} {
  func.func @_mm_kernel(%arg0: i32, %arg1: i32, %arg2: i32, %arg3: memref<16x5248xbf16, #tpu.memory_space<vmem>>, %arg4: memref<5248x256xbf16, #tpu.memory_space<vmem>>, %arg5: memref<1x256xf32, #tpu.memory_space<vmem>>, %arg6: memref<16x256xbf16, #tpu.memory_space<vmem>>, %arg7: memref<16x256xf32, #tpu.memory_space<vmem>>) attributes {dimension_semantics = [#tpu.dimension_semantics<parallel>, #tpu.dimension_semantics<parallel>, #tpu.dimension_semantics<arbitrary>], iteration_bounds = array<i64: 1, 5, 1>, scalar_prefetch = 0 : i64, scratch_operands = 1 : i64, tpu.core_type = #tpu.core_type<tc>, window_params = [{transform_indices = @transform_0, window_bounds = array<i64: 16, 5248>}, {transform_indices = @transform_1, window_bounds = array<i64: 5248, 256>}, {transform_indices = @transform_2, window_bounds = array<i64: 1, 256>}, {transform_indices = @transform_3, window_bounds = array<i64: 16, 256>}]} {
    %c0_i32 = arith.constant 0 : i32
    %0 = arith.cmpi eq, %arg2, %c0_i32 : i32
    %1 = arith.extui %0 : i1 to i32
    %c0_i32_0 = arith.constant 0 : i32
    %2 = arith.cmpi ne, %1, %c0_i32_0 : i32
    scf.if %2 {
      %cst_10 = arith.constant 0.000000e+00 : f32
      %12 = vector.broadcast %cst_10 : f32 to vector<16x256xf32>
      %c0_11 = arith.constant 0 : index
      %c0_12 = arith.constant 0 : index
      %13 = vector.load %arg7[%c0_11, %c0_12] : memref<16x256xf32, #tpu.memory_space<vmem>>, vector<16x256xf32>
      tpu.vector_store %arg7[%c0_11, %c0_12], %12 {strides = array<i32>} : memref<16x256xf32, #tpu.memory_space<vmem>>, vector<16x256xf32>,
    } else {
    }
    %c0 = arith.constant 0 : index
    %c0_1 = arith.constant 0 : index
    %3 = vector.load %arg7[%c0, %c0_1] : memref<16x256xf32, #tpu.memory_space<vmem>>, vector<16x256xf32>
    %c0_2 = arith.constant 0 : index
    %c0_3 = arith.constant 0 : index
    %4 = vector.load %arg3[%c0_2, %c0_3] : memref<16x5248xbf16, #tpu.memory_space<vmem>>, vector<16x5248xbf16>
    %c0_4 = arith.constant 0 : index
    %c0_5 = arith.constant 0 : index
    %5 = vector.load %arg4[%c0_4, %c0_5] : memref<5248x256xbf16, #tpu.memory_space<vmem>>, vector<5248x256xbf16>
    %cst = arith.constant dense<0.000000e+00> : vector<16x256xf32>
    %6 = tpu.matmul %4, %5, %cst {dimension_numbers = #tpu.dot_dimension_numbers<[1], [0], [0], [1], [0, 0, 1, 1], [], []>} : vector<16x5248xbf16>, vector<5248x256xbf16>, vector<16x256xf32> -> vector<16x256xf32>
    %7 = arith.addf %3, %6 : vector<16x256xf32>
    %c0_6 = arith.constant 0 : index
    %c0_7 = arith.constant 0 : index
    %8 = vector.load %arg7[%c0_6, %c0_7] : memref<16x256xf32, #tpu.memory_space<vmem>>, vector<16x256xf32>
    tpu.vector_store %arg7[%c0_6, %c0_7], %7 {strides = array<i32>} : memref<16x256xf32, #tpu.memory_space<vmem>>, vector<16x256xf32>,
    %c0_i32_8 = arith.constant 0 : i32
    %9 = arith.cmpi eq, %arg2, %c0_i32_8 : i32
    %10 = arith.extui %9 : i1 to i32
    %c0_i32_9 = arith.constant 0 : i32
    %11 = arith.cmpi ne, %10, %c0_i32_9 : i32
    scf.if %11 {
      %c0_10 = arith.constant 0 : index
      %c0_11 = arith.constant 0 : index
      %12 = vector.load %arg7[%c0_10, %c0_11] : memref<16x256xf32, #tpu.memory_space<vmem>>, vector<16x256xf32>
      %c0_12 = arith.constant 0 : index
      %c0_13 = arith.constant 0 : index
      %13 = vector.load %arg5[%c0_12, %c0_13] : memref<1x256xf32, #tpu.memory_space<vmem>>, vector<1x256xf32>
      %14 = vector.broadcast %13 : vector<1x256xf32> to vector<16x256xf32>
      %15 = arith.addf %12, %14 : vector<16x256xf32>
      %cst_14 = arith.constant 0.000000e+00 : f32
      %16 = vector.broadcast %cst_14 : f32 to vector<16x256xf32>
      %17 = arith.maximumf %15, %16 : vector<16x256xf32>
      %18 = arith.truncf %17 : vector<16x256xf32> to vector<16x256xbf16>
      %c0_15 = arith.constant 0 : index
      %c0_16 = arith.constant 0 : index
      %19 = vector.load %arg6[%c0_15, %c0_16] : memref<16x256xbf16, #tpu.memory_space<vmem>>, vector<16x256xbf16>
      tpu.vector_store %arg6[%c0_15, %c0_16], %18 {strides = array<i32>} : memref<16x256xbf16, #tpu.memory_space<vmem>>, vector<16x256xbf16>,
    } else {
    }
    return
  }
  func.func @transform_0(%arg0: i32, %arg1: i32, %arg2: i32) -> (i32, i32) {
    %c0_i32 = arith.constant 0 : i32
    return %arg0, %arg2 : i32, i32
  }
  func.func @transform_1(%arg0: i32, %arg1: i32, %arg2: i32) -> (i32, i32) {
    %c0_i32 = arith.constant 0 : i32
    return %arg2, %arg1 : i32, i32
  }
  func.func @transform_2(%arg0: i32, %arg1: i32, %arg2: i32) -> (i32, i32) {
    %c0_i32 = arith.constant 0 : i32
    %c0_i32_0 = arith.constant 0 : i32
    return %c0_i32, %arg1 : i32, i32
  }
  func.func @transform_3(%arg0: i32, %arg1: i32, %arg2: i32) -> (i32, i32) {
    %c0_i32 = arith.constant 0 : i32
    return %arg0, %arg1 : i32, i32
  }
}

module attributes {stable_mosaic.version = 11 : i64} {
  func.func @_head_kernel(%arg0: i32, %arg1: memref<16x1280xbf16, #tpu.memory_space<vmem>>, %arg2: memref<1280x128xbf16, #tpu.memory_space<vmem>>, %arg3: memref<1x128xf32, #tpu.memory_space<vmem>>, %arg4: memref<128x128xbf16, #tpu.memory_space<vmem>>, %arg5: memref<1x128xf32, #tpu.memory_space<vmem>>, %arg6: memref<128x128xbf16, #tpu.memory_space<vmem>>, %arg7: memref<1x128xf32, #tpu.memory_space<vmem>>, %arg8: memref<128x128xbf16, #tpu.memory_space<vmem>>, %arg9: memref<1x128xf32, #tpu.memory_space<vmem>>, %arg10: memref<16x128xf32, #tpu.memory_space<vmem>>, %arg11: memref<16x128xf32, #tpu.memory_space<vmem>>) attributes {dimension_semantics = [#tpu.dimension_semantics<arbitrary>], iteration_bounds = array<i64: 1>, scalar_prefetch = 0 : i64, scratch_operands = 0 : i64, tpu.core_type = #tpu.core_type<tc>, window_params = [{pipeline_mode = #tpu.pipeline_mode<synchronous>, transform_indices = @transform_0, window_bounds = array<i64: 16, 1280>}, {pipeline_mode = #tpu.pipeline_mode<synchronous>, transform_indices = @transform_1, window_bounds = array<i64: 1280, 128>}, {pipeline_mode = #tpu.pipeline_mode<synchronous>, transform_indices = @transform_2, window_bounds = array<i64: 1, 128>}, {pipeline_mode = #tpu.pipeline_mode<synchronous>, transform_indices = @transform_3, window_bounds = array<i64: 128, 128>}, {pipeline_mode = #tpu.pipeline_mode<synchronous>, transform_indices = @transform_4, window_bounds = array<i64: 1, 128>}, {pipeline_mode = #tpu.pipeline_mode<synchronous>, transform_indices = @transform_5, window_bounds = array<i64: 128, 128>}, {pipeline_mode = #tpu.pipeline_mode<synchronous>, transform_indices = @transform_6, window_bounds = array<i64: 1, 128>}, {pipeline_mode = #tpu.pipeline_mode<synchronous>, transform_indices = @transform_7, window_bounds = array<i64: 128, 128>}, {pipeline_mode = #tpu.pipeline_mode<synchronous>, transform_indices = @transform_8, window_bounds = array<i64: 1, 128>}, {pipeline_mode = #tpu.pipeline_mode<synchronous>, transform_indices = @transform_9, window_bounds = array<i64: 16, 128>}, {pipeline_mode = #tpu.pipeline_mode<synchronous>, transform_indices = @transform_10, window_bounds = array<i64: 16, 128>}]} {
    %c0 = arith.constant 0 : index
    %c0_0 = arith.constant 0 : index
    %0 = vector.load %arg1[%c0, %c0_0] : memref<16x1280xbf16, #tpu.memory_space<vmem>>, vector<16x1280xbf16>
    %c0_1 = arith.constant 0 : index
    %c0_2 = arith.constant 0 : index
    %1 = vector.load %arg2[%c0_1, %c0_2] : memref<1280x128xbf16, #tpu.memory_space<vmem>>, vector<1280x128xbf16>
    %cst = arith.constant dense<0.000000e+00> : vector<16x128xf32>
    %2 = tpu.matmul %0, %1, %cst {dimension_numbers = #tpu.dot_dimension_numbers<[1], [0], [0], [1], [0, 0, 1, 1], [], []>} : vector<16x1280xbf16>, vector<1280x128xbf16>, vector<16x128xf32> -> vector<16x128xf32>
    %c0_3 = arith.constant 0 : index
    %c0_4 = arith.constant 0 : index
    %3 = vector.load %arg3[%c0_3, %c0_4] : memref<1x128xf32, #tpu.memory_space<vmem>>, vector<1x128xf32>
    %4 = vector.broadcast %3 : vector<1x128xf32> to vector<16x128xf32>
    %5 = arith.addf %2, %4 : vector<16x128xf32>
    %cst_5 = arith.constant 0.000000e+00 : f32
    %6 = vector.broadcast %cst_5 : f32 to vector<16x128xf32>
    %7 = arith.maximumf %5, %6 : vector<16x128xf32>
    %8 = arith.truncf %7 : vector<16x128xf32> to vector<16x128xbf16>
    %c0_6 = arith.constant 0 : index
    %c0_7 = arith.constant 0 : index
    %9 = vector.load %arg4[%c0_6, %c0_7] : memref<128x128xbf16, #tpu.memory_space<vmem>>, vector<128x128xbf16>
    %cst_8 = arith.constant dense<0.000000e+00> : vector<16x128xf32>
    %10 = tpu.matmul %8, %9, %cst_8 {dimension_numbers = #tpu.dot_dimension_numbers<[1], [0], [0], [1], [0, 0, 1, 1], [], []>} : vector<16x128xbf16>, vector<128x128xbf16>, vector<16x128xf32> -> vector<16x128xf32>
    %c0_9 = arith.constant 0 : index
    %c0_10 = arith.constant 0 : index
    %11 = vector.load %arg5[%c0_9, %c0_10] : memref<1x128xf32, #tpu.memory_space<vmem>>, vector<1x128xf32>
    %12 = vector.broadcast %11 : vector<1x128xf32> to vector<16x128xf32>
    %13 = arith.addf %10, %12 : vector<16x128xf32>
    %cst_11 = arith.constant 0.000000e+00 : f32
    %14 = vector.broadcast %cst_11 : f32 to vector<16x128xf32>
    %15 = arith.maximumf %13, %14 : vector<16x128xf32>
    %16 = arith.truncf %15 : vector<16x128xf32> to vector<16x128xbf16>
    %c0_12 = arith.constant 0 : index
    %c0_13 = arith.constant 0 : index
    %17 = vector.load %arg6[%c0_12, %c0_13] : memref<128x128xbf16, #tpu.memory_space<vmem>>, vector<128x128xbf16>
    %cst_14 = arith.constant dense<0.000000e+00> : vector<16x128xf32>
    %18 = tpu.matmul %16, %17, %cst_14 {dimension_numbers = #tpu.dot_dimension_numbers<[1], [0], [0], [1], [0, 0, 1, 1], [], []>} : vector<16x128xbf16>, vector<128x128xbf16>, vector<16x128xf32> -> vector<16x128xf32>
    %c0_15 = arith.constant 0 : index
    %c0_16 = arith.constant 0 : index
    %19 = vector.load %arg7[%c0_15, %c0_16] : memref<1x128xf32, #tpu.memory_space<vmem>>, vector<1x128xf32>
    %20 = vector.broadcast %19 : vector<1x128xf32> to vector<16x128xf32>
    %21 = arith.addf %18, %20 : vector<16x128xf32>
    %cst_17 = arith.constant 0.000000e+00 : f32
    %22 = vector.broadcast %cst_17 : f32 to vector<16x128xf32>
    %23 = arith.maximumf %21, %22 : vector<16x128xf32>
    %c0_18 = arith.constant 0 : index
    %c0_19 = arith.constant 0 : index
    %24 = vector.load %arg10[%c0_18, %c0_19] : memref<16x128xf32, #tpu.memory_space<vmem>>, vector<16x128xf32>
    tpu.vector_store %arg10[%c0_18, %c0_19], %23 {strides = array<i32>} : memref<16x128xf32, #tpu.memory_space<vmem>>, vector<16x128xf32>,
    %25 = arith.truncf %23 : vector<16x128xf32> to vector<16x128xbf16>
    %c0_20 = arith.constant 0 : index
    %c0_21 = arith.constant 0 : index
    %26 = vector.load %arg8[%c0_20, %c0_21] : memref<128x128xbf16, #tpu.memory_space<vmem>>, vector<128x128xbf16>
    %cst_22 = arith.constant dense<0.000000e+00> : vector<16x128xf32>
    %27 = tpu.matmul %25, %26, %cst_22 {dimension_numbers = #tpu.dot_dimension_numbers<[1], [0], [0], [1], [0, 0, 1, 1], [], []>} : vector<16x128xbf16>, vector<128x128xbf16>, vector<16x128xf32> -> vector<16x128xf32>
    %c0_23 = arith.constant 0 : index
    %c0_24 = arith.constant 0 : index
    %28 = vector.load %arg9[%c0_23, %c0_24] : memref<1x128xf32, #tpu.memory_space<vmem>>, vector<1x128xf32>
    %29 = vector.broadcast %28 : vector<1x128xf32> to vector<16x128xf32>
    %30 = arith.addf %27, %29 : vector<16x128xf32>
    %c0_25 = arith.constant 0 : index
    %c0_26 = arith.constant 0 : index
    %31 = vector.load %arg11[%c0_25, %c0_26] : memref<16x128xf32, #tpu.memory_space<vmem>>, vector<16x128xf32>
    tpu.vector_store %arg11[%c0_25, %c0_26], %30 {strides = array<i32>} : memref<16x128xf32, #tpu.memory_space<vmem>>, vector<16x128xf32>,
    return
  }
  func.func @transform_0(%arg0: i32) -> (i32, i32) {
    %c0_i32 = arith.constant 0 : i32
    %c0_i32_0 = arith.constant 0 : i32
    %c0_i32_1 = arith.constant 0 : i32
    return %c0_i32, %c0_i32_0 : i32, i32
  }
  func.func @transform_1(%arg0: i32) -> (i32, i32) {
    %c0_i32 = arith.constant 0 : i32
    %c0_i32_0 = arith.constant 0 : i32
    %c0_i32_1 = arith.constant 0 : i32
    return %c0_i32, %c0_i32_0 : i32, i32
  }
  func.func @transform_2(%arg0: i32) -> (i32, i32) {
    %c0_i32 = arith.constant 0 : i32
    %c0_i32_0 = arith.constant 0 : i32
    %c0_i32_1 = arith.constant 0 : i32
    return %c0_i32, %c0_i32_0 : i32, i32
  }
  func.func @transform_3(%arg0: i32) -> (i32, i32) {
    %c0_i32 = arith.constant 0 : i32
    %c0_i32_0 = arith.constant 0 : i32
    %c0_i32_1 = arith.constant 0 : i32
    return %c0_i32, %c0_i32_0 : i32, i32
  }
  func.func @transform_4(%arg0: i32) -> (i32, i32) {
    %c0_i32 = arith.constant 0 : i32
    %c0_i32_0 = arith.constant 0 : i32
    %c0_i32_1 = arith.constant 0 : i32
    return %c0_i32, %c0_i32_0 : i32, i32
  }
  func.func @transform_5(%arg0: i32) -> (i32, i32) {
    %c0_i32 = arith.constant 0 : i32
    %c0_i32_0 = arith.constant 0 : i32
    %c0_i32_1 = arith.constant 0 : i32
    return %c0_i32, %c0_i32_0 : i32, i32
  }
  func.func @transform_6(%arg0: i32) -> (i32, i32) {
    %c0_i32 = arith.constant 0 : i32
    %c0_i32_0 = arith.constant 0 : i32
    %c0_i32_1 = arith.constant 0 : i32
    return %c0_i32, %c0_i32_0 : i32, i32
  }
  func.func @transform_7(%arg0: i32) -> (i32, i32) {
    %c0_i32 = arith.constant 0 : i32
    %c0_i32_0 = arith.constant 0 : i32
    %c0_i32_1 = arith.constant 0 : i32
    return %c0_i32, %c0_i32_0 : i32, i32
  }
  func.func @transform_8(%arg0: i32) -> (i32, i32) {
    %c0_i32 = arith.constant 0 : i32
    %c0_i32_0 = arith.constant 0 : i32
    %c0_i32_1 = arith.constant 0 : i32
    return %c0_i32, %c0_i32_0 : i32, i32
  }
  func.func @transform_9(%arg0: i32) -> (i32, i32) {
    %c0_i32 = arith.constant 0 : i32
    %c0_i32_0 = arith.constant 0 : i32
    %c0_i32_1 = arith.constant 0 : i32
    return %c0_i32, %c0_i32_0 : i32, i32
  }
  func.func @transform_10(%arg0: i32) -> (i32, i32) {
    %c0_i32 = arith.constant 0 : i32
    %c0_i32_0 = arith.constant 0 : i32
    %c0_i32_1 = arith.constant 0 : i32
    return %c0_i32, %c0_i32_0 : i32, i32
  }
}

</mosaic_0001>

<bundles_post_ra>
// kernel: nvidia_forward.7
= control target key start
LH: loop header
LB: loop body
LE: loop exit
PB: predicated region body
PF: predicated region fallthrough
CT: control target
= control target key end

     0   :  { %s2379_s12 = smov 0   ;;  %s2381_s13 = smov 0   ;;  %s2580_s0 = inlined_call_operand.vmem [shape: bf16[8192,128], index: 0, kind: input, shape index: {}]   ;;  %s2581_s1 = inlined_call_operand.vmem [shape: bf16[128,128], index: 1, kind: input, shape index: {}]   ;;  %s2582_s2 = inlined_call_operand.vmem [shape: f32[1,128], index: 2, kind: input, shape index: {}]   ;;  %s2583_s3 = inlined_call_operand.vmem [shape: bf16[8192,128], index: 3, kind: output, shape index: {}]  }
   0x1   :  { %s2383_s14 = smov 0  }
   0x2 LB: > { %s32_s15 = sadd.s32 1, %s2353_s13  ;;  %p1768_p0 = scmp.ge.s32.totalorder %s2357_s14, 1  ;;  %s2357_s14 = sphi %s2383_s14, %s13_s14   ;;  %s2353_s13 = sphi %s2381_s13, %s2585_s13   ;;  %s2349_s12 = sphi %s2379_s12, %s2584_s12  }
   0x3   : > { %p34_p1 = scmp.ge.s32.totalorder %s32_s15, 16  ;;  %p188_p2 = scmp.lt.s32.totalorder %s2357_s14, 17 }
   0x5   : > { %s2587_s15 = smov (%p34_p1, %s32_s15), 0  ;;  %p189_p3 = pnand %p1768_p0, %p188_p2 }
   0x6   : > { %v2295_v0 = vld [vmem:[%s2581_s1] sm:$0xff] (!%p189_p3)   ;;  %s1769_s18 = sshll.u32 (!%p189_p3), %s2349_s12, 6  ;;  %v2296_v1 = vld [vmem:[%s2581_s1 + $0x8] sm:$0xff] (!%p189_p3)   ;;  %v2297_v2 = vld [vmem:[%s2581_s1 + $0x10] sm:$0xff] (!%p189_p3)  }
   0x7   : > { %192 = sbr.rel (%p189_p3) target bundleno = 317 (0x13d), region = 32  ;;  %p230_p4 = scmp.lt.s32.totalorder (!%p189_p3), %s1769_s18, 1023  ;;  %2175 = vmatprep.subr.bf16.mxu0 (!%p189_p3), %v2295_v0  ;;  %2255 = vmatprep.subr.bf16.mxu1 (!%p189_p3), %v2295_v0  ;;  %v2298_v3 = vld [vmem:[%s2581_s1 + $0x18] sm:$0xff] (!%p189_p3)   ;;  %v2299_v6 = vld [vmem:[%s2581_s1 + $0x20] sm:$0xff] (!%p189_p3)   ;;  %v2300_v7 = vld [vmem:[%s2581_s1 + $0x28] sm:$0xff] (!%p189_p3)  }
   0x8   : > { %2176 = vmatpush3.bf16.msra.mxu0 (!%p189_p3), %v2295_v0  ;;  %2263 = vmatpush3.bf16.msra.mxu1 (!%p189_p3), %v2295_v0  ;;  %v2301_v8 = vld [vmem:[%s2581_s1 + $0x30] sm:$0xff] (!%p189_p3)   ;;  %v2302_v9 = vld [vmem:[%s2581_s1 + $0x38] sm:$0xff] (!%p189_p3)   ;;  %v2466_v40 = vld [vmem:[%s2582_s2] ss:$0 sm:$0xff] (!%p189_p3) }
   0x9   : > { %2177 = vmatprep.subr.bf16.mxu0 (!%p189_p3), %v2296_v1  ;;  %2256 = vmatprep.subr.bf16.mxu1 (!%p189_p3), %v2296_v1 }
   0xc   : > { %2178 = vmatpush3.bf16.msra.mxu0 (!%p189_p3), %v2296_v1  ;;  %2264 = vmatpush3.bf16.msra.mxu1 (!%p189_p3), %v2296_v1 }
   0xd   : > { %2179 = vmatprep.subr.bf16.mxu0 (!%p189_p3), %v2297_v2  ;;  %2257 = vmatprep.subr.bf16.mxu1 (!%p189_p3), %v2297_v2 }
   0xe   : > { %s2589_s18 = smov (!%p230_p4, %s1769_s18), 1023 }
   0xf   : > { %s1770_s23 = sshll.u32 %s2589_s18, 2 }
  0x10   : > { %s2414_s26 = scalar_lea.vmem %s2580_s0, %s1770_s23  ;;  %2180 = vmatpush3.bf16.msra.mxu0 %v2297_v2  ;;  %2265 = vmatpush3.bf16.msra.mxu1 %v2297_v2  ;;  %s2481_s17 = scalar_lea.vmem %s2583_s3, %s1770_s23 }
  0x11   : > { %v2303_v4 = vld [vmem:[%s2414_s26] sm:$0xff]   ;;  %2181 = vmatprep.subr.bf16.mxu0 %v2298_v3  ;;  %2258 = vmatprep.subr.bf16.mxu1 %v2298_v3  ;;  %v2305_v10 = vld [vmem:[%s2414_s26 + $0x8] sm:$0xff]   ;;  %v2307_v12 = vld [vmem:[%s2414_s26 + $0x10] sm:$0xff]  }
  0x12   : > { %v2304_v5 = vld [vmem:[%s2414_s26 + $0x80] sm:$0xff]   ;;  %2191 = vmatprep.mubr.bf16.mxu0 %v2303_v4  ;;  %v2306_v11 = vld [vmem:[%s2414_s26 + $0x88] sm:$0xff]   ;;  %v2308_v13 = vld [vmem:[%s2414_s26 + $0x90] sm:$0xff]  }
  0x13   : > { %2223 = vmatprep.mubr.bf16.mxu1 %v2304_v5  ;;  %v2309_v14 = vld [vmem:[%s2414_s26 + $0x18] sm:$0xff]   ;;  %v2311_v16 = vld [vmem:[%s2414_s26 + $0x20] sm:$0xff]   ;;  %v2313_v18 = vld [vmem:[%s2414_s26 + $0x28] sm:$0xff]  }
  0x14   : > { %2182 = vmatpush3.bf16.msra.mxu0 %v2298_v3  ;;  %2266 = vmatpush3.bf16.msra.mxu1 %v2298_v3  ;;  %v2310_v15 = vld [vmem:[%s2414_s26 + $0x98] sm:$0xff]   ;;  %v2312_v17 = vld [vmem:[%s2414_s26 + $0xa0] sm:$0xff]   ;;  %v2314_v19 = vld [vmem:[%s2414_s26 + $0xa8] sm:$0xff]  }
  0x15   : > { %2183 = vmatprep.subr.bf16.mxu0 %v2299_v6  ;;  %2259 = vmatprep.subr.bf16.mxu1 %v2299_v6  ;;  %v2315_v20 = vld [vmem:[%s2414_s26 + $0x30] sm:$0xff]   ;;  %v2317_v22 = vld [vmem:[%s2414_s26 + $0x38] sm:$0xff]   ;;  %v2319_v24 = vld [vmem:[%s2414_s26 + $0x40] sm:$0xff]  }
  0x16   : > { %v2316_v21 = vld [vmem:[%s2414_s26 + $0xb0] sm:$0xff]   ;;  %v2318_v23 = vld [vmem:[%s2414_s26 + $0xb8] sm:$0xff]   ;;  %v2320_v25 = vld [vmem:[%s2414_s26 + $0xc0] sm:$0xff]  }
  0x17   : > { %v2321_v26 = vld [vmem:[%s2414_s26 + $0x48] sm:$0xff]   ;;  %v2323_v28 = vld [vmem:[%s2414_s26 + $0x50] sm:$0xff]   ;;  %v2325_v30 = vld [vmem:[%s2414_s26 + $0x58] sm:$0xff]  }
  0x18   : > { %2184 = vmatpush3.bf16.msra.mxu0 %v2299_v6  ;;  %2267 = vmatpush3.bf16.msra.mxu1 %v2299_v6  ;;  %v2322_v27 = vld [vmem:[%s2414_s26 + $0xc8] sm:$0xff]   ;;  %v2324_v29 = vld [vmem:[%s2414_s26 + $0xd0] sm:$0xff]   ;;  %v2326_v31 = vld [vmem:[%s2414_s26 + $0xd8] sm:$0xff]  }
  0x19   : > { %2185 = vmatprep.subr.bf16.mxu0 %v2300_v7  ;;  %2260 = vmatprep.subr.bf16.mxu1 %v2300_v7  ;;  %v2327_v32 = vld [vmem:[%s2414_s26 + $0x60] sm:$0xff]   ;;  %v2329_v34 = vld [vmem:[%s2414_s26 + $0x68] sm:$0xff]   ;;  %v2331_v36 = vld [vmem:[%s2414_s26 + $0x70] sm:$0xff]  }
  0x1a   : > { %v2328_v33 = vld [vmem:[%s2414_s26 + $0xe0] sm:$0xff]   ;;  %v2330_v35 = vld [vmem:[%s2414_s26 + $0xe8] sm:$0xff]   ;;  %v2332_v37 = vld [vmem:[%s2414_s26 + $0xf0] sm:$0xff]  }
  0x1b   : > { %v2333_v38 = vld [vmem:[%s2414_s26 + $0x78] sm:$0xff]  }
  0x1c   : > { %2186 = vmatpush3.bf16.msra.mxu0 %v2300_v7  ;;  %2268 = vmatpush3.bf16.msra.mxu1 %v2300_v7  ;;  %v2334_v39 = vld [vmem:[%s2414_s26 + $0xf8] sm:$0xff]  }
  0x1d   : > { %2187 = vmatprep.subr.bf16.mxu0 %v2301_v8  ;;  %2261 = vmatprep.subr.bf16.mxu1 %v2301_v8 }
  0x20   : > { %2188 = vmatpush3.bf16.msra.mxu0 %v2301_v8  ;;  %2269 = vmatpush3.bf16.msra.mxu1 %v2301_v8 }
  0x21   : > { %2189 = vmatprep.subr.bf16.mxu0 %v2302_v9  ;;  %2262 = vmatprep.subr.bf16.mxu1 %v2302_v9 }
  0x24   : > { %2190 = vmatpush3.bf16.msra.mxu0 %v2302_v9  ;;  %2270 = vmatpush3.bf16.msra.mxu1 %v2302_v9 }
  0x27   : > { %2192 = vmatmul.mubr.bf16.vlgmr.msra.gmra.mrb[0].mxu0 %v2305_v10  ;;  %2224 = vmatmul.mubr.bf16.vlgmr.msra.gmra.mrb[0].mxu1 %v2306_v11 }
  0x28   : > { %2195 = vmatprep.mubr.bf16.mxu0 %v2307_v12  ;;  %2227 = vmatprep.mubr.bf16.mxu1 %v2308_v13 }
  0x2f   : > { %2196 = vmatmul.mubr.bf16.gmra.mrb[4].mxu0 %v2309_v14  ;;  %2228 = vmatmul.mubr.bf16.gmra.mrb[4].mxu1 %v2310_v15 }
  0x30   : > { %2199 = vmatprep.mubr.bf16.mxu0 %v2311_v16  ;;  %2231 = vmatprep.mubr.bf16.mxu1 %v2312_v17 }
  0x37   : > { %2200 = vmatmul.mubr.bf16.gmra.mrb[8].mxu0 %v2313_v18  ;;  %2232 = vmatmul.mubr.bf16.gmra.mrb[8].mxu1 %v2314_v19 }
  0x38   : > { %2203 = vmatprep.mubr.bf16.mxu0 %v2315_v20  ;;  %2235 = vmatprep.mubr.bf16.mxu1 %v2316_v21 }
  0x3f   : > { %2204 = vmatmul.mubr.bf16.gmra.mrb[12].mxu0 %v2317_v22  ;;  %2236 = vmatmul.mubr.bf16.gmra.mrb[12].mxu1 %v2318_v23 }
  0x40   : > { %2207 = vmatprep.mubr.bf16.mxu0 %v2319_v24  ;;  %2239 = vmatprep.mubr.bf16.mxu1 %v2320_v25 }
  0x47   : > { %2208 = vmatmul.mubr.bf16.gmra.mrb[16].mxu0 %v2321_v26  ;;  %2240 = vmatmul.mubr.bf16.gmra.mrb[16].mxu1 %v2322_v27 }
  0x48   : > { %2211 = vmatprep.mubr.bf16.mxu0 %v2323_v28  ;;  %2243 = vmatprep.mubr.bf16.mxu1 %v2324_v29 }
  0x4f   : > { %2212 = vmatmul.mubr.bf16.gmra.mrb[20].mxu0 %v2325_v30  ;;  %2244 = vmatmul.mubr.bf16.gmra.mrb[20].mxu1 %v2326_v31 }
  0x50   : > { %2215 = vmatprep.mubr.bf16.mxu0 %v2327_v32  ;;  %2247 = vmatprep.mubr.bf16.mxu1 %v2328_v33 }
  0x57   : > { %2216 = vmatmul.mubr.bf16.gmra.mrb[24].mxu0 %v2329_v34  ;;  %2248 = vmatmul.mubr.bf16.gmra.mrb[24].mxu1 %v2330_v35 }
  0x58   : > { %2219 = vmatprep.mubr.bf16.mxu0 %v2331_v36  ;;  %2251 = vmatprep.mubr.bf16.mxu1 %v2332_v37 }
  0x5f   : > { %2220 = vmatmul.mubr.bf16.gmra.mrb[28].mxu0 %v2333_v38  ;;  %2252 = vmatmul.mubr.bf16.gmra.mrb[28].mxu1 %v2334_v39 }
  0xfa   : > { %v2193_v41 = vpop.f32.mrb[0].mxu0  ;;  %v2225_v42 = vpop.f32.mrb[0].mxu1 }
  0xfb   : > { %v1205_v43 = vadd.f32 %v2193_v41, %v2466_v40  ;;  %v1237_v44 = vadd.f32 %v2225_v42, %v2466_v40  ;;  %v746_v45 = vpop.f32.mrb[1].mxu0  ;;  %v874_v46 = vpop.f32.mrb[1].mxu1 }
  0xfc   : > { %v1203_v47 = vadd.f32 %v2466_v40, %v746_v45  ;;  %v1235_v48 = vadd.f32 %v2466_v40, %v874_v46  ;;  %v2194_v49 = vpop.f32.mrb[2].mxu0  ;;  %v2226_v50 = vpop.f32.mrb[2].mxu1 }
  0xfd   : > { %v1206_v51 = vadd.f32 %v2194_v49, %v2466_v40  ;;  %v1238_v52 = vadd.f32 %v2226_v50, %v2466_v40  ;;  %v749_v53 = vpop.f32.mrb[3].mxu0  ;;  %v877_v54 = vpop.f32.mrb[3].mxu1  ;;  %v1269_v57 = vmax.f32 %v1205_v43, 0.0  ;;  %v1301_v58 = vmax.f32 %v1237_v44, 0.0 }
  0xfe   : > { %v1204_v55 = vadd.f32 %v2466_v40, %v749_v53  ;;  %v1236_v56 = vadd.f32 %v2466_v40, %v877_v54  ;;  %v1267_v61 = vmax.f32 %v1203_v47, 0.0  ;;  %v1299_v62 = vmax.f32 %v1235_v48, 0.0 }
  0xff   : > { %v1270_v59 = vmax.f32 %v1206_v51, 0.0  ;;  %v1302_v60 = vmax.f32 %v1238_v52, 0.0 }
 0x100   : > { %v1268_v63 = vmax.f32 %v1204_v55, 0.0  ;;  %v1300_v0 = vmax.f32 %v1236_v56, 0.0 }
 0x101   : > { %v1952_v1 = vpack.c.bf16 %v1270_v59, %v1269_v57  ;;  %v2032_v2 = vpack.c.bf16 %v1302_v60, %v1301_v58 }
 0x102   : > { %v1947_v3 = vpack.c.bf16 %v1268_v63, %v1267_v61  ;;  %v2027_v4 = vpack.c.bf16 %v1300_v0, %v1299_v62  ;;  %v2197_v5 = vpop.f32.mrb[4].mxu0  ;;  %v2229_v6 = vpop.f32.mrb[4].mxu1 }
 0x103   : > { %2104 = vst [vmem:[%s2481_s17 + $0x8] sm:$0xff] %v1952_v1   ;;  %2120 = vst [vmem:[%s2481_s17 + $0x88] sm:$0xff] %v2032_v2   ;;  %v1209_v7 = vadd.f32 %v2197_v5, %v2466_v40  ;;  %v1241_v8 = vadd.f32 %v2229_v6, %v2466_v40  ;;  %v762_v9 = vpop.f32.mrb[5].mxu0  ;;  %v890_v10 = vpop.f32.mrb[5].mxu1 }
 0x104   : > { %1948 = vst [vmem:[%s2481_s17] sm:$0xff] %v1947_v3   ;;  %2119 = vst [vmem:[%s2481_s17 + $0x80] sm:$0xff] %v2027_v4   ;;  %v1207_v11 = vadd.f32 %v2466_v40, %v762_v9  ;;  %v1239_v12 = vadd.f32 %v2466_v40, %v890_v10  ;;  %v2198_v13 = vpop.f32.mrb[6].mxu0  ;;  %v2230_v14 = vpop.f32.mrb[6].mxu1 }
 0x105   : > { %v1210_v15 = vadd.f32 %v2198_v13, %v2466_v40  ;;  %v1242_v16 = vadd.f32 %v2230_v14, %v2466_v40  ;;  %v765_v17 = vpop.f32.mrb[7].mxu0  ;;  %v893_v18 = vpop.f32.mrb[7].mxu1  ;;  %v1273_v21 = vmax.f32 %v1209_v7, 0.0  ;;  %v1305_v22 = vmax.f32 %v1241_v8, 0.0 }
 0x106   : > { %v1208_v19 = vadd.f32 %v2466_v40, %v765_v17  ;;  %v1240_v20 = vadd.f32 %v2466_v40, %v893_v18  ;;  %v1271_v25 = vmax.f32 %v1207_v11, 0.0  ;;  %v1303_v26 = vmax.f32 %v1239_v12, 0.0 }
 0x107   : > { %v1274_v23 = vmax.f32 %v1210_v15, 0.0  ;;  %v1306_v24 = vmax.f32 %v1242_v16, 0.0 }
 0x108   : > { %v1272_v27 = vmax.f32 %v1208_v19, 0.0  ;;  %v1304_v28 = vmax.f32 %v1240_v20, 0.0 }
 0x109   : > { %v1962_v29 = vpack.c.bf16 %v1274_v23, %v1273_v21  ;;  %v2042_v30 = vpack.c.bf16 %v1306_v24, %v1305_v22 }
 0x10a   : > { %v1957_v31 = vpack.c.bf16 %v1272_v27, %v1271_v25  ;;  %v2037_v32 = vpack.c.bf16 %v1304_v28, %v1303_v26  ;;  %v2201_v33 = vpop.f32.mrb[8].mxu0  ;;  %v2233_v34 = vpop.f32.mrb[8].mxu1 }
 0x10b   : > { %2106 = vst [vmem:[%s2481_s17 + $0x18] sm:$0xff] %v1962_v29   ;;  %2122 = vst [vmem:[%s2481_s17 + $0x98] sm:$0xff] %v2042_v30   ;;  %v1213_v35 = vadd.f32 %v2201_v33, %v2466_v40  ;;  %v1245_v36 = vadd.f32 %v2233_v34, %v2466_v40  ;;  %v778_v37 = vpop.f32.mrb[9].mxu0  ;;  %v906_v38 = vpop.f32.mrb[9].mxu1 }
 0x10c   : > { %2105 = vst [vmem:[%s2481_s17 + $0x10] sm:$0xff] %v1957_v31   ;;  %2121 = vst [vmem:[%s2481_s17 + $0x90] sm:$0xff] %v2037_v32   ;;  %v1211_v39 = vadd.f32 %v2466_v40, %v778_v37  ;;  %v1243_v41 = vadd.f32 %v2466_v40, %v906_v38  ;;  %v2202_v42 = vpop.f32.mrb[10].mxu0  ;;  %v2234_v43 = vpop.f32.mrb[10].mxu1 }
 0x10d   : > { %v1214_v44 = vadd.f32 %v2202_v42, %v2466_v40  ;;  %v1246_v45 = vadd.f32 %v2234_v43, %v2466_v40  ;;  %v781_v46 = vpop.f32.mrb[11].mxu0  ;;  %v909_v47 = vpop.f32.mrb[11].mxu1  ;;  %v1277_v50 = vmax.f32 %v1213_v35, 0.0  ;;  %v1309_v51 = vmax.f32 %v1245_v36, 0.0 }
 0x10e   : > { %v1212_v48 = vadd.f32 %v2466_v40, %v781_v46  ;;  %v1244_v49 = vadd.f32 %v2466_v40, %v909_v47  ;;  %v1275_v54 = vmax.f32 %v1211_v39, 0.0  ;;  %v1307_v55 = vmax.f32 %v1243_v41, 0.0 }
 0x10f   : > { %v1278_v52 = vmax.f32 %v1214_v44, 0.0  ;;  %v1310_v53 = vmax.f32 %v1246_v45, 0.0 }
 0x110   : > { %v1276_v56 = vmax.f32 %v1212_v48, 0.0  ;;  %v1308_v57 = vmax.f32 %v1244_v49, 0.0 }
 0x111   : > { %v1972_v58 = vpack.c.bf16 %v1278_v52, %v1277_v50  ;;  %v2052_v59 = vpack.c.bf16 %v1310_v53, %v1309_v51 }
 0x112   : > { %v1967_v60 = vpack.c.bf16 %v1276_v56, %v1275_v54  ;;  %v2047_v61 = vpack.c.bf16 %v1308_v57, %v1307_v55  ;;  %v2205_v62 = vpop.f32.mrb[12].mxu0  ;;  %v2237_v63 = vpop.f32.mrb[12].mxu1 }
 0x113   : > { %2108 = vst [vmem:[%s2481_s17 + $0x28] sm:$0xff] %v1972_v58   ;;  %2124 = vst [vmem:[%s2481_s17 + $0xa8] sm:$0xff] %v2052_v59   ;;  %v1217_v0 = vadd.f32 %v2205_v62, %v2466_v40  ;;  %v1249_v1 = vadd.f32 %v2237_v63, %v2466_v40  ;;  %v794_v2 = vpop.f32.mrb[13].mxu0  ;;  %v922_v3 = vpop.f32.mrb[13].mxu1 }
 0x114   : > { %2107 = vst [vmem:[%s2481_s17 + $0x20] sm:$0xff] %v1967_v60   ;;  %2123 = vst [vmem:[%s2481_s17 + $0xa0] sm:$0xff] %v2047_v61   ;;  %v1215_v4 = vadd.f32 %v2466_v40, %v794_v2  ;;  %v1247_v5 = vadd.f32 %v2466_v40, %v922_v3  ;;  %v2206_v6 = vpop.f32.mrb[14].mxu0  ;;  %v2238_v7 = vpop.f32.mrb[14].mxu1 }
 0x115   : > { %v1218_v8 = vadd.f32 %v2206_v6, %v2466_v40  ;;  %v1250_v9 = vadd.f32 %v2238_v7, %v2466_v40  ;;  %v797_v10 = vpop.f32.mrb[15].mxu0  ;;  %v925_v11 = vpop.f32.mrb[15].mxu1  ;;  %v1281_v14 = vmax.f32 %v1217_v0, 0.0  ;;  %v1313_v15 = vmax.f32 %v1249_v1, 0.0 }
 0x116   : > { %v1216_v12 = vadd.f32 %v2466_v40, %v797_v10  ;;  %v1248_v13 = vadd.f32 %v2466_v40, %v925_v11  ;;  %v1279_v18 = vmax.f32 %v1215_v4, 0.0  ;;  %v1311_v19 = vmax.f32 %v1247_v5, 0.0 }
 0x117   : > { %v1282_v16 = vmax.f32 %v1218_v8, 0.0  ;;  %v1314_v17 = vmax.f32 %v1250_v9, 0.0 }
 0x118   : > { %v1280_v20 = vmax.f32 %v1216_v12, 0.0  ;;  %v1312_v21 = vmax.f32 %v1248_v13, 0.0 }
 0x119   : > { %v1982_v22 = vpack.c.bf16 %v1282_v16, %v1281_v14  ;;  %v2062_v23 = vpack.c.bf16 %v1314_v17, %v1313_v15 }
 0x11a   : > { %v1977_v24 = vpack.c.bf16 %v1280_v20, %v1279_v18  ;;  %v2057_v25 = vpack.c.bf16 %v1312_v21, %v1311_v19  ;;  %v2209_v26 = vpop.f32.mrb[16].mxu0  ;;  %v2241_v27 = vpop.f32.mrb[16].mxu1 }
 0x11b   : > { %2110 = vst [vmem:[%s2481_s17 + $0x38] sm:$0xff] %v1982_v22   ;;  %2126 = vst [vmem:[%s2481_s17 + $0xb8] sm:$0xff] %v2062_v23   ;;  %v1221_v28 = vadd.f32 %v2209_v26, %v2466_v40  ;;  %v1253_v29 = vadd.f32 %v2241_v27, %v2466_v40  ;;  %v810_v30 = vpop.f32.mrb[17].mxu0  ;;  %v938_v31 = vpop.f32.mrb[17].mxu1 }
 0x11c   : > { %2109 = vst [vmem:[%s2481_s17 + $0x30] sm:$0xff] %v1977_v24   ;;  %2125 = vst [vmem:[%s2481_s17 + $0xb0] sm:$0xff] %v2057_v25   ;;  %v1219_v32 = vadd.f32 %v2466_v40, %v810_v30  ;;  %v1251_v33 = vadd.f32 %v2466_v40, %v938_v31  ;;  %v2210_v34 = vpop.f32.mrb[18].mxu0  ;;  %v2242_v35 = vpop.f32.mrb[18].mxu1 }
 0x11d   : > { %v1222_v36 = vadd.f32 %v2210_v34, %v2466_v40  ;;  %v1254_v37 = vadd.f32 %v2242_v35, %v2466_v40  ;;  %v813_v38 = vpop.f32.mrb[19].mxu0  ;;  %v941_v39 = vpop.f32.mrb[19].mxu1  ;;  %v1285_v43 = vmax.f32 %v1221_v28, 0.0  ;;  %v1317_v44 = vmax.f32 %v1253_v29, 0.0 }
 0x11e   : > { %v1220_v41 = vadd.f32 %v2466_v40, %v813_v38  ;;  %v1252_v42 = vadd.f32 %v2466_v40, %v941_v39  ;;  %v1283_v47 = vmax.f32 %v1219_v32, 0.0  ;;  %v1315_v48 = vmax.f32 %v1251_v33, 0.0 }
 0x11f   : > { %v1286_v45 = vmax.f32 %v1222_v36, 0.0  ;;  %v1318_v46 = vmax.f32 %v1254_v37, 0.0 }
 0x120   : > { %v1284_v49 = vmax.f32 %v1220_v41, 0.0  ;;  %v1316_v50 = vmax.f32 %v1252_v42, 0.0 }
 0x121   : > { %v1992_v51 = vpack.c.bf16 %v1286_v45, %v1285_v43  ;;  %v2072_v52 = vpack.c.bf16 %v1318_v46, %v1317_v44 }
 0x122   : > { %v1987_v53 = vpack.c.bf16 %v1284_v49, %v1283_v47  ;;  %v2067_v54 = vpack.c.bf16 %v1316_v50, %v1315_v48  ;;  %v2213_v55 = vpop.f32.mrb[20].mxu0  ;;  %v2245_v56 = vpop.f32.mrb[20].mxu1 }
 0x123   : > { %2112 = vst [vmem:[%s2481_s17 + $0x48] sm:$0xff] %v1992_v51   ;;  %2128 = vst [vmem:[%s2481_s17 + $0xc8] sm:$0xff] %v2072_v52   ;;  %v1225_v57 = vadd.f32 %v2213_v55, %v2466_v40  ;;  %v1257_v58 = vadd.f32 %v2245_v56, %v2466_v40  ;;  %v826_v59 = vpop.f32.mrb[21].mxu0  ;;  %v954_v60 = vpop.f32.mrb[21].mxu1 }
 0x124   : > { %2111 = vst [vmem:[%s2481_s17 + $0x40] sm:$0xff] %v1987_v53   ;;  %2127 = vst [vmem:[%s2481_s17 + $0xc0] sm:$0xff] %v2067_v54   ;;  %v1223_v61 = vadd.f32 %v2466_v40, %v826_v59  ;;  %v1255_v62 = vadd.f32 %v2466_v40, %v954_v60  ;;  %v2214_v63 = vpop.f32.mrb[22].mxu0  ;;  %v2246_v0 = vpop.f32.mrb[22].mxu1 }
 0x125   : > { %v1226_v1 = vadd.f32 %v2214_v63, %v2466_v40  ;;  %v1258_v2 = vadd.f32 %v2246_v0, %v2466_v40  ;;  %v829_v3 = vpop.f32.mrb[23].mxu0  ;;  %v957_v4 = vpop.f32.mrb[23].mxu1  ;;  %v1289_v7 = vmax.f32 %v1225_v57, 0.0  ;;  %v1321_v8 = vmax.f32 %v1257_v58, 0.0 }
 0x126   : > { %v1224_v5 = vadd.f32 %v2466_v40, %v829_v3  ;;  %v1256_v6 = vadd.f32 %v2466_v40, %v957_v4  ;;  %v1287_v11 = vmax.f32 %v1223_v61, 0.0  ;;  %v1319_v12 = vmax.f32 %v1255_v62, 0.0 }
 0x127   : > { %v1290_v9 = vmax.f32 %v1226_v1, 0.0  ;;  %v1322_v10 = vmax.f32 %v1258_v2, 0.0 }
 0x128   : > { %v1288_v13 = vmax.f32 %v1224_v5, 0.0  ;;  %v1320_v14 = vmax.f32 %v1256_v6, 0.0 }
 0x129   : > { %v2002_v15 = vpack.c.bf16 %v1290_v9, %v1289_v7  ;;  %v2082_v16 = vpack.c.bf16 %v1322_v10, %v1321_v8 }
 0x12a   : > { %v1997_v17 = vpack.c.bf16 %v1288_v13, %v1287_v11  ;;  %v2077_v18 = vpack.c.bf16 %v1320_v14, %v1319_v12  ;;  %v2217_v19 = vpop.f32.mrb[24].mxu0  ;;  %v2249_v20 = vpop.f32.mrb[24].mxu1 }
 0x12b   : > { %2114 = vst [vmem:[%s2481_s17 + $0x58] sm:$0xff] %v2002_v15   ;;  %2130 = vst [vmem:[%s2481_s17 + $0xd8] sm:$0xff] %v2082_v16   ;;  %v1229_v21 = vadd.f32 %v2217_v19, %v2466_v40  ;;  %v1261_v22 = vadd.f32 %v2249_v20, %v2466_v40  ;;  %v842_v23 = vpop.f32.mrb[25].mxu0  ;;  %v970_v24 = vpop.f32.mrb[25].mxu1 }
 0x12c   : > { %2113 = vst [vmem:[%s2481_s17 + $0x50] sm:$0xff] %v1997_v17   ;;  %2129 = vst [vmem:[%s2481_s17 + $0xd0] sm:$0xff] %v2077_v18   ;;  %v1227_v25 = vadd.f32 %v2466_v40, %v842_v23  ;;  %v1259_v26 = vadd.f32 %v2466_v40, %v970_v24  ;;  %v2218_v27 = vpop.f32.mrb[26].mxu0  ;;  %v2250_v28 = vpop.f32.mrb[26].mxu1 }
 0x12d   : > { %v1230_v29 = vadd.f32 %v2218_v27, %v2466_v40  ;;  %v1262_v30 = vadd.f32 %v2250_v28, %v2466_v40  ;;  %v845_v31 = vpop.f32.mrb[27].mxu0  ;;  %v973_v32 = vpop.f32.mrb[27].mxu1  ;;  %v1293_v35 = vmax.f32 %v1229_v21, 0.0  ;;  %v1325_v36 = vmax.f32 %v1261_v22, 0.0 }
 0x12e   : > { %v1228_v33 = vadd.f32 %v2466_v40, %v845_v31  ;;  %v1260_v34 = vadd.f32 %v2466_v40, %v973_v32  ;;  %v1291_v39 = vmax.f32 %v1227_v25, 0.0  ;;  %v1323_v41 = vmax.f32 %v1259_v26, 0.0 }
 0x12f   : > { %v1294_v37 = vmax.f32 %v1230_v29, 0.0  ;;  %v1326_v38 = vmax.f32 %v1262_v30, 0.0 }
 0x130   : > { %v1292_v42 = vmax.f32 %v1228_v33, 0.0  ;;  %v1324_v43 = vmax.f32 %v1260_v34, 0.0 }
 0x131   : > { %v2012_v44 = vpack.c.bf16 %v1294_v37, %v1293_v35  ;;  %v2092_v45 = vpack.c.bf16 %v1326_v38, %v1325_v36 }
 0x132   : > { %v2007_v46 = vpack.c.bf16 %v1292_v42, %v1291_v39  ;;  %v2087_v47 = vpack.c.bf16 %v1324_v43, %v1323_v41  ;;  %v2221_v48 = vpop.f32.mrb[28].mxu0  ;;  %v2253_v49 = vpop.f32.mrb[28].mxu1 }
 0x133   : > { %2116 = vst [vmem:[%s2481_s17 + $0x68] sm:$0xff] %v2012_v44   ;;  %2132 = vst [vmem:[%s2481_s17 + $0xe8] sm:$0xff] %v2092_v45   ;;  %v1233_v50 = vadd.f32 %v2221_v48, %v2466_v40  ;;  %v1265_v51 = vadd.f32 %v2253_v49, %v2466_v40  ;;  %v858_v52 = vpop.f32.mrb[29].mxu0  ;;  %v986_v53 = vpop.f32.mrb[29].mxu1 }
 0x134   : > { %2115 = vst [vmem:[%s2481_s17 + $0x60] sm:$0xff] %v2007_v46   ;;  %2131 = vst [vmem:[%s2481_s17 + $0xe0] sm:$0xff] %v2087_v47   ;;  %v1231_v54 = vadd.f32 %v2466_v40, %v858_v52  ;;  %v1263_v55 = vadd.f32 %v2466_v40, %v986_v53  ;;  %v2222_v56 = vpop.f32.mrb[30].mxu0  ;;  %v2254_v57 = vpop.f32.mrb[30].mxu1 }
 0x135   : > { %v1234_v58 = vadd.f32 %v2222_v56, %v2466_v40  ;;  %v1266_v59 = vadd.f32 %v2254_v57, %v2466_v40  ;;  %v861_v60 = vpop.f32.mrb[31].mxu0  ;;  %v989_v61 = vpop.f32.mrb[31].mxu1  ;;  %v1297_v0 = vmax.f32 %v1233_v50, 0.0  ;;  %v1329_v1 = vmax.f32 %v1265_v51, 0.0 }
 0x136   : > { %v1232_v62 = vadd.f32 %v2466_v40, %v861_v60  ;;  %v1264_v63 = vadd.f32 %v2466_v40, %v989_v61  ;;  %v1295_v4 = vmax.f32 %v1231_v54, 0.0  ;;  %v1327_v5 = vmax.f32 %v1263_v55, 0.0 }
 0x137   : > { %v1298_v2 = vmax.f32 %v1234_v58, 0.0  ;;  %v1330_v3 = vmax.f32 %v1266_v59, 0.0 }
 0x138   : > { %v1296_v6 = vmax.f32 %v1232_v62, 0.0  ;;  %v1328_v7 = vmax.f32 %v1264_v63, 0.0 }
 0x139   : > { %v2022_v8 = vpack.c.bf16 %v1298_v2, %v1297_v0  ;;  %v2102_v9 = vpack.c.bf16 %v1330_v3, %v1329_v1 }
 0x13a   : > { %v2017_v10 = vpack.c.bf16 %v1296_v6, %v1295_v4  ;;  %v2097_v11 = vpack.c.bf16 %v1328_v7, %v1327_v5 }
 0x13b   : > { %2118 = vst [vmem:[%s2481_s17 + $0x78] sm:$0xff] %v2022_v8   ;;  %2134 = vst [vmem:[%s2481_s17 + $0xf8] sm:$0xff] %v2102_v9  }
 0x13c   : > { %2117 = vst [vmem:[%s2481_s17 + $0x70] sm:$0xff] %v2017_v10   ;;  %2133 = vst [vmem:[%s2481_s17 + $0xf0] sm:$0xff] %v2097_v11  }
 0x13d PF: > { %s13_s14 = sadd.s32 1, %s2357_s14   ;;  %s2584_s12 = smov %s2353_s13 }
 0x13e   : > { %p10_p5 = scmp.ge.s32.totalorder %s13_s14, 18   ;;  %s2585_s13 = smov %s2587_s15 }
 0x140   :  { %12 = sbr.rel (!%p10_p5) target bundleno = 2 (0x2), region = 76 }

// kernel: nvidia_forward.8
= control target key start
LH: loop header
LB: loop body
LE: loop exit
PB: predicated region body
PF: predicated region fallthrough
CT: control target
= control target key end

     0   :  { %s2921_s12 = smov 0   ;;  %s2923_s13 = smov 0   ;;  %s3329_s0 = inlined_call_operand.vmem [shape: bf16[1792,640], index: 0, kind: input, shape index: {}]   ;;  %s3330_s1 = inlined_call_operand.vmem [shape: bf16[640,128], index: 1, kind: input, shape index: {}]   ;;  %s3331_s2 = inlined_call_operand.vmem [shape: f32[1,128], index: 2, kind: input, shape index: {}]   ;;  %s3332_s3 = inlined_call_operand.vmem [shape: bf16[1792,128], index: 3, kind: output, shape index: {}]  }
   0x1   :  { %s2925_s14 = smov 0  }
   0x2 LB: > { %s32_s15 = sadd.s32 1, %s2895_s13  ;;  %p2101_p0 = scmp.ge.s32.totalorder %s2899_s14, 1  ;;  %s2899_s14 = sphi %s2925_s14, %s13_s14   ;;  %s2895_s13 = sphi %s2923_s13, %s3334_s13   ;;  %s2891_s12 = sphi %s2921_s12, %s3333_s12  }
   0x3   : > { %p34_p1 = scmp.ge.s32.totalorder %s32_s15, 7  ;;  %p191_p2 = scmp.lt.s32.totalorder %s2899_s14, 8 }
   0x5   : > { %s3336_s15 = smov (%p34_p1, %s32_s15), 0  ;;  %p192_p3 = pnand %p2101_p0, %p191_p2 }
   0x6   : > { %v2725_v0 = vld [vmem:[%s3330_s1 + $0x40] sm:$0xff] (!%p192_p3)   ;;  %s2102_s18 = sshll.u32 (!%p192_p3), %s2891_s12, 5  ;;  %v2727_v2 = vld [vmem:[%s3330_s1 + $0x48] sm:$0xff] (!%p192_p3)   ;;  %v2729_v4 = vld [vmem:[%s3330_s1 + $0x50] sm:$0xff] (!%p192_p3)  }
   0x7   : > { %195 = sbr.rel (%p192_p3) target bundleno = 419 (0x1a3), region = 32  ;;  %v2726_v1 = vld [vmem:[%s3330_s1] sm:$0xff] (!%p192_p3)   ;;  %2388 = vmatprep.subr.bf16.mxu0 (!%p192_p3), %v2725_v0  ;;  %2684 = vmatprep.subr.bf16.mxu1 (!%p192_p3), %v2725_v0  ;;  %p236_p4 = scmp.lt.s32.totalorder (!%p192_p3), %s2102_s18, 223  ;;  %v2728_v3 = vld [vmem:[%s3330_s1 + $0x8] sm:$0xff] (!%p192_p3)   ;;  %v2730_v5 = vld [vmem:[%s3330_s1 + $0x10] sm:$0xff] (!%p192_p3)  }
   0x8   : > { %2389 = vmatpush3.bf16.msra.mxu0 (!%p192_p3), %v2726_v1  ;;  %2692 = vmatpush3.bf16.msra.mxu1 (!%p192_p3), %v2726_v1  ;;  %v2731_v6 = vld [vmem:[%s3330_s1 + $0x58] sm:$0xff] (!%p192_p3)   ;;  %v2733_v8 = vld [vmem:[%s3330_s1 + $0x60] sm:$0xff] (!%p192_p3)   ;;  %v2735_v10 = vld [vmem:[%s3330_s1 + $0x68] sm:$0xff] (!%p192_p3)  }
   0x9   : > { %2390 = vmatprep.subr.bf16.mxu0 (!%p192_p3), %v2727_v2  ;;  %2685 = vmatprep.subr.bf16.mxu1 (!%p192_p3), %v2727_v2  ;;  %v2732_v7 = vld [vmem:[%s3330_s1 + $0x18] sm:$0xff] (!%p192_p3)   ;;  %v2734_v9 = vld [vmem:[%s3330_s1 + $0x20] sm:$0xff] (!%p192_p3)   ;;  %v2736_v13 = vld [vmem:[%s3330_s1 + $0x28] sm:$0xff] (!%p192_p3)  }
   0xa   : > { %v2737_v14 = vld [vmem:[%s3330_s1 + $0x70] sm:$0xff] (!%p192_p3)   ;;  %v2739_v16 = vld [vmem:[%s3330_s1 + $0x78] sm:$0xff] (!%p192_p3)   ;;  %v2747_v18 = vld [vmem:[%s3330_s1 + $0xc0] sm:$0xff] (!%p192_p3)  }
   0xb   : > { %v2738_v15 = vld [vmem:[%s3330_s1 + $0x30] sm:$0xff] (!%p192_p3)   ;;  %v2740_v17 = vld [vmem:[%s3330_s1 + $0x38] sm:$0xff] (!%p192_p3)   ;;  %v2750_v19 = vld [vmem:[%s3330_s1 + $0x100] sm:$0xff] (!%p192_p3)  }
   0xc   : > { %2391 = vmatpush3.bf16.msra.mxu0 (!%p192_p3), %v2728_v3  ;;  %2693 = vmatpush3.bf16.msra.mxu1 (!%p192_p3), %v2728_v3  ;;  %v2748_v22 = vld [vmem:[%s3330_s1 + $0x80] sm:$0xff] (!%p192_p3)   ;;  %v2749_v23 = vld [vmem:[%s3330_s1 + $0xc8] sm:$0xff] (!%p192_p3)   ;;  %v2758_v29 = vld [vmem:[%s3330_s1 + $0xd0] sm:$0xff] (!%p192_p3)  }
   0xd   : > { %2392 = vmatprep.subr.bf16.mxu0 (!%p192_p3), %v2729_v4  ;;  %2686 = vmatprep.subr.bf16.mxu1 (!%p192_p3), %v2729_v4  ;;  %v2769_v26 = vld [vmem:[%s3330_s1 + $0x108] sm:$0xff] (!%p192_p3)   ;;  %v2759_v31 = vld [vmem:[%s3330_s1 + $0x90] sm:$0xff] (!%p192_p3)   ;;  %v2760_v33 = vld [vmem:[%s3330_s1 + $0xd8] sm:$0xff] (!%p192_p3)  }
   0xe   : > { %s3338_s18 = smov (!%p236_p4, %s2102_s18), 223  ;;  %v2751_v27 = vld [vmem:[%s3330_s1 + $0x88] sm:$0xff]   ;;  %v2761_v35 = vld [vmem:[%s3330_s1 + $0x98] sm:$0xff]   ;;  %v2768_v36 = vld [vmem:[%s3330_s1 + $0xe0] sm:$0xff]  }
   0xf   : > { %s2700_s4 = smul.u32 20, %s3338_s18  ;;  %v2782_v38 = vld [vmem:[%s3330_s1 + $0x110] sm:$0xff]   ;;  %v2770_v40 = vld [vmem:[%s3330_s1 + $0xa0] sm:$0xff]   ;;  %v2771_v41 = vld [vmem:[%s3330_s1 + $0xe8] sm:$0xff]   ;;  %s2105_s8 = sshll.u32 %s3338_s18, 2 }
  0x10   : > { %2393 = vmatpush3.bf16.msra.mxu0 %v2730_v5  ;;  %2694 = vmatpush3.bf16.msra.mxu1 %v2730_v5  ;;  %v2772_v44 = vld [vmem:[%s3330_s1 + $0xa8] sm:$0xff]   ;;  %v2796_v45 = vld [vmem:[%s3330_s1 + $0x118] sm:$0xff]   ;;  %v2779_v48 = vld [vmem:[%s3330_s1 + $0xf0] sm:$0xff]   ;;  %s3234_s12 = scalar_lea.vmem %s3332_s3, %s2105_s8 }
  0x11   : > { %2394 = vmatprep.subr.bf16.mxu0 %v2731_v6  ;;  %2687 = vmatprep.subr.bf16.mxu1 %v2731_v6  ;;  %s2972_s11 = scalar_lea.vmem %s3329_s0, %s2700_s4  ;;  %v2780_v49 = vld [vmem:[%s3330_s1 + $0xb0] sm:$0xff]   ;;  %v2781_v50 = vld [vmem:[%s3330_s1 + $0xf8] sm:$0xff]   ;;  %v2803_v52 = vld [vmem:[%s3330_s1 + $0x120] sm:$0xff]  }
  0x12   : > { %v2743_v11 = vld [vmem:[%s2972_s11 + $0x4] ss:$20 sps:$4 sm:$0xff]   ;;  %v2741_v20 = vld [vmem:[%s2972_s11] ss:$20 sps:$4 sm:$0xff]   ;;  %v2756_v28 = vld [vmem:[%s2972_s11 + $0x28] ss:$20 sps:$4 sm:$0xff]  }
  0x13   : > { %v2746_v12 = vld [vmem:[%s2972_s11 + $0x1e4] ss:$20 sps:$4 sm:$0xff]   ;;  %1200 = vmatprep.mubr.bf16.mxu0 %v2743_v11  ;;  %v2744_v21 = vld [vmem:[%s2972_s11 + $0x1e0] ss:$20 sps:$4 sm:$0xff]   ;;  %v2757_v30 = vld [vmem:[%s2972_s11 + $0x208] ss:$20 sps:$4 sm:$0xff]  }
  0x14   : > { %2395 = vmatpush3.bf16.msra.mxu0 %v2732_v7  ;;  %2695 = vmatpush3.bf16.msra.mxu1 %v2732_v7  ;;  %v2752_v24 = vld [vmem:[%s2972_s11 + $0x2c] ss:$20 sps:$4 sm:$0xff]   ;;  %v2762_v32 = vld [vmem:[%s2972_s11 + $0x54] ss:$20 sps:$4 sm:$0xff]   ;;  %v2766_v37 = vld [vmem:[%s2972_s11 + $0x50] ss:$20 sps:$4 sm:$0xff]  }
  0x15   : > { %2396 = vmatprep.subr.bf16.mxu0 %v2733_v8  ;;  %2688 = vmatprep.subr.bf16.mxu1 %v2733_v8  ;;  %v2754_v25 = vld [vmem:[%s2972_s11 + $0x20c] ss:$20 sps:$4 sm:$0xff]   ;;  %v2764_v34 = vld [vmem:[%s2972_s11 + $0x234] ss:$20 sps:$4 sm:$0xff]   ;;  %v2767_v39 = vld [vmem:[%s2972_s11 + $0x230] ss:$20 sps:$4 sm:$0xff]  }
  0x16   : > { %1296 = vmatprep.mubr.bf16.mxu1 %v2746_v12  ;;  %v2773_v42 = vld [vmem:[%s2972_s11 + $0x7c] ss:$20 sps:$4 sm:$0xff]   ;;  %v2777_v46 = vld [vmem:[%s2972_s11 + $0x78] ss:$20 sps:$4 sm:$0xff]   ;;  %v2789_v56 = vld [vmem:[%s2972_s11 + $0xa0] ss:$20 sps:$4 sm:$0xff]  }
  0x17   : > { %v2775_v43 = vld [vmem:[%s2972_s11 + $0x25c] ss:$20 sps:$4 sm:$0xff]   ;;  %v2778_v47 = vld [vmem:[%s2972_s11 + $0x258] ss:$20 sps:$4 sm:$0xff]   ;;  %v2792_v59 = vld [vmem:[%s2972_s11 + $0x34] ss:$20 sps:$4 sm:$0xff]  }
  0x18   : > { %2397 = vmatpush3.bf16.msra.mxu0 %v2734_v9  ;;  %2696 = vmatpush3.bf16.msra.mxu1 %v2734_v9  ;;  %v2784_v51 = vld [vmem:[%s2972_s11 + $0xa4] ss:$20 sps:$4 sm:$0xff]   ;;  %v2788_v53 = vld [vmem:[%s2972_s11 + $0xc] ss:$20 sps:$4 sm:$0xff]   ;;  %v2786_v55 = vld [vmem:[%s2972_s11 + $0x8] ss:$20 sps:$4 sm:$0xff]  }
  0x19   : > { %2398 = vmatprep.subr.bf16.mxu0 %v2735_v10  ;;  %2689 = vmatprep.subr.bf16.mxu1 %v2735_v10  ;;  %v2783_v54 = vld [vmem:[%s3330_s1 + $0xb8] sm:$0xff]   ;;  %v2816_v57 = vld [vmem:[%s3330_s1 + $0x128] sm:$0xff]   ;;  %v2823_v60 = vld [vmem:[%s3330_s1 + $0x130] sm:$0xff]  }
  0x1a   : > { %v2790_v58 = vld [vmem:[%s2972_s11 + $0xcc] ss:$20 sps:$4 sm:$0xff]   ;;  %v2794_v61 = vld [vmem:[%s2972_s11 + $0xc8] ss:$20 sps:$4 sm:$0xff]   ;;  %v2795_v62 = vld [vmem:[%s2972_s11 + $0x30] ss:$20 sps:$4 sm:$0xff]  }
  0x1b   : > { %v2797_v63 = vld [vmem:[%s2972_s11 + $0xf4] ss:$20 sps:$4 sm:$0xff]   ;;  %v2799_v0 = vld [vmem:[%s2972_s11 + $0x5c] ss:$20 sps:$4 sm:$0xff]   ;;  %v2802_v3 = vld [vmem:[%s2972_s11 + $0x58] ss:$20 sps:$4 sm:$0xff]  }
  0x1c   : > { %2399 = vmatpush3.bf16.msra.mxu0 %v2736_v13  ;;  %2697 = vmatpush3.bf16.msra.mxu1 %v2736_v13  ;;  %v2836_v1 = vld [vmem:[%s3330_s1 + $0x138] sm:$0xff]   ;;  %v2801_v2 = vld [vmem:[%s2972_s11 + $0xf0] ss:$20 sps:$4 sm:$0xff]   ;;  %v2809_v7 = vld [vmem:[%s2972_s11 + $0x80] ss:$20 sps:$4 sm:$0xff]  }
  0x1d   : > { %2400 = vmatprep.subr.bf16.mxu0 %v2737_v14  ;;  %2690 = vmatprep.subr.bf16.mxu1 %v2737_v14  ;;  %v2804_v4 = vld [vmem:[%s2972_s11 + $0x11c] ss:$20 sps:$4 sm:$0xff]   ;;  %v2806_v5 = vld [vmem:[%s2972_s11 + $0x84] ss:$20 sps:$4 sm:$0xff]   ;;  %v2812_v9 = vld [vmem:[%s2972_s11 + $0xac] ss:$20 sps:$4 sm:$0xff]  }
  0x1e   : > { %v2808_v6 = vld [vmem:[%s2972_s11 + $0x118] ss:$20 sps:$4 sm:$0xff]   ;;  %v2814_v10 = vld [vmem:[%s2972_s11 + $0x140] ss:$20 sps:$4 sm:$0xff]   ;;  %v2815_v11 = vld [vmem:[%s2972_s11 + $0xa8] ss:$20 sps:$4 sm:$0xff]  }
  0x1f   : > { %v2810_v8 = vld [vmem:[%s2972_s11 + $0x144] ss:$20 sps:$4 sm:$0xff]   ;;  %v2817_v12 = vld [vmem:[%s2972_s11 + $0x16c] ss:$20 sps:$4 sm:$0xff]   ;;  %v2819_v13 = vld [vmem:[%s2972_s11 + $0xd4] ss:$20 sps:$4 sm:$0xff]  }
  0x20   : > { %2401 = vmatpush3.bf16.msra.mxu0 %v2738_v15  ;;  %2698 = vmatpush3.bf16.msra.mxu1 %v2738_v15  ;;  %v2821_v14 = vld [vmem:[%s2972_s11 + $0x168] ss:$20 sps:$4 sm:$0xff]   ;;  %v2822_v15 = vld [vmem:[%s2972_s11 + $0xd0] ss:$20 sps:$4 sm:$0xff]  }
  0x21   : > { %2402 = vmatprep.subr.bf16.mxu0 %v2739_v16  ;;  %2691 = vmatprep.subr.bf16.mxu1 %v2739_v16  ;;  %v2824_v16 = vld [vmem:[%s2972_s11 + $0x194] ss:$20 sps:$4 sm:$0xff]  }
  0x24   : > { %2403 = vmatpush3.bf16.msra.mxu0 %v2740_v17  ;;  %2699 = vmatpush3.bf16.msra.mxu1 %v2740_v17  ;;  %v2826_v17 = vld [vmem:[%s2972_s11 + $0xfc] ss:$20 sps:$4 sm:$0xff]  }
  0x25   : > { %2500 = vmatprep.subr.bf16.mxu1 %v2747_v18  ;;  %2636 = vmatprep.subr.bf16.mxu0 %v2750_v19  ;;  %v2828_v18 = vld [vmem:[%s2972_s11 + $0x190] ss:$20 sps:$4 sm:$0xff]  }
  0x27   : > { %1201 = vmatmul.mubr.bf16.vlgmr.msra.gmra.mrb[0].mxu0 %v2741_v20  ;;  %1297 = vmatmul.mubr.bf16.vlgmr.msra.gmra.mrb[0].mxu1 %v2744_v21  ;;  %v2830_v20 = vld [vmem:[%s2972_s11 + $0x1bc] ss:$20 sps:$4 sm:$0xff]   ;;  %v2832_v21 = vld [vmem:[%s2972_s11 + $0x124] ss:$20 sps:$4 sm:$0xff]  }
  0x28   : > { %2501 = vmatpush3.bf16.msra.mxu1 %v2748_v22  ;;  %2637 = vmatpush3.bf16.msra.mxu0 %v2750_v19  ;;  %v2829_v19 = vld [vmem:[%s2972_s11 + $0xf8] ss:$20 sps:$4 sm:$0xff]  }
  0x29   : > { %2502 = vmatprep.subr.bf16.mxu1 %v2749_v23  ;;  %1208 = vmatprep.mubr.bf16.mxu0 %v2752_v24  ;;  %v2834_v22 = vld [vmem:[%s2972_s11 + $0x1b8] ss:$20 sps:$4 sm:$0xff]   ;;  %v2835_v23 = vld [vmem:[%s2972_s11 + $0x120] ss:$20 sps:$4 sm:$0xff]  }
  0x2a   : > { %1304 = vmatprep.mubr.bf16.mxu1 %v2754_v25  ;;  %2638 = vmatprep.subr.bf16.mxu0 %v2769_v26  ;;  %v2837_v24 = vld [vmem:[%s2972_s11 + $0x14c] ss:$20 sps:$4 sm:$0xff]   ;;  %v2839_v25 = vld [vmem:[%s2972_s11 + $0x10] ss:$20 sps:$4 sm:$0xff]  }
  0x2c   : > { %2503 = vmatpush3.bf16.msra.mxu1 %v2751_v27  ;;  %2639 = vmatpush3.bf16.msra.mxu0 %v2769_v26  ;;  %v2840_v26 = vld [vmem:[%s2972_s11 + $0x148] ss:$20 sps:$4 sm:$0xff]   ;;  %v2841_v27 = vld [vmem:[%s2972_s11 + $0x38] ss:$20 sps:$4 sm:$0xff]  }
  0x2d   : > { %2504 = vmatprep.subr.bf16.mxu1 %v2758_v29  ;;  %2640 = vmatprep.subr.bf16.mxu0 %v2782_v38  ;;  %v2844_v29 = vld [vmem:[%s2972_s11 + $0x60] ss:$20 sps:$4 sm:$0xff]  }
  0x2f   : > { %1209 = vmatmul.mubr.bf16.gmra.mrb[4].mxu0 %v2756_v28  ;;  %1305 = vmatmul.mubr.bf16.gmra.mrb[4].mxu1 %v2757_v30  ;;  %v2842_v28 = vld [vmem:[%s2972_s11 + $0x174] ss:$20 sps:$4 sm:$0xff]   ;;  %v2845_v30 = vld [vmem:[%s2972_s11 + $0x170] ss:$20 sps:$4 sm:$0xff]  }
  0x30   : > { %2505 = vmatpush3.bf16.msra.mxu1 %v2759_v31  ;;  %1216 = vmatprep.mubr.bf16.mxu0 %v2762_v32  ;;  %v2846_v31 = vld [vmem:[%s2972_s11 + $0x88] ss:$20 sps:$4 sm:$0xff]  }
  0x31   : > { %2506 = vmatprep.subr.bf16.mxu1 %v2760_v33  ;;  %1312 = vmatprep.mubr.bf16.mxu1 %v2764_v34  ;;  %v2847_v32 = vld [vmem:[%s2972_s11 + $0x19c] ss:$20 sps:$4 sm:$0xff]   ;;  %v2850_v34 = vld [vmem:[%s2972_s11 + $0x198] ss:$20 sps:$4 sm:$0xff]  }
  0x32   : > { %2641 = vmatpush3.bf16.msra.mxu0 %v2782_v38  ;;  %v2849_v33 = vld [vmem:[%s2972_s11 + $0xb0] ss:$20 sps:$4 sm:$0xff]   ;;  %v2855_v38 = vld [vmem:[%s2972_s11 + $0x1c0] ss:$20 sps:$4 sm:$0xff]  }
  0x33   : > { %2642 = vmatprep.subr.bf16.mxu0 %v2796_v45 }
  0x34   : > { %2507 = vmatpush3.bf16.msra.mxu1 %v2761_v35  ;;  %v2851_v35 = vld [vmem:[%s2972_s11 + $0xd8] ss:$20 sps:$4 sm:$0xff]  }
  0x35   : > { %2508 = vmatprep.subr.bf16.mxu1 %v2768_v36  ;;  %v2852_v36 = vld [vmem:[%s2972_s11 + $0x1c4] ss:$20 sps:$4 sm:$0xff]  }
  0x36   : > { %2643 = vmatpush3.bf16.msra.mxu0 %v2796_v45  ;;  %v2864_v45 = vld [vmem:[%s2972_s11 + $0x1a0] ss:$20 sps:$4 sm:$0xff]  }
  0x37   : > { %1217 = vmatmul.mubr.bf16.gmra.mrb[8].mxu0 %v2766_v37  ;;  %1313 = vmatmul.mubr.bf16.gmra.mrb[8].mxu1 %v2767_v39  ;;  %v2854_v37 = vld [vmem:[%s2972_s11 + $0x100] ss:$20 sps:$4 sm:$0xff]   ;;  %v2856_v39 = vld [vmem:[%s2972_s11 + $0x128] ss:$20 sps:$4 sm:$0xff]  }
  0x38   : > { %2509 = vmatpush3.bf16.msra.mxu1 %v2770_v40  ;;  %1224 = vmatprep.mubr.bf16.mxu0 %v2773_v42  ;;  %v2857_v40 = vld [vmem:[%s2972_s11 + $0x1ec] ss:$20 sps:$4 sm:$0xff]   ;;  %v2860_v42 = vld [vmem:[%s2972_s11 + $0x1e8] ss:$20 sps:$4 sm:$0xff]  }
  0x39   : > { %2510 = vmatprep.subr.bf16.mxu1 %v2771_v41  ;;  %1320 = vmatprep.mubr.bf16.mxu1 %v2775_v43  ;;  %v2859_v41 = vld [vmem:[%s2972_s11 + $0x150] ss:$20 sps:$4 sm:$0xff]   ;;  %v2861_v43 = vld [vmem:[%s2972_s11 + $0x178] ss:$20 sps:$4 sm:$0xff]  }
  0x3a   : > { %2644 = vmatprep.subr.bf16.mxu0 %v2803_v52 }
  0x3b   : > { %2645 = vmatpush3.bf16.msra.mxu0 %v2803_v52  ;;  %v2872_v52 = vld [vmem:[%s2972_s11 + $0x264] ss:$20 sps:$4 sm:$0xff]  }
  0x3c   : > { %2511 = vmatpush3.bf16.msra.mxu1 %v2772_v44  ;;  %2646 = vmatprep.subr.bf16.mxu0 %v2816_v57  ;;  %v2862_v44 = vld [vmem:[%s2972_s11 + $0x214] ss:$20 sps:$4 sm:$0xff]  }
  0x3d   : > { %2512 = vmatprep.subr.bf16.mxu1 %v2779_v48  ;;  %v2867_v48 = vld [vmem:[%s2972_s11 + $0x23c] ss:$20 sps:$4 sm:$0xff]  }
  0x3f   : > { %1225 = vmatmul.mubr.bf16.gmra.mrb[12].mxu0 %v2777_v46  ;;  %1321 = vmatmul.mubr.bf16.gmra.mrb[12].mxu1 %v2778_v47  ;;  %v2865_v46 = vld [vmem:[%s2972_s11 + $0x210] ss:$20 sps:$4 sm:$0xff]   ;;  %v2866_v47 = vld [vmem:[%s2972_s11 + $0x1c8] ss:$20 sps:$4 sm:$0xff]  }
  0x40   : > { %2513 = vmatpush3.bf16.msra.mxu1 %v2780_v49  ;;  %1232 = vmatprep.mubr.bf16.mxu0 %v2784_v51  ;;  %v2869_v49 = vld [vmem:[%s2972_s11 + $0x1f0] ss:$20 sps:$4 sm:$0xff]   ;;  %v2871_v51 = vld [vmem:[%s2972_s11 + $0x218] ss:$20 sps:$4 sm:$0xff]  }
  0x41   : > { %2514 = vmatprep.subr.bf16.mxu1 %v2781_v50  ;;  %1361 = vmatprep.mubr.bf16.mxu1 %v2788_v53  ;;  %v2870_v50 = vld [vmem:[%s2972_s11 + $0x238] ss:$20 sps:$4 sm:$0xff]   ;;  %v2874_v53 = vld [vmem:[%s2972_s11 + $0x240] ss:$20 sps:$4 sm:$0xff]  }
  0x42   : > { %2647 = vmatpush3.bf16.msra.mxu0 %v2816_v57 }
  0x43   : > { %2648 = vmatprep.subr.bf16.mxu0 %v2823_v60 }
  0x44   : > { %2515 = vmatpush3.bf16.msra.mxu1 %v2783_v54  ;;  %v2875_v54 = vld [vmem:[%s2972_s11 + $0x260] ss:$20 sps:$4 sm:$0xff]  }
  0x46   : > { %2649 = vmatpush3.bf16.msra.mxu0 %v2823_v60 }
  0x47   : > { %1233 = vmatmul.mubr.bf16.gmra.mrb[16].mxu0 %v2789_v56  ;;  %1362 = vmatmul.mubr.bf16.vlgmr.msra.gmra.mrb[16].mxu1 %v2786_v55  ;;  %v2876_v55 = vld [vmem:[%s2972_s11 + $0x268] ss:$20 sps:$4 sm:$0xff]  }
  0x48   : > { %1240 = vmatprep.mubr.bf16.mxu0 %v2790_v58  ;;  %1369 = vmatprep.mubr.bf16.mxu1 %v2792_v59 }
  0x49   : > { %2650 = vmatprep.subr.bf16.mxu0 %v2836_v1 }
  0x4a   : > { %2651 = vmatpush3.bf16.msra.mxu0 %v2836_v1 }
  0x4f   : > { %1241 = vmatmul.mubr.bf16.gmra.mrb[20].mxu0 %v2794_v61  ;;  %1370 = vmatmul.mubr.bf16.gmra.mrb[20].mxu1 %v2795_v62 }
  0x50   : > { %1248 = vmatprep.mubr.bf16.mxu0 %v2797_v63  ;;  %1377 = vmatprep.mubr.bf16.mxu1 %v2799_v0 }
  0x57   : > { %1249 = vmatmul.mubr.bf16.gmra.mrb[24].mxu0 %v2801_v2  ;;  %1378 = vmatmul.mubr.bf16.gmra.mrb[24].mxu1 %v2802_v3 }
  0x58   : > { %1256 = vmatprep.mubr.bf16.mxu0 %v2804_v4  ;;  %1385 = vmatprep.mubr.bf16.mxu1 %v2806_v5 }
  0x5f   : > { %1257 = vmatmul.mubr.bf16.gmra.mrb[28].mxu0 %v2808_v6  ;;  %1386 = vmatmul.mubr.bf16.gmra.mrb[28].mxu1 %v2809_v7 }
  0x60   : > { %1264 = vmatprep.mubr.bf16.mxu0 %v2810_v8  ;;  %1393 = vmatprep.mubr.bf16.mxu1 %v2812_v9 }
  0x67   : > { %1265 = vmatmul.mubr.bf16.gmra.mrb[32].mxu0 %v2814_v10  ;;  %1394 = vmatmul.mubr.bf16.gmra.mrb[32].mxu1 %v2815_v11 }
  0x68   : > { %1272 = vmatprep.mubr.bf16.mxu0 %v2817_v12  ;;  %1401 = vmatprep.mubr.bf16.mxu1 %v2819_v13 }
  0x6f   : > { %1273 = vmatmul.mubr.bf16.gmra.mrb[36].mxu0 %v2821_v14  ;;  %1402 = vmatmul.mubr.bf16.gmra.mrb[36].mxu1 %v2822_v15 }
  0x70   : > { %1280 = vmatprep.mubr.bf16.mxu0 %v2824_v16  ;;  %1409 = vmatprep.mubr.bf16.mxu1 %v2826_v17 }
  0x77   : > { %1281 = vmatmul.mubr.bf16.gmra.mrb[40].mxu0 %v2828_v18  ;;  %1410 = vmatmul.mubr.bf16.gmra.mrb[40].mxu1 %v2829_v19 }
  0x78   : > { %1288 = vmatprep.mubr.bf16.mxu0 %v2830_v20  ;;  %1417 = vmatprep.mubr.bf16.mxu1 %v2832_v21 }
  0x7f   : > { %1289 = vmatmul.mubr.bf16.gmra.mrb[44].mxu0 %v2834_v22  ;;  %1418 = vmatmul.mubr.bf16.gmra.mrb[44].mxu1 %v2835_v23 }
  0x80   : > { %1425 = vmatprep.mubr.bf16.mxu1 %v2837_v24  ;;  %2652 = vmatprep.mubr.bf16.mxu0 %v2839_v25 }
  0x87   : > { %1426 = vmatmul.mubr.bf16.gmra.mrb[48].mxu1 %v2840_v26  ;;  %2653 = vmatmul.mubr.bf16.vlgmr.msra.gmra.mrb[48].mxu0 %v2841_v27 }
  0x88   : > { %1433 = vmatprep.mubr.bf16.mxu1 %v2842_v28  ;;  %2656 = vmatprep.mubr.bf16.mxu0 %v2844_v29 }
  0x8f   : > { %1434 = vmatmul.mubr.bf16.gmra.mrb[52].mxu1 %v2845_v30  ;;  %2657 = vmatmul.mubr.bf16.gmra.mrb[52].mxu0 %v2846_v31 }
  0x90   : > { %1441 = vmatprep.mubr.bf16.mxu1 %v2847_v32  ;;  %2660 = vmatprep.mubr.bf16.mxu0 %v2849_v33 }
  0x97   : > { %1442 = vmatmul.mubr.bf16.gmra.mrb[56].mxu1 %v2850_v34  ;;  %2661 = vmatmul.mubr.bf16.gmra.mrb[56].mxu0 %v2851_v35 }
  0x98   : > { %1449 = vmatprep.mubr.bf16.mxu1 %v2852_v36  ;;  %2664 = vmatprep.mubr.bf16.mxu0 %v2854_v37 }
  0x9f   : > { %1450 = vmatmul.mubr.bf16.gmra.mrb[60].mxu1 %v2855_v38  ;;  %2665 = vmatmul.mubr.bf16.gmra.mrb[60].mxu0 %v2856_v39 }
  0xa0   : > { %1457 = vmatprep.mubr.bf16.mxu1 %v2857_v40  ;;  %2668 = vmatprep.mubr.bf16.mxu0 %v2859_v41 }
  0xa7   : > { %1458 = vmatmul.mubr.bf16.gmra.mrb[64].mxu1 %v2860_v42  ;;  %2669 = vmatmul.mubr.bf16.gmra.mrb[64].mxu0 %v2861_v43 }
  0xa8   : > { %1465 = vmatprep.mubr.bf16.mxu1 %v2862_v44  ;;  %2672 = vmatprep.mubr.bf16.mxu0 %v2864_v45 }
  0xaf   : > { %1466 = vmatmul.mubr.bf16.gmra.mrb[68].mxu1 %v2865_v46  ;;  %2673 = vmatmul.mubr.bf16.gmra.mrb[68].mxu0 %v2866_v47 }
  0xb0   : > { %1473 = vmatprep.mubr.bf16.mxu1 %v2867_v48  ;;  %2676 = vmatprep.mubr.bf16.mxu0 %v2869_v49 }
  0xb7   : > { %1474 = vmatmul.mubr.bf16.gmra.mrb[72].mxu1 %v2870_v50  ;;  %2677 = vmatmul.mubr.bf16.gmra.mrb[72].mxu0 %v2871_v51 }
  0xb8   : > { %1481 = vmatprep.mubr.bf16.mxu1 %v2872_v52  ;;  %2680 = vmatprep.mubr.bf16.mxu0 %v2874_v53 }
  0xbf   : > { %1482 = vmatmul.mubr.bf16.gmra.mrb[76].mxu1 %v2875_v54  ;;  %2681 = vmatmul.mubr.bf16.gmra.mrb[76].mxu0 %v2876_v55 }
  0xfa   : > { %v2476_v56 = vpop.f32.mrb[0].mxu1  ;;  %v2404_v57 = vpop.f32.mrb[0].mxu0 }
  0xfb   : > { %v2477_v58 = vpop.f32.mrb[1].mxu1  ;;  %v2405_v59 = vpop.f32.mrb[1].mxu0 }
  0xfc   : > { %v3147_v60 = vadd.f32 %v2477_v58, %v2476_v56  ;;  %v2479_v61 = vpop.f32.mrb[2].mxu1  ;;  %v2406_v62 = vadd.f32 %v2405_v59, %v2404_v57  ;;  %v2407_v63 = vpop.f32.mrb[2].mxu0 }
  0xfd   : > { %v2480_v0 = vpop.f32.mrb[3].mxu1  ;;  %v2408_v1 = vpop.f32.mrb[3].mxu0 }
  0xfe   : > { %v3149_v2 = vadd.f32 %v2480_v0, %v2479_v61  ;;  %v2409_v3 = vadd.f32 %v2408_v1, %v2407_v63 }
 0x102   : > { %v2482_v4 = vpop.f32.mrb[4].mxu1  ;;  %v2410_v5 = vpop.f32.mrb[4].mxu0 }
 0x103   : > { %v2483_v6 = vpop.f32.mrb[5].mxu1  ;;  %v2411_v7 = vpop.f32.mrb[5].mxu0 }
 0x104   : > { %v3151_v8 = vadd.f32 %v2483_v6, %v2482_v4  ;;  %v2485_v9 = vpop.f32.mrb[6].mxu1  ;;  %v2412_v10 = vadd.f32 %v2411_v7, %v2410_v5  ;;  %v2413_v11 = vpop.f32.mrb[6].mxu0 }
 0x105   : > { %v2486_v12 = vpop.f32.mrb[7].mxu1  ;;  %v2414_v13 = vpop.f32.mrb[7].mxu0 }
 0x106   : > { %v3153_v14 = vadd.f32 %v2486_v12, %v2485_v9  ;;  %v2415_v15 = vadd.f32 %v2414_v13, %v2413_v11 }
 0x10a   : > { %v2488_v16 = vpop.f32.mrb[8].mxu1  ;;  %v2416_v17 = vpop.f32.mrb[8].mxu0 }
 0x10b   : > { %v2489_v18 = vpop.f32.mrb[9].mxu1  ;;  %v2417_v19 = vpop.f32.mrb[9].mxu0 }
 0x10c   : > { %v3155_v20 = vadd.f32 %v2489_v18, %v2488_v16  ;;  %v2491_v21 = vpop.f32.mrb[10].mxu1  ;;  %v2418_v22 = vadd.f32 %v2417_v19, %v2416_v17  ;;  %v2419_v23 = vpop.f32.mrb[10].mxu0 }
 0x10d   : > { %v2492_v24 = vpop.f32.mrb[11].mxu1  ;;  %v2420_v25 = vpop.f32.mrb[11].mxu0 }
 0x10e   : > { %v3157_v26 = vadd.f32 %v2492_v24, %v2491_v21  ;;  %v2421_v27 = vadd.f32 %v2420_v25, %v2419_v23 }
 0x112   : > { %v2494_v28 = vpop.f32.mrb[12].mxu1  ;;  %v2422_v29 = vpop.f32.mrb[12].mxu0 }
 0x113   : > { %v2495_v30 = vpop.f32.mrb[13].mxu1  ;;  %v2423_v31 = vpop.f32.mrb[13].mxu0 }
 0x114   : > { %v3159_v32 = vadd.f32 %v2495_v30, %v2494_v28  ;;  %v2497_v33 = vpop.f32.mrb[14].mxu1  ;;  %v2424_v34 = vadd.f32 %v2423_v31, %v2422_v29  ;;  %v2425_v35 = vpop.f32.mrb[14].mxu0 }
 0x115   : > { %v2498_v36 = vpop.f32.mrb[15].mxu1  ;;  %v2426_v37 = vpop.f32.mrb[15].mxu0 }
 0x116   : > { %v3161_v38 = vadd.f32 %v2498_v36, %v2497_v33  ;;  %v2427_v39 = vadd.f32 %v2426_v37, %v2425_v35 }
 0x11a   : > { %v2516_v40 = vpop.f32.mrb[16].mxu1  ;;  %v2428_v41 = vpop.f32.mrb[16].mxu0 }
 0x11b   : > { %v2517_v42 = vpop.f32.mrb[17].mxu1  ;;  %v2429_v43 = vpop.f32.mrb[17].mxu0 }
 0x11c   : > { %v2518_v44 = vadd.f32 %v2517_v42, %v2516_v40  ;;  %v2519_v45 = vpop.f32.mrb[18].mxu1  ;;  %v2430_v46 = vadd.f32 %v2429_v43, %v2428_v41  ;;  %v2431_v47 = vpop.f32.mrb[18].mxu0 }
 0x11d   : > { %v2520_v48 = vpop.f32.mrb[19].mxu1  ;;  %v2432_v49 = vpop.f32.mrb[19].mxu0 }
 0x11e   : > { %v2521_v50 = vadd.f32 %v2520_v48, %v2519_v45  ;;  %v2433_v51 = vadd.f32 %v2432_v49, %v2431_v47  ;;  %v3163_v52 = vadd.f32 %v2518_v44, %v2406_v62 }
 0x120   : > { %v3165_v53 = vadd.f32 %v2521_v50, %v2409_v3 }
 0x122   : > { %v2522_v54 = vpop.f32.mrb[20].mxu1  ;;  %v2434_v55 = vpop.f32.mrb[20].mxu0 }
 0x123   : > { %v2523_v56 = vpop.f32.mrb[21].mxu1  ;;  %v2435_v57 = vpop.f32.mrb[21].mxu0 }
 0x124   : > { %v2524_v58 = vadd.f32 %v2523_v56, %v2522_v54  ;;  %v2525_v59 = vpop.f32.mrb[22].mxu1  ;;  %v2436_v61 = vadd.f32 %v2435_v57, %v2434_v55  ;;  %v2437_v63 = vpop.f32.mrb[22].mxu0 }
 0x125   : > { %v2526_v0 = vpop.f32.mrb[23].mxu1  ;;  %v2438_v1 = vpop.f32.mrb[23].mxu0 }
 0x126   : > { %v2527_v4 = vadd.f32 %v2526_v0, %v2525_v59  ;;  %v2439_v5 = vadd.f32 %v2438_v1, %v2437_v63  ;;  %v3167_v6 = vadd.f32 %v2524_v58, %v2412_v10 }
 0x128   : > { %v3169_v7 = vadd.f32 %v2527_v4, %v2415_v15 }
 0x12a   : > { %v2528_v62 = vpop.f32.mrb[24].mxu1  ;;  %v2440_v9 = vpop.f32.mrb[24].mxu0 }
 0x12b   : > { %v2529_v3 = vpop.f32.mrb[25].mxu1  ;;  %v2441_v11 = vpop.f32.mrb[25].mxu0 }
 0x12c   : > { %v2530_v12 = vadd.f32 %v2529_v3, %v2528_v62  ;;  %v2531_v13 = vpop.f32.mrb[26].mxu1  ;;  %v2442_v16 = vadd.f32 %v2441_v11, %v2440_v9  ;;  %v2443_v17 = vpop.f32.mrb[26].mxu0 }
 0x12d   : > { %v2532_v18 = vpop.f32.mrb[27].mxu1  ;;  %v2444_v19 = vpop.f32.mrb[27].mxu0 }
 0x12e   : > { %v2533_v21 = vadd.f32 %v2532_v18, %v2531_v13  ;;  %v2445_v23 = vadd.f32 %v2444_v19, %v2443_v17  ;;  %v3171_v24 = vadd.f32 %v2530_v12, %v2418_v22 }
 0x130   : > { %v3173_v25 = vadd.f32 %v2533_v21, %v2421_v27 }
 0x132   : > { %v2534_v10 = vpop.f32.mrb[28].mxu1  ;;  %v2446_v28 = vpop.f32.mrb[28].mxu0 }
 0x133   : > { %v2535_v15 = vpop.f32.mrb[29].mxu1  ;;  %v2447_v29 = vpop.f32.mrb[29].mxu0 }
 0x134   : > { %v2536_v30 = vadd.f32 %v2535_v15, %v2534_v10  ;;  %v2537_v31 = vpop.f32.mrb[30].mxu1  ;;  %v2448_v33 = vadd.f32 %v2447_v29, %v2446_v28  ;;  %v2449_v35 = vpop.f32.mrb[30].mxu0 }
 0x135   : > { %v2538_v36 = vpop.f32.mrb[31].mxu1  ;;  %v2450_v37 = vpop.f32.mrb[31].mxu0 }
 0x136   : > { %v2539_v40 = vadd.f32 %v2538_v36, %v2537_v31  ;;  %v2451_v41 = vadd.f32 %v2450_v37, %v2449_v35  ;;  %v3175_v42 = vadd.f32 %v2536_v30, %v2424_v34 }
 0x138   : > { %v3177_v43 = vadd.f32 %v2539_v40, %v2427_v39 }
 0x13a   : > { %v2540_v22 = vpop.f32.mrb[32].mxu1  ;;  %v2452_v44 = vpop.f32.mrb[32].mxu0 }
 0x13b   : > { %v2541_v27 = vpop.f32.mrb[33].mxu1  ;;  %v2453_v45 = vpop.f32.mrb[33].mxu0 }
 0x13c   : > { %v2542_v47 = vadd.f32 %v2541_v27, %v2540_v22  ;;  %v2543_v48 = vpop.f32.mrb[34].mxu1  ;;  %v3179_v49 = vadd.f32 %v2453_v45, %v2452_v44  ;;  %v2455_v50 = vpop.f32.mrb[34].mxu0 }
 0x13d   : > { %v2544_v54 = vpop.f32.mrb[35].mxu1  ;;  %v2456_v55 = vpop.f32.mrb[35].mxu0 }
 0x13e   : > { %v2545_v56 = vadd.f32 %v2544_v54, %v2543_v48  ;;  %v3181_v57 = vadd.f32 %v2456_v55, %v2455_v50  ;;  %v3183_v58 = vadd.f32 %v2542_v47, %v2430_v46 }
 0x140   : > { %v3185_v34 = vadd.f32 %v2545_v56, %v2433_v51 }
 0x142   : > { %v2546_v39 = vpop.f32.mrb[36].mxu1  ;;  %v2458_v59 = vpop.f32.mrb[36].mxu0 }
 0x143   : > { %v2547_v63 = vpop.f32.mrb[37].mxu1  ;;  %v2459_v0 = vpop.f32.mrb[37].mxu0 }
 0x144   : > { %v2548_v1 = vadd.f32 %v2547_v63, %v2546_v39  ;;  %v2549_v4 = vpop.f32.mrb[38].mxu1  ;;  %v3187_v62 = vadd.f32 %v2459_v0, %v2458_v59  ;;  %v2461_v9 = vpop.f32.mrb[38].mxu0  ;;  %v3214_v63 = vld [vmem:[%s3331_s2] ss:$0 sm:$0xff] }
 0x145   : > { %v2550_v3 = vpop.f32.mrb[39].mxu1  ;;  %v2462_v11 = vpop.f32.mrb[39].mxu0 }
 0x146   : > { %v2551_v12 = vadd.f32 %v2550_v3, %v2549_v4  ;;  %v3189_v13 = vadd.f32 %v2462_v11, %v2461_v9  ;;  %v3191_v17 = vadd.f32 %v2548_v1, %v2436_v61 }
 0x148   : > { %v3193_v46 = vadd.f32 %v2551_v12, %v2439_v5 }
 0x14a   : > { %v2552_v51 = vpop.f32.mrb[40].mxu1  ;;  %v2464_v18 = vpop.f32.mrb[40].mxu0 }
 0x14b   : > { %v2553_v19 = vpop.f32.mrb[41].mxu1  ;;  %v2465_v21 = vpop.f32.mrb[41].mxu0 }
 0x14c   : > { %v2554_v10 = vadd.f32 %v2553_v19, %v2552_v51  ;;  %v2555_v28 = vpop.f32.mrb[42].mxu1  ;;  %v3195_v15 = vadd.f32 %v2465_v21, %v2464_v18  ;;  %v2467_v29 = vpop.f32.mrb[42].mxu0 }
 0x14d   : > { %v2556_v30 = vpop.f32.mrb[43].mxu1  ;;  %v2468_v31 = vpop.f32.mrb[43].mxu0 }
 0x14e   : > { %v2557_v35 = vadd.f32 %v2556_v30, %v2555_v28  ;;  %v3197_v36 = vadd.f32 %v2468_v31, %v2467_v29  ;;  %v3199_v37 = vadd.f32 %v2554_v10, %v2442_v16 }
 0x150   : > { %v3201_v61 = vadd.f32 %v2557_v35, %v2445_v23 }
 0x152   : > { %v2558_v5 = vpop.f32.mrb[44].mxu1  ;;  %v2470_v40 = vpop.f32.mrb[44].mxu0 }
 0x153   : > { %v2559_v22 = vpop.f32.mrb[45].mxu1  ;;  %v2471_v44 = vpop.f32.mrb[45].mxu0 }
 0x154   : > { %v2560_v27 = vadd.f32 %v2559_v22, %v2558_v5  ;;  %v2561_v45 = vpop.f32.mrb[46].mxu1  ;;  %v3203_v47 = vadd.f32 %v2471_v44, %v2470_v40  ;;  %v2473_v48 = vpop.f32.mrb[46].mxu0 }
 0x155   : > { %v2562_v50 = vpop.f32.mrb[47].mxu1  ;;  %v2474_v54 = vpop.f32.mrb[47].mxu0 }
 0x156   : > { %v2563_v55 = vadd.f32 %v2562_v50, %v2561_v45  ;;  %v3205_v56 = vadd.f32 %v2474_v54, %v2473_v48  ;;  %v3207_v39 = vadd.f32 %v2560_v27, %v2448_v33 }
 0x158   : > { %v3209_v16 = vadd.f32 %v2563_v55, %v2451_v41 }
 0x15a   : > { %v2564_v23 = vpop.f32.mrb[48].mxu1  ;;  %v2654_v59 = vpop.f32.mrb[48].mxu0 }
 0x15b   : > { %v1533_v0 = vadd.f32 %v2654_v59, %v3167_v6  ;;  %v2565_v1 = vpop.f32.mrb[49].mxu1  ;;  %v1524_v4 = vpop.f32.mrb[49].mxu0 }
 0x15c   : > { %v2566_v9 = vadd.f32 %v2565_v1, %v2564_v23  ;;  %v1525_v3 = vadd.f32 %v1524_v4, %v3163_v52  ;;  %v2567_v11 = vpop.f32.mrb[50].mxu1  ;;  %v2655_v33 = vpop.f32.mrb[50].mxu0 }
 0x15d   : > { %v1759_v41 = vadd.f32 %v3214_v63, %v1533_v0  ;;  %v1536_v12 = vadd.f32 %v2655_v33, %v3169_v7  ;;  %v2568_v51 = vpop.f32.mrb[51].mxu1  ;;  %v1527_v18 = vpop.f32.mrb[51].mxu0 }
 0x15e   : > { %v1757_v19 = vadd.f32 %v3214_v63, %v1525_v3  ;;  %v2569_v21 = vadd.f32 %v2568_v51, %v2567_v11  ;;  %v1528_v10 = vadd.f32 %v1527_v18, %v3165_v53  ;;  %v3223_v6 = vadd.f32 %v2566_v9, %v3179_v49 }
 0x15f   : > { %v1760_v28 = vadd.f32 %v3214_v63, %v1536_v12  ;;  %v1791_v30 = vmax.f32 %v1759_v41, 0.0 }
 0x160   : > { %v1758_v52 = vadd.f32 %v3214_v63, %v1528_v10  ;;  %v3229_v29 = vadd.f32 %v2569_v21, %v3181_v57  ;;  %v1789_v31 = vmax.f32 %v1757_v19, 0.0 }
 0x161   : > { %v1792_v7 = vmax.f32 %v1760_v28, 0.0 }
 0x162   : > { %v1790_v53 = vmax.f32 %v1758_v52, 0.0  ;;  %v2570_v49 = vpop.f32.mrb[52].mxu1  ;;  %v2658_v35 = vpop.f32.mrb[52].mxu0 }
 0x163   : > { %v2301_v5 = vpack.c.bf16 %v1792_v7, %v1791_v30  ;;  %v1549_v40 = vadd.f32 %v2658_v35, %v3175_v42  ;;  %v2571_v22 = vpop.f32.mrb[53].mxu1  ;;  %v1540_v44 = vpop.f32.mrb[53].mxu0 }
 0x164   : > { %v2296_v57 = vpack.c.bf16 %v1790_v53, %v1789_v31  ;;  %v2572_v27 = vadd.f32 %v2571_v22, %v2570_v49  ;;  %v1541_v45 = vadd.f32 %v1540_v44, %v3171_v24  ;;  %v2573_v48 = vpop.f32.mrb[54].mxu1  ;;  %v2659_v50 = vpop.f32.mrb[54].mxu0 }
 0x165   : > { %2373 = vst [vmem:[%s3234_s12 + $0x8] sm:$0xff] %v2301_v5   ;;  %v1763_v54 = vadd.f32 %v3214_v63, %v1549_v40  ;;  %v1552_v55 = vadd.f32 %v2659_v50, %v3177_v43  ;;  %v2574_v23 = vpop.f32.mrb[55].mxu1  ;;  %v1543_v59 = vpop.f32.mrb[55].mxu0 }
 0x166   : > { %2297 = vst [vmem:[%s3234_s12] sm:$0xff] %v2296_v57   ;;  %v1761_v0 = vadd.f32 %v3214_v63, %v1541_v45  ;;  %v2575_v1 = vadd.f32 %v2574_v23, %v2573_v48  ;;  %v1544_v42 = vadd.f32 %v1543_v59, %v3173_v25  ;;  %v3245_v4 = vadd.f32 %v2572_v27, %v3187_v62 }
 0x167   : > { %v1764_v24 = vadd.f32 %v3214_v63, %v1552_v55  ;;  %v1795_v43 = vmax.f32 %v1763_v54, 0.0 }
 0x168   : > { %v1762_v9 = vadd.f32 %v3214_v63, %v1544_v42  ;;  %v3250_v3 = vadd.f32 %v2575_v1, %v3189_v13  ;;  %v1793_v33 = vmax.f32 %v1761_v0, 0.0 }
 0x169   : > { %v1796_v11 = vmax.f32 %v1764_v24, 0.0 }
 0x16a   : > { %v1794_v41 = vmax.f32 %v1762_v9, 0.0  ;;  %v2576_v12 = vpop.f32.mrb[56].mxu1  ;;  %v2662_v51 = vpop.f32.mrb[56].mxu0 }
 0x16b   : > { %v2311_v18 = vpack.c.bf16 %v1796_v11, %v1795_v43  ;;  %v1565_v25 = vadd.f32 %v2662_v51, %v3191_v17  ;;  %v2577_v62 = vpop.f32.mrb[57].mxu1  ;;  %v1556_v19 = vpop.f32.mrb[57].mxu0 }
 0x16c   : > { %v2306_v21 = vpack.c.bf16 %v1794_v41, %v1793_v33  ;;  %v2578_v10 = vadd.f32 %v2577_v62, %v2576_v12  ;;  %v1557_v28 = vadd.f32 %v1556_v19, %v3183_v58  ;;  %v2579_v52 = vpop.f32.mrb[58].mxu1  ;;  %v2663_v13 = vpop.f32.mrb[58].mxu0 }
 0x16d   : > { %2375 = vst [vmem:[%s3234_s12 + $0x18] sm:$0xff] %v2311_v18   ;;  %v1767_v30 = vadd.f32 %v3214_v63, %v1565_v25  ;;  %v1568_v7 = vadd.f32 %v2663_v13, %v3193_v46  ;;  %v2580_v31 = vpop.f32.mrb[59].mxu1  ;;  %v1559_v53 = vpop.f32.mrb[59].mxu0 }
 0x16e   : > { %2374 = vst [vmem:[%s3234_s12 + $0x10] sm:$0xff] %v2306_v21   ;;  %v1765_v49 = vadd.f32 %v3214_v63, %v1557_v28  ;;  %v2581_v35 = vadd.f32 %v2580_v31, %v2579_v52  ;;  %v1560_v17 = vadd.f32 %v1559_v53, %v3185_v34  ;;  %v3261_v5 = vadd.f32 %v2578_v10, %v3195_v15 }
 0x16f   : > { %v1768_v58 = vadd.f32 %v3214_v63, %v1568_v7  ;;  %v1799_v46 = vmax.f32 %v1767_v30, 0.0 }
 0x170   : > { %v1766_v40 = vadd.f32 %v3214_v63, %v1560_v17  ;;  %v3266_v22 = vadd.f32 %v2581_v35, %v3197_v36  ;;  %v1797_v57 = vmax.f32 %v1765_v49, 0.0 }
 0x171   : > { %v1800_v44 = vmax.f32 %v1768_v58, 0.0 }
 0x172   : > { %v1798_v27 = vmax.f32 %v1766_v40, 0.0  ;;  %v2582_v45 = vpop.f32.mrb[60].mxu1  ;;  %v2666_v48 = vpop.f32.mrb[60].mxu0 }
 0x173   : > { %v2321_v50 = vpack.c.bf16 %v1800_v44, %v1799_v46  ;;  %v1581_v34 = vadd.f32 %v2666_v48, %v3207_v39  ;;  %v2583_v15 = vpop.f32.mrb[61].mxu1  ;;  %v1572_v54 = vpop.f32.mrb[61].mxu0 }
 0x174   : > { %v2316_v55 = vpack.c.bf16 %v1798_v27, %v1797_v57  ;;  %v2584_v23 = vadd.f32 %v2583_v15, %v2582_v45  ;;  %v1573_v59 = vadd.f32 %v1572_v54, %v3199_v37  ;;  %v2585_v0 = vpop.f32.mrb[62].mxu1  ;;  %v2667_v36 = vpop.f32.mrb[62].mxu0 }
 0x175   : > { %2377 = vst [vmem:[%s3234_s12 + $0x28] sm:$0xff] %v2321_v50   ;;  %v1771_v1 = vadd.f32 %v3214_v63, %v1581_v34  ;;  %v1584_v42 = vadd.f32 %v2667_v36, %v3209_v16  ;;  %v2586_v24 = vpop.f32.mrb[63].mxu1  ;;  %v1575_v9 = vpop.f32.mrb[63].mxu0 }
 0x176   : > { %2376 = vst [vmem:[%s3234_s12 + $0x20] sm:$0xff] %v2316_v55   ;;  %v1769_v43 = vadd.f32 %v3214_v63, %v1573_v59  ;;  %v2587_v11 = vadd.f32 %v2586_v24, %v2585_v0  ;;  %v1576_v39 = vadd.f32 %v1575_v9, %v3201_v61  ;;  %v1452_v33 = vadd.f32 %v2584_v23, %v3203_v47 }
 0x177   : > { %v1772_v41 = vadd.f32 %v3214_v63, %v1584_v42  ;;  %v1803_v51 = vmax.f32 %v1771_v1, 0.0 }
 0x178   : > { %v1770_v37 = vadd.f32 %v3214_v63, %v1576_v39  ;;  %v1455_v12 = vadd.f32 %v2587_v11, %v3205_v56  ;;  %v1801_v16 = vmax.f32 %v1769_v43, 0.0 }
 0x179   : > { %v1804_v18 = vmax.f32 %v1772_v41, 0.0 }
 0x17a   : > { %v1802_v25 = vmax.f32 %v1770_v37, 0.0  ;;  %v2588_v62 = vpop.f32.mrb[64].mxu1  ;;  %v2670_v19 = vpop.f32.mrb[64].mxu0 }
 0x17b   : > { %v2331_v21 = vpack.c.bf16 %v1804_v18, %v1803_v51  ;;  %v1597_v10 = vadd.f32 %v2670_v19, %v3245_v4  ;;  %v2589_v61 = vpop.f32.mrb[65].mxu1  ;;  %v1588_v28 = vpop.f32.mrb[65].mxu0 }
 0x17c   : > { %v2326_v47 = vpack.c.bf16 %v1802_v25, %v1801_v16  ;;  %v2590_v52 = vadd.f32 %v2589_v61, %v2588_v62  ;;  %v1589_v13 = vadd.f32 %v1588_v28, %v3223_v6  ;;  %v2591_v30 = vpop.f32.mrb[66].mxu1  ;;  %v2671_v7 = vpop.f32.mrb[66].mxu0 }
 0x17d   : > { %2379 = vst [vmem:[%s3234_s12 + $0x38] sm:$0xff] %v2331_v21   ;;  %v1775_v56 = vadd.f32 %v3214_v63, %v1597_v10  ;;  %v1600_v31 = vadd.f32 %v2671_v7, %v3250_v3  ;;  %v2592_v53 = vpop.f32.mrb[67].mxu1  ;;  %v1591_v49 = vpop.f32.mrb[67].mxu0 }
 0x17e   : > { %2378 = vst [vmem:[%s3234_s12 + $0x30] sm:$0xff] %v2326_v47   ;;  %v1773_v35 = vadd.f32 %v3214_v63, %v1589_v13  ;;  %v2593_v17 = vadd.f32 %v2592_v53, %v2591_v30  ;;  %v1592_v4 = vadd.f32 %v1591_v49, %v3229_v29  ;;  %v1460_v58 = vadd.f32 %v2590_v52, %v3147_v60 }
 0x17f   : > { %v1776_v40 = vadd.f32 %v3214_v63, %v1600_v31  ;;  %v1807_v44 = vmax.f32 %v1775_v56, 0.0 }
 0x180   : > { %v1774_v6 = vadd.f32 %v3214_v63, %v1592_v4  ;;  %v1463_v46 = vadd.f32 %v2593_v17, %v3149_v2  ;;  %v1805_v3 = vmax.f32 %v1773_v35, 0.0 }
 0x181   : > { %v1808_v57 = vmax.f32 %v1776_v40, 0.0 }
 0x182   : > { %v1806_v27 = vmax.f32 %v1774_v6, 0.0  ;;  %v2594_v45 = vpop.f32.mrb[68].mxu1  ;;  %v2674_v48 = vpop.f32.mrb[68].mxu0 }
 0x183   : > { %v2341_v50 = vpack.c.bf16 %v1808_v57, %v1807_v44  ;;  %v1613_v34 = vadd.f32 %v2674_v48, %v1452_v33  ;;  %v2595_v15 = vpop.f32.mrb[69].mxu1  ;;  %v1604_v29 = vpop.f32.mrb[69].mxu0 }
 0x184   : > { %v2336_v54 = vpack.c.bf16 %v1806_v27, %v1805_v3  ;;  %v2596_v60 = vadd.f32 %v2595_v15, %v2594_v45  ;;  %v1605_v55 = vadd.f32 %v1604_v29, %v3261_v5  ;;  %v2597_v23 = vpop.f32.mrb[70].mxu1  ;;  %v2675_v59 = vpop.f32.mrb[70].mxu0 }
 0x185   : > { %2381 = vst [vmem:[%s3234_s12 + $0x48] sm:$0xff] %v2341_v50   ;;  %v1779_v2 = vadd.f32 %v3214_v63, %v1613_v34  ;;  %v1616_v0 = vadd.f32 %v2675_v59, %v1455_v12  ;;  %v2598_v36 = vpop.f32.mrb[71].mxu1  ;;  %v1607_v1 = vpop.f32.mrb[71].mxu0 }
 0x186   : > { %2380 = vst [vmem:[%s3234_s12 + $0x40] sm:$0xff] %v2336_v54   ;;  %v1777_v42 = vadd.f32 %v3214_v63, %v1605_v55  ;;  %v2599_v24 = vadd.f32 %v2598_v36, %v2597_v23  ;;  %v1608_v9 = vadd.f32 %v1607_v1, %v3266_v22  ;;  %v1468_v43 = vadd.f32 %v2596_v60, %v3151_v8 }
 0x187   : > { %v1780_v11 = vadd.f32 %v3214_v63, %v1616_v0  ;;  %v1811_v33 = vmax.f32 %v1779_v2, 0.0 }
 0x188   : > { %v1778_v5 = vadd.f32 %v3214_v63, %v1608_v9  ;;  %v1471_v39 = vadd.f32 %v2599_v24, %v3153_v14  ;;  %v1809_v37 = vmax.f32 %v1777_v42, 0.0 }
 0x189   : > { %v1812_v41 = vmax.f32 %v1780_v11, 0.0 }
 0x18a   : > { %v1810_v12 = vmax.f32 %v1778_v5, 0.0  ;;  %v2600_v51 = vpop.f32.mrb[72].mxu1  ;;  %v2678_v18 = vpop.f32.mrb[72].mxu0 }
 0x18b   : > { %v2351_v16 = vpack.c.bf16 %v1812_v41, %v1811_v33  ;;  %v1629_v25 = vadd.f32 %v2678_v18, %v1468_v43  ;;  %v2601_v62 = vpop.f32.mrb[73].mxu1  ;;  %v1620_v22 = vpop.f32.mrb[73].mxu0 }
 0x18c   : > { %v2346_v19 = vpack.c.bf16 %v1810_v12, %v1809_v37  ;;  %v2602_v8 = vadd.f32 %v2601_v62, %v2600_v51  ;;  %v1621_v21 = vadd.f32 %v1620_v22, %v1460_v58  ;;  %v2603_v10 = vpop.f32.mrb[74].mxu1  ;;  %v2679_v61 = vpop.f32.mrb[74].mxu0 }
 0x18d   : > { %2383 = vst [vmem:[%s3234_s12 + $0x58] sm:$0xff] %v2351_v16   ;;  %v1783_v14 = vadd.f32 %v3214_v63, %v1629_v25  ;;  %v1632_v28 = vadd.f32 %v2679_v61, %v1471_v39  ;;  %v2604_v47 = vpop.f32.mrb[75].mxu1  ;;  %v1623_v52 = vpop.f32.mrb[75].mxu0 }
 0x18e   : > { %2382 = vst [vmem:[%s3234_s12 + $0x50] sm:$0xff] %v2346_v19   ;;  %v1781_v13 = vadd.f32 %v3214_v63, %v1621_v21  ;;  %v2605_v30 = vadd.f32 %v2604_v47, %v2603_v10  ;;  %v1624_v7 = vadd.f32 %v1623_v52, %v1463_v46  ;;  %v1476_v56 = vadd.f32 %v2602_v8, %v3155_v20 }
 0x18f   : > { %v1784_v31 = vadd.f32 %v3214_v63, %v1632_v28  ;;  %v1815_v35 = vmax.f32 %v1783_v14, 0.0 }
 0x190   : > { %v1782_v53 = vadd.f32 %v3214_v63, %v1624_v7  ;;  %v1479_v49 = vadd.f32 %v2605_v30, %v3157_v26  ;;  %v1813_v4 = vmax.f32 %v1781_v13, 0.0 }
 0x191   : > { %v1816_v17 = vmax.f32 %v1784_v31, 0.0 }
 0x192   : > { %v1814_v58 = vmax.f32 %v1782_v53, 0.0  ;;  %v2606_v40 = vpop.f32.mrb[76].mxu1  ;;  %v2682_v6 = vpop.f32.mrb[76].mxu0 }
 0x193   : > { %v2361_v44 = vpack.c.bf16 %v1816_v17, %v1815_v35  ;;  %v2607_v57 = vpop.f32.mrb[77].mxu1  ;;  %v1636_v3 = vpop.f32.mrb[77].mxu0 }
 0x194   : > { %v2356_v46 = vpack.c.bf16 %v1814_v58, %v1813_v4  ;;  %v2608_v27 = vadd.f32 %v2607_v57, %v2606_v40  ;;  %v1637_v20 = vadd.f32 %v1636_v3, %v1476_v56  ;;  %v2609_v45 = vpop.f32.mrb[78].mxu1  ;;  %v2683_v48 = vpop.f32.mrb[78].mxu0 }
 0x195   : > { %2385 = vst [vmem:[%s3234_s12 + $0x68] sm:$0xff] %v2361_v44   ;;  %v2610_v50 = vpop.f32.mrb[79].mxu1  ;;  %v1639_v34 = vpop.f32.mrb[79].mxu0 }
 0x196   : > { %2384 = vst [vmem:[%s3234_s12 + $0x60] sm:$0xff] %v2356_v46   ;;  %v1484_v26 = vadd.f32 %v2608_v27, %v3159_v32  ;;  %v1785_v15 = vadd.f32 %v3214_v63, %v1637_v20  ;;  %v2611_v29 = vadd.f32 %v2610_v50, %v2609_v45  ;;  %v1640_v54 = vadd.f32 %v1639_v34, %v1479_v49 }
 0x198   : > { %v1645_v60 = vadd.f32 %v2682_v6, %v1484_v26  ;;  %v1487_v55 = vadd.f32 %v2611_v29, %v3161_v38  ;;  %v1786_v23 = vadd.f32 %v3214_v63, %v1640_v54  ;;  %v1817_v2 = vmax.f32 %v1785_v15, 0.0 }
 0x19a   : > { %v1787_v59 = vadd.f32 %v3214_v63, %v1645_v60  ;;  %v1648_v0 = vadd.f32 %v2683_v48, %v1487_v55  ;;  %v1818_v36 = vmax.f32 %v1786_v23, 0.0 }
 0x19c   : > { %v1788_v1 = vadd.f32 %v3214_v63, %v1648_v0  ;;  %v2366_v42 = vpack.c.bf16 %v1818_v36, %v1817_v2  ;;  %v1819_v24 = vmax.f32 %v1787_v59, 0.0 }
 0x19e   : > { %v1820_v32 = vmax.f32 %v1788_v1, 0.0  ;;  %2386 = vst [vmem:[%s3234_s12 + $0x70] sm:$0xff] %v2366_v42  }
 0x1a0   : > { %v2371_v9 = vpack.c.bf16 %v1820_v32, %v1819_v24 }
 0x1a2   : > { %2387 = vst [vmem:[%s3234_s12 + $0x78] sm:$0xff] %v2371_v9  }
 0x1a3 PF: > { %s13_s14 = sadd.s32 1, %s2899_s14   ;;  %s3333_s12 = smov %s2895_s13 }
 0x1a4   : > { %p10_p5 = scmp.ge.s32.totalorder %s13_s14, 9   ;;  %s3334_s13 = smov %s3336_s15 }
 0x1a6   :  { %12 = sbr.rel (!%p10_p5) target bundleno = 2 (0x2), region = 76 }

// kernel: nvidia_forward.9
= control target key start
LH: loop header
LB: loop body
LE: loop exit
PB: predicated region body
PF: predicated region fallthrough
CT: control target
= control target key end

     0   :  { %v3490_v0 = vmov 0   ;;  %s4554_s1 = inlined_call_operand.vmem [shape: bf16[1024,128], index: 1, kind: input, shape index: {}]   ;;  %s4555_s0 = inlined_call_operand.vmem [shape: bf16[352,1024], index: 0, kind: input, shape index: {}]   ;;  %s4556_s2 = inlined_call_operand.vmem [shape: f32[1,128], index: 2, kind: input, shape index: {}]   ;;  %s4557_s3 = inlined_call_operand.vmem [shape: bf16[352,128], index: 3, kind: output, shape index: {}]  }
   0x1   :  { %1675 = vmatprep.subr.bf16.mxu0 %v3490_v0  ;;  %1884 = vmatprep.subr.bf16.mxu1 %v3490_v0  ;;  %v3426_v1 = vld [vmem:[%s4554_s1] sm:$0xff]   ;;  %v3428_v3 = vld [vmem:[%s4554_s1 + $0x8] sm:$0xff]   ;;  %v3430_v5 = vld [vmem:[%s4554_s1 + $0x10] sm:$0xff]  }
   0x2   :  { %v3427_v2 = vld [vmem:[%s4554_s1 + $0x80] sm:$0xff]   ;;  %1676 = vmatpush1.bf16.msra.mxu0 %v3426_v1  ;;  %v3429_v4 = vld [vmem:[%s4554_s1 + $0x88] sm:$0xff]   ;;  %v3431_v6 = vld [vmem:[%s4554_s1 + $0x90] sm:$0xff]  }
   0x3   :  { %1885 = vmatpush1.bf16.msra.mxu1 %v3427_v2  ;;  %1677 = vmatprep.subr.bf16.mxu0 %v3490_v0  ;;  %v3432_v7 = vld [vmem:[%s4554_s1 + $0x18] sm:$0xff]   ;;  %v3434_v9 = vld [vmem:[%s4554_s1 + $0x20] sm:$0xff]   ;;  %v3436_v11 = vld [vmem:[%s4554_s1 + $0x28] sm:$0xff]  }
   0x4   :  { %1886 = vmatprep.subr.bf16.mxu1 %v3490_v0  ;;  %v3433_v8 = vld [vmem:[%s4554_s1 + $0x98] sm:$0xff]   ;;  %v3435_v10 = vld [vmem:[%s4554_s1 + $0xa0] sm:$0xff]   ;;  %v3437_v12 = vld [vmem:[%s4554_s1 + $0xa8] sm:$0xff]  }
   0x5   :  { %v3438_v13 = vld [vmem:[%s4554_s1 + $0x30] sm:$0xff]   ;;  %v3440_v15 = vld [vmem:[%s4554_s1 + $0x38] sm:$0xff]   ;;  %v3442_v17 = vld [vmem:[%s4554_s1 + $0x40] sm:$0xff]  }
   0x6   :  { %1678 = vmatpush1.bf16.msra.mxu0 %v3428_v3  ;;  %v3439_v14 = vld [vmem:[%s4554_s1 + $0xb0] sm:$0xff]   ;;  %v3441_v16 = vld [vmem:[%s4554_s1 + $0xb8] sm:$0xff]   ;;  %v3443_v18 = vld [vmem:[%s4554_s1 + $0xc0] sm:$0xff]  }
   0x7   :  { %1887 = vmatpush1.bf16.msra.mxu1 %v3429_v4  ;;  %1679 = vmatprep.subr.bf16.mxu0 %v3490_v0  ;;  %v3586_v19 = vld [vmem:[%s4555_s0] sm:$0xff]  ;;  %v3596_v21 = vld [vmem:[%s4555_s0 + $0x8] sm:$0xff]  ;;  %v3446_v27 = vld [vmem:[%s4554_s1 + $0x50] sm:$0xff]  }
   0x8   :  { %1888 = vmatprep.subr.bf16.mxu1 %v3490_v0  ;;  %v3591_v20 = vld [vmem:[%s4555_s0 + $0x20] sm:$0xff]  ;;  %v112_v23 = vld [vmem:[%s4555_s0 + $0x28] sm:$0xff]  ;;  %v3447_v28 = vld [vmem:[%s4554_s1 + $0xd0] sm:$0xff]  }
   0x9   :  { %v2966_v22 = vcombine.high %v3586_v19, %v3591_v20  ;;  %v3444_v24 = vld [vmem:[%s4554_s1 + $0x48] sm:$0xff]   ;;  %v2968_v25 = vcombine.high %v3596_v21, %v112_v23  ;;  %v3448_v29 = vld [vmem:[%s4554_s1 + $0x58] sm:$0xff]   ;;  %v3450_v31 = vld [vmem:[%s4554_s1 + $0x60] sm:$0xff]   ;;  %v2965_v41 = vcombine.low %v3586_v19, %v3591_v20  ;;  %v2967_v44 = vcombine.low %v3596_v21, %v112_v23 }
   0xa   :  { %1680 = vmatpush1.bf16.msra.mxu0 %v3430_v5  ;;  %v3445_v26 = vld [vmem:[%s4554_s1 + $0xc8] sm:$0xff]   ;;  %v3449_v30 = vld [vmem:[%s4554_s1 + $0xd8] sm:$0xff]   ;;  %v3451_v32 = vld [vmem:[%s4554_s1 + $0xe0] sm:$0xff]  }
   0xb   :  { %1889 = vmatpush1.bf16.msra.mxu1 %v3431_v6  ;;  %1681 = vmatprep.subr.bf16.mxu0 %v3490_v0  ;;  %v3452_v33 = vld [vmem:[%s4554_s1 + $0x68] sm:$0xff]   ;;  %v3454_v35 = vld [vmem:[%s4554_s1 + $0x70] sm:$0xff]   ;;  %v3456_v37 = vld [vmem:[%s4554_s1 + $0x78] sm:$0xff]  }
   0xc   :  { %1890 = vmatprep.subr.bf16.mxu1 %v3490_v0  ;;  %1707 = vmatprep.mubr.bf16.mxu0 %v2966_v22  ;;  %v3453_v34 = vld [vmem:[%s4554_s1 + $0xe8] sm:$0xff]   ;;  %v3455_v36 = vld [vmem:[%s4554_s1 + $0xf0] sm:$0xff]   ;;  %v3457_v38 = vld [vmem:[%s4554_s1 + $0xf8] sm:$0xff]  }
   0xd   :  { %1916 = vmatprep.mubr.bf16.mxu1 %v2968_v25  ;;  %v115_v39 = vld [vmem:[%s4555_s0 + $0x40] sm:$0xff]  ;;  %v116_v42 = vld [vmem:[%s4555_s0 + $0x48] sm:$0xff]  ;;  %v3462_v59 = vld [vmem:[%s4554_s1 + $0x110] sm:$0xff]  }
   0xe   :  { %1682 = vmatpush1.bf16.msra.mxu0 %v3432_v7  ;;  %v119_v40 = vld [vmem:[%s4555_s0 + $0x60] sm:$0xff]  ;;  %v120_v43 = vld [vmem:[%s4555_s0 + $0x68] sm:$0xff]  ;;  %v3463_v60 = vld [vmem:[%s4554_s1 + $0x190] sm:$0xff]  }
   0xf   :  { %1891 = vmatpush1.bf16.msra.mxu1 %v3433_v8  ;;  %1683 = vmatprep.subr.bf16.mxu0 %v3490_v0  ;;  %v3458_v45 = vld [vmem:[%s4554_s1 + $0x100] sm:$0xff]   ;;  %v2974_v47 = vcombine.high %v115_v39, %v119_v40  ;;  %v2976_v48 = vcombine.high %v116_v42, %v120_v43  ;;  %v3460_v49 = vld [vmem:[%s4554_s1 + $0x108] sm:$0xff]   ;;  %v2973_v55 = vcombine.low %v115_v39, %v119_v40  ;;  %v3464_v2 = vld [vmem:[%s4554_s1 + $0x118] sm:$0xff]  }
  0x10   :  { %1892 = vmatprep.subr.bf16.mxu1 %v3490_v0  ;;  %v3459_v46 = vld [vmem:[%s4554_s1 + $0x180] sm:$0xff]   ;;  %v3461_v50 = vld [vmem:[%s4554_s1 + $0x188] sm:$0xff]   ;;  %v2975_v56 = vcombine.low %v116_v42, %v120_v43  ;;  %v3465_v3 = vld [vmem:[%s4554_s1 + $0x198] sm:$0xff]  }
  0x11   :  { %v123_v51 = vld [vmem:[%s4555_s0 + $0x80] sm:$0xff]  ;;  %v124_v53 = vld [vmem:[%s4555_s0 + $0x88] sm:$0xff]  ;;  %v3470_v19 = vld [vmem:[%s4554_s1 + $0x130] sm:$0xff]  }
  0x12   :  { %1684 = vmatpush1.bf16.msra.mxu0 %v3434_v9  ;;  %v127_v52 = vld [vmem:[%s4555_s0 + $0xa0] sm:$0xff]  ;;  %v128_v54 = vld [vmem:[%s4555_s0 + $0xa8] sm:$0xff]  ;;  %v3471_v20 = vld [vmem:[%s4554_s1 + $0x1b0] sm:$0xff]  }
  0x13   :  { %1893 = vmatpush1.bf16.msra.mxu1 %v3435_v10  ;;  %1685 = vmatprep.subr.bf16.mxu0 %v3490_v0  ;;  %v2982_v57 = vcombine.high %v123_v51, %v127_v52  ;;  %v2984_v58 = vcombine.high %v124_v53, %v128_v54  ;;  %v131_v61 = vld [vmem:[%s4555_s0 + $0xc0] sm:$0xff]  ;;  %v132_v63 = vld [vmem:[%s4555_s0 + $0xc8] sm:$0xff]  ;;  %v2981_v4 = vcombine.low %v123_v51, %v127_v52  ;;  %v3481_v51 = vld [vmem:[%s4554_s1 + $0x1d8] sm:$0xff]  }
  0x14   :  { %1894 = vmatprep.subr.bf16.mxu1 %v3490_v0  ;;  %v135_v62 = vld [vmem:[%s4555_s0 + $0xe0] sm:$0xff]  ;;  %v136_v1 = vld [vmem:[%s4555_s0 + $0xe8] sm:$0xff]  ;;  %v2983_v5 = vcombine.low %v124_v53, %v128_v54 }
  0x15   :  { %v2990_v6 = vcombine.high %v131_v61, %v135_v62  ;;  %v2992_v7 = vcombine.high %v132_v63, %v136_v1  ;;  %v3466_v8 = vld [vmem:[%s4554_s1 + $0x120] sm:$0xff]   ;;  %v148_v25 = vld [vmem:[%s4555_s0 + $0x148] sm:$0xff] }
  0x16   :  { %1686 = vmatpush1.bf16.msra.mxu0 %v3436_v11  ;;  %v3467_v9 = vld [vmem:[%s4554_s1 + $0x1a0] sm:$0xff]   ;;  %v3477_v39 = vld [vmem:[%s4554_s1 + $0x1c8] sm:$0xff]  }
  0x17   :  { %1895 = vmatpush1.bf16.msra.mxu1 %v3437_v12  ;;  %1687 = vmatprep.subr.bf16.mxu0 %v3490_v0  ;;  %v139_v10 = vld [vmem:[%s4555_s0 + $0x100] sm:$0xff]  ;;  %v140_v12 = vld [vmem:[%s4555_s0 + $0x108] sm:$0xff] }
  0x18   :  { %1896 = vmatprep.subr.bf16.mxu1 %v3490_v0  ;;  %v143_v11 = vld [vmem:[%s4555_s0 + $0x120] sm:$0xff] }
  0x19   :  { %v147_v22 = vld [vmem:[%s4555_s0 + $0x140] sm:$0xff] }
  0x1a   :  { %1688 = vmatpush1.bf16.msra.mxu0 %v3438_v13  ;;  %v144_v13 = vld [vmem:[%s4555_s0 + $0x128] sm:$0xff]  ;;  %v151_v23 = vld [vmem:[%s4555_s0 + $0x160] sm:$0xff] }
  0x1b   :  { %1897 = vmatpush1.bf16.msra.mxu1 %v3439_v14  ;;  %1689 = vmatprep.subr.bf16.mxu0 %v3490_v0  ;;  %v3468_v14 = vld [vmem:[%s4554_s1 + $0x128] sm:$0xff]   ;;  %v3000_v21 = vcombine.high %v140_v12, %v144_v13  ;;  %v3005_v40 = vcombine.low %v147_v22, %v151_v23 }
  0x1c   :  { %1898 = vmatprep.subr.bf16.mxu1 %v3490_v0 }
  0x1e   :  { %1690 = vmatpush1.bf16.msra.mxu0 %v3440_v15  ;;  %v3469_v15 = vld [vmem:[%s4554_s1 + $0x1a8] sm:$0xff]  }
  0x1f   :  { %1899 = vmatpush1.bf16.msra.mxu1 %v3441_v16  ;;  %1691 = vmatprep.subr.bf16.mxu0 %v3490_v0  ;;  %v2989_v16 = vcombine.low %v131_v61, %v135_v62  ;;  %v172_v61 = vld [vmem:[%s4555_s0 + $0x208] sm:$0xff] }
  0x20   :  { %1900 = vmatprep.subr.bf16.mxu1 %v3490_v0  ;;  %v176_v62 = vld [vmem:[%s4555_s0 + $0x228] sm:$0xff] }
  0x22   :  { %1692 = vmatpush1.bf16.msra.mxu0 %v3442_v17  ;;  %v2991_v17 = vcombine.low %v132_v63, %v136_v1  ;;  %v3485_v63 = vld [vmem:[%s4554_s1 + $0x1e8] sm:$0xff]  }
  0x23   :  { %1901 = vmatpush1.bf16.msra.mxu1 %v3443_v18  ;;  %1693 = vmatprep.subr.bf16.mxu0 %v3490_v0  ;;  %v2998_v18 = vcombine.high %v139_v10, %v143_v11 }
  0x24   :  { %1902 = vmatprep.subr.bf16.mxu1 %v3490_v0 }
  0x26   :  { %1694 = vmatpush1.bf16.msra.mxu0 %v3444_v24  ;;  %v3472_v24 = vld [vmem:[%s4554_s1 + $0x138] sm:$0xff]  }
  0x27   :  { %1903 = vmatpush1.bf16.msra.mxu1 %v3445_v26  ;;  %1695 = vmatprep.subr.bf16.mxu0 %v3490_v0  ;;  %v152_v26 = vld [vmem:[%s4555_s0 + $0x168] sm:$0xff] }
  0x28   :  { %1904 = vmatprep.subr.bf16.mxu1 %v3490_v0 }
  0x2a   :  { %1696 = vmatpush1.bf16.msra.mxu0 %v3446_v27  ;;  %v3473_v27 = vld [vmem:[%s4554_s1 + $0x1b8] sm:$0xff]  }
  0x2b   :  { %1905 = vmatpush1.bf16.msra.mxu1 %v3447_v28  ;;  %1697 = vmatprep.subr.bf16.mxu0 %v3490_v0  ;;  %v2997_v28 = vcombine.low %v139_v10, %v143_v11  ;;  %v180_v10 = vld [vmem:[%s4555_s0 + $0x248] sm:$0xff] }
  0x2c   :  { %1906 = vmatprep.subr.bf16.mxu1 %v3490_v0  ;;  %v184_v11 = vld [vmem:[%s4555_s0 + $0x268] sm:$0xff] }
  0x2e   :  { %1698 = vmatpush1.bf16.msra.mxu0 %v3448_v29  ;;  %v2999_v29 = vcombine.low %v140_v12, %v144_v13  ;;  %v3489_v12 = vld [vmem:[%s4554_s1 + $0x1f8] sm:$0xff]  }
  0x2f   :  { %1907 = vmatpush1.bf16.msra.mxu1 %v3449_v30  ;;  %1699 = vmatprep.subr.bf16.mxu0 %v3490_v0  ;;  %v3006_v30 = vcombine.high %v147_v22, %v151_v23 }
  0x30   :  { %1908 = vmatprep.subr.bf16.mxu1 %v3490_v0 }
  0x32   :  { %1700 = vmatpush1.bf16.msra.mxu0 %v3450_v31  ;;  %v3008_v31 = vcombine.high %v148_v25, %v152_v26 }
  0x33   :  { %1909 = vmatpush1.bf16.msra.mxu1 %v3451_v32  ;;  %1701 = vmatprep.subr.bf16.mxu0 %v3490_v0  ;;  %v3474_v32 = vld [vmem:[%s4554_s1 + $0x140] sm:$0xff]  }
  0x34   :  { %1910 = vmatprep.subr.bf16.mxu1 %v3490_v0 }
  0x36   :  { %1702 = vmatpush1.bf16.msra.mxu0 %v3452_v33  ;;  %v3475_v33 = vld [vmem:[%s4554_s1 + $0x1c0] sm:$0xff]  }
  0x37   :  { %1911 = vmatpush1.bf16.msra.mxu1 %v3453_v34  ;;  %1703 = vmatprep.subr.bf16.mxu0 %v3490_v0  ;;  %v155_v34 = vld [vmem:[%s4555_s0 + $0x180] sm:$0xff] }
  0x38   :  { %1912 = vmatprep.subr.bf16.mxu1 %v3490_v0 }
  0x3a   :  { %1704 = vmatpush1.bf16.msra.mxu0 %v3454_v35  ;;  %v159_v35 = vld [vmem:[%s4555_s0 + $0x1a0] sm:$0xff] }
  0x3b   :  { %1913 = vmatpush1.bf16.msra.mxu1 %v3455_v36  ;;  %1705 = vmatprep.subr.bf16.mxu0 %v3490_v0  ;;  %v3476_v36 = vld [vmem:[%s4554_s1 + $0x148] sm:$0xff]   ;;  %v3014_v42 = vcombine.high %v155_v34, %v159_v35  ;;  %v3013_v52 = vcombine.low %v155_v34, %v159_v35 }
  0x3c   :  { %1914 = vmatprep.subr.bf16.mxu1 %v3490_v0  ;;  %v204_v34 = vld [vmem:[%s4555_s0 + $0x308] sm:$0xff] }
  0x3d   :  { %v208_v35 = vld [vmem:[%s4555_s0 + $0x328] sm:$0xff] }
  0x3e   :  { %1706 = vmatpush1.bf16.msra.mxu0 %v3456_v37  ;;  %v156_v37 = vld [vmem:[%s4555_s0 + $0x188] sm:$0xff] }
  0x3f   :  { %1915 = vmatpush1.bf16.msra.mxu1 %v3457_v38  ;;  %2093 = vmatprep.subr.bf16.mxu0 %v3490_v0  ;;  %v160_v38 = vld [vmem:[%s4555_s0 + $0x1a8] sm:$0xff] }
  0x40   :  { %2302 = vmatprep.subr.bf16.mxu1 %v3490_v0  ;;  %v3016_v43 = vcombine.high %v156_v37, %v160_v38  ;;  %v3015_v53 = vcombine.low %v156_v37, %v160_v38 }
  0x41   :  { %1708 = vmatmul.mubr.bf16.vlgmr.msra.gmra.mrb[0].mxu0 %v2965_v41  ;;  %v3007_v41 = vcombine.low %v148_v25, %v152_v26  ;;  %v199_v25 = vld [vmem:[%s4555_s0 + $0x2e0] sm:$0xff]  ;;  %v196_v26 = vld [vmem:[%s4555_s0 + $0x2c8] sm:$0xff] }
  0x42   :  { %1917 = vmatmul.mubr.bf16.vlgmr.msra.gmra.mrb[0].mxu1 %v2967_v44  ;;  %2094 = vmatpush1.bf16.msra.mxu0 %v3458_v45  ;;  %v3478_v44 = vld [vmem:[%s4554_s1 + $0x150] sm:$0xff]  }
  0x43   :  { %2303 = vmatpush1.bf16.msra.mxu1 %v3459_v46  ;;  %1715 = vmatprep.mubr.bf16.mxu0 %v2974_v47  ;;  %v3479_v45 = vld [vmem:[%s4554_s1 + $0x1d0] sm:$0xff]   ;;  %v163_v46 = vld [vmem:[%s4555_s0 + $0x1c0] sm:$0xff] }
  0x44   :  { %1924 = vmatprep.mubr.bf16.mxu1 %v2976_v48  ;;  %2095 = vmatprep.subr.bf16.mxu0 %v3490_v0  ;;  %v167_v47 = vld [vmem:[%s4555_s0 + $0x1e0] sm:$0xff]  ;;  %v3480_v48 = vld [vmem:[%s4554_s1 + $0x158] sm:$0xff]  }
  0x45   :  { %2304 = vmatprep.subr.bf16.mxu1 %v3490_v0  ;;  %v3022_v54 = vcombine.high %v163_v46, %v167_v47  ;;  %v3021_v1 = vcombine.low %v163_v46, %v167_v47 }
  0x46   :  { %2096 = vmatpush1.bf16.msra.mxu0 %v3460_v49  ;;  %v164_v49 = vld [vmem:[%s4555_s0 + $0x1c8] sm:$0xff] }
  0x47   :  { %2305 = vmatpush1.bf16.msra.mxu1 %v3461_v50  ;;  %2097 = vmatprep.subr.bf16.mxu0 %v3490_v0  ;;  %v168_v50 = vld [vmem:[%s4555_s0 + $0x1e8] sm:$0xff] }
  0x48   :  { %2306 = vmatprep.subr.bf16.mxu1 %v3490_v0 }
  0x49   :  { %1716 = vmatmul.mubr.bf16.gmra.mrb[4].mxu0 %v2973_v55  ;;  %v3024_v55 = vcombine.high %v164_v49, %v168_v50 }
  0x4a   :  { %1925 = vmatmul.mubr.bf16.gmra.mrb[4].mxu1 %v2975_v56  ;;  %1723 = vmatprep.mubr.bf16.mxu0 %v2982_v57  ;;  %v3482_v56 = vld [vmem:[%s4554_s1 + $0x160] sm:$0xff]  }
  0x4b   :  { %1932 = vmatprep.mubr.bf16.mxu1 %v2984_v58  ;;  %2098 = vmatpush1.bf16.msra.mxu0 %v3462_v59  ;;  %v3483_v57 = vld [vmem:[%s4554_s1 + $0x1e0] sm:$0xff]  }
  0x4c   :  { %2307 = vmatpush1.bf16.msra.mxu1 %v3463_v60  ;;  %2099 = vmatprep.subr.bf16.mxu0 %v3490_v0  ;;  %v171_v58 = vld [vmem:[%s4555_s0 + $0x200] sm:$0xff]  ;;  %v3484_v60 = vld [vmem:[%s4554_s1 + $0x168] sm:$0xff]  }
  0x4d   :  { %2308 = vmatprep.subr.bf16.mxu1 %v3490_v0  ;;  %v175_v59 = vld [vmem:[%s4555_s0 + $0x220] sm:$0xff] }
  0x4e   :  { %v3029_v13 = vcombine.low %v171_v58, %v175_v59 }
  0x4f   :  { %2100 = vmatpush1.bf16.msra.mxu0 %v3464_v2  ;;  %v3023_v2 = vcombine.low %v164_v49, %v168_v50  ;;  %v223_v49 = vld [vmem:[%s4555_s0 + $0x3a0] sm:$0xff]  ;;  %v220_v50 = vld [vmem:[%s4555_s0 + $0x388] sm:$0xff] }
  0x50   :  { %2309 = vmatpush1.bf16.msra.mxu1 %v3465_v3  ;;  %2101 = vmatprep.subr.bf16.mxu0 %v3490_v0  ;;  %v3030_v3 = vcombine.high %v171_v58, %v175_v59  ;;  %v228_v58 = vld [vmem:[%s4555_s0 + $0x3c8] sm:$0xff] }
  0x51   :  { %1724 = vmatmul.mubr.bf16.gmra.mrb[8].mxu0 %v2981_v4  ;;  %2310 = vmatprep.subr.bf16.mxu1 %v3490_v0  ;;  %v3032_v4 = vcombine.high %v172_v61, %v176_v62  ;;  %v232_v59 = vld [vmem:[%s4555_s0 + $0x3e8] sm:$0xff] }
  0x52   :  { %1933 = vmatmul.mubr.bf16.gmra.mrb[8].mxu1 %v2983_v5  ;;  %1731 = vmatprep.mubr.bf16.mxu0 %v2990_v6  ;;  %v3486_v5 = vld [vmem:[%s4554_s1 + $0x170] sm:$0xff]  }
  0x53   :  { %1940 = vmatprep.mubr.bf16.mxu1 %v2992_v7  ;;  %2102 = vmatpush1.bf16.msra.mxu0 %v3466_v8  ;;  %v3487_v6 = vld [vmem:[%s4554_s1 + $0x1f0] sm:$0xff]   ;;  %v179_v7 = vld [vmem:[%s4555_s0 + $0x240] sm:$0xff] }
  0x54   :  { %2311 = vmatpush1.bf16.msra.mxu1 %v3467_v9  ;;  %2103 = vmatprep.subr.bf16.mxu0 %v3490_v0  ;;  %v183_v8 = vld [vmem:[%s4555_s0 + $0x260] sm:$0xff]  ;;  %v3488_v9 = vld [vmem:[%s4554_s1 + $0x178] sm:$0xff]  }
  0x55   :  { %2312 = vmatprep.subr.bf16.mxu1 %v3490_v0 }
  0x57   :  { %2104 = vmatpush1.bf16.msra.mxu0 %v3468_v14  ;;  %v3031_v14 = vcombine.low %v172_v61, %v176_v62 }
  0x58   :  { %2313 = vmatpush1.bf16.msra.mxu1 %v3469_v15  ;;  %2105 = vmatprep.subr.bf16.mxu0 %v3490_v0  ;;  %v3038_v15 = vcombine.high %v179_v7, %v183_v8 }
  0x59   :  { %1732 = vmatmul.mubr.bf16.gmra.mrb[12].mxu0 %v2989_v16  ;;  %2314 = vmatprep.subr.bf16.mxu1 %v3490_v0  ;;  %v3040_v16 = vcombine.high %v180_v10, %v184_v11 }
  0x5a   :  { %1941 = vmatmul.mubr.bf16.gmra.mrb[12].mxu1 %v2991_v17  ;;  %1739 = vmatprep.mubr.bf16.mxu0 %v2998_v18  ;;  %v187_v17 = vld [vmem:[%s4555_s0 + $0x280] sm:$0xff] }
  0x5b   :  { %1948 = vmatprep.mubr.bf16.mxu1 %v3000_v21  ;;  %2106 = vmatpush1.bf16.msra.mxu0 %v3470_v19  ;;  %v191_v18 = vld [vmem:[%s4555_s0 + $0x2a0] sm:$0xff]  ;;  %v192_v19 = vld [vmem:[%s4555_s0 + $0x2a8] sm:$0xff]  ;;  %v3039_v21 = vcombine.low %v180_v10, %v184_v11 }
  0x5c   :  { %2315 = vmatpush1.bf16.msra.mxu1 %v3471_v20  ;;  %2107 = vmatprep.subr.bf16.mxu0 %v3490_v0  ;;  %v3037_v20 = vcombine.low %v179_v7, %v183_v8  ;;  %v3046_v22 = vcombine.high %v187_v17, %v191_v18  ;;  %v247_v10 = vld [vmem:[%s4555_s0 + $0x460] sm:$0xff]  ;;  %v244_v11 = vld [vmem:[%s4555_s0 + $0x448] sm:$0xff] }
  0x5d   :  { %2316 = vmatprep.subr.bf16.mxu1 %v3490_v0 }
  0x5f   :  { %2108 = vmatpush1.bf16.msra.mxu0 %v3472_v24  ;;  %v195_v24 = vld [vmem:[%s4555_s0 + $0x2c0] sm:$0xff] }
  0x60   :  { %2317 = vmatpush1.bf16.msra.mxu1 %v3473_v27  ;;  %2109 = vmatprep.subr.bf16.mxu0 %v3490_v0  ;;  %v200_v27 = vld [vmem:[%s4555_s0 + $0x2e8] sm:$0xff] }
  0x61   :  { %1740 = vmatmul.mubr.bf16.gmra.mrb[16].mxu0 %v2997_v28  ;;  %2318 = vmatprep.subr.bf16.mxu1 %v3490_v0  ;;  %v3045_v28 = vcombine.low %v187_v17, %v191_v18  ;;  %v3055_v37 = vcombine.low %v196_v26, %v200_v27  ;;  %v251_v17 = vld [vmem:[%s4555_s0 + $0x480] sm:$0xff] }
  0x62   :  { %1949 = vmatmul.mubr.bf16.gmra.mrb[16].mxu1 %v2999_v29  ;;  %1747 = vmatprep.mubr.bf16.mxu0 %v3006_v30  ;;  %v3054_v30 = vcombine.high %v195_v24, %v199_v25  ;;  %v255_v18 = vld [vmem:[%s4555_s0 + $0x4a0] sm:$0xff] }
  0x63   :  { %1956 = vmatprep.mubr.bf16.mxu1 %v3008_v31  ;;  %2110 = vmatpush1.bf16.msra.mxu0 %v3474_v32  ;;  %v3056_v31 = vcombine.high %v196_v26, %v200_v27  ;;  %v203_v32 = vld [vmem:[%s4555_s0 + $0x300] sm:$0xff]  ;;  %v260_v26 = vld [vmem:[%s4555_s0 + $0x4c8] sm:$0xff] }
  0x64   :  { %2319 = vmatpush1.bf16.msra.mxu1 %v3475_v33  ;;  %2111 = vmatprep.subr.bf16.mxu0 %v3490_v0  ;;  %v207_v33 = vld [vmem:[%s4555_s0 + $0x320] sm:$0xff]  ;;  %v264_v27 = vld [vmem:[%s4555_s0 + $0x4e8] sm:$0xff] }
  0x65   :  { %2320 = vmatprep.subr.bf16.mxu1 %v3490_v0  ;;  %v3062_v38 = vcombine.high %v203_v32, %v207_v33 }
  0x67   :  { %2112 = vmatpush1.bf16.msra.mxu0 %v3476_v36  ;;  %v3053_v36 = vcombine.low %v195_v24, %v199_v25  ;;  %v259_v24 = vld [vmem:[%s4555_s0 + $0x4c0] sm:$0xff] }
  0x68   :  { %2321 = vmatpush1.bf16.msra.mxu1 %v3477_v39  ;;  %2113 = vmatprep.subr.bf16.mxu0 %v3490_v0  ;;  %v3064_v39 = vcombine.high %v204_v34, %v208_v35  ;;  %v263_v25 = vld [vmem:[%s4555_s0 + $0x4e0] sm:$0xff] }
  0x69   :  { %1748 = vmatmul.mubr.bf16.gmra.mrb[20].mxu0 %v3005_v40  ;;  %2322 = vmatprep.subr.bf16.mxu1 %v3490_v0  ;;  %v211_v40 = vld [vmem:[%s4555_s0 + $0x340] sm:$0xff] }
  0x6a   :  { %1957 = vmatmul.mubr.bf16.gmra.mrb[20].mxu1 %v3007_v41  ;;  %1755 = vmatprep.mubr.bf16.mxu0 %v3014_v42  ;;  %v215_v41 = vld [vmem:[%s4555_s0 + $0x360] sm:$0xff]  ;;  %v212_v42 = vld [vmem:[%s4555_s0 + $0x348] sm:$0xff] }
  0x6b   :  { %1964 = vmatprep.mubr.bf16.mxu1 %v3016_v43  ;;  %2114 = vmatpush1.bf16.msra.mxu0 %v3478_v44  ;;  %v216_v43 = vld [vmem:[%s4555_s0 + $0x368] sm:$0xff]  ;;  %v3061_v44 = vcombine.low %v203_v32, %v207_v33  ;;  %v3070_v46 = vcombine.high %v211_v40, %v215_v41  ;;  %v267_v32 = vld [vmem:[%s4555_s0 + $0x500] sm:$0xff] }
  0x6c   :  { %2323 = vmatpush1.bf16.msra.mxu1 %v3479_v45  ;;  %2115 = vmatprep.subr.bf16.mxu0 %v3490_v0  ;;  %v3063_v45 = vcombine.low %v204_v34, %v208_v35  ;;  %v3072_v47 = vcombine.high %v212_v42, %v216_v43  ;;  %v271_v33 = vld [vmem:[%s4555_s0 + $0x520] sm:$0xff]  ;;  %v268_v34 = vld [vmem:[%s4555_s0 + $0x508] sm:$0xff] }
  0x6d   :  { %2324 = vmatprep.subr.bf16.mxu1 %v3490_v0  ;;  %v272_v35 = vld [vmem:[%s4555_s0 + $0x528] sm:$0xff] }
  0x6f   :  { %2116 = vmatpush1.bf16.msra.mxu0 %v3480_v48  ;;  %v219_v48 = vld [vmem:[%s4555_s0 + $0x380] sm:$0xff] }
  0x70   :  { %2325 = vmatpush1.bf16.msra.mxu1 %v3481_v51  ;;  %2117 = vmatprep.subr.bf16.mxu0 %v3490_v0  ;;  %v224_v51 = vld [vmem:[%s4555_s0 + $0x3a8] sm:$0xff] }
  0x71   :  { %1756 = vmatmul.mubr.bf16.gmra.mrb[24].mxu0 %v3013_v52  ;;  %2326 = vmatprep.subr.bf16.mxu1 %v3490_v0  ;;  %v3069_v52 = vcombine.low %v211_v40, %v215_v41  ;;  %v3079_v61 = vcombine.low %v220_v50, %v224_v51  ;;  %v275_v40 = vld [vmem:[%s4555_s0 + $0x540] sm:$0xff] }
  0x72   :  { %1965 = vmatmul.mubr.bf16.gmra.mrb[24].mxu1 %v3015_v53  ;;  %1763 = vmatprep.mubr.bf16.mxu0 %v3022_v54  ;;  %v3071_v53 = vcombine.low %v212_v42, %v216_v43  ;;  %v3078_v54 = vcombine.high %v219_v48, %v223_v49  ;;  %v279_v41 = vld [vmem:[%s4555_s0 + $0x560] sm:$0xff]  ;;  %v276_v42 = vld [vmem:[%s4555_s0 + $0x548] sm:$0xff] }
  0x73   :  { %1972 = vmatprep.mubr.bf16.mxu1 %v3024_v55  ;;  %2118 = vmatpush1.bf16.msra.mxu0 %v3482_v56  ;;  %v3080_v55 = vcombine.high %v220_v50, %v224_v51  ;;  %v227_v56 = vld [vmem:[%s4555_s0 + $0x3c0] sm:$0xff]  ;;  %v280_v43 = vld [vmem:[%s4555_s0 + $0x568] sm:$0xff]  ;;  %v110_v50 = vld [vmem:[%s4555_s0 + $0x18] sm:$0xff] }
  0x74   :  { %2327 = vmatpush1.bf16.msra.mxu1 %v3483_v57  ;;  %2119 = vmatprep.subr.bf16.mxu0 %v3490_v0  ;;  %v231_v57 = vld [vmem:[%s4555_s0 + $0x3e0] sm:$0xff]  ;;  %v114_v51 = vld [vmem:[%s4555_s0 + $0x38] sm:$0xff] }
  0x75   :  { %2328 = vmatprep.subr.bf16.mxu1 %v3490_v0  ;;  %v3086_v62 = vcombine.high %v227_v56, %v231_v57 }
  0x77   :  { %2120 = vmatpush1.bf16.msra.mxu0 %v3484_v60  ;;  %v3077_v60 = vcombine.low %v219_v48, %v223_v49  ;;  %v109_v48 = vld [vmem:[%s4555_s0 + $0x10] sm:$0xff] }
  0x78   :  { %2329 = vmatpush1.bf16.msra.mxu1 %v3485_v63  ;;  %2121 = vmatprep.subr.bf16.mxu0 %v3490_v0  ;;  %v3088_v63 = vcombine.high %v228_v58, %v232_v59  ;;  %v113_v49 = vld [vmem:[%s4555_s0 + $0x30] sm:$0xff] }
  0x79   :  { %1764 = vmatmul.mubr.bf16.gmra.mrb[28].mxu0 %v3021_v1  ;;  %2330 = vmatprep.subr.bf16.mxu1 %v3490_v0  ;;  %v235_v1 = vld [vmem:[%s4555_s0 + $0x400] sm:$0xff] }
  0x7a   :  { %1973 = vmatmul.mubr.bf16.gmra.mrb[28].mxu1 %v3023_v2  ;;  %1771 = vmatprep.mubr.bf16.mxu0 %v3030_v3  ;;  %v239_v2 = vld [vmem:[%s4555_s0 + $0x420] sm:$0xff]  ;;  %v236_v3 = vld [vmem:[%s4555_s0 + $0x408] sm:$0xff] }
  0x7b   :  { %1980 = vmatprep.mubr.bf16.mxu1 %v3032_v4  ;;  %2122 = vmatpush1.bf16.msra.mxu0 %v3486_v5  ;;  %v240_v4 = vld [vmem:[%s4555_s0 + $0x428] sm:$0xff]  ;;  %v3085_v5 = vcombine.low %v227_v56, %v231_v57  ;;  %v3094_v7 = vcombine.high %v235_v1, %v239_v2  ;;  %v117_v56 = vld [vmem:[%s4555_s0 + $0x50] sm:$0xff] }
  0x7c   :  { %2331 = vmatpush1.bf16.msra.mxu1 %v3487_v6  ;;  %2123 = vmatprep.subr.bf16.mxu0 %v3490_v0  ;;  %v3087_v6 = vcombine.low %v228_v58, %v232_v59  ;;  %v3096_v8 = vcombine.high %v236_v3, %v240_v4  ;;  %v121_v57 = vld [vmem:[%s4555_s0 + $0x70] sm:$0xff]  ;;  %v118_v58 = vld [vmem:[%s4555_s0 + $0x58] sm:$0xff] }
  0x7d   :  { %2332 = vmatprep.subr.bf16.mxu1 %v3490_v0  ;;  %v188_v0 = vld [vmem:[%s4555_s0 + $0x288] sm:$0xff]  ;;  %v122_v59 = vld [vmem:[%s4555_s0 + $0x78] sm:$0xff] }
  0x7e   :  { %v3048_v23 = vcombine.high %v188_v0, %v192_v19  ;;  %v3047_v29 = vcombine.low %v188_v0, %v192_v19  ;;  %v252_v0 = vld [vmem:[%s4555_s0 + $0x488] sm:$0xff] }
  0x7f   :  { %2124 = vmatpush1.bf16.msra.mxu0 %v3488_v9  ;;  %v243_v9 = vld [vmem:[%s4555_s0 + $0x440] sm:$0xff]  ;;  %v256_v19 = vld [vmem:[%s4555_s0 + $0x4a8] sm:$0xff] }
  0x80   :  { %2333 = vmatpush1.bf16.msra.mxu1 %v3489_v12  ;;  %v248_v12 = vld [vmem:[%s4555_s0 + $0x468] sm:$0xff] }
  0x81   :  { %1772 = vmatmul.mubr.bf16.gmra.mrb[32].mxu0 %v3029_v13  ;;  %v3093_v13 = vcombine.low %v235_v1, %v239_v2  ;;  %v125_v1 = vld [vmem:[%s4555_s0 + $0x90] sm:$0xff] }
  0x82   :  { %1981 = vmatmul.mubr.bf16.gmra.mrb[32].mxu1 %v3031_v14  ;;  %1779 = vmatprep.mubr.bf16.mxu0 %v3038_v15  ;;  %v3095_v14 = vcombine.low %v236_v3, %v240_v4  ;;  %v3102_v15 = vcombine.high %v243_v9, %v247_v10  ;;  %v129_v2 = vld [vmem:[%s4555_s0 + $0xb0] sm:$0xff]  ;;  %v126_v3 = vld [vmem:[%s4555_s0 + $0x98] sm:$0xff] }
  0x83   :  { %1988 = vmatprep.mubr.bf16.mxu1 %v3040_v16  ;;  %v3104_v16 = vcombine.high %v244_v11, %v248_v12  ;;  %v130_v4 = vld [vmem:[%s4555_s0 + $0xb8] sm:$0xff] }
  0x89   :  { %1780 = vmatmul.mubr.bf16.gmra.mrb[36].mxu0 %v3037_v20  ;;  %v3101_v20 = vcombine.low %v243_v9, %v247_v10  ;;  %v133_v9 = vld [vmem:[%s4555_s0 + $0xd0] sm:$0xff] }
  0x8a   :  { %1989 = vmatmul.mubr.bf16.gmra.mrb[36].mxu1 %v3039_v21  ;;  %1787 = vmatprep.mubr.bf16.mxu0 %v3046_v22  ;;  %v3103_v21 = vcombine.low %v244_v11, %v248_v12  ;;  %v3110_v22 = vcombine.high %v251_v17, %v255_v18  ;;  %v137_v10 = vld [vmem:[%s4555_s0 + $0xf0] sm:$0xff]  ;;  %v134_v11 = vld [vmem:[%s4555_s0 + $0xd8] sm:$0xff] }
  0x8b   :  { %1996 = vmatprep.mubr.bf16.mxu1 %v3048_v23  ;;  %v3112_v23 = vcombine.high %v252_v0, %v256_v19  ;;  %v138_v12 = vld [vmem:[%s4555_s0 + $0xf8] sm:$0xff] }
  0x91   :  { %1788 = vmatmul.mubr.bf16.gmra.mrb[40].mxu0 %v3045_v28  ;;  %v3109_v28 = vcombine.low %v251_v17, %v255_v18  ;;  %v141_v17 = vld [vmem:[%s4555_s0 + $0x110] sm:$0xff] }
  0x92   :  { %1997 = vmatmul.mubr.bf16.gmra.mrb[40].mxu1 %v3047_v29  ;;  %1795 = vmatprep.mubr.bf16.mxu0 %v3054_v30  ;;  %v3111_v29 = vcombine.low %v252_v0, %v256_v19  ;;  %v3118_v30 = vcombine.high %v259_v24, %v263_v25  ;;  %v145_v18 = vld [vmem:[%s4555_s0 + $0x130] sm:$0xff]  ;;  %v142_v0 = vld [vmem:[%s4555_s0 + $0x118] sm:$0xff] }
  0x93   :  { %2004 = vmatprep.mubr.bf16.mxu1 %v3056_v31  ;;  %v3120_v31 = vcombine.high %v260_v26, %v264_v27  ;;  %v146_v19 = vld [vmem:[%s4555_s0 + $0x138] sm:$0xff] }
  0x99   :  { %1796 = vmatmul.mubr.bf16.gmra.mrb[44].mxu0 %v3053_v36  ;;  %v3117_v36 = vcombine.low %v259_v24, %v263_v25  ;;  %v149_v24 = vld [vmem:[%s4555_s0 + $0x150] sm:$0xff] }
  0x9a   :  { %2005 = vmatmul.mubr.bf16.gmra.mrb[44].mxu1 %v3055_v37  ;;  %1803 = vmatprep.mubr.bf16.mxu0 %v3062_v38  ;;  %v3119_v37 = vcombine.low %v260_v26, %v264_v27  ;;  %v3126_v38 = vcombine.high %v267_v32, %v271_v33  ;;  %v153_v25 = vld [vmem:[%s4555_s0 + $0x170] sm:$0xff]  ;;  %v150_v26 = vld [vmem:[%s4555_s0 + $0x158] sm:$0xff] }
  0x9b   :  { %2012 = vmatprep.mubr.bf16.mxu1 %v3064_v39  ;;  %v3128_v39 = vcombine.high %v268_v34, %v272_v35  ;;  %v154_v27 = vld [vmem:[%s4555_s0 + $0x178] sm:$0xff] }
  0xa1   :  { %1804 = vmatmul.mubr.bf16.gmra.mrb[48].mxu0 %v3061_v44  ;;  %v3125_v44 = vcombine.low %v267_v32, %v271_v33  ;;  %v157_v32 = vld [vmem:[%s4555_s0 + $0x190] sm:$0xff] }
  0xa2   :  { %2013 = vmatmul.mubr.bf16.gmra.mrb[48].mxu1 %v3063_v45  ;;  %1811 = vmatprep.mubr.bf16.mxu0 %v3070_v46  ;;  %v3127_v45 = vcombine.low %v268_v34, %v272_v35  ;;  %v3134_v46 = vcombine.high %v275_v40, %v279_v41  ;;  %v161_v33 = vld [vmem:[%s4555_s0 + $0x1b0] sm:$0xff]  ;;  %v158_v35 = vld [vmem:[%s4555_s0 + $0x198] sm:$0xff] }
  0xa3   :  { %2020 = vmatprep.mubr.bf16.mxu1 %v3072_v47  ;;  %v3136_v47 = vcombine.high %v276_v42, %v280_v43 }
  0xa9   :  { %1812 = vmatmul.mubr.bf16.gmra.mrb[52].mxu0 %v3069_v52  ;;  %v3133_v52 = vcombine.low %v275_v40, %v279_v41 }
  0xaa   :  { %2021 = vmatmul.mubr.bf16.gmra.mrb[52].mxu1 %v3071_v53  ;;  %1819 = vmatprep.mubr.bf16.mxu0 %v3078_v54  ;;  %v3135_v53 = vcombine.low %v276_v42, %v280_v43  ;;  %v2970_v54 = vcombine.high %v109_v48, %v113_v49  ;;  %v3011_v43 = vcombine.low %v150_v26, %v154_v27 }
  0xab   :  { %2028 = vmatprep.mubr.bf16.mxu1 %v3080_v55  ;;  %v2972_v55 = vcombine.high %v110_v50, %v114_v51 }
  0xb1   :  { %1820 = vmatmul.mubr.bf16.gmra.mrb[56].mxu0 %v3077_v60  ;;  %v2969_v60 = vcombine.low %v109_v48, %v113_v49 }
  0xb2   :  { %2029 = vmatmul.mubr.bf16.gmra.mrb[56].mxu1 %v3079_v61  ;;  %1827 = vmatprep.mubr.bf16.mxu0 %v3086_v62  ;;  %v2971_v61 = vcombine.low %v110_v50, %v114_v51  ;;  %v2978_v62 = vcombine.high %v117_v56, %v121_v57  ;;  %v165_v50 = vld [vmem:[%s4555_s0 + $0x1d0] sm:$0xff] }
  0xb3   :  { %2036 = vmatprep.mubr.bf16.mxu1 %v3088_v63  ;;  %v2980_v63 = vcombine.high %v118_v58, %v122_v59  ;;  %v169_v51 = vld [vmem:[%s4555_s0 + $0x1f0] sm:$0xff] }
  0xb9   :  { %1828 = vmatmul.mubr.bf16.gmra.mrb[60].mxu0 %v3085_v5  ;;  %v2977_v5 = vcombine.low %v117_v56, %v121_v57  ;;  %v3017_v57 = vcombine.low %v157_v32, %v161_v33 }
  0xba   :  { %2037 = vmatmul.mubr.bf16.gmra.mrb[60].mxu1 %v3087_v6  ;;  %1835 = vmatprep.mubr.bf16.mxu0 %v3094_v7  ;;  %v2979_v6 = vcombine.low %v118_v58, %v122_v59  ;;  %v2986_v7 = vcombine.high %v125_v1, %v129_v2 }
  0xbb   :  { %2044 = vmatprep.mubr.bf16.mxu1 %v3096_v8  ;;  %v2988_v8 = vcombine.high %v126_v3, %v130_v4 }
  0xc1   :  { %1836 = vmatmul.mubr.bf16.gmra.mrb[64].mxu0 %v3093_v13  ;;  %v2985_v13 = vcombine.low %v125_v1, %v129_v2 }
  0xc2   :  { %2045 = vmatmul.mubr.bf16.gmra.mrb[64].mxu1 %v3095_v14  ;;  %1843 = vmatprep.mubr.bf16.mxu0 %v3102_v15  ;;  %v2987_v14 = vcombine.low %v126_v3, %v130_v4  ;;  %v2994_v15 = vcombine.high %v133_v9, %v137_v10 }
  0xc3   :  { %2052 = vmatprep.mubr.bf16.mxu1 %v3104_v16  ;;  %v2996_v16 = vcombine.high %v134_v11, %v138_v12 }
  0xc9   :  { %1844 = vmatmul.mubr.bf16.gmra.mrb[68].mxu0 %v3101_v20  ;;  %v2993_v20 = vcombine.low %v133_v9, %v137_v10  ;;  %v178_v9 = vld [vmem:[%s4555_s0 + $0x238] sm:$0xff] }
  0xca   :  { %2053 = vmatmul.mubr.bf16.gmra.mrb[68].mxu1 %v3103_v21  ;;  %1851 = vmatprep.mubr.bf16.mxu0 %v3110_v22  ;;  %v2995_v21 = vcombine.low %v134_v11, %v138_v12  ;;  %v3002_v22 = vcombine.high %v141_v17, %v145_v18  ;;  %v3025_v12 = vcombine.low %v165_v50, %v169_v51 }
  0xcb   :  { %2060 = vmatprep.mubr.bf16.mxu1 %v3112_v23  ;;  %v3004_v23 = vcombine.high %v142_v0, %v146_v19 }
  0xd1   :  { %1852 = vmatmul.mubr.bf16.gmra.mrb[72].mxu0 %v3109_v28  ;;  %v3001_v28 = vcombine.low %v141_v17, %v145_v18 }
  0xd2   :  { %2061 = vmatmul.mubr.bf16.gmra.mrb[72].mxu1 %v3111_v29  ;;  %1859 = vmatprep.mubr.bf16.mxu0 %v3118_v30  ;;  %v3003_v29 = vcombine.low %v142_v0, %v146_v19  ;;  %v3010_v30 = vcombine.high %v149_v24, %v153_v25 }
  0xd3   :  { %2068 = vmatprep.mubr.bf16.mxu1 %v3120_v31  ;;  %v3012_v31 = vcombine.high %v150_v26, %v154_v27  ;;  %v186_v26 = vld [vmem:[%s4555_s0 + $0x278] sm:$0xff] }
  0xd9   :  { %1860 = vmatmul.mubr.bf16.gmra.mrb[76].mxu0 %v3117_v36  ;;  %v162_v36 = vld [vmem:[%s4555_s0 + $0x1b8] sm:$0xff] }
  0xda   :  { %2069 = vmatmul.mubr.bf16.gmra.mrb[76].mxu1 %v3119_v37  ;;  %1867 = vmatprep.mubr.bf16.mxu0 %v3126_v38 }
  0xdb   :  { %2076 = vmatprep.mubr.bf16.mxu1 %v3128_v39  ;;  %v3009_v39 = vcombine.low %v149_v24, %v153_v25  ;;  %v182_v25 = vld [vmem:[%s4555_s0 + $0x258] sm:$0xff] }
  0xe1   :  { %1868 = vmatmul.mubr.bf16.gmra.mrb[80].mxu0 %v3125_v44  ;;  %v3018_v44 = vcombine.high %v157_v32, %v161_v33 }
  0xe2   :  { %2077 = vmatmul.mubr.bf16.gmra.mrb[80].mxu1 %v3127_v45  ;;  %1875 = vmatprep.mubr.bf16.mxu0 %v3134_v46 }
  0xe3   :  { %2084 = vmatprep.mubr.bf16.mxu1 %v3136_v47  ;;  %v3020_v47 = vcombine.high %v158_v35, %v162_v36 }
  0xe9   :  { %1876 = vmatmul.mubr.bf16.gmra.mrb[84].mxu0 %v3133_v52 }
  0xea   :  { %2085 = vmatmul.mubr.bf16.gmra.mrb[84].mxu1 %v3135_v53  ;;  %2125 = vmatprep.mubr.bf16.mxu0 %v2970_v54  ;;  %v166_v53 = vld [vmem:[%s4555_s0 + $0x1d8] sm:$0xff] }
  0xeb   :  { %2334 = vmatprep.mubr.bf16.mxu1 %v2972_v55  ;;  %v170_v54 = vld [vmem:[%s4555_s0 + $0x1f8] sm:$0xff] }
  0xec   :  { %v3028_v2 = vcombine.high %v166_v53, %v170_v54 }
  0xf1   :  { %2126 = vmatmul.mubr.bf16.vlgmr.msra.gmra.mrb[88].mxu0 %v2969_v60 }
  0xf2   :  { %2335 = vmatmul.mubr.bf16.vlgmr.msra.gmra.mrb[88].mxu1 %v2971_v61  ;;  %2133 = vmatprep.mubr.bf16.mxu0 %v2978_v62  ;;  %v3019_v61 = vcombine.low %v158_v35, %v162_v36  ;;  %v3026_v62 = vcombine.high %v165_v50, %v169_v51 }
  0xf3   :  { %2342 = vmatprep.mubr.bf16.mxu1 %v2980_v63 }
  0xf9   :  { %2134 = vmatmul.mubr.bf16.gmra.mrb[92].mxu0 %v2977_v5  ;;  %v173_v5 = vld [vmem:[%s4555_s0 + $0x210] sm:$0xff] }
  0xfa   :  { %2343 = vmatmul.mubr.bf16.gmra.mrb[92].mxu1 %v2979_v6  ;;  %2141 = vmatprep.mubr.bf16.mxu0 %v2986_v7  ;;  %v177_v6 = vld [vmem:[%s4555_s0 + $0x230] sm:$0xff] }
  0xfb   :  { %2350 = vmatprep.mubr.bf16.mxu1 %v2988_v8  ;;  %v174_v8 = vld [vmem:[%s4555_s0 + $0x218] sm:$0xff]  ;;  %v3034_v17 = vcombine.high %v173_v5, %v177_v6 }
  0xfc   :  { %v3036_v19 = vcombine.high %v174_v8, %v178_v9  ;;  %v3035_v33 = vcombine.low %v174_v8, %v178_v9 }
 0x101   :  { %2142 = vmatmul.mubr.bf16.gmra.mrb[96].mxu0 %v2985_v13 }
 0x102   :  { %2351 = vmatmul.mubr.bf16.gmra.mrb[96].mxu1 %v2987_v14  ;;  %2149 = vmatprep.mubr.bf16.mxu0 %v2994_v15 }
 0x103   :  { %2358 = vmatprep.mubr.bf16.mxu1 %v2996_v16  ;;  %v3027_v16 = vcombine.low %v166_v53, %v170_v54  ;;  %v3043_v53 = vcombine.low %v182_v25, %v186_v26 }
 0x109   :  { %2150 = vmatmul.mubr.bf16.gmra.mrb[100].mxu0 %v2993_v20 }
 0x10a   :  { %2359 = vmatmul.mubr.bf16.gmra.mrb[100].mxu1 %v2995_v21  ;;  %2157 = vmatprep.mubr.bf16.mxu0 %v3002_v22  ;;  %v181_v22 = vld [vmem:[%s4555_s0 + $0x250] sm:$0xff] }
 0x10b   :  { %2366 = vmatprep.mubr.bf16.mxu1 %v3004_v23  ;;  %v185_v23 = vld [vmem:[%s4555_s0 + $0x270] sm:$0xff] }
 0x111   :  { %2158 = vmatmul.mubr.bf16.gmra.mrb[104].mxu0 %v3001_v28 }
 0x112   :  { %2367 = vmatmul.mubr.bf16.gmra.mrb[104].mxu1 %v3003_v29  ;;  %2165 = vmatprep.mubr.bf16.mxu0 %v3010_v30  ;;  %v3033_v29 = vcombine.low %v173_v5, %v177_v6 }
 0x113   :  { %2374 = vmatprep.mubr.bf16.mxu1 %v3012_v31 }
 0x114   :  { %v1709_v34 = vpop.f32.mrb[0].mxu0 }
 0x115   :  { %v1918_v37 = vpop.f32.mrb[0].mxu1  ;;  %v1711_v38 = vpop.f32.mrb[1].mxu0 }
 0x116   :  { %v4127_v40 = vadd.f32 %v1918_v37, %v1709_v34  ;;  %v1920_v41 = vpop.f32.mrb[1].mxu1  ;;  %v1712_v42 = vpop.f32.mrb[2].mxu0  ;;  %v3042_v34 = vcombine.high %v181_v22, %v185_v23  ;;  %v3044_v37 = vcombine.high %v182_v25, %v186_v26 }
 0x117   :  { %v1921_v45 = vpop.f32.mrb[2].mxu1  ;;  %v1714_v46 = vpop.f32.mrb[3].mxu0  ;;  %v189_v41 = vld [vmem:[%s4555_s0 + $0x290] sm:$0xff] }
 0x118   :  { %v4129_v48 = vadd.f32 %v1921_v45, %v1712_v42  ;;  %v1923_v49 = vpop.f32.mrb[3].mxu1  ;;  %v193_v42 = vld [vmem:[%s4555_s0 + $0x2b0] sm:$0xff]  ;;  %v194_v45 = vld [vmem:[%s4555_s0 + $0x2b8] sm:$0xff] }
 0x119   :  { %2166 = vmatmul.mubr.bf16.gmra.mrb[108].mxu0 %v3009_v39  ;;  %v3041_v49 = vcombine.low %v181_v22, %v185_v23  ;;  %v3050_v54 = vcombine.high %v189_v41, %v193_v42  ;;  %v3049_v6 = vcombine.low %v189_v41, %v193_v42  ;;  %v210_v22 = vld [vmem:[%s4555_s0 + $0x338] sm:$0xff] }
 0x11a   :  { %2375 = vmatmul.mubr.bf16.gmra.mrb[108].mxu1 %v3011_v43  ;;  %2173 = vmatprep.mubr.bf16.mxu0 %v3018_v44  ;;  %v190_v44 = vld [vmem:[%s4555_s0 + $0x298] sm:$0xff] }
 0x11b   :  { %2382 = vmatprep.mubr.bf16.mxu1 %v3020_v47  ;;  %v214_v42 = vld [vmem:[%s4555_s0 + $0x358] sm:$0xff] }
 0x11c   :  { %v1717_v52 = vpop.f32.mrb[4].mxu0 }
 0x11d   :  { %v1926_v55 = vpop.f32.mrb[4].mxu1  ;;  %v1719_v56 = vpop.f32.mrb[5].mxu0 }
 0x11e   :  { %v4143_v58 = vadd.f32 %v1926_v55, %v1717_v52  ;;  %v1928_v59 = vpop.f32.mrb[5].mxu1  ;;  %v1720_v60 = vpop.f32.mrb[6].mxu0 }
 0x11f   :  { %v1929_v63 = vpop.f32.mrb[6].mxu1  ;;  %v1722_v1 = vpop.f32.mrb[7].mxu0 }
 0x120   :  { %v4145_v3 = vadd.f32 %v1929_v63, %v1720_v60  ;;  %v1931_v4 = vpop.f32.mrb[7].mxu1  ;;  %v198_v1 = vld [vmem:[%s4555_s0 + $0x2d8] sm:$0xff] }
 0x121   :  { %2174 = vmatmul.mubr.bf16.gmra.mrb[112].mxu0 %v3017_v57  ;;  %v3052_v57 = vcombine.high %v190_v44, %v194_v45 }
 0x122   :  { %2383 = vmatmul.mubr.bf16.gmra.mrb[112].mxu1 %v3019_v61  ;;  %2181 = vmatprep.mubr.bf16.mxu0 %v3026_v62  ;;  %v197_v61 = vld [vmem:[%s4555_s0 + $0x2d0] sm:$0xff] }
 0x123   :  { %2390 = vmatprep.mubr.bf16.mxu1 %v3028_v2  ;;  %v201_v62 = vld [vmem:[%s4555_s0 + $0x2f0] sm:$0xff]  ;;  %v202_v2 = vld [vmem:[%s4555_s0 + $0x2f8] sm:$0xff] }
 0x124   :  { %v1725_v7 = vpop.f32.mrb[8].mxu0  ;;  %v3057_v25 = vcombine.low %v197_v61, %v201_v62 }
 0x125   :  { %v1934_v10 = vpop.f32.mrb[8].mxu1  ;;  %v1727_v11 = vpop.f32.mrb[9].mxu0 }
 0x126   :  { %v4159_v13 = vadd.f32 %v1934_v10, %v1725_v7  ;;  %v1936_v14 = vpop.f32.mrb[9].mxu1  ;;  %v1728_v15 = vpop.f32.mrb[10].mxu0  ;;  %v3051_v10 = vcombine.low %v190_v44, %v194_v45  ;;  %v3058_v11 = vcombine.high %v197_v61, %v201_v62  ;;  %v221_v61 = vld [vmem:[%s4555_s0 + $0x390] sm:$0xff] }
 0x127   :  { %v1937_v18 = vpop.f32.mrb[10].mxu1  ;;  %v1730_v0 = vpop.f32.mrb[11].mxu0  ;;  %v225_v62 = vld [vmem:[%s4555_s0 + $0x3b0] sm:$0xff] }
 0x128   :  { %v4161_v20 = vadd.f32 %v1937_v18, %v1728_v15  ;;  %v1939_v21 = vpop.f32.mrb[11].mxu1  ;;  %v3060_v15 = vcombine.high %v198_v1, %v202_v2  ;;  %v205_v18 = vld [vmem:[%s4555_s0 + $0x310] sm:$0xff] }
 0x129   :  { %2182 = vmatmul.mubr.bf16.gmra.mrb[116].mxu0 %v3025_v12  ;;  %v209_v0 = vld [vmem:[%s4555_s0 + $0x330] sm:$0xff]  ;;  %v206_v21 = vld [vmem:[%s4555_s0 + $0x318] sm:$0xff] }
 0x12a   :  { %2391 = vmatmul.mubr.bf16.gmra.mrb[116].mxu1 %v3027_v16  ;;  %2189 = vmatprep.mubr.bf16.mxu0 %v3034_v17 }
 0x12b   :  { %2398 = vmatprep.mubr.bf16.mxu1 %v3036_v19 }
 0x12c   :  { %v1733_v24 = vpop.f32.mrb[12].mxu0 }
 0x12d   :  { %v1942_v27 = vpop.f32.mrb[12].mxu1  ;;  %v1735_v28 = vpop.f32.mrb[13].mxu0 }
 0x12e   :  { %v4175_v30 = vadd.f32 %v1942_v27, %v1733_v24  ;;  %v1944_v31 = vpop.f32.mrb[13].mxu1  ;;  %v1736_v32 = vpop.f32.mrb[14].mxu0 }
 0x12f   :  { %v1945_v35 = vpop.f32.mrb[14].mxu1  ;;  %v1738_v36 = vpop.f32.mrb[15].mxu0  ;;  %v3066_v31 = vcombine.high %v205_v18, %v209_v0 }
 0x130   :  { %v4177_v38 = vadd.f32 %v1945_v35, %v1736_v32  ;;  %v1947_v39 = vpop.f32.mrb[15].mxu1 }
 0x131   :  { %2190 = vmatmul.mubr.bf16.gmra.mrb[120].mxu0 %v3033_v29  ;;  %v3059_v29 = vcombine.low %v198_v1, %v202_v2  ;;  %v217_v39 = vld [vmem:[%s4555_s0 + $0x370] sm:$0xff]  ;;  %v222_v1 = vld [vmem:[%s4555_s0 + $0x398] sm:$0xff] }
 0x132   :  { %2399 = vmatmul.mubr.bf16.gmra.mrb[120].mxu1 %v3035_v33  ;;  %2197 = vmatprep.mubr.bf16.mxu0 %v3042_v34  ;;  %v3068_v34 = vcombine.high %v206_v21, %v210_v22  ;;  %v226_v2 = vld [vmem:[%s4555_s0 + $0x3b8] sm:$0xff] }
 0x133   :  { %2406 = vmatprep.mubr.bf16.mxu1 %v3044_v37  ;;  %v213_v37 = vld [vmem:[%s4555_s0 + $0x350] sm:$0xff] }
 0x134   :  { %v1741_v43 = vpop.f32.mrb[16].mxu0 }
 0x135   :  { %v1950_v46 = vpop.f32.mrb[16].mxu1  ;;  %v1743_v47 = vpop.f32.mrb[17].mxu0 }
 0x136   :  { %v4191_v50 = vadd.f32 %v1950_v46, %v1741_v43  ;;  %v1952_v51 = vpop.f32.mrb[17].mxu1  ;;  %v1744_v52 = vpop.f32.mrb[18].mxu0  ;;  %v218_v43 = vld [vmem:[%s4555_s0 + $0x378] sm:$0xff]  ;;  %v3065_v46 = vcombine.low %v205_v18, %v209_v0 }
 0x137   :  { %v1953_v55 = vpop.f32.mrb[18].mxu1  ;;  %v1746_v56 = vpop.f32.mrb[19].mxu0 }
 0x138   :  { %v4193_v59 = vadd.f32 %v1953_v55, %v1744_v52  ;;  %v1955_v60 = vpop.f32.mrb[19].mxu1  ;;  %v3067_v52 = vcombine.low %v206_v21, %v210_v22  ;;  %v3076_v56 = vcombine.high %v214_v42, %v218_v43  ;;  %v233_v21 = vld [vmem:[%s4555_s0 + $0x3f0] sm:$0xff] }
 0x139   :  { %2198 = vmatmul.mubr.bf16.gmra.mrb[124].mxu0 %v3041_v49 }
 0x13a   :  { %2407 = vmatmul.mubr.bf16.gmra.mrb[124].mxu1 %v3043_v53  ;;  %2205 = vmatprep.mubr.bf16.mxu0 %v3050_v54  ;;  %v3074_v53 = vcombine.high %v213_v37, %v217_v39 }
 0x13b   :  { %2414 = vmatprep.mubr.bf16.mxu1 %v3052_v57 }
 0x13c   :  { %v1749_v63 = vpop.f32.mrb[20].mxu0 }
 0x13d   :  { %v1958_v4 = vpop.f32.mrb[20].mxu1  ;;  %v1751_v5 = vpop.f32.mrb[21].mxu0 }
 0x13e   :  { %v4207_v7 = vadd.f32 %v1958_v4, %v1749_v63  ;;  %v1960_v8 = vpop.f32.mrb[21].mxu1  ;;  %v1752_v9 = vpop.f32.mrb[22].mxu0 }
 0x13f   :  { %v1961_v12 = vpop.f32.mrb[22].mxu1  ;;  %v1754_v14 = vpop.f32.mrb[23].mxu0 }
 0x140   :  { %v4209_v16 = vadd.f32 %v1961_v12, %v1752_v9  ;;  %v1963_v17 = vpop.f32.mrb[23].mxu1  ;;  %v3082_v12 = vcombine.high %v221_v61, %v225_v62 }
 0x141   :  { %2206 = vmatmul.mubr.bf16.gmra.mrb[128].mxu0 %v3049_v6  ;;  %v3073_v6 = vcombine.low %v213_v37, %v217_v39  ;;  %v3084_v17 = vcombine.high %v222_v1, %v226_v2 }
 0x142   :  { %2415 = vmatmul.mubr.bf16.gmra.mrb[128].mxu1 %v3051_v10  ;;  %2213 = vmatprep.mubr.bf16.mxu0 %v3058_v11  ;;  %v3075_v11 = vcombine.low %v214_v42, %v218_v43  ;;  %v237_v43 = vld [vmem:[%s4555_s0 + $0x410] sm:$0xff] }
 0x143   :  { %2422 = vmatprep.mubr.bf16.mxu1 %v3060_v15 }
 0x144   :  { %v1757_v19 = vpop.f32.mrb[24].mxu0 }
 0x145   :  { %v1966_v23 = vpop.f32.mrb[24].mxu1  ;;  %v1759_v24 = vpop.f32.mrb[25].mxu0 }
 0x146   :  { %v4223_v26 = vadd.f32 %v1966_v23, %v1757_v19  ;;  %v1968_v27 = vpop.f32.mrb[25].mxu1  ;;  %v1760_v28 = vpop.f32.mrb[26].mxu0  ;;  %v229_v19 = vld [vmem:[%s4555_s0 + $0x3d0] sm:$0xff]  ;;  %v230_v23 = vld [vmem:[%s4555_s0 + $0x3d8] sm:$0xff] }
 0x147   :  { %v1969_v32 = vpop.f32.mrb[26].mxu1  ;;  %v1762_v33 = vpop.f32.mrb[27].mxu0  ;;  %v234_v24 = vld [vmem:[%s4555_s0 + $0x3f8] sm:$0xff] }
 0x148   :  { %v4225_v35 = vadd.f32 %v1969_v32, %v1760_v28  ;;  %v1971_v36 = vpop.f32.mrb[27].mxu1  ;;  %v3081_v28 = vcombine.low %v221_v61, %v225_v62  ;;  %v3083_v33 = vcombine.low %v222_v1, %v226_v2  ;;  %v3092_v39 = vcombine.high %v230_v23, %v234_v24 }
 0x149   :  { %2214 = vmatmul.mubr.bf16.gmra.mrb[132].mxu0 %v3057_v25 }
 0x14a   :  { %2423 = vmatmul.mubr.bf16.gmra.mrb[132].mxu1 %v3059_v29  ;;  %2221 = vmatprep.mubr.bf16.mxu0 %v3066_v31 }
 0x14b   :  { %2430 = vmatprep.mubr.bf16.mxu1 %v3068_v34  ;;  %v3090_v34 = vcombine.high %v229_v19, %v233_v21 }
 0x14c   :  { %v1765_v41 = vpop.f32.mrb[28].mxu0 }
 0x14d   :  { %v1974_v44 = vpop.f32.mrb[28].mxu1  ;;  %v1767_v45 = vpop.f32.mrb[29].mxu0 }
 0x14e   :  { %v4239_v47 = vadd.f32 %v1974_v44, %v1765_v41  ;;  %v1976_v49 = vpop.f32.mrb[29].mxu1  ;;  %v1768_v51 = vpop.f32.mrb[30].mxu0  ;;  %v241_v44 = vld [vmem:[%s4555_s0 + $0x430] sm:$0xff] }
 0x14f   :  { %v1977_v54 = vpop.f32.mrb[30].mxu1  ;;  %v1770_v55 = vpop.f32.mrb[31].mxu0  ;;  %v242_v49 = vld [vmem:[%s4555_s0 + $0x438] sm:$0xff]  ;;  %v3098_v61 = vcombine.high %v237_v43, %v241_v44 }
 0x150   :  { %v4241_v57 = vadd.f32 %v1977_v54, %v1768_v51  ;;  %v1979_v60 = vpop.f32.mrb[31].mxu1 }
 0x151   :  { %2222 = vmatmul.mubr.bf16.gmra.mrb[136].mxu0 %v3065_v46  ;;  %v238_v46 = vld [vmem:[%s4555_s0 + $0x418] sm:$0xff]  ;;  %v3091_v60 = vcombine.low %v230_v23, %v234_v24 }
 0x152   :  { %2431 = vmatmul.mubr.bf16.gmra.mrb[136].mxu1 %v3067_v52  ;;  %2229 = vmatprep.mubr.bf16.mxu0 %v3074_v53  ;;  %v3089_v53 = vcombine.low %v229_v19, %v233_v21  ;;  %v3100_v1 = vcombine.high %v238_v46, %v242_v49  ;;  %v3099_v21 = vcombine.low %v238_v46, %v242_v49 }
 0x153   :  { %2438 = vmatprep.mubr.bf16.mxu1 %v3076_v56 }
 0x154   :  { %v1773_v63 = vpop.f32.mrb[32].mxu0 }
 0x155   :  { %v1982_v4 = vpop.f32.mrb[32].mxu1  ;;  %v1775_v5 = vpop.f32.mrb[33].mxu0 }
 0x156   :  { %v4255_v8 = vadd.f32 %v1982_v4, %v1773_v63  ;;  %v1984_v9 = vpop.f32.mrb[33].mxu1  ;;  %v1776_v10 = vpop.f32.mrb[34].mxu0  ;;  %v245_v5 = vld [vmem:[%s4555_s0 + $0x450] sm:$0xff] }
 0x157   :  { %v1985_v14 = vpop.f32.mrb[34].mxu1  ;;  %v1778_v15 = vpop.f32.mrb[35].mxu0 }
 0x158   :  { %v4257_v18 = vadd.f32 %v1985_v14, %v1776_v10  ;;  %v1987_v0 = vpop.f32.mrb[35].mxu1  ;;  %v246_v10 = vld [vmem:[%s4555_s0 + $0x458] sm:$0xff]  ;;  %v3097_v15 = vcombine.low %v237_v43, %v241_v44 }
 0x159   :  { %2230 = vmatmul.mubr.bf16.gmra.mrb[140].mxu0 %v3073_v6  ;;  %v249_v6 = vld [vmem:[%s4555_s0 + $0x470] sm:$0xff] }
 0x15a   :  { %2439 = vmatmul.mubr.bf16.gmra.mrb[140].mxu1 %v3075_v11  ;;  %2237 = vmatprep.mubr.bf16.mxu0 %v3082_v12  ;;  %v250_v11 = vld [vmem:[%s4555_s0 + $0x478] sm:$0xff] }
 0x15b   :  { %2446 = vmatprep.mubr.bf16.mxu1 %v3084_v17  ;;  %v3107_v46 = vcombine.low %v246_v10, %v250_v11 }
 0x15c   :  { %v1781_v22 = vpop.f32.mrb[36].mxu0 }
 0x15d   :  { %v1990_v25 = vpop.f32.mrb[36].mxu1  ;;  %v1783_v27 = vpop.f32.mrb[37].mxu0 }
 0x15e   :  { %v4271_v29 = vadd.f32 %v1990_v25, %v1781_v22  ;;  %v1992_v31 = vpop.f32.mrb[37].mxu1  ;;  %v1784_v32 = vpop.f32.mrb[38].mxu0  ;;  %v3106_v22 = vcombine.high %v245_v5, %v249_v6  ;;  %v3108_v25 = vcombine.high %v246_v10, %v250_v11 }
 0x15f   :  { %v1993_v36 = vpop.f32.mrb[38].mxu1  ;;  %v1786_v37 = vpop.f32.mrb[39].mxu0  ;;  %v253_v31 = vld [vmem:[%s4555_s0 + $0x490] sm:$0xff] }
 0x160   :  { %v4273_v41 = vadd.f32 %v1993_v36, %v1784_v32  ;;  %v1995_v42 = vpop.f32.mrb[39].mxu1  ;;  %v257_v32 = vld [vmem:[%s4555_s0 + $0x4b0] sm:$0xff]  ;;  %v258_v36 = vld [vmem:[%s4555_s0 + $0x4b8] sm:$0xff] }
 0x161   :  { %2238 = vmatmul.mubr.bf16.gmra.mrb[144].mxu0 %v3081_v28  ;;  %v3105_v42 = vcombine.low %v245_v5, %v249_v6  ;;  %v3114_v49 = vcombine.high %v253_v31, %v257_v32  ;;  %v3113_v6 = vcombine.low %v253_v31, %v257_v32  ;;  %v274_v31 = vld [vmem:[%s4555_s0 + $0x538] sm:$0xff] }
 0x162   :  { %2447 = vmatmul.mubr.bf16.gmra.mrb[144].mxu1 %v3083_v33  ;;  %2245 = vmatprep.mubr.bf16.mxu0 %v3090_v34  ;;  %v254_v34 = vld [vmem:[%s4555_s0 + $0x498] sm:$0xff] }
 0x163   :  { %2454 = vmatprep.mubr.bf16.mxu1 %v3092_v39 }
 0x164   :  { %v1789_v45 = vpop.f32.mrb[40].mxu0 }
 0x165   :  { %v1998_v51 = vpop.f32.mrb[40].mxu1  ;;  %v1791_v52 = vpop.f32.mrb[41].mxu0 }
 0x166   :  { %v4287_v54 = vadd.f32 %v1998_v51, %v1789_v45  ;;  %v2000_v55 = vpop.f32.mrb[41].mxu1  ;;  %v1792_v56 = vpop.f32.mrb[42].mxu0 }
 0x167   :  { %v2001_v62 = vpop.f32.mrb[42].mxu1  ;;  %v1794_v63 = vpop.f32.mrb[43].mxu0 }
 0x168   :  { %v4289_v2 = vadd.f32 %v2001_v62, %v1792_v56  ;;  %v2003_v4 = vpop.f32.mrb[43].mxu1  ;;  %v262_v63 = vld [vmem:[%s4555_s0 + $0x4d8] sm:$0xff] }
 0x169   :  { %2246 = vmatmul.mubr.bf16.gmra.mrb[148].mxu0 %v3089_v53  ;;  %v3116_v53 = vcombine.high %v254_v34, %v258_v36 }
 0x16a   :  { %2455 = vmatmul.mubr.bf16.gmra.mrb[148].mxu1 %v3091_v60  ;;  %2253 = vmatprep.mubr.bf16.mxu0 %v3098_v61  ;;  %v261_v60 = vld [vmem:[%s4555_s0 + $0x4d0] sm:$0xff] }
 0x16b   :  { %2462 = vmatprep.mubr.bf16.mxu1 %v3100_v1  ;;  %v265_v61 = vld [vmem:[%s4555_s0 + $0x4f0] sm:$0xff]  ;;  %v266_v1 = vld [vmem:[%s4555_s0 + $0x4f8] sm:$0xff] }
 0x16c   :  { %v1797_v9 = vpop.f32.mrb[44].mxu0 }
 0x16d   :  { %v2006_v12 = vpop.f32.mrb[44].mxu1  ;;  %v1799_v14 = vpop.f32.mrb[45].mxu0 }
 0x16e   :  { %v4303_v17 = vadd.f32 %v2006_v12, %v1797_v9  ;;  %v2008_v0 = vpop.f32.mrb[45].mxu1  ;;  %v1800_v19 = vpop.f32.mrb[46].mxu0  ;;  %v3115_v12 = vcombine.low %v254_v34, %v258_v36  ;;  %v3122_v14 = vcombine.high %v261_v60, %v265_v61  ;;  %v3121_v34 = vcombine.low %v261_v60, %v265_v61  ;;  %v278_v61 = vld [vmem:[%s4555_s0 + $0x558] sm:$0xff] }
 0x16f   :  { %v2009_v23 = vpop.f32.mrb[46].mxu1  ;;  %v1802_v24 = vpop.f32.mrb[47].mxu0 }
 0x170   :  { %v4305_v27 = vadd.f32 %v2009_v23, %v1800_v19  ;;  %v2011_v28 = vpop.f32.mrb[47].mxu1  ;;  %v3124_v19 = vcombine.high %v262_v63, %v266_v1  ;;  %v269_v23 = vld [vmem:[%s4555_s0 + $0x510] sm:$0xff] }
 0x171   :  { %2254 = vmatmul.mubr.bf16.gmra.mrb[152].mxu0 %v3097_v15  ;;  %v273_v24 = vld [vmem:[%s4555_s0 + $0x530] sm:$0xff]  ;;  %v270_v28 = vld [vmem:[%s4555_s0 + $0x518] sm:$0xff] }
 0x172   :  { %2463 = vmatmul.mubr.bf16.gmra.mrb[152].mxu1 %v3099_v21  ;;  %2261 = vmatprep.mubr.bf16.mxu0 %v3106_v22 }
 0x173   :  { %2470 = vmatprep.mubr.bf16.mxu1 %v3108_v25 }
 0x174   :  { %v1805_v33 = vpop.f32.mrb[48].mxu0 }
 0x175   :  { %v2014_v37 = vpop.f32.mrb[48].mxu1  ;;  %v1807_v39 = vpop.f32.mrb[49].mxu0 }
 0x176   :  { %v4319_v43 = vadd.f32 %v2014_v37, %v1805_v33  ;;  %v2016_v44 = vpop.f32.mrb[49].mxu1  ;;  %v1808_v45 = vpop.f32.mrb[50].mxu0 }
 0x177   :  { %v2017_v51 = vpop.f32.mrb[50].mxu1  ;;  %v1810_v52 = vpop.f32.mrb[51].mxu0  ;;  %v3130_v44 = vcombine.high %v269_v23, %v273_v24 }
 0x178   :  { %v4321_v55 = vadd.f32 %v2017_v51, %v1808_v45  ;;  %v2019_v56 = vpop.f32.mrb[51].mxu1 }
 0x179   :  { %2262 = vmatmul.mubr.bf16.gmra.mrb[156].mxu0 %v3105_v42  ;;  %v3123_v42 = vcombine.low %v262_v63, %v266_v1  ;;  %v281_v56 = vld [vmem:[%s4555_s0 + $0x570] sm:$0xff] }
 0x17a   :  { %2471 = vmatmul.mubr.bf16.gmra.mrb[156].mxu1 %v3107_v46  ;;  %2269 = vmatprep.mubr.bf16.mxu0 %v3114_v49  ;;  %v3132_v49 = vcombine.high %v270_v28, %v274_v31 }
 0x17b   :  { %2478 = vmatprep.mubr.bf16.mxu1 %v3116_v53  ;;  %v277_v53 = vld [vmem:[%s4555_s0 + $0x550] sm:$0xff] }
 0x17c   :  { %v1813_v62 = vpop.f32.mrb[52].mxu0 }
 0x17d   :  { %v2022_v4 = vpop.f32.mrb[52].mxu1  ;;  %v1815_v5 = vpop.f32.mrb[53].mxu0 }
 0x17e   :  { %v4335_v9 = vadd.f32 %v2022_v4, %v1813_v62  ;;  %v2024_v10 = vpop.f32.mrb[53].mxu1  ;;  %v1816_v11 = vpop.f32.mrb[54].mxu0  ;;  %v282_v62 = vld [vmem:[%s4555_s0 + $0x578] sm:$0xff]  ;;  %v3129_v4 = vcombine.low %v269_v23, %v273_v24  ;;  %v3137_v23 = vcombine.low %v277_v53, %v281_v56 }
 0x17f   :  { %v2025_v15 = vpop.f32.mrb[54].mxu1  ;;  %v1818_v0 = vpop.f32.mrb[55].mxu0 }
 0x180   :  { %v4337_v21 = vadd.f32 %v2025_v15, %v1816_v11  ;;  %v2027_v22 = vpop.f32.mrb[55].mxu1  ;;  %v3131_v11 = vcombine.low %v270_v28, %v274_v31  ;;  %v3140_v0 = vcombine.high %v278_v61, %v282_v62  ;;  %v3139_v28 = vcombine.low %v278_v61, %v282_v62 }
 0x181   :  { %2270 = vmatmul.mubr.bf16.gmra.mrb[160].mxu0 %v3113_v6 }
 0x182   :  { %2479 = vmatmul.mubr.bf16.gmra.mrb[160].mxu1 %v3115_v12  ;;  %2277 = vmatprep.mubr.bf16.mxu0 %v3122_v14  ;;  %v3138_v12 = vcombine.high %v277_v53, %v281_v56 }
 0x183   :  { %2486 = vmatprep.mubr.bf16.mxu1 %v3124_v19 }
 0x184   :  { %v1821_v25 = vpop.f32.mrb[56].mxu0 }
 0x185   :  { %v2030_v32 = vpop.f32.mrb[56].mxu1  ;;  %v1823_v33 = vpop.f32.mrb[57].mxu0 }
 0x186   :  { %v4351_v36 = vadd.f32 %v2030_v32, %v1821_v25  ;;  %v2032_v37 = vpop.f32.mrb[57].mxu1  ;;  %v1824_v39 = vpop.f32.mrb[58].mxu0 }
 0x187   :  { %v2033_v45 = vpop.f32.mrb[58].mxu1  ;;  %v1826_v46 = vpop.f32.mrb[59].mxu0 }
 0x188   :  { %v4353_v51 = vadd.f32 %v2033_v45, %v1824_v39  ;;  %v2035_v52 = vpop.f32.mrb[59].mxu1 }
 0x189   :  { %2278 = vmatmul.mubr.bf16.gmra.mrb[164].mxu0 %v3121_v34 }
 0x18a   :  { %2487 = vmatmul.mubr.bf16.gmra.mrb[164].mxu1 %v3123_v42  ;;  %2285 = vmatprep.mubr.bf16.mxu0 %v3130_v44 }
 0x18b   :  { %2494 = vmatprep.mubr.bf16.mxu1 %v3132_v49 }
 0x18c   :  { %v1829_v60 = vpop.f32.mrb[60].mxu0 }
 0x18d   :  { %v2038_v63 = vpop.f32.mrb[60].mxu1  ;;  %v1831_v1 = vpop.f32.mrb[61].mxu0 }
 0x18e   :  { %v4367_v5 = vadd.f32 %v2038_v63, %v1829_v60  ;;  %v2040_v6 = vpop.f32.mrb[61].mxu1  ;;  %v1832_v10 = vpop.f32.mrb[62].mxu0 }
 0x18f   :  { %v2041_v14 = vpop.f32.mrb[62].mxu1  ;;  %v1834_v15 = vpop.f32.mrb[63].mxu0 }
 0x190   :  { %v4369_v19 = vadd.f32 %v2041_v14, %v1832_v10  ;;  %v2043_v22 = vpop.f32.mrb[63].mxu1 }
 0x191   :  { %2286 = vmatmul.mubr.bf16.gmra.mrb[168].mxu0 %v3129_v4 }
 0x192   :  { %2495 = vmatmul.mubr.bf16.gmra.mrb[168].mxu1 %v3131_v11  ;;  %2293 = vmatprep.mubr.bf16.mxu0 %v3138_v12 }
 0x193   :  { %2502 = vmatprep.mubr.bf16.mxu1 %v3140_v0 }
 0x194   :  { %v1837_v25 = vpop.f32.mrb[64].mxu0 }
 0x195   :  { %v2046_v32 = vpop.f32.mrb[64].mxu1  ;;  %v1839_v33 = vpop.f32.mrb[65].mxu0 }
 0x196   :  { %v4371_v24 = vadd.f32 %v2046_v32, %v1837_v25  ;;  %v2048_v34 = vpop.f32.mrb[65].mxu1  ;;  %v1840_v37 = vpop.f32.mrb[66].mxu0 }
 0x197   :  { %v2049_v31 = vpop.f32.mrb[66].mxu1  ;;  %v1842_v39 = vpop.f32.mrb[67].mxu0 }
 0x198   :  { %v4373_v42 = vadd.f32 %v2049_v31, %v1840_v37  ;;  %v2051_v44 = vpop.f32.mrb[67].mxu1 }
 0x199   :  { %2294 = vmatmul.mubr.bf16.gmra.mrb[172].mxu0 %v3137_v23 }
 0x19a   :  { %2503 = vmatmul.mubr.bf16.gmra.mrb[172].mxu1 %v3139_v28 }
 0x19c   :  { %v1845_v45 = vpop.f32.mrb[68].mxu0 }
 0x19d   :  { %v2054_v46 = vpop.f32.mrb[68].mxu1  ;;  %v1847_v49 = vpop.f32.mrb[69].mxu0 }
 0x19e   :  { %v4375_v52 = vadd.f32 %v2054_v46, %v1845_v45  ;;  %v2056_v60 = vpop.f32.mrb[69].mxu1  ;;  %v1848_v63 = vpop.f32.mrb[70].mxu0 }
 0x19f   :  { %v2057_v53 = vpop.f32.mrb[70].mxu1  ;;  %v1850_v56 = vpop.f32.mrb[71].mxu0 }
 0x1a0   :  { %v4377_v1 = vadd.f32 %v2057_v53, %v1848_v63  ;;  %v2059_v4 = vpop.f32.mrb[71].mxu1 }
 0x1a4   :  { %v1853_v61 = vpop.f32.mrb[72].mxu0 }
 0x1a5   :  { %v2062_v62 = vpop.f32.mrb[72].mxu1  ;;  %v1855_v6 = vpop.f32.mrb[73].mxu0 }
 0x1a6   :  { %v4379_v10 = vadd.f32 %v2062_v62, %v1853_v61  ;;  %v2064_v11 = vpop.f32.mrb[73].mxu1  ;;  %v1856_v12 = vpop.f32.mrb[74].mxu0 }
 0x1a7   :  { %v2065_v14 = vpop.f32.mrb[74].mxu1  ;;  %v1858_v15 = vpop.f32.mrb[75].mxu0 }
 0x1a8   :  { %v4381_v0 = vadd.f32 %v2065_v14, %v1856_v12  ;;  %v2067_v22 = vpop.f32.mrb[75].mxu1 }
 0x1ac   :  { %v1861_v25 = vpop.f32.mrb[76].mxu0 }
 0x1ad   :  { %v2070_v32 = vpop.f32.mrb[76].mxu1  ;;  %v1863_v33 = vpop.f32.mrb[77].mxu0 }
 0x1ae   :  { %v4383_v23 = vadd.f32 %v2070_v32, %v1861_v25  ;;  %v2072_v34 = vpop.f32.mrb[77].mxu1  ;;  %v1864_v37 = vpop.f32.mrb[78].mxu0 }
 0x1af   :  { %v2073_v28 = vpop.f32.mrb[78].mxu1  ;;  %v1866_v31 = vpop.f32.mrb[79].mxu0 }
 0x1b0   :  { %v4385_v39 = vadd.f32 %v2073_v28, %v1864_v37  ;;  %v2075_v44 = vpop.f32.mrb[79].mxu1 }
 0x1b4   :  { %v1869_v45 = vpop.f32.mrb[80].mxu0 }
 0x1b5   :  { %v2078_v46 = vpop.f32.mrb[80].mxu1  ;;  %v1871_v49 = vpop.f32.mrb[81].mxu0 }
 0x1b6   :  { %v4387_v60 = vadd.f32 %v2078_v46, %v1869_v45  ;;  %v2080_v63 = vpop.f32.mrb[81].mxu1  ;;  %v1872_v53 = vpop.f32.mrb[82].mxu0  ;;  %v4399_v45 = vld [vmem:[%s4556_s2] ss:$0 sm:$0xff] }
 0x1b7   :  { %v2081_v56 = vpop.f32.mrb[82].mxu1  ;;  %v1874_v4 = vpop.f32.mrb[83].mxu0 }
 0x1b8   :  { %v4389_v61 = vadd.f32 %v2081_v56, %v1872_v53  ;;  %v2083_v62 = vpop.f32.mrb[83].mxu1 }
 0x1bc   :  { %v1877_v6 = vpop.f32.mrb[84].mxu0 }
 0x1bd   :  { %v2086_v11 = vpop.f32.mrb[84].mxu1  ;;  %v1879_v12 = vpop.f32.mrb[85].mxu0 }
 0x1be   :  { %v4391_v14 = vadd.f32 %v2086_v11, %v1877_v6  ;;  %v2088_v15 = vpop.f32.mrb[85].mxu1  ;;  %v1880_v22 = vpop.f32.mrb[86].mxu0 }
 0x1bf   :  { %v2089_v25 = vpop.f32.mrb[86].mxu1  ;;  %v1882_v32 = vpop.f32.mrb[87].mxu0 }
 0x1c0   :  { %v4393_v33 = vadd.f32 %v2089_v25, %v1880_v22  ;;  %v2091_v34 = vpop.f32.mrb[87].mxu1 }
 0x1c4   :  { %v2127_v37 = vpop.f32.mrb[88].mxu0 }
 0x1c5   :  { %v2128_v28 = vadd.f32 %v2127_v37, %v4127_v40  ;;  %v2336_v31 = vpop.f32.mrb[88].mxu1  ;;  %v2129_v44 = vpop.f32.mrb[89].mxu0 }
 0x1c6   :  { %v2338_v46 = vpop.f32.mrb[89].mxu1  ;;  %v2130_v49 = vpop.f32.mrb[90].mxu0 }
 0x1c7   :  { %v2337_v63 = vadd.f32 %v2336_v31, %v2128_v28  ;;  %v2131_v53 = vadd.f32 %v2130_v49, %v4129_v48  ;;  %v2339_v56 = vpop.f32.mrb[90].mxu1  ;;  %v2132_v4 = vpop.f32.mrb[91].mxu0 }
 0x1c8   :  { %v2341_v62 = vpop.f32.mrb[91].mxu1 }
 0x1c9   :  { %v2653_v6 = vadd.f32 %v4399_v45, %v2337_v63  ;;  %v2340_v11 = vadd.f32 %v2339_v56, %v2131_v53 }
 0x1cb   :  { %v2654_v40 = vadd.f32 %v4399_v45, %v2340_v11  ;;  %v2697_v15 = vmax.f32 %v2653_v6, 0.0 }
 0x1cc   :  { %v2135_v12 = vpop.f32.mrb[92].mxu0 }
 0x1cd   :  { %v2698_v22 = vmax.f32 %v2654_v40, 0.0  ;;  %v2136_v25 = vadd.f32 %v2135_v12, %v4143_v58  ;;  %v2344_v32 = vpop.f32.mrb[92].mxu1  ;;  %v2137_v34 = vpop.f32.mrb[93].mxu0 }
 0x1ce   :  { %v2346_v37 = vpop.f32.mrb[93].mxu1  ;;  %v2138_v44 = vpop.f32.mrb[94].mxu0 }
 0x1cf   :  { %v3297_v28 = vpack.c.bf16 %v2698_v22, %v2697_v15  ;;  %v2345_v31 = vadd.f32 %v2344_v32, %v2136_v25  ;;  %v2139_v48 = vadd.f32 %v2138_v44, %v4145_v3  ;;  %v2347_v46 = vpop.f32.mrb[94].mxu1  ;;  %v2140_v49 = vpop.f32.mrb[95].mxu0 }
 0x1d0   :  { %v2349_v4 = vpop.f32.mrb[95].mxu1 }
 0x1d1   :  { %3298 = vst [vmem:[%s4557_s3] sm:$0xff] %v3297_v28   ;;  %v2655_v63 = vadd.f32 %v4399_v45, %v2345_v31  ;;  %v2348_v53 = vadd.f32 %v2347_v46, %v2139_v48 }
 0x1d3   :  { %v2656_v58 = vadd.f32 %v4399_v45, %v2348_v53  ;;  %v2699_v62 = vmax.f32 %v2655_v63, 0.0 }
 0x1d4   :  { %v2143_v56 = vpop.f32.mrb[96].mxu0 }
 0x1d5   :  { %v2700_v6 = vmax.f32 %v2656_v58, 0.0  ;;  %v2144_v11 = vadd.f32 %v2143_v56, %v4159_v13  ;;  %v2352_v40 = vpop.f32.mrb[96].mxu1  ;;  %v2145_v12 = vpop.f32.mrb[97].mxu0 }
 0x1d6   :  { %v2354_v3 = vpop.f32.mrb[97].mxu1  ;;  %v2146_v15 = vpop.f32.mrb[98].mxu0 }
 0x1d7   :  { %v3302_v22 = vpack.c.bf16 %v2700_v6, %v2699_v62  ;;  %v2353_v25 = vadd.f32 %v2352_v40, %v2144_v11  ;;  %v2147_v32 = vadd.f32 %v2146_v15, %v4161_v20  ;;  %v2355_v34 = vpop.f32.mrb[98].mxu1  ;;  %v2148_v37 = vpop.f32.mrb[99].mxu0 }
 0x1d8   :  { %v2357_v44 = vpop.f32.mrb[99].mxu1 }
 0x1d9   :  { %3404 = vst [vmem:[%s4557_s3 + $0x8] sm:$0xff] %v3302_v22   ;;  %v2657_v28 = vadd.f32 %v4399_v45, %v2353_v25  ;;  %v2356_v31 = vadd.f32 %v2355_v34, %v2147_v32 }
 0x1db   :  { %v2658_v13 = vadd.f32 %v4399_v45, %v2356_v31  ;;  %v2701_v46 = vmax.f32 %v2657_v28, 0.0 }
 0x1dc   :  { %v2151_v48 = vpop.f32.mrb[100].mxu0 }
 0x1dd   :  { %v2702_v49 = vmax.f32 %v2658_v13, 0.0  ;;  %v2152_v4 = vadd.f32 %v2151_v48, %v4175_v30  ;;  %v2360_v63 = vpop.f32.mrb[100].mxu1  ;;  %v2153_v53 = vpop.f32.mrb[101].mxu0 }
 0x1de   :  { %v2362_v20 = vpop.f32.mrb[101].mxu1  ;;  %v2154_v58 = vpop.f32.mrb[102].mxu0 }
 0x1df   :  { %v3307_v56 = vpack.c.bf16 %v2702_v49, %v2701_v46  ;;  %v2361_v62 = vadd.f32 %v2360_v63, %v2152_v4  ;;  %v2155_v6 = vadd.f32 %v2154_v58, %v4177_v38  ;;  %v2363_v11 = vpop.f32.mrb[102].mxu1  ;;  %v2156_v40 = vpop.f32.mrb[103].mxu0 }
 0x1e0   :  { %v2365_v12 = vpop.f32.mrb[103].mxu1 }
 0x1e1   :  { %3405 = vst [vmem:[%s4557_s3 + $0x10] sm:$0xff] %v3307_v56   ;;  %v2659_v3 = vadd.f32 %v4399_v45, %v2361_v62  ;;  %v2364_v15 = vadd.f32 %v2363_v11, %v2155_v6 }
 0x1e3   :  { %v2660_v30 = vadd.f32 %v4399_v45, %v2364_v15  ;;  %v2703_v25 = vmax.f32 %v2659_v3, 0.0 }
 0x1e4   :  { %v2159_v22 = vpop.f32.mrb[104].mxu0 }
 0x1e5   :  { %v2704_v32 = vmax.f32 %v2660_v30, 0.0  ;;  %v2160_v34 = vadd.f32 %v2159_v22, %v4191_v50  ;;  %v2368_v37 = vpop.f32.mrb[104].mxu1  ;;  %v2161_v44 = vpop.f32.mrb[105].mxu0 }
 0x1e6   :  { %v2370_v38 = vpop.f32.mrb[105].mxu1  ;;  %v2162_v28 = vpop.f32.mrb[106].mxu0 }
 0x1e7   :  { %v3312_v31 = vpack.c.bf16 %v2704_v32, %v2703_v25  ;;  %v2369_v13 = vadd.f32 %v2368_v37, %v2160_v34  ;;  %v2163_v48 = vadd.f32 %v2162_v28, %v4193_v59  ;;  %v2371_v46 = vpop.f32.mrb[106].mxu1  ;;  %v2164_v49 = vpop.f32.mrb[107].mxu0 }
 0x1e8   :  { %v2373_v4 = vpop.f32.mrb[107].mxu1 }
 0x1e9   :  { %3406 = vst [vmem:[%s4557_s3 + $0x18] sm:$0xff] %v3312_v31   ;;  %v2661_v63 = vadd.f32 %v4399_v45, %v2369_v13  ;;  %v2372_v53 = vadd.f32 %v2371_v46, %v2163_v48 }
 0x1eb   :  { %v2662_v50 = vadd.f32 %v4399_v45, %v2372_v53  ;;  %v2705_v58 = vmax.f32 %v2661_v63, 0.0 }
 0x1ec   :  { %v2167_v20 = vpop.f32.mrb[108].mxu0 }
 0x1ed   :  { %v2706_v56 = vmax.f32 %v2662_v50, 0.0  ;;  %v2168_v62 = vadd.f32 %v2167_v20, %v4207_v7  ;;  %v2376_v6 = vpop.f32.mrb[108].mxu1  ;;  %v2169_v11 = vpop.f32.mrb[109].mxu0 }
 0x1ee   :  { %v2378_v59 = vpop.f32.mrb[109].mxu1  ;;  %v2170_v40 = vpop.f32.mrb[110].mxu0 }
 0x1ef   :  { %v3317_v12 = vpack.c.bf16 %v2706_v56, %v2705_v58  ;;  %v2377_v3 = vadd.f32 %v2376_v6, %v2168_v62  ;;  %v2171_v15 = vadd.f32 %v2170_v40, %v4209_v16  ;;  %v2379_v30 = vpop.f32.mrb[110].mxu1  ;;  %v2172_v22 = vpop.f32.mrb[111].mxu0 }
 0x1f0   :  { %v2381_v25 = vpop.f32.mrb[111].mxu1 }
 0x1f1   :  { %3407 = vst [vmem:[%s4557_s3 + $0x20] sm:$0xff] %v3317_v12   ;;  %v2663_v32 = vadd.f32 %v4399_v45, %v2377_v3  ;;  %v2380_v34 = vadd.f32 %v2379_v30, %v2171_v15 }
 0x1f3   :  { %v2664_v7 = vadd.f32 %v4399_v45, %v2380_v34  ;;  %v2707_v44 = vmax.f32 %v2663_v32, 0.0 }
 0x1f4   :  { %v2175_v37 = vpop.f32.mrb[112].mxu0 }
 0x1f5   :  { %v2708_v38 = vmax.f32 %v2664_v7, 0.0  ;;  %v2176_v28 = vadd.f32 %v2175_v37, %v4223_v26  ;;  %v2384_v31 = vpop.f32.mrb[112].mxu1  ;;  %v2177_v13 = vpop.f32.mrb[113].mxu0 }
 0x1f6   :  { %v2386_v16 = vpop.f32.mrb[113].mxu1  ;;  %v2178_v48 = vpop.f32.mrb[114].mxu0 }
 0x1f7   :  { %v3322_v46 = vpack.c.bf16 %v2708_v38, %v2707_v44  ;;  %v2385_v49 = vadd.f32 %v2384_v31, %v2176_v28  ;;  %v2179_v4 = vadd.f32 %v2178_v48, %v4225_v35  ;;  %v2387_v63 = vpop.f32.mrb[114].mxu1  ;;  %v2180_v53 = vpop.f32.mrb[115].mxu0 }
 0x1f8   :  { %v2389_v50 = vpop.f32.mrb[115].mxu1 }
 0x1f9   :  { %3408 = vst [vmem:[%s4557_s3 + $0x28] sm:$0xff] %v3322_v46   ;;  %v2665_v20 = vadd.f32 %v4399_v45, %v2385_v49  ;;  %v2388_v58 = vadd.f32 %v2387_v63, %v2179_v4 }
 0x1fb   :  { %v2666_v26 = vadd.f32 %v4399_v45, %v2388_v58  ;;  %v2709_v62 = vmax.f32 %v2665_v20, 0.0 }
 0x1fc   :  { %v2183_v56 = vpop.f32.mrb[116].mxu0 }
 0x1fd   :  { %v2710_v6 = vmax.f32 %v2666_v26, 0.0  ;;  %v2184_v11 = vadd.f32 %v2183_v56, %v4239_v47  ;;  %v2392_v59 = vpop.f32.mrb[116].mxu1  ;;  %v2185_v40 = vpop.f32.mrb[117].mxu0 }
 0x1fe   :  { %v2394_v35 = vpop.f32.mrb[117].mxu1  ;;  %v2186_v12 = vpop.f32.mrb[118].mxu0 }
 0x1ff   :  { %v3327_v3 = vpack.c.bf16 %v2710_v6, %v2709_v62  ;;  %v2393_v15 = vadd.f32 %v2392_v59, %v2184_v11  ;;  %v2187_v30 = vadd.f32 %v2186_v12, %v4241_v57  ;;  %v2395_v22 = vpop.f32.mrb[118].mxu1  ;;  %v2188_v25 = vpop.f32.mrb[119].mxu0 }
 0x200   :  { %v2397_v32 = vpop.f32.mrb[119].mxu1 }
 0x201   :  { %3409 = vst [vmem:[%s4557_s3 + $0x30] sm:$0xff] %v3327_v3   ;;  %v2667_v34 = vadd.f32 %v4399_v45, %v2393_v15  ;;  %v2396_v7 = vadd.f32 %v2395_v22, %v2187_v30 }
 0x203   :  { %v2668_v47 = vadd.f32 %v4399_v45, %v2396_v7  ;;  %v2711_v44 = vmax.f32 %v2667_v34, 0.0 }
 0x204   :  { %v2191_v37 = vpop.f32.mrb[120].mxu0 }
 0x205   :  { %v2712_v38 = vmax.f32 %v2668_v47, 0.0  ;;  %v2192_v28 = vadd.f32 %v2191_v37, %v4255_v8  ;;  %v2400_v31 = vpop.f32.mrb[120].mxu1  ;;  %v2193_v13 = vpop.f32.mrb[121].mxu0 }
 0x206   :  { %v2402_v57 = vpop.f32.mrb[121].mxu1  ;;  %v2194_v16 = vpop.f32.mrb[122].mxu0 }
 0x207   :  { %v3332_v48 = vpack.c.bf16 %v2712_v38, %v2711_v44  ;;  %v2401_v46 = vadd.f32 %v2400_v31, %v2192_v28  ;;  %v2195_v49 = vadd.f32 %v2194_v16, %v4257_v18  ;;  %v2403_v4 = vpop.f32.mrb[122].mxu1  ;;  %v2196_v63 = vpop.f32.mrb[123].mxu0 }
 0x208   :  { %v2405_v53 = vpop.f32.mrb[123].mxu1 }
 0x209   :  { %3410 = vst [vmem:[%s4557_s3 + $0x38] sm:$0xff] %v3332_v48   ;;  %v2669_v50 = vadd.f32 %v4399_v45, %v2401_v46  ;;  %v2404_v20 = vadd.f32 %v2403_v4, %v2195_v49 }
 0x20b   :  { %v2670_v8 = vadd.f32 %v4399_v45, %v2404_v20  ;;  %v2713_v26 = vmax.f32 %v2669_v50, 0.0 }
 0x20c   :  { %v2199_v58 = vpop.f32.mrb[124].mxu0 }
 0x20d   :  { %v2714_v56 = vmax.f32 %v2670_v8, 0.0  ;;  %v2200_v62 = vadd.f32 %v2199_v58, %v4271_v29  ;;  %v2408_v6 = vpop.f32.mrb[124].mxu1  ;;  %v2201_v11 = vpop.f32.mrb[125].mxu0 }
 0x20e   :  { %v2410_v18 = vpop.f32.mrb[125].mxu1  ;;  %v2202_v59 = vpop.f32.mrb[126].mxu0 }
 0x20f   :  { %v3337_v40 = vpack.c.bf16 %v2714_v56, %v2713_v26  ;;  %v2409_v35 = vadd.f32 %v2408_v6, %v2200_v62  ;;  %v2203_v12 = vadd.f32 %v2202_v59, %v4273_v41  ;;  %v2411_v3 = vpop.f32.mrb[126].mxu1  ;;  %v2204_v15 = vpop.f32.mrb[127].mxu0 }
 0x210   :  { %v2413_v30 = vpop.f32.mrb[127].mxu1 }
 0x211   :  { %3411 = vst [vmem:[%s4557_s3 + $0x40] sm:$0xff] %v3337_v40   ;;  %v2671_v22 = vadd.f32 %v4399_v45, %v2409_v35  ;;  %v2412_v25 = vadd.f32 %v2411_v3, %v2203_v12 }
 0x213   :  { %v2672_v29 = vadd.f32 %v4399_v45, %v2412_v25  ;;  %v2715_v34 = vmax.f32 %v2671_v22, 0.0 }
 0x214   :  { %v2207_v32 = vpop.f32.mrb[128].mxu0 }
 0x215   :  { %v2716_v7 = vmax.f32 %v2672_v29, 0.0  ;;  %v2208_v47 = vadd.f32 %v2207_v32, %v4287_v54  ;;  %v2416_v37 = vpop.f32.mrb[128].mxu1  ;;  %v2209_v44 = vpop.f32.mrb[129].mxu0 }
 0x216   :  { %v2418_v41 = vpop.f32.mrb[129].mxu1  ;;  %v2210_v38 = vpop.f32.mrb[130].mxu0 }
 0x217   :  { %v3342_v28 = vpack.c.bf16 %v2716_v7, %v2715_v34  ;;  %v2417_v31 = vadd.f32 %v2416_v37, %v2208_v47  ;;  %v2211_v13 = vadd.f32 %v2210_v38, %v4289_v2  ;;  %v2419_v57 = vpop.f32.mrb[130].mxu1  ;;  %v2212_v16 = vpop.f32.mrb[131].mxu0 }
 0x218   :  { %v2421_v48 = vpop.f32.mrb[131].mxu1 }
 0x219   :  { %3412 = vst [vmem:[%s4557_s3 + $0x48] sm:$0xff] %v3342_v28   ;;  %v2673_v46 = vadd.f32 %v4399_v45, %v2417_v31  ;;  %v2420_v49 = vadd.f32 %v2419_v57, %v2211_v13 }
 0x21b   :  { %v2674_v54 = vadd.f32 %v4399_v45, %v2420_v49  ;;  %v2717_v63 = vmax.f32 %v2673_v46, 0.0 }
 0x21c   :  { %v2215_v4 = vpop.f32.mrb[132].mxu0 }
 0x21d   :  { %v2718_v53 = vmax.f32 %v2674_v54, 0.0  ;;  %v2216_v50 = vadd.f32 %v2215_v4, %v4303_v17  ;;  %v2424_v20 = vpop.f32.mrb[132].mxu1  ;;  %v2217_v8 = vpop.f32.mrb[133].mxu0 }
 0x21e   :  { %v2426_v2 = vpop.f32.mrb[133].mxu1  ;;  %v2218_v58 = vpop.f32.mrb[134].mxu0 }
 0x21f   :  { %v3347_v26 = vpack.c.bf16 %v2718_v53, %v2717_v63  ;;  %v2425_v56 = vadd.f32 %v2424_v20, %v2216_v50  ;;  %v2219_v62 = vadd.f32 %v2218_v58, %v4305_v27  ;;  %v2427_v6 = vpop.f32.mrb[134].mxu1  ;;  %v2220_v11 = vpop.f32.mrb[135].mxu0 }
 0x220   :  { %v2429_v18 = vpop.f32.mrb[135].mxu1 }
 0x221   :  { %3413 = vst [vmem:[%s4557_s3 + $0x50] sm:$0xff] %v3347_v26   ;;  %v2675_v59 = vadd.f32 %v4399_v45, %v2425_v56  ;;  %v2428_v40 = vadd.f32 %v2427_v6, %v2219_v62 }
 0x223   :  { %v2676_v17 = vadd.f32 %v4399_v45, %v2428_v40  ;;  %v2719_v12 = vmax.f32 %v2675_v59, 0.0 }
 0x224   :  { %v2223_v35 = vpop.f32.mrb[136].mxu0 }
 0x225   :  { %v2720_v3 = vmax.f32 %v2676_v17, 0.0  ;;  %v2224_v15 = vadd.f32 %v2223_v35, %v4319_v43  ;;  %v2432_v30 = vpop.f32.mrb[136].mxu1  ;;  %v2225_v22 = vpop.f32.mrb[137].mxu0 }
 0x226   :  { %v2434_v27 = vpop.f32.mrb[137].mxu1  ;;  %v2226_v25 = vpop.f32.mrb[138].mxu0 }
 0x227   :  { %v3352_v29 = vpack.c.bf16 %v2720_v3, %v2719_v12  ;;  %v2433_v32 = vadd.f32 %v2432_v30, %v2224_v15  ;;  %v2227_v34 = vadd.f32 %v2226_v25, %v4321_v55  ;;  %v2435_v7 = vpop.f32.mrb[138].mxu1  ;;  %v2228_v47 = vpop.f32.mrb[139].mxu0 }
 0x228   :  { %v2437_v37 = vpop.f32.mrb[139].mxu1 }
 0x229   :  { %3414 = vst [vmem:[%s4557_s3 + $0x58] sm:$0xff] %v3352_v29   ;;  %v2677_v44 = vadd.f32 %v4399_v45, %v2433_v32  ;;  %v2436_v41 = vadd.f32 %v2435_v7, %v2227_v34 }
 0x22b   :  { %v2678_v43 = vadd.f32 %v4399_v45, %v2436_v41  ;;  %v2721_v28 = vmax.f32 %v2677_v44, 0.0 }
 0x22c   :  { %v2231_v38 = vpop.f32.mrb[140].mxu0 }
 0x22d   :  { %v2722_v31 = vmax.f32 %v2678_v43, 0.0  ;;  %v2232_v13 = vadd.f32 %v2231_v38, %v4335_v9  ;;  %v2440_v57 = vpop.f32.mrb[140].mxu1  ;;  %v2233_v16 = vpop.f32.mrb[141].mxu0 }
 0x22e   :  { %v2442_v55 = vpop.f32.mrb[141].mxu1  ;;  %v2234_v48 = vpop.f32.mrb[142].mxu0 }
 0x22f   :  { %v3357_v46 = vpack.c.bf16 %v2722_v31, %v2721_v28  ;;  %v2441_v49 = vadd.f32 %v2440_v57, %v2232_v13  ;;  %v2235_v54 = vadd.f32 %v2234_v48, %v4337_v21  ;;  %v2443_v4 = vpop.f32.mrb[142].mxu1  ;;  %v2236_v63 = vpop.f32.mrb[143].mxu0 }
 0x230   :  { %v2445_v53 = vpop.f32.mrb[143].mxu1 }
 0x231   :  { %3415 = vst [vmem:[%s4557_s3 + $0x60] sm:$0xff] %v3357_v46   ;;  %v2679_v50 = vadd.f32 %v4399_v45, %v2441_v49  ;;  %v2444_v20 = vadd.f32 %v2443_v4, %v2235_v54 }
 0x233   :  { %v2680_v9 = vadd.f32 %v4399_v45, %v2444_v20  ;;  %v2723_v2 = vmax.f32 %v2679_v50, 0.0 }
 0x234   :  { %v2239_v8 = vpop.f32.mrb[144].mxu0 }
 0x235   :  { %v2724_v58 = vmax.f32 %v2680_v9, 0.0  ;;  %v2240_v26 = vadd.f32 %v2239_v8, %v4351_v36  ;;  %v2448_v56 = vpop.f32.mrb[144].mxu1  ;;  %v2241_v62 = vpop.f32.mrb[145].mxu0 }
 0x236   :  { %v2450_v21 = vpop.f32.mrb[145].mxu1  ;;  %v2242_v6 = vpop.f32.mrb[146].mxu0 }
 0x237   :  { %v3362_v11 = vpack.c.bf16 %v2724_v58, %v2723_v2  ;;  %v2449_v18 = vadd.f32 %v2448_v56, %v2240_v26  ;;  %v2243_v59 = vadd.f32 %v2242_v6, %v4353_v51  ;;  %v2451_v40 = vpop.f32.mrb[146].mxu1  ;;  %v2244_v17 = vpop.f32.mrb[147].mxu0 }
 0x238   :  { %v2453_v35 = vpop.f32.mrb[147].mxu1 }
 0x239   :  { %3416 = vst [vmem:[%s4557_s3 + $0x68] sm:$0xff] %v3362_v11   ;;  %v2681_v12 = vadd.f32 %v4399_v45, %v2449_v18  ;;  %v2452_v3 = vadd.f32 %v2451_v40, %v2243_v59 }
 0x23b   :  { %v2682_v36 = vadd.f32 %v4399_v45, %v2452_v3  ;;  %v2725_v30 = vmax.f32 %v2681_v12, 0.0 }
 0x23c   :  { %v2247_v15 = vpop.f32.mrb[148].mxu0 }
 0x23d   :  { %v2726_v22 = vmax.f32 %v2682_v36, 0.0  ;;  %v2248_v27 = vadd.f32 %v2247_v15, %v4367_v5  ;;  %v2456_v25 = vpop.f32.mrb[148].mxu1  ;;  %v2249_v29 = vpop.f32.mrb[149].mxu0 }
 0x23e   :  { %v2458_v51 = vpop.f32.mrb[149].mxu1  ;;  %v2250_v32 = vpop.f32.mrb[150].mxu0 }
 0x23f   :  { %v3367_v34 = vpack.c.bf16 %v2726_v22, %v2725_v30  ;;  %v2457_v7 = vadd.f32 %v2456_v25, %v2248_v27  ;;  %v2251_v47 = vadd.f32 %v2250_v32, %v4369_v19  ;;  %v2459_v37 = vpop.f32.mrb[150].mxu1  ;;  %v2252_v44 = vpop.f32.mrb[151].mxu0 }
 0x240   :  { %v2461_v41 = vpop.f32.mrb[151].mxu1 }
 0x241   :  { %3417 = vst [vmem:[%s4557_s3 + $0x70] sm:$0xff] %v3367_v34   ;;  %v2683_v43 = vadd.f32 %v4399_v45, %v2457_v7  ;;  %v2460_v38 = vadd.f32 %v2459_v37, %v2251_v47 }
 0x243   :  { %v2684_v5 = vadd.f32 %v4399_v45, %v2460_v38  ;;  %v2727_v31 = vmax.f32 %v2683_v43, 0.0 }
 0x244   :  { %v2255_v28 = vpop.f32.mrb[152].mxu0 }
 0x245   :  { %v2728_v13 = vmax.f32 %v2684_v5, 0.0  ;;  %v2256_v57 = vadd.f32 %v2255_v28, %v4371_v24  ;;  %v2464_v16 = vpop.f32.mrb[152].mxu1  ;;  %v2257_v55 = vpop.f32.mrb[153].mxu0 }
 0x246   :  { %v2466_v19 = vpop.f32.mrb[153].mxu1  ;;  %v2258_v48 = vpop.f32.mrb[154].mxu0 }
 0x247   :  { %v3372_v46 = vpack.c.bf16 %v2728_v13, %v2727_v31  ;;  %v2465_v49 = vadd.f32 %v2464_v16, %v2256_v57  ;;  %v2259_v54 = vadd.f32 %v2258_v48, %v4373_v42  ;;  %v2467_v4 = vpop.f32.mrb[154].mxu1  ;;  %v2260_v63 = vpop.f32.mrb[155].mxu0 }
 0x248   :  { %v2469_v53 = vpop.f32.mrb[155].mxu1 }
 0x249   :  { %3418 = vst [vmem:[%s4557_s3 + $0x78] sm:$0xff] %v3372_v46   ;;  %v2685_v50 = vadd.f32 %v4399_v45, %v2465_v49  ;;  %v2468_v20 = vadd.f32 %v2467_v4, %v2259_v54 }
 0x24b   :  { %v2686_v24 = vadd.f32 %v4399_v45, %v2468_v20  ;;  %v2729_v8 = vmax.f32 %v2685_v50, 0.0 }
 0x24c   :  { %v2263_v9 = vpop.f32.mrb[156].mxu0 }
 0x24d   :  { %v2730_v2 = vmax.f32 %v2686_v24, 0.0  ;;  %v2264_v58 = vadd.f32 %v2263_v9, %v4375_v52  ;;  %v2472_v26 = vpop.f32.mrb[156].mxu1  ;;  %v2265_v56 = vpop.f32.mrb[157].mxu0 }
 0x24e   :  { %v2474_v42 = vpop.f32.mrb[157].mxu1  ;;  %v2266_v62 = vpop.f32.mrb[158].mxu0 }
 0x24f   :  { %v3377_v21 = vpack.c.bf16 %v2730_v2, %v2729_v8  ;;  %v2473_v6 = vadd.f32 %v2472_v26, %v2264_v58  ;;  %v2267_v11 = vadd.f32 %v2266_v62, %v4377_v1  ;;  %v2475_v18 = vpop.f32.mrb[158].mxu1  ;;  %v2268_v59 = vpop.f32.mrb[159].mxu0 }
 0x250   :  { %v2477_v40 = vpop.f32.mrb[159].mxu1 }
 0x251   :  { %3419 = vst [vmem:[%s4557_s3 + $0x80] sm:$0xff] %v3377_v21   ;;  %v2687_v17 = vadd.f32 %v4399_v45, %v2473_v6  ;;  %v2476_v35 = vadd.f32 %v2475_v18, %v2267_v11 }
 0x253   :  { %v2688_v52 = vadd.f32 %v4399_v45, %v2476_v35  ;;  %v2731_v3 = vmax.f32 %v2687_v17, 0.0 }
 0x254   :  { %v2271_v12 = vpop.f32.mrb[160].mxu0 }
 0x255   :  { %v2732_v36 = vmax.f32 %v2688_v52, 0.0  ;;  %v2272_v15 = vadd.f32 %v2271_v12, %v4379_v10  ;;  %v2480_v30 = vpop.f32.mrb[160].mxu1  ;;  %v2273_v22 = vpop.f32.mrb[161].mxu0 }
 0x256   :  { %v2482_v1 = vpop.f32.mrb[161].mxu1  ;;  %v2274_v27 = vpop.f32.mrb[162].mxu0 }
 0x257   :  { %v3382_v25 = vpack.c.bf16 %v2732_v36, %v2731_v3  ;;  %v2481_v29 = vadd.f32 %v2480_v30, %v2272_v15  ;;  %v2275_v51 = vadd.f32 %v2274_v27, %v4381_v0  ;;  %v2483_v32 = vpop.f32.mrb[162].mxu1  ;;  %v2276_v34 = vpop.f32.mrb[163].mxu0 }
 0x258   :  { %v2485_v7 = vpop.f32.mrb[163].mxu1 }
 0x259   :  { %3420 = vst [vmem:[%s4557_s3 + $0x88] sm:$0xff] %v3382_v25   ;;  %v2689_v47 = vadd.f32 %v4399_v45, %v2481_v29  ;;  %v2484_v37 = vadd.f32 %v2483_v32, %v2275_v51 }
 0x25b   :  { %v2690_v10 = vadd.f32 %v4399_v45, %v2484_v37  ;;  %v2733_v41 = vmax.f32 %v2689_v47, 0.0 }
 0x25c   :  { %v2279_v44 = vpop.f32.mrb[164].mxu0 }
 0x25d   :  { %v2734_v43 = vmax.f32 %v2690_v10, 0.0  ;;  %v2280_v38 = vadd.f32 %v2279_v44, %v4383_v23  ;;  %v2488_v5 = vpop.f32.mrb[164].mxu1  ;;  %v2281_v28 = vpop.f32.mrb[165].mxu0 }
 0x25e   :  { %v2490_v0 = vpop.f32.mrb[165].mxu1  ;;  %v2282_v31 = vpop.f32.mrb[166].mxu0 }
 0x25f   :  { %v3387_v13 = vpack.c.bf16 %v2734_v43, %v2733_v41  ;;  %v2489_v57 = vadd.f32 %v2488_v5, %v2280_v38  ;;  %v2283_v16 = vadd.f32 %v2282_v31, %v4385_v39  ;;  %v2491_v55 = vpop.f32.mrb[166].mxu1  ;;  %v2284_v19 = vpop.f32.mrb[167].mxu0 }
 0x260   :  { %v2493_v48 = vpop.f32.mrb[167].mxu1 }
 0x261   :  { %3421 = vst [vmem:[%s4557_s3 + $0x90] sm:$0xff] %v3387_v13   ;;  %v2691_v46 = vadd.f32 %v4399_v45, %v2489_v57  ;;  %v2492_v49 = vadd.f32 %v2491_v55, %v2283_v16 }
 0x263   :  { %v2692_v23 = vadd.f32 %v4399_v45, %v2492_v49  ;;  %v2735_v4 = vmax.f32 %v2691_v46, 0.0 }
 0x264   :  { %v2287_v54 = vpop.f32.mrb[168].mxu0 }
 0x265   :  { %v2736_v63 = vmax.f32 %v2692_v23, 0.0  ;;  %v2288_v53 = vadd.f32 %v2287_v54, %v4387_v60  ;;  %v2496_v50 = vpop.f32.mrb[168].mxu1  ;;  %v2289_v20 = vpop.f32.mrb[169].mxu0 }
 0x266   :  { %v2498_v39 = vpop.f32.mrb[169].mxu1  ;;  %v2290_v24 = vpop.f32.mrb[170].mxu0 }
 0x267   :  { %v3392_v9 = vpack.c.bf16 %v2736_v63, %v2735_v4  ;;  %v2497_v8 = vadd.f32 %v2496_v50, %v2288_v53  ;;  %v2291_v2 = vadd.f32 %v2290_v24, %v4389_v61  ;;  %v2499_v58 = vpop.f32.mrb[170].mxu1  ;;  %v2292_v26 = vpop.f32.mrb[171].mxu0 }
 0x268   :  { %v2501_v56 = vpop.f32.mrb[171].mxu1 }
 0x269   :  { %3422 = vst [vmem:[%s4557_s3 + $0x98] sm:$0xff] %v3392_v9   ;;  %v2693_v42 = vadd.f32 %v4399_v45, %v2497_v8  ;;  %v2500_v62 = vadd.f32 %v2499_v58, %v2291_v2 }
 0x26b   :  { %v2694_v60 = vadd.f32 %v4399_v45, %v2500_v62  ;;  %v2737_v6 = vmax.f32 %v2693_v42, 0.0 }
 0x26c   :  { %v2295_v21 = vpop.f32.mrb[172].mxu0 }
 0x26d   :  { %v2738_v11 = vmax.f32 %v2694_v60, 0.0  ;;  %v2296_v18 = vadd.f32 %v2295_v21, %v4391_v14  ;;  %v2504_v59 = vpop.f32.mrb[172].mxu1  ;;  %v2297_v40 = vpop.f32.mrb[173].mxu0 }
 0x26e   :  { %v2506_v61 = vpop.f32.mrb[173].mxu1  ;;  %v2298_v17 = vpop.f32.mrb[174].mxu0 }
 0x26f   :  { %v3397_v35 = vpack.c.bf16 %v2738_v11, %v2737_v6  ;;  %v2505_v52 = vadd.f32 %v2504_v59, %v2296_v18  ;;  %v2299_v12 = vadd.f32 %v2298_v17, %v4393_v33  ;;  %v2507_v3 = vpop.f32.mrb[174].mxu1  ;;  %v2300_v36 = vpop.f32.mrb[175].mxu0 }
 0x270   :  { %v2509_v15 = vpop.f32.mrb[175].mxu1 }
 0x271   :  { %3423 = vst [vmem:[%s4557_s3 + $0xa0] sm:$0xff] %v3397_v35   ;;  %v2695_v30 = vadd.f32 %v4399_v45, %v2505_v52  ;;  %v2508_v22 = vadd.f32 %v2507_v3, %v2299_v12 }
 0x273   :  { %v2696_v14 = vadd.f32 %v4399_v45, %v2508_v22  ;;  %v2739_v1 = vmax.f32 %v2695_v30, 0.0 }
 0x275   :  { %v2740_v27 = vmax.f32 %v2696_v14, 0.0 }
 0x277   :  { %v3402_v25 = vpack.c.bf16 %v2740_v27, %v2739_v1 }
 0x279   :  { %3424 = vst [vmem:[%s4557_s3 + $0xa8] sm:$0xff] %v3402_v25  }

// kernel: nvidia_forward.10
= control target key start
LH: loop header
LB: loop body
LE: loop exit
PB: predicated region body
PF: predicated region fallthrough
CT: control target
= control target key end

     0   :  { %s2380_s1 = inlined_call_operand.vmem [shape: bf16[512,128], index: 1, kind: input, shape index: {}]   ;;  %s2381_s0 = inlined_call_operand.vmem [shape: bf16[256,512], index: 0, kind: input, shape index: {}]   ;;  %s2382_s2 = inlined_call_operand.vmem [shape: f32[1,128], index: 2, kind: input, shape index: {}]   ;;  %s2383_s3 = inlined_call_operand.vmem [shape: bf16[256,128], index: 3, kind: output, shape index: {}]  }
   0x1   :  { %v1859_v0 = vld [vmem:[%s2380_s1 + $0x40] sm:$0xff]   ;;  %v1863_v4 = vld [vmem:[%s2380_s1 + $0x48] sm:$0xff]   ;;  %v1867_v8 = vld [vmem:[%s2380_s1 + $0x50] sm:$0xff]  }
   0x2   :  { %v1860_v1 = vld [vmem:[%s2380_s1 + $0xc0] sm:$0xff]   ;;  %1635 = vmatprep.subr.bf16.mxu0 %v1859_v0  ;;  %v1864_v5 = vld [vmem:[%s2380_s1 + $0xc8] sm:$0xff]   ;;  %v1868_v9 = vld [vmem:[%s2380_s1 + $0xd0] sm:$0xff]  }
   0x3   :  { %v1861_v2 = vld [vmem:[%s2380_s1] sm:$0xff]   ;;  %1747 = vmatprep.subr.bf16.mxu1 %v1860_v1  ;;  %v1865_v6 = vld [vmem:[%s2380_s1 + $0x8] sm:$0xff]   ;;  %v1869_v10 = vld [vmem:[%s2380_s1 + $0x10] sm:$0xff]  }
   0x4   :  { %v1862_v3 = vld [vmem:[%s2380_s1 + $0x80] sm:$0xff]   ;;  %1636 = vmatpush3.bf16.msra.mxu0 %v1861_v2  ;;  %v1866_v7 = vld [vmem:[%s2380_s1 + $0x88] sm:$0xff]   ;;  %v1870_v11 = vld [vmem:[%s2380_s1 + $0x90] sm:$0xff]  }
   0x5   :  { %1748 = vmatpush3.bf16.msra.mxu1 %v1862_v3  ;;  %1637 = vmatprep.subr.bf16.mxu0 %v1863_v4  ;;  %v1871_v12 = vld [vmem:[%s2380_s1 + $0x58] sm:$0xff]   ;;  %v1875_v16 = vld [vmem:[%s2380_s1 + $0x60] sm:$0xff]   ;;  %v1879_v20 = vld [vmem:[%s2380_s1 + $0x68] sm:$0xff]  }
   0x6   :  { %1749 = vmatprep.subr.bf16.mxu1 %v1864_v5  ;;  %v1872_v13 = vld [vmem:[%s2380_s1 + $0xd8] sm:$0xff]   ;;  %v1876_v17 = vld [vmem:[%s2380_s1 + $0xe0] sm:$0xff]   ;;  %v1880_v21 = vld [vmem:[%s2380_s1 + $0xe8] sm:$0xff]  }
   0x7   :  { %v1873_v14 = vld [vmem:[%s2380_s1 + $0x18] sm:$0xff]   ;;  %v1877_v18 = vld [vmem:[%s2380_s1 + $0x20] sm:$0xff]   ;;  %v1881_v22 = vld [vmem:[%s2380_s1 + $0x28] sm:$0xff]  }
   0x8   :  { %1638 = vmatpush3.bf16.msra.mxu0 %v1865_v6  ;;  %v1874_v15 = vld [vmem:[%s2380_s1 + $0x98] sm:$0xff]   ;;  %v1878_v19 = vld [vmem:[%s2380_s1 + $0xa0] sm:$0xff]   ;;  %v1882_v23 = vld [vmem:[%s2380_s1 + $0xa8] sm:$0xff]  }
   0x9   :  { %1750 = vmatpush3.bf16.msra.mxu1 %v1866_v7  ;;  %1639 = vmatprep.subr.bf16.mxu0 %v1867_v8  ;;  %v1883_v24 = vld [vmem:[%s2380_s1 + $0x70] sm:$0xff]   ;;  %v1887_v28 = vld [vmem:[%s2380_s1 + $0x78] sm:$0xff]  }
   0xa   :  { %1751 = vmatprep.subr.bf16.mxu1 %v1868_v9  ;;  %v1884_v25 = vld [vmem:[%s2380_s1 + $0xf0] sm:$0xff]   ;;  %v1888_v29 = vld [vmem:[%s2380_s1 + $0xf8] sm:$0xff]  }
   0xb   :  { %v1885_v26 = vld [vmem:[%s2380_s1 + $0x30] sm:$0xff]   ;;  %v1889_v30 = vld [vmem:[%s2380_s1 + $0x38] sm:$0xff]  }
   0xc   :  { %1640 = vmatpush3.bf16.msra.mxu0 %v1869_v10  ;;  %v1886_v27 = vld [vmem:[%s2380_s1 + $0xb0] sm:$0xff]   ;;  %v1890_v31 = vld [vmem:[%s2380_s1 + $0xb8] sm:$0xff]  }
   0xd   :  { %1752 = vmatpush3.bf16.msra.mxu1 %v1870_v11  ;;  %1641 = vmatprep.subr.bf16.mxu0 %v1871_v12  ;;  %v1891_v32 = vld [vmem:[%s2381_s0] ss:$16 sps:$4 sm:$0xff]   ;;  %v1893_v33 = vld [vmem:[%s2381_s0 + $0x4] ss:$16 sps:$4 sm:$0xff]   ;;  %v1894_v34 = vld [vmem:[%s2381_s0 + $0x8] ss:$16 sps:$4 sm:$0xff]  }
   0xe   :  { %1753 = vmatprep.subr.bf16.mxu1 %v1872_v13  ;;  %v1896_v35 = vld [vmem:[%s2381_s0 + $0xc] ss:$16 sps:$4 sm:$0xff]   ;;  %755 = vmatprep.mubr.bf16.mxu0 %v1893_v33  ;;  %v1897_v36 = vld [vmem:[%s2381_s0 + $0x24] ss:$16 sps:$4 sm:$0xff]   ;;  %v1901_v38 = vld [vmem:[%s2381_s0 + $0x20] ss:$16 sps:$4 sm:$0xff]  }
   0xf   :  { %916 = vmatprep.mubr.bf16.mxu1 %v1896_v35  ;;  %v1899_v37 = vld [vmem:[%s2381_s0 + $0x2c] ss:$16 sps:$4 sm:$0xff]   ;;  %v1902_v39 = vld [vmem:[%s2381_s0 + $0x28] ss:$16 sps:$4 sm:$0xff]   ;;  %v1903_v40 = vld [vmem:[%s2381_s0 + $0x44] ss:$16 sps:$4 sm:$0xff]  }
  0x10   :  { %1642 = vmatpush3.bf16.msra.mxu0 %v1873_v14  ;;  %v1905_v41 = vld [vmem:[%s2381_s0 + $0x4c] ss:$16 sps:$4 sm:$0xff]   ;;  %v1907_v42 = vld [vmem:[%s2381_s0 + $0x40] ss:$16 sps:$4 sm:$0xff]   ;;  %v1908_v43 = vld [vmem:[%s2381_s0 + $0x48] ss:$16 sps:$4 sm:$0xff]  }
  0x11   :  { %1754 = vmatpush3.bf16.msra.mxu1 %v1874_v15  ;;  %1643 = vmatprep.subr.bf16.mxu0 %v1875_v16  ;;  %v1909_v44 = vld [vmem:[%s2381_s0 + $0x64] ss:$16 sps:$4 sm:$0xff]   ;;  %v1911_v45 = vld [vmem:[%s2381_s0 + $0x6c] ss:$16 sps:$4 sm:$0xff]   ;;  %v1913_v46 = vld [vmem:[%s2381_s0 + $0x60] ss:$16 sps:$4 sm:$0xff]  }
  0x12   :  { %1755 = vmatprep.subr.bf16.mxu1 %v1876_v17  ;;  %v1914_v47 = vld [vmem:[%s2381_s0 + $0x68] ss:$16 sps:$4 sm:$0xff]   ;;  %v1915_v48 = vld [vmem:[%s2381_s0 + $0x84] ss:$16 sps:$4 sm:$0xff]   ;;  %v1917_v49 = vld [vmem:[%s2381_s0 + $0x8c] ss:$16 sps:$4 sm:$0xff]  }
  0x13   :  { %v1919_v50 = vld [vmem:[%s2381_s0 + $0x80] ss:$16 sps:$4 sm:$0xff]   ;;  %v1920_v51 = vld [vmem:[%s2381_s0 + $0x88] ss:$16 sps:$4 sm:$0xff]   ;;  %v1921_v52 = vld [vmem:[%s2381_s0 + $0xa4] ss:$16 sps:$4 sm:$0xff]  }
  0x14   :  { %1644 = vmatpush3.bf16.msra.mxu0 %v1877_v18  ;;  %v1923_v53 = vld [vmem:[%s2381_s0 + $0xac] ss:$16 sps:$4 sm:$0xff]   ;;  %v1925_v54 = vld [vmem:[%s2381_s0 + $0xa0] ss:$16 sps:$4 sm:$0xff]   ;;  %v1926_v55 = vld [vmem:[%s2381_s0 + $0xa8] ss:$16 sps:$4 sm:$0xff]  }
  0x15   :  { %1756 = vmatpush3.bf16.msra.mxu1 %v1878_v19  ;;  %1645 = vmatprep.subr.bf16.mxu0 %v1879_v20  ;;  %v1927_v56 = vld [vmem:[%s2381_s0 + $0xc4] ss:$16 sps:$4 sm:$0xff]   ;;  %v1929_v57 = vld [vmem:[%s2381_s0 + $0xcc] ss:$16 sps:$4 sm:$0xff]   ;;  %v1931_v58 = vld [vmem:[%s2381_s0 + $0xc0] ss:$16 sps:$4 sm:$0xff]  }
  0x16   :  { %1757 = vmatprep.subr.bf16.mxu1 %v1880_v21  ;;  %v1932_v59 = vld [vmem:[%s2381_s0 + $0xc8] ss:$16 sps:$4 sm:$0xff]   ;;  %v1933_v60 = vld [vmem:[%s2381_s0 + $0xe4] ss:$16 sps:$4 sm:$0xff]   ;;  %v1935_v61 = vld [vmem:[%s2381_s0 + $0xec] ss:$16 sps:$4 sm:$0xff]  }
  0x17   :  { %v1937_v62 = vld [vmem:[%s2381_s0 + $0xe0] ss:$16 sps:$4 sm:$0xff]   ;;  %v1938_v63 = vld [vmem:[%s2381_s0 + $0xe8] ss:$16 sps:$4 sm:$0xff]   ;;  %v1939_v0 = vld [vmem:[%s2381_s0 + $0x104] ss:$16 sps:$4 sm:$0xff]  }
  0x18   :  { %1646 = vmatpush3.bf16.msra.mxu0 %v1881_v22  ;;  %v1941_v1 = vld [vmem:[%s2381_s0 + $0x10c] ss:$16 sps:$4 sm:$0xff]   ;;  %v1943_v2 = vld [vmem:[%s2381_s0 + $0x100] ss:$16 sps:$4 sm:$0xff]   ;;  %v1944_v3 = vld [vmem:[%s2381_s0 + $0x108] ss:$16 sps:$4 sm:$0xff]  }
  0x19   :  { %1758 = vmatpush3.bf16.msra.mxu1 %v1882_v23  ;;  %1647 = vmatprep.subr.bf16.mxu0 %v1883_v24  ;;  %v1945_v4 = vld [vmem:[%s2381_s0 + $0x124] ss:$16 sps:$4 sm:$0xff]   ;;  %v1947_v5 = vld [vmem:[%s2381_s0 + $0x12c] ss:$16 sps:$4 sm:$0xff]   ;;  %v1949_v6 = vld [vmem:[%s2381_s0 + $0x120] ss:$16 sps:$4 sm:$0xff]  }
  0x1a   :  { %1759 = vmatprep.subr.bf16.mxu1 %v1884_v25  ;;  %v1950_v7 = vld [vmem:[%s2381_s0 + $0x128] ss:$16 sps:$4 sm:$0xff]   ;;  %v1951_v8 = vld [vmem:[%s2381_s0 + $0x144] ss:$16 sps:$4 sm:$0xff]   ;;  %v1953_v9 = vld [vmem:[%s2381_s0 + $0x14c] ss:$16 sps:$4 sm:$0xff]  }
  0x1b   :  { %v1955_v10 = vld [vmem:[%s2381_s0 + $0x140] ss:$16 sps:$4 sm:$0xff]   ;;  %v1956_v11 = vld [vmem:[%s2381_s0 + $0x148] ss:$16 sps:$4 sm:$0xff]   ;;  %v1957_v12 = vld [vmem:[%s2381_s0 + $0x164] ss:$16 sps:$4 sm:$0xff]  }
  0x1c   :  { %1648 = vmatpush3.bf16.msra.mxu0 %v1885_v26  ;;  %v1959_v13 = vld [vmem:[%s2381_s0 + $0x16c] ss:$16 sps:$4 sm:$0xff]   ;;  %v1961_v14 = vld [vmem:[%s2381_s0 + $0x160] ss:$16 sps:$4 sm:$0xff]   ;;  %v1962_v15 = vld [vmem:[%s2381_s0 + $0x168] ss:$16 sps:$4 sm:$0xff]  }
  0x1d   :  { %1760 = vmatpush3.bf16.msra.mxu1 %v1886_v27  ;;  %1649 = vmatprep.subr.bf16.mxu0 %v1887_v28  ;;  %v1963_v16 = vld [vmem:[%s2381_s0 + $0x184] ss:$16 sps:$4 sm:$0xff]   ;;  %v1965_v17 = vld [vmem:[%s2381_s0 + $0x18c] ss:$16 sps:$4 sm:$0xff]   ;;  %v1967_v18 = vld [vmem:[%s2381_s0 + $0x180] ss:$16 sps:$4 sm:$0xff]  }
  0x1e   :  { %1761 = vmatprep.subr.bf16.mxu1 %v1888_v29  ;;  %v1968_v19 = vld [vmem:[%s2381_s0 + $0x188] ss:$16 sps:$4 sm:$0xff]   ;;  %v1969_v20 = vld [vmem:[%s2381_s0 + $0x1a4] ss:$16 sps:$4 sm:$0xff]   ;;  %v1971_v21 = vld [vmem:[%s2381_s0 + $0x1ac] ss:$16 sps:$4 sm:$0xff]  }
  0x1f   :  { %v1973_v22 = vld [vmem:[%s2381_s0 + $0x1a0] ss:$16 sps:$4 sm:$0xff]   ;;  %v1974_v23 = vld [vmem:[%s2381_s0 + $0x1a8] ss:$16 sps:$4 sm:$0xff]   ;;  %v1975_v24 = vld [vmem:[%s2381_s0 + $0x1c4] ss:$16 sps:$4 sm:$0xff]  }
  0x20   :  { %1650 = vmatpush3.bf16.msra.mxu0 %v1889_v30  ;;  %v1977_v25 = vld [vmem:[%s2381_s0 + $0x1cc] ss:$16 sps:$4 sm:$0xff]   ;;  %v1979_v26 = vld [vmem:[%s2381_s0 + $0x1c0] ss:$16 sps:$4 sm:$0xff]   ;;  %v1980_v27 = vld [vmem:[%s2381_s0 + $0x1c8] ss:$16 sps:$4 sm:$0xff]  }
  0x21   :  { %1762 = vmatpush3.bf16.msra.mxu1 %v1890_v31  ;;  %v1981_v28 = vld [vmem:[%s2381_s0 + $0x1e4] ss:$16 sps:$4 sm:$0xff]   ;;  %v1983_v29 = vld [vmem:[%s2381_s0 + $0x1ec] ss:$16 sps:$4 sm:$0xff]   ;;  %v1985_v30 = vld [vmem:[%s2381_s0 + $0x1e0] ss:$16 sps:$4 sm:$0xff]  }
  0x22   :  { %v1986_v31 = vld [vmem:[%s2381_s0 + $0x1e8] ss:$16 sps:$4 sm:$0xff]  }
  0x23   :  { %756 = vmatmul.mubr.bf16.vlgmr.msra.gmra.mrb[0].mxu0 %v1891_v32 }
  0x24   :  { %917 = vmatmul.mubr.bf16.vlgmr.msra.gmra.mrb[0].mxu1 %v1894_v34  ;;  %763 = vmatprep.mubr.bf16.mxu0 %v1897_v36 }
  0x25   :  { %924 = vmatprep.mubr.bf16.mxu1 %v1899_v37 }
  0x2b   :  { %764 = vmatmul.mubr.bf16.gmra.mrb[4].mxu0 %v1901_v38 }
  0x2c   :  { %925 = vmatmul.mubr.bf16.gmra.mrb[4].mxu1 %v1902_v39  ;;  %771 = vmatprep.mubr.bf16.mxu0 %v1903_v40 }
  0x2d   :  { %932 = vmatprep.mubr.bf16.mxu1 %v1905_v41  ;;  %v2298_v41 = vld [vmem:[%s2382_s2] ss:$0 sm:$0xff] }
  0x33   :  { %772 = vmatmul.mubr.bf16.gmra.mrb[8].mxu0 %v1907_v42 }
  0x34   :  { %933 = vmatmul.mubr.bf16.gmra.mrb[8].mxu1 %v1908_v43  ;;  %779 = vmatprep.mubr.bf16.mxu0 %v1909_v44 }
  0x35   :  { %940 = vmatprep.mubr.bf16.mxu1 %v1911_v45 }
  0x3b   :  { %780 = vmatmul.mubr.bf16.gmra.mrb[12].mxu0 %v1913_v46 }
  0x3c   :  { %941 = vmatmul.mubr.bf16.gmra.mrb[12].mxu1 %v1914_v47  ;;  %787 = vmatprep.mubr.bf16.mxu0 %v1915_v48 }
  0x3d   :  { %948 = vmatprep.mubr.bf16.mxu1 %v1917_v49 }
  0x43   :  { %788 = vmatmul.mubr.bf16.gmra.mrb[16].mxu0 %v1919_v50 }
  0x44   :  { %949 = vmatmul.mubr.bf16.gmra.mrb[16].mxu1 %v1920_v51  ;;  %795 = vmatprep.mubr.bf16.mxu0 %v1921_v52 }
  0x45   :  { %956 = vmatprep.mubr.bf16.mxu1 %v1923_v53 }
  0x4b   :  { %796 = vmatmul.mubr.bf16.gmra.mrb[20].mxu0 %v1925_v54 }
  0x4c   :  { %957 = vmatmul.mubr.bf16.gmra.mrb[20].mxu1 %v1926_v55  ;;  %803 = vmatprep.mubr.bf16.mxu0 %v1927_v56 }
  0x4d   :  { %964 = vmatprep.mubr.bf16.mxu1 %v1929_v57 }
  0x53   :  { %804 = vmatmul.mubr.bf16.gmra.mrb[24].mxu0 %v1931_v58 }
  0x54   :  { %965 = vmatmul.mubr.bf16.gmra.mrb[24].mxu1 %v1932_v59  ;;  %811 = vmatprep.mubr.bf16.mxu0 %v1933_v60 }
  0x55   :  { %972 = vmatprep.mubr.bf16.mxu1 %v1935_v61 }
  0x5b   :  { %812 = vmatmul.mubr.bf16.gmra.mrb[28].mxu0 %v1937_v62 }
  0x5c   :  { %973 = vmatmul.mubr.bf16.gmra.mrb[28].mxu1 %v1938_v63  ;;  %819 = vmatprep.mubr.bf16.mxu0 %v1939_v0 }
  0x5d   :  { %980 = vmatprep.mubr.bf16.mxu1 %v1941_v1 }
  0x63   :  { %820 = vmatmul.mubr.bf16.gmra.mrb[32].mxu0 %v1943_v2 }
  0x64   :  { %981 = vmatmul.mubr.bf16.gmra.mrb[32].mxu1 %v1944_v3  ;;  %827 = vmatprep.mubr.bf16.mxu0 %v1945_v4 }
  0x65   :  { %988 = vmatprep.mubr.bf16.mxu1 %v1947_v5 }
  0x6b   :  { %828 = vmatmul.mubr.bf16.gmra.mrb[36].mxu0 %v1949_v6 }
  0x6c   :  { %989 = vmatmul.mubr.bf16.gmra.mrb[36].mxu1 %v1950_v7  ;;  %835 = vmatprep.mubr.bf16.mxu0 %v1951_v8 }
  0x6d   :  { %996 = vmatprep.mubr.bf16.mxu1 %v1953_v9 }
  0x73   :  { %836 = vmatmul.mubr.bf16.gmra.mrb[40].mxu0 %v1955_v10 }
  0x74   :  { %997 = vmatmul.mubr.bf16.gmra.mrb[40].mxu1 %v1956_v11  ;;  %843 = vmatprep.mubr.bf16.mxu0 %v1957_v12 }
  0x75   :  { %1004 = vmatprep.mubr.bf16.mxu1 %v1959_v13 }
  0x7b   :  { %844 = vmatmul.mubr.bf16.gmra.mrb[44].mxu0 %v1961_v14 }
  0x7c   :  { %1005 = vmatmul.mubr.bf16.gmra.mrb[44].mxu1 %v1962_v15  ;;  %851 = vmatprep.mubr.bf16.mxu0 %v1963_v16 }
  0x7d   :  { %1012 = vmatprep.mubr.bf16.mxu1 %v1965_v17 }
  0x83   :  { %852 = vmatmul.mubr.bf16.gmra.mrb[48].mxu0 %v1967_v18 }
  0x84   :  { %1013 = vmatmul.mubr.bf16.gmra.mrb[48].mxu1 %v1968_v19  ;;  %859 = vmatprep.mubr.bf16.mxu0 %v1969_v20 }
  0x85   :  { %1020 = vmatprep.mubr.bf16.mxu1 %v1971_v21 }
  0x8b   :  { %860 = vmatmul.mubr.bf16.gmra.mrb[52].mxu0 %v1973_v22 }
  0x8c   :  { %1021 = vmatmul.mubr.bf16.gmra.mrb[52].mxu1 %v1974_v23  ;;  %867 = vmatprep.mubr.bf16.mxu0 %v1975_v24 }
  0x8d   :  { %1028 = vmatprep.mubr.bf16.mxu1 %v1977_v25 }
  0x93   :  { %868 = vmatmul.mubr.bf16.gmra.mrb[56].mxu0 %v1979_v26 }
  0x94   :  { %1029 = vmatmul.mubr.bf16.gmra.mrb[56].mxu1 %v1980_v27  ;;  %875 = vmatprep.mubr.bf16.mxu0 %v1981_v28 }
  0x95   :  { %1036 = vmatprep.mubr.bf16.mxu1 %v1983_v29 }
  0x9b   :  { %876 = vmatmul.mubr.bf16.gmra.mrb[60].mxu0 %v1985_v30 }
  0x9c   :  { %1037 = vmatmul.mubr.bf16.gmra.mrb[60].mxu1 %v1986_v31 }
  0xf6   :  { %v1651_v32 = vpop.f32.mrb[0].mxu0 }
  0xf7   :  { %v1763_v33 = vpop.f32.mrb[0].mxu1  ;;  %v1652_v34 = vpop.f32.mrb[1].mxu0 }
  0xf8   :  { %v1653_v35 = vadd.f32 %v1652_v34, %v1651_v32  ;;  %v1764_v36 = vpop.f32.mrb[1].mxu1  ;;  %v1654_v37 = vpop.f32.mrb[2].mxu0 }
  0xf9   :  { %v1765_v38 = vadd.f32 %v1764_v36, %v1763_v33  ;;  %v1766_v39 = vpop.f32.mrb[2].mxu1  ;;  %v1655_v40 = vpop.f32.mrb[3].mxu0 }
  0xfa   :  { %v1656_v42 = vadd.f32 %v1655_v40, %v1654_v37  ;;  %v1767_v43 = vpop.f32.mrb[3].mxu1 }
  0xfb   :  { %v919_v44 = vadd.f32 %v1765_v38, %v1653_v35  ;;  %v1768_v45 = vadd.f32 %v1767_v43, %v1766_v39 }
  0xfd   :  { %v1151_v46 = vadd.f32 %v2298_v41, %v919_v44  ;;  %v922_v47 = vadd.f32 %v1768_v45, %v1656_v42 }
  0xfe   :  { %v1657_v48 = vpop.f32.mrb[4].mxu0 }
  0xff   :  { %v1152_v49 = vadd.f32 %v2298_v41, %v922_v47  ;;  %v1769_v50 = vpop.f32.mrb[4].mxu1  ;;  %v1658_v51 = vpop.f32.mrb[5].mxu0  ;;  %v1183_v55 = vmax.f32 %v1151_v46, 0.0 }
 0x100   :  { %v1659_v52 = vadd.f32 %v1658_v51, %v1657_v48  ;;  %v1770_v53 = vpop.f32.mrb[5].mxu1  ;;  %v1660_v54 = vpop.f32.mrb[6].mxu0 }
 0x101   :  { %v1184_v56 = vmax.f32 %v1152_v49, 0.0  ;;  %v1771_v57 = vadd.f32 %v1770_v53, %v1769_v50  ;;  %v1772_v58 = vpop.f32.mrb[6].mxu1  ;;  %v1661_v59 = vpop.f32.mrb[7].mxu0 }
 0x102   :  { %v1662_v60 = vadd.f32 %v1661_v59, %v1660_v54  ;;  %v1773_v61 = vpop.f32.mrb[7].mxu1 }
 0x103   :  { %v1543_v62 = vpack.c.bf16 %v1184_v56, %v1183_v55  ;;  %v927_v63 = vadd.f32 %v1771_v57, %v1659_v52  ;;  %v1774_v0 = vadd.f32 %v1773_v61, %v1772_v58 }
 0x105   :  { %1544 = vst [vmem:[%s2383_s3] sm:$0xff] %v1543_v62   ;;  %v1153_v1 = vadd.f32 %v2298_v41, %v927_v63  ;;  %v930_v2 = vadd.f32 %v1774_v0, %v1662_v60 }
 0x106   :  { %v1663_v3 = vpop.f32.mrb[8].mxu0 }
 0x107   :  { %v1154_v4 = vadd.f32 %v2298_v41, %v930_v2  ;;  %v1775_v5 = vpop.f32.mrb[8].mxu1  ;;  %v1664_v6 = vpop.f32.mrb[9].mxu0  ;;  %v1185_v10 = vmax.f32 %v1153_v1, 0.0 }
 0x108   :  { %v1665_v7 = vadd.f32 %v1664_v6, %v1663_v3  ;;  %v1776_v8 = vpop.f32.mrb[9].mxu1  ;;  %v1666_v9 = vpop.f32.mrb[10].mxu0 }
 0x109   :  { %v1186_v11 = vmax.f32 %v1154_v4, 0.0  ;;  %v1777_v12 = vadd.f32 %v1776_v8, %v1775_v5  ;;  %v1778_v13 = vpop.f32.mrb[10].mxu1  ;;  %v1667_v14 = vpop.f32.mrb[11].mxu0 }
 0x10a   :  { %v1668_v15 = vadd.f32 %v1667_v14, %v1666_v9  ;;  %v1779_v16 = vpop.f32.mrb[11].mxu1 }
 0x10b   :  { %v1548_v17 = vpack.c.bf16 %v1186_v11, %v1185_v10  ;;  %v935_v18 = vadd.f32 %v1777_v12, %v1665_v7  ;;  %v1780_v19 = vadd.f32 %v1779_v16, %v1778_v13 }
 0x10d   :  { %1620 = vst [vmem:[%s2383_s3 + $0x8] sm:$0xff] %v1548_v17   ;;  %v1155_v20 = vadd.f32 %v2298_v41, %v935_v18  ;;  %v938_v21 = vadd.f32 %v1780_v19, %v1668_v15 }
 0x10e   :  { %v1669_v22 = vpop.f32.mrb[12].mxu0 }
 0x10f   :  { %v1156_v23 = vadd.f32 %v2298_v41, %v938_v21  ;;  %v1781_v24 = vpop.f32.mrb[12].mxu1  ;;  %v1670_v25 = vpop.f32.mrb[13].mxu0  ;;  %v1187_v29 = vmax.f32 %v1155_v20, 0.0 }
 0x110   :  { %v1671_v26 = vadd.f32 %v1670_v25, %v1669_v22  ;;  %v1782_v27 = vpop.f32.mrb[13].mxu1  ;;  %v1672_v28 = vpop.f32.mrb[14].mxu0 }
 0x111   :  { %v1188_v30 = vmax.f32 %v1156_v23, 0.0  ;;  %v1783_v31 = vadd.f32 %v1782_v27, %v1781_v24  ;;  %v1784_v32 = vpop.f32.mrb[14].mxu1  ;;  %v1673_v33 = vpop.f32.mrb[15].mxu0 }
 0x112   :  { %v1674_v34 = vadd.f32 %v1673_v33, %v1672_v28  ;;  %v1785_v35 = vpop.f32.mrb[15].mxu1 }
 0x113   :  { %v1553_v36 = vpack.c.bf16 %v1188_v30, %v1187_v29  ;;  %v943_v37 = vadd.f32 %v1783_v31, %v1671_v26  ;;  %v1786_v38 = vadd.f32 %v1785_v35, %v1784_v32 }
 0x115   :  { %1621 = vst [vmem:[%s2383_s3 + $0x10] sm:$0xff] %v1553_v36   ;;  %v1157_v39 = vadd.f32 %v2298_v41, %v943_v37  ;;  %v946_v40 = vadd.f32 %v1786_v38, %v1674_v34 }
 0x116   :  { %v1675_v42 = vpop.f32.mrb[16].mxu0 }
 0x117   :  { %v1158_v43 = vadd.f32 %v2298_v41, %v946_v40  ;;  %v1787_v44 = vpop.f32.mrb[16].mxu1  ;;  %v1676_v45 = vpop.f32.mrb[17].mxu0  ;;  %v1189_v49 = vmax.f32 %v1157_v39, 0.0 }
 0x118   :  { %v1677_v46 = vadd.f32 %v1676_v45, %v1675_v42  ;;  %v1788_v47 = vpop.f32.mrb[17].mxu1  ;;  %v1678_v48 = vpop.f32.mrb[18].mxu0 }
 0x119   :  { %v1190_v50 = vmax.f32 %v1158_v43, 0.0  ;;  %v1789_v51 = vadd.f32 %v1788_v47, %v1787_v44  ;;  %v1790_v52 = vpop.f32.mrb[18].mxu1  ;;  %v1679_v53 = vpop.f32.mrb[19].mxu0 }
 0x11a   :  { %v1680_v54 = vadd.f32 %v1679_v53, %v1678_v48  ;;  %v1791_v55 = vpop.f32.mrb[19].mxu1 }
 0x11b   :  { %v1558_v56 = vpack.c.bf16 %v1190_v50, %v1189_v49  ;;  %v951_v57 = vadd.f32 %v1789_v51, %v1677_v46  ;;  %v1792_v58 = vadd.f32 %v1791_v55, %v1790_v52 }
 0x11d   :  { %1622 = vst [vmem:[%s2383_s3 + $0x18] sm:$0xff] %v1558_v56   ;;  %v1159_v59 = vadd.f32 %v2298_v41, %v951_v57  ;;  %v954_v60 = vadd.f32 %v1792_v58, %v1680_v54 }
 0x11e   :  { %v1681_v61 = vpop.f32.mrb[20].mxu0 }
 0x11f   :  { %v1160_v62 = vadd.f32 %v2298_v41, %v954_v60  ;;  %v1793_v63 = vpop.f32.mrb[20].mxu1  ;;  %v1682_v0 = vpop.f32.mrb[21].mxu0  ;;  %v1191_v4 = vmax.f32 %v1159_v59, 0.0 }
 0x120   :  { %v1683_v1 = vadd.f32 %v1682_v0, %v1681_v61  ;;  %v1794_v2 = vpop.f32.mrb[21].mxu1  ;;  %v1684_v3 = vpop.f32.mrb[22].mxu0 }
 0x121   :  { %v1192_v5 = vmax.f32 %v1160_v62, 0.0  ;;  %v1795_v6 = vadd.f32 %v1794_v2, %v1793_v63  ;;  %v1796_v7 = vpop.f32.mrb[22].mxu1  ;;  %v1685_v8 = vpop.f32.mrb[23].mxu0 }
 0x122   :  { %v1686_v9 = vadd.f32 %v1685_v8, %v1684_v3  ;;  %v1797_v10 = vpop.f32.mrb[23].mxu1 }
 0x123   :  { %v1563_v11 = vpack.c.bf16 %v1192_v5, %v1191_v4  ;;  %v959_v12 = vadd.f32 %v1795_v6, %v1683_v1  ;;  %v1798_v13 = vadd.f32 %v1797_v10, %v1796_v7 }
 0x125   :  { %1623 = vst [vmem:[%s2383_s3 + $0x20] sm:$0xff] %v1563_v11   ;;  %v1161_v14 = vadd.f32 %v2298_v41, %v959_v12  ;;  %v962_v15 = vadd.f32 %v1798_v13, %v1686_v9 }
 0x126   :  { %v1687_v16 = vpop.f32.mrb[24].mxu0 }
 0x127   :  { %v1162_v17 = vadd.f32 %v2298_v41, %v962_v15  ;;  %v1799_v18 = vpop.f32.mrb[24].mxu1  ;;  %v1688_v19 = vpop.f32.mrb[25].mxu0  ;;  %v1193_v23 = vmax.f32 %v1161_v14, 0.0 }
 0x128   :  { %v1689_v20 = vadd.f32 %v1688_v19, %v1687_v16  ;;  %v1800_v21 = vpop.f32.mrb[25].mxu1  ;;  %v1690_v22 = vpop.f32.mrb[26].mxu0 }
 0x129   :  { %v1194_v24 = vmax.f32 %v1162_v17, 0.0  ;;  %v1801_v25 = vadd.f32 %v1800_v21, %v1799_v18  ;;  %v1802_v26 = vpop.f32.mrb[26].mxu1  ;;  %v1691_v27 = vpop.f32.mrb[27].mxu0 }
 0x12a   :  { %v1692_v28 = vadd.f32 %v1691_v27, %v1690_v22  ;;  %v1803_v29 = vpop.f32.mrb[27].mxu1 }
 0x12b   :  { %v1568_v30 = vpack.c.bf16 %v1194_v24, %v1193_v23  ;;  %v967_v31 = vadd.f32 %v1801_v25, %v1689_v20  ;;  %v1804_v32 = vadd.f32 %v1803_v29, %v1802_v26 }
 0x12d   :  { %1624 = vst [vmem:[%s2383_s3 + $0x28] sm:$0xff] %v1568_v30   ;;  %v1163_v33 = vadd.f32 %v2298_v41, %v967_v31  ;;  %v970_v34 = vadd.f32 %v1804_v32, %v1692_v28 }
 0x12e   :  { %v1693_v35 = vpop.f32.mrb[28].mxu0 }
 0x12f   :  { %v1164_v36 = vadd.f32 %v2298_v41, %v970_v34  ;;  %v1805_v37 = vpop.f32.mrb[28].mxu1  ;;  %v1694_v38 = vpop.f32.mrb[29].mxu0  ;;  %v1195_v43 = vmax.f32 %v1163_v33, 0.0 }
 0x130   :  { %v1695_v39 = vadd.f32 %v1694_v38, %v1693_v35  ;;  %v1806_v40 = vpop.f32.mrb[29].mxu1  ;;  %v1696_v42 = vpop.f32.mrb[30].mxu0 }
 0x131   :  { %v1196_v44 = vmax.f32 %v1164_v36, 0.0  ;;  %v1807_v45 = vadd.f32 %v1806_v40, %v1805_v37  ;;  %v1808_v46 = vpop.f32.mrb[30].mxu1  ;;  %v1697_v47 = vpop.f32.mrb[31].mxu0 }
 0x132   :  { %v1698_v48 = vadd.f32 %v1697_v47, %v1696_v42  ;;  %v1809_v49 = vpop.f32.mrb[31].mxu1 }
 0x133   :  { %v1573_v50 = vpack.c.bf16 %v1196_v44, %v1195_v43  ;;  %v975_v51 = vadd.f32 %v1807_v45, %v1695_v39  ;;  %v1810_v52 = vadd.f32 %v1809_v49, %v1808_v46 }
 0x135   :  { %1625 = vst [vmem:[%s2383_s3 + $0x30] sm:$0xff] %v1573_v50   ;;  %v1165_v53 = vadd.f32 %v2298_v41, %v975_v51  ;;  %v978_v54 = vadd.f32 %v1810_v52, %v1698_v48 }
 0x136   :  { %v1699_v55 = vpop.f32.mrb[32].mxu0 }
 0x137   :  { %v1166_v56 = vadd.f32 %v2298_v41, %v978_v54  ;;  %v1811_v57 = vpop.f32.mrb[32].mxu1  ;;  %v1700_v58 = vpop.f32.mrb[33].mxu0  ;;  %v1197_v62 = vmax.f32 %v1165_v53, 0.0 }
 0x138   :  { %v1701_v59 = vadd.f32 %v1700_v58, %v1699_v55  ;;  %v1812_v60 = vpop.f32.mrb[33].mxu1  ;;  %v1702_v61 = vpop.f32.mrb[34].mxu0 }
 0x139   :  { %v1198_v63 = vmax.f32 %v1166_v56, 0.0  ;;  %v1813_v0 = vadd.f32 %v1812_v60, %v1811_v57  ;;  %v1814_v1 = vpop.f32.mrb[34].mxu1  ;;  %v1703_v2 = vpop.f32.mrb[35].mxu0 }
 0x13a   :  { %v1704_v3 = vadd.f32 %v1703_v2, %v1702_v61  ;;  %v1815_v4 = vpop.f32.mrb[35].mxu1 }
 0x13b   :  { %v1578_v5 = vpack.c.bf16 %v1198_v63, %v1197_v62  ;;  %v983_v6 = vadd.f32 %v1813_v0, %v1701_v59  ;;  %v1816_v7 = vadd.f32 %v1815_v4, %v1814_v1 }
 0x13d   :  { %1626 = vst [vmem:[%s2383_s3 + $0x38] sm:$0xff] %v1578_v5   ;;  %v1167_v8 = vadd.f32 %v2298_v41, %v983_v6  ;;  %v986_v9 = vadd.f32 %v1816_v7, %v1704_v3 }
 0x13e   :  { %v1705_v10 = vpop.f32.mrb[36].mxu0 }
 0x13f   :  { %v1168_v11 = vadd.f32 %v2298_v41, %v986_v9  ;;  %v1817_v12 = vpop.f32.mrb[36].mxu1  ;;  %v1706_v13 = vpop.f32.mrb[37].mxu0  ;;  %v1199_v17 = vmax.f32 %v1167_v8, 0.0 }
 0x140   :  { %v1707_v14 = vadd.f32 %v1706_v13, %v1705_v10  ;;  %v1818_v15 = vpop.f32.mrb[37].mxu1  ;;  %v1708_v16 = vpop.f32.mrb[38].mxu0 }
 0x141   :  { %v1200_v18 = vmax.f32 %v1168_v11, 0.0  ;;  %v1819_v19 = vadd.f32 %v1818_v15, %v1817_v12  ;;  %v1820_v20 = vpop.f32.mrb[38].mxu1  ;;  %v1709_v21 = vpop.f32.mrb[39].mxu0 }
 0x142   :  { %v1710_v22 = vadd.f32 %v1709_v21, %v1708_v16  ;;  %v1821_v23 = vpop.f32.mrb[39].mxu1 }
 0x143   :  { %v1583_v24 = vpack.c.bf16 %v1200_v18, %v1199_v17  ;;  %v991_v25 = vadd.f32 %v1819_v19, %v1707_v14  ;;  %v1822_v26 = vadd.f32 %v1821_v23, %v1820_v20 }
 0x145   :  { %1627 = vst [vmem:[%s2383_s3 + $0x40] sm:$0xff] %v1583_v24   ;;  %v1169_v27 = vadd.f32 %v2298_v41, %v991_v25  ;;  %v994_v28 = vadd.f32 %v1822_v26, %v1710_v22 }
 0x146   :  { %v1711_v29 = vpop.f32.mrb[40].mxu0 }
 0x147   :  { %v1170_v30 = vadd.f32 %v2298_v41, %v994_v28  ;;  %v1823_v31 = vpop.f32.mrb[40].mxu1  ;;  %v1712_v32 = vpop.f32.mrb[41].mxu0  ;;  %v1201_v36 = vmax.f32 %v1169_v27, 0.0 }
 0x148   :  { %v1713_v33 = vadd.f32 %v1712_v32, %v1711_v29  ;;  %v1824_v34 = vpop.f32.mrb[41].mxu1  ;;  %v1714_v35 = vpop.f32.mrb[42].mxu0 }
 0x149   :  { %v1202_v37 = vmax.f32 %v1170_v30, 0.0  ;;  %v1825_v38 = vadd.f32 %v1824_v34, %v1823_v31  ;;  %v1826_v39 = vpop.f32.mrb[42].mxu1  ;;  %v1715_v40 = vpop.f32.mrb[43].mxu0 }
 0x14a   :  { %v1716_v42 = vadd.f32 %v1715_v40, %v1714_v35  ;;  %v1827_v43 = vpop.f32.mrb[43].mxu1 }
 0x14b   :  { %v1588_v44 = vpack.c.bf16 %v1202_v37, %v1201_v36  ;;  %v999_v45 = vadd.f32 %v1825_v38, %v1713_v33  ;;  %v1828_v46 = vadd.f32 %v1827_v43, %v1826_v39 }
 0x14d   :  { %1628 = vst [vmem:[%s2383_s3 + $0x48] sm:$0xff] %v1588_v44   ;;  %v1171_v47 = vadd.f32 %v2298_v41, %v999_v45  ;;  %v1002_v48 = vadd.f32 %v1828_v46, %v1716_v42 }
 0x14e   :  { %v1717_v49 = vpop.f32.mrb[44].mxu0 }
 0x14f   :  { %v1172_v50 = vadd.f32 %v2298_v41, %v1002_v48  ;;  %v1829_v51 = vpop.f32.mrb[44].mxu1  ;;  %v1718_v52 = vpop.f32.mrb[45].mxu0  ;;  %v1203_v56 = vmax.f32 %v1171_v47, 0.0 }
 0x150   :  { %v1719_v53 = vadd.f32 %v1718_v52, %v1717_v49  ;;  %v1830_v54 = vpop.f32.mrb[45].mxu1  ;;  %v1720_v55 = vpop.f32.mrb[46].mxu0 }
 0x151   :  { %v1204_v57 = vmax.f32 %v1172_v50, 0.0  ;;  %v1831_v58 = vadd.f32 %v1830_v54, %v1829_v51  ;;  %v1832_v59 = vpop.f32.mrb[46].mxu1  ;;  %v1721_v60 = vpop.f32.mrb[47].mxu0 }
 0x152   :  { %v1722_v61 = vadd.f32 %v1721_v60, %v1720_v55  ;;  %v1833_v62 = vpop.f32.mrb[47].mxu1 }
 0x153   :  { %v1593_v63 = vpack.c.bf16 %v1204_v57, %v1203_v56  ;;  %v1007_v0 = vadd.f32 %v1831_v58, %v1719_v53  ;;  %v1834_v1 = vadd.f32 %v1833_v62, %v1832_v59 }
 0x155   :  { %1629 = vst [vmem:[%s2383_s3 + $0x50] sm:$0xff] %v1593_v63   ;;  %v1173_v2 = vadd.f32 %v2298_v41, %v1007_v0  ;;  %v1010_v3 = vadd.f32 %v1834_v1, %v1722_v61 }
 0x156   :  { %v1723_v4 = vpop.f32.mrb[48].mxu0 }
 0x157   :  { %v1174_v5 = vadd.f32 %v2298_v41, %v1010_v3  ;;  %v1835_v6 = vpop.f32.mrb[48].mxu1  ;;  %v1724_v7 = vpop.f32.mrb[49].mxu0  ;;  %v1205_v11 = vmax.f32 %v1173_v2, 0.0 }
 0x158   :  { %v1725_v8 = vadd.f32 %v1724_v7, %v1723_v4  ;;  %v1836_v9 = vpop.f32.mrb[49].mxu1  ;;  %v1726_v10 = vpop.f32.mrb[50].mxu0 }
 0x159   :  { %v1206_v12 = vmax.f32 %v1174_v5, 0.0  ;;  %v1837_v13 = vadd.f32 %v1836_v9, %v1835_v6  ;;  %v1838_v14 = vpop.f32.mrb[50].mxu1  ;;  %v1727_v15 = vpop.f32.mrb[51].mxu0 }
 0x15a   :  { %v1728_v16 = vadd.f32 %v1727_v15, %v1726_v10  ;;  %v1839_v17 = vpop.f32.mrb[51].mxu1 }
 0x15b   :  { %v1598_v18 = vpack.c.bf16 %v1206_v12, %v1205_v11  ;;  %v1015_v19 = vadd.f32 %v1837_v13, %v1725_v8  ;;  %v1840_v20 = vadd.f32 %v1839_v17, %v1838_v14 }
 0x15d   :  { %1630 = vst [vmem:[%s2383_s3 + $0x58] sm:$0xff] %v1598_v18   ;;  %v1175_v21 = vadd.f32 %v2298_v41, %v1015_v19  ;;  %v1018_v22 = vadd.f32 %v1840_v20, %v1728_v16 }
 0x15e   :  { %v1729_v23 = vpop.f32.mrb[52].mxu0 }
 0x15f   :  { %v1176_v24 = vadd.f32 %v2298_v41, %v1018_v22  ;;  %v1841_v25 = vpop.f32.mrb[52].mxu1  ;;  %v1730_v26 = vpop.f32.mrb[53].mxu0  ;;  %v1207_v30 = vmax.f32 %v1175_v21, 0.0 }
 0x160   :  { %v1731_v27 = vadd.f32 %v1730_v26, %v1729_v23  ;;  %v1842_v28 = vpop.f32.mrb[53].mxu1  ;;  %v1732_v29 = vpop.f32.mrb[54].mxu0 }
 0x161   :  { %v1208_v31 = vmax.f32 %v1176_v24, 0.0  ;;  %v1843_v32 = vadd.f32 %v1842_v28, %v1841_v25  ;;  %v1844_v33 = vpop.f32.mrb[54].mxu1  ;;  %v1733_v34 = vpop.f32.mrb[55].mxu0 }
 0x162   :  { %v1734_v35 = vadd.f32 %v1733_v34, %v1732_v29  ;;  %v1845_v36 = vpop.f32.mrb[55].mxu1 }
 0x163   :  { %v1603_v37 = vpack.c.bf16 %v1208_v31, %v1207_v30  ;;  %v1023_v38 = vadd.f32 %v1843_v32, %v1731_v27  ;;  %v1846_v39 = vadd.f32 %v1845_v36, %v1844_v33 }
 0x165   :  { %1631 = vst [vmem:[%s2383_s3 + $0x60] sm:$0xff] %v1603_v37   ;;  %v1177_v40 = vadd.f32 %v2298_v41, %v1023_v38  ;;  %v1026_v42 = vadd.f32 %v1846_v39, %v1734_v35 }
 0x166   :  { %v1735_v43 = vpop.f32.mrb[56].mxu0 }
 0x167   :  { %v1178_v44 = vadd.f32 %v2298_v41, %v1026_v42  ;;  %v1847_v45 = vpop.f32.mrb[56].mxu1  ;;  %v1736_v46 = vpop.f32.mrb[57].mxu0  ;;  %v1209_v50 = vmax.f32 %v1177_v40, 0.0 }
 0x168   :  { %v1737_v47 = vadd.f32 %v1736_v46, %v1735_v43  ;;  %v1848_v48 = vpop.f32.mrb[57].mxu1  ;;  %v1738_v49 = vpop.f32.mrb[58].mxu0 }
 0x169   :  { %v1210_v51 = vmax.f32 %v1178_v44, 0.0  ;;  %v1849_v52 = vadd.f32 %v1848_v48, %v1847_v45  ;;  %v1850_v53 = vpop.f32.mrb[58].mxu1  ;;  %v1739_v54 = vpop.f32.mrb[59].mxu0 }
 0x16a   :  { %v1740_v55 = vadd.f32 %v1739_v54, %v1738_v49  ;;  %v1851_v56 = vpop.f32.mrb[59].mxu1 }
 0x16b   :  { %v1608_v57 = vpack.c.bf16 %v1210_v51, %v1209_v50  ;;  %v1031_v58 = vadd.f32 %v1849_v52, %v1737_v47  ;;  %v1852_v59 = vadd.f32 %v1851_v56, %v1850_v53 }
 0x16d   :  { %1632 = vst [vmem:[%s2383_s3 + $0x68] sm:$0xff] %v1608_v57   ;;  %v1179_v60 = vadd.f32 %v2298_v41, %v1031_v58  ;;  %v1034_v61 = vadd.f32 %v1852_v59, %v1740_v55 }
 0x16e   :  { %v1741_v62 = vpop.f32.mrb[60].mxu0 }
 0x16f   :  { %v1180_v63 = vadd.f32 %v2298_v41, %v1034_v61  ;;  %v1853_v0 = vpop.f32.mrb[60].mxu1  ;;  %v1742_v1 = vpop.f32.mrb[61].mxu0  ;;  %v1211_v5 = vmax.f32 %v1179_v60, 0.0 }
 0x170   :  { %v1743_v2 = vadd.f32 %v1742_v1, %v1741_v62  ;;  %v1854_v3 = vpop.f32.mrb[61].mxu1  ;;  %v1744_v4 = vpop.f32.mrb[62].mxu0 }
 0x171   :  { %v1212_v6 = vmax.f32 %v1180_v63, 0.0  ;;  %v1855_v7 = vadd.f32 %v1854_v3, %v1853_v0  ;;  %v1856_v8 = vpop.f32.mrb[62].mxu1  ;;  %v1745_v9 = vpop.f32.mrb[63].mxu0 }
 0x172   :  { %v1746_v10 = vadd.f32 %v1745_v9, %v1744_v4  ;;  %v1857_v11 = vpop.f32.mrb[63].mxu1 }
 0x173   :  { %v1613_v12 = vpack.c.bf16 %v1212_v6, %v1211_v5  ;;  %v1039_v13 = vadd.f32 %v1855_v7, %v1743_v2  ;;  %v1858_v14 = vadd.f32 %v1857_v11, %v1856_v8 }
 0x175   :  { %1633 = vst [vmem:[%s2383_s3 + $0x70] sm:$0xff] %v1613_v12   ;;  %v1181_v15 = vadd.f32 %v2298_v41, %v1039_v13  ;;  %v1042_v16 = vadd.f32 %v1858_v14, %v1746_v10 }
 0x177   :  { %v1182_v17 = vadd.f32 %v2298_v41, %v1042_v16  ;;  %v1213_v18 = vmax.f32 %v1181_v15, 0.0 }
 0x179   :  { %v1214_v19 = vmax.f32 %v1182_v17, 0.0 }
 0x17b   :  { %v1618_v20 = vpack.c.bf16 %v1214_v19, %v1213_v18 }
 0x17d   :  { %1634 = vst [vmem:[%s2383_s3 + $0x78] sm:$0xff] %v1618_v20  }

// kernel: nvidia_forward.11
= control target key start
LH: loop header
LB: loop body
LE: loop exit
PB: predicated region body
PF: predicated region fallthrough
CT: control target
= control target key end

     0   :  { %v1915_v23 = vmov 0.0   ;;  %vm1916_vm0 = vmmov 0   ;;  %s2378_s1 = inlined_call_operand.vmem [shape: bf16[640,128], index: 1, kind: input, shape index: {}]   ;;  %s2379_s0 = inlined_call_operand.vmem [shape: bf16[176,640], index: 0, kind: input, shape index: {}]   ;;  %s2380_s2 = inlined_call_operand.vmem [shape: f32[1,128], index: 2, kind: input, shape index: {}]   ;;  %s2381_s3 = inlined_call_operand.vmem [shape: bf16[176,128], index: 3, kind: output, shape index: {}]  }
   0x1   :  { %v1798_v0 = vld [vmem:[%s2378_s1 + $0x40] sm:$0xff]   ;;  %v1800_v2 = vld [vmem:[%s2378_s1 + $0x48] sm:$0xff]   ;;  %v1802_v4 = vld [vmem:[%s2378_s1 + $0x50] sm:$0xff]  }
   0x2   :  { %v1799_v1 = vld [vmem:[%s2378_s1] sm:$0xff]   ;;  %1537 = vmatprep.subr.bf16.mxu0 %v1798_v0  ;;  %1780 = vmatprep.subr.bf16.mxu1 %v1798_v0  ;;  %v1801_v3 = vld [vmem:[%s2378_s1 + $0x8] sm:$0xff]   ;;  %v1803_v5 = vld [vmem:[%s2378_s1 + $0x10] sm:$0xff]  }
   0x3   :  { %1538 = vmatpush3.bf16.msra.mxu0 %v1799_v1  ;;  %1788 = vmatpush3.bf16.msra.mxu1 %v1799_v1  ;;  %v1804_v6 = vld [vmem:[%s2378_s1 + $0x58] sm:$0xff]   ;;  %v1806_v8 = vld [vmem:[%s2378_s1 + $0x60] sm:$0xff]   ;;  %v1808_v10 = vld [vmem:[%s2378_s1 + $0x68] sm:$0xff]  }
   0x4   :  { %1539 = vmatprep.subr.bf16.mxu0 %v1800_v2  ;;  %1781 = vmatprep.subr.bf16.mxu1 %v1800_v2  ;;  %v1805_v7 = vld [vmem:[%s2378_s1 + $0x18] sm:$0xff]   ;;  %v1807_v9 = vld [vmem:[%s2378_s1 + $0x20] sm:$0xff]   ;;  %v1819_v12 = vld [vmem:[%s2379_s0 + $0xf4] ss:$20 sps:$4 sm:$0xff]  }
   0x5   :  { %v1816_v11 = vld [vmem:[%s2379_s0 + $0x4] ss:$20 sps:$4 sm:$0xff]   ;;  %v1809_v13 = vld [vmem:[%s2378_s1 + $0x28] sm:$0xff]   ;;  %v1810_v14 = vld [vmem:[%s2378_s1 + $0x70] sm:$0xff]   ;;  %815 = vmatprep.mubr.bf16.mxu1 %v1819_v12 }
   0x6   :  { %767 = vmatprep.mubr.bf16.mxu0 %v1816_v11  ;;  %v1811_v15 = vld [vmem:[%s2378_s1 + $0x30] sm:$0xff]   ;;  %v1812_v16 = vld [vmem:[%s2378_s1 + $0x78] sm:$0xff]   ;;  %v1821_v19 = vld [vmem:[%s2378_s1 + $0xc0] sm:$0xff]  }
   0x7   :  { %1540 = vmatpush3.bf16.msra.mxu0 %v1801_v3  ;;  %1789 = vmatpush3.bf16.msra.mxu1 %v1801_v3  ;;  %v1813_v17 = vld [vmem:[%s2378_s1 + $0x38] sm:$0xff]   ;;  %v1814_v18 = vld [vmem:[%s2379_s0] ss:$20 sps:$4 sm:$0xff]   ;;  %v1817_v20 = vld [vmem:[%s2379_s0 + $0xf0] ss:$20 sps:$4 sm:$0xff]  }
   0x8   :  { %1541 = vmatprep.subr.bf16.mxu0 %v1802_v4  ;;  %1782 = vmatprep.subr.bf16.mxu1 %v1802_v4  ;;  %v1820_v21 = vld [vmem:[%s2378_s1 + $0x100] sm:$0xff]   ;;  %v1825_v25 = vld [vmem:[%s2379_s0 + $0x11c] ss:$20 sps:$4 sm:$0xff]   ;;  %v1830_v26 = vld [vmem:[%s2378_s1 + $0xc8] sm:$0xff]  }
   0x9   :  { %v1822_v22 = vld [vmem:[%s2378_s1 + $0x80] sm:$0xff]   ;;  %v1827_v27 = vld [vmem:[%s2378_s1 + $0x108] sm:$0xff]   ;;  %v1832_v30 = vld [vmem:[%s2378_s1 + $0xd0] sm:$0xff]  }
   0xa   :  { %v1823_v24 = vld [vmem:[%s2379_s0 + $0x2c] ss:$20 sps:$4 sm:$0xff]   ;;  %v1828_v29 = vld [vmem:[%s2379_s0 + $0x28] ss:$20 sps:$4 sm:$0xff]   ;;  %v1833_v32 = vld [vmem:[%s2378_s1 + $0x110] sm:$0xff]  }
   0xb   :  { %1542 = vmatpush3.bf16.msra.mxu0 %v1803_v5  ;;  %1790 = vmatpush3.bf16.msra.mxu1 %v1803_v5  ;;  %v1831_v28 = vld [vmem:[%s2378_s1 + $0x88] sm:$0xff]   ;;  %v1834_v33 = vld [vmem:[%s2378_s1 + $0x90] sm:$0xff]   ;;  %v1837_v35 = vld [vmem:[%s2379_s0 + $0x144] ss:$20 sps:$4 sm:$0xff]  }
   0xc   :  { %1543 = vmatprep.subr.bf16.mxu0 %v1804_v6  ;;  %1783 = vmatprep.subr.bf16.mxu1 %v1804_v6  ;;  %v1829_v31 = vld [vmem:[%s2379_s0 + $0x118] ss:$20 sps:$4 sm:$0xff]   ;;  %v1835_v34 = vld [vmem:[%s2379_s0 + $0x54] ss:$20 sps:$4 sm:$0xff]   ;;  %v1839_v39 = vld [vmem:[%s2379_s0 + $0x50] ss:$20 sps:$4 sm:$0xff]  }
   0xd   :  { %v1841_v36 = vld [vmem:[%s2378_s1 + $0xd8] sm:$0xff]   ;;  %v1848_v40 = vld [vmem:[%s2378_s1 + $0xe0] sm:$0xff]   ;;  %v1853_v46 = vld [vmem:[%s2378_s1 + $0xe8] sm:$0xff]  }
   0xe   :  { %v1842_v37 = vld [vmem:[%s2378_s1 + $0x98] sm:$0xff]   ;;  %v1840_v41 = vld [vmem:[%s2379_s0 + $0x140] ss:$20 sps:$4 sm:$0xff]   ;;  %v1854_v47 = vld [vmem:[%s2378_s1 + $0xa8] sm:$0xff]  }
   0xf   :  { %1544 = vmatpush3.bf16.msra.mxu0 %v1805_v7  ;;  %1791 = vmatpush3.bf16.msra.mxu1 %v1805_v7  ;;  %v1843_v38 = vld [vmem:[%s2378_s1 + $0x118] sm:$0xff]   ;;  %v1846_v43 = vld [vmem:[%s2379_s0 + $0x16c] ss:$20 sps:$4 sm:$0xff]   ;;  %v1862_v50 = vld [vmem:[%s2378_s1 + $0xf0] sm:$0xff]  }
  0x10   :  { %1545 = vmatprep.subr.bf16.mxu0 %v1806_v8  ;;  %1784 = vmatprep.subr.bf16.mxu1 %v1806_v8  ;;  %v1844_v42 = vld [vmem:[%s2379_s0 + $0x7c] ss:$20 sps:$4 sm:$0xff]   ;;  %v1851_v44 = vld [vmem:[%s2378_s1 + $0xa0] sm:$0xff]   ;;  %v1849_v48 = vld [vmem:[%s2379_s0 + $0x78] ss:$20 sps:$4 sm:$0xff]  }
  0x11   :  { %v1852_v45 = vld [vmem:[%s2378_s1 + $0x120] sm:$0xff]   ;;  %v1859_v49 = vld [vmem:[%s2378_s1 + $0x128] sm:$0xff]   ;;  %v1863_v54 = vld [vmem:[%s2378_s1 + $0xb0] sm:$0xff]  }
  0x12   :  { %v1850_v51 = vld [vmem:[%s2379_s0 + $0x168] ss:$20 sps:$4 sm:$0xff]   ;;  %v1855_v52 = vld [vmem:[%s2379_s0 + $0xa4] ss:$20 sps:$4 sm:$0xff]   ;;  %v1866_v55 = vld [vmem:[%s2378_s1 + $0x130] sm:$0xff]  }
  0x13   :  { %1546 = vmatpush3.bf16.msra.mxu0 %v1807_v9  ;;  %1792 = vmatpush3.bf16.msra.mxu1 %v1807_v9  ;;  %v1857_v53 = vld [vmem:[%s2379_s0 + $0x194] ss:$20 sps:$4 sm:$0xff]   ;;  %v1864_v56 = vld [vmem:[%s2378_s1 + $0xf8] sm:$0xff]   ;;  %v1861_v60 = vld [vmem:[%s2379_s0 + $0x190] ss:$20 sps:$4 sm:$0xff]  }
  0x14   :  { %1547 = vmatprep.subr.bf16.mxu0 %v1808_v10  ;;  %1785 = vmatprep.subr.bf16.mxu1 %v1808_v10  ;;  %v1865_v57 = vld [vmem:[%s2378_s1 + $0xb8] sm:$0xff]   ;;  %v1860_v59 = vld [vmem:[%s2379_s0 + $0xa0] ss:$20 sps:$4 sm:$0xff]   ;;  %v1876_v2 = vld [vmem:[%s2379_s0 + $0x30] ss:$20 sps:$4 sm:$0xff]  }
  0x15   :  { %v1873_v58 = vld [vmem:[%s2378_s1 + $0x138] sm:$0xff]   ;;  %v1867_v61 = vld [vmem:[%s2379_s0 + $0xcc] ss:$20 sps:$4 sm:$0xff]   ;;  %v1874_v1 = vld [vmem:[%s2379_s0 + $0x34] ss:$20 sps:$4 sm:$0xff]  }
  0x16   :  { %v1871_v62 = vld [vmem:[%s2379_s0 + $0xc] ss:$20 sps:$4 sm:$0xff]   ;;  %v1869_v63 = vld [vmem:[%s2379_s0 + $0x8] ss:$20 sps:$4 sm:$0xff]   ;;  %v1877_v3 = vld [vmem:[%s2379_s0 + $0x10] ss:$20 sps:$4 sm:$0xff]  }
  0x17   :  { %1548 = vmatpush3.bf16.msra.mxu0 %v1809_v13  ;;  %1793 = vmatpush3.bf16.msra.mxu1 %v1809_v13  ;;  %v1872_v0 = vld [vmem:[%s2379_s0 + $0xc8] ss:$20 sps:$4 sm:$0xff]   ;;  %v1880_v5 = vld [vmem:[%s2379_s0 + $0x58] ss:$20 sps:$4 sm:$0xff]   ;;  %v1884_v8 = vld [vmem:[%s2379_s0 + $0x80] ss:$20 sps:$4 sm:$0xff]  }
  0x18   :  { %1549 = vmatprep.subr.bf16.mxu0 %v1810_v14  ;;  %1786 = vmatprep.subr.bf16.mxu1 %v1810_v14  ;;  %v1878_v4 = vld [vmem:[%s2379_s0 + $0x5c] ss:$20 sps:$4 sm:$0xff]   ;;  %v1881_v6 = vld [vmem:[%s2379_s0 + $0x38] ss:$20 sps:$4 sm:$0xff]   ;;  %v1885_v9 = vld [vmem:[%s2379_s0 + $0x60] ss:$20 sps:$4 sm:$0xff]  }
  0x19   :  { %v1882_v7 = vld [vmem:[%s2379_s0 + $0x84] ss:$20 sps:$4 sm:$0xff]   ;;  %v1886_v10 = vld [vmem:[%s2379_s0 + $0xac] ss:$20 sps:$4 sm:$0xff]   ;;  %v1888_v11 = vld [vmem:[%s2379_s0 + $0xa8] ss:$20 sps:$4 sm:$0xff]  }
  0x1a   :  { %v1889_v12 = vld [vmem:[%s2379_s0 + $0x88] ss:$20 sps:$4 sm:$0xff]   ;;  %v1892_v14 = vld [vmem:[%s2379_s0 + $0xd0] ss:$20 sps:$4 sm:$0xff]  }
  0x1b   :  { %1550 = vmatpush3.bf16.msra.mxu0 %v1811_v15  ;;  %1794 = vmatpush3.bf16.msra.mxu1 %v1811_v15  ;;  %v1890_v13 = vld [vmem:[%s2379_s0 + $0xd4] ss:$20 sps:$4 sm:$0xff]   ;;  %v1893_v15 = vld [vmem:[%s2379_s0 + $0xb0] ss:$20 sps:$4 sm:$0xff]  }
  0x1c   :  { %1551 = vmatprep.subr.bf16.mxu0 %v1812_v16  ;;  %1787 = vmatprep.subr.bf16.mxu1 %v1812_v16  ;;  %v1894_v16 = vld [vmem:[%s2379_s0 + $0xfc] ss:$20 sps:$4 sm:$0xff]  }
  0x1f   :  { %1552 = vmatpush3.bf16.msra.mxu0 %v1813_v17  ;;  %1795 = vmatpush3.bf16.msra.mxu1 %v1813_v17  ;;  %v1896_v17 = vld [vmem:[%s2379_s0 + $0xf8] ss:$20 sps:$4 sm:$0xff]  }
  0x20   :  { %1720 = vmatprep.subr.bf16.mxu0 %v1915_v23  ;;  %1619 = vmatprep.subr.bf16.mxu1 %v1821_v19  ;;  %v1898_v19 = vld [vmem:[%s2379_s0 + $0x124] ss:$20 sps:$4 sm:$0xff]  }
  0x22   :  { %768 = vmatmul.mubr.bf16.vlgmr.msra.gmra.mrb[0].mxu0 %v1814_v18  ;;  %816 = vmatmul.mubr.bf16.vlgmr.msra.gmra.mrb[0].mxu1 %v1817_v20  ;;  %v1897_v18 = vld [vmem:[%s2379_s0 + $0xd8] ss:$20 sps:$4 sm:$0xff]   ;;  %v1900_v20 = vld [vmem:[%s2379_s0 + $0x120] ss:$20 sps:$4 sm:$0xff]  }
  0x23   :  { %1721 = vmatpush3.bf16.msra.mxu0 %v1820_v21  ;;  %1620 = vmatpush3.bf16.msra.mxu1 %v1822_v22  ;;  %v1901_v21 = vld [vmem:[%s2379_s0 + $0x100] ss:$20 sps:$4 sm:$0xff]  }
  0x24   :  { %1722 = vmatprep.subr.bf16.mxu0 %v1915_v23  ;;  %775 = vmatprep.mubr.bf16.mxu0 %v1823_v24  ;;  %v1902_v22 = vld [vmem:[%s2379_s0 + $0x14c] ss:$20 sps:$4 sm:$0xff]   ;;  %v1904_v24 = vld [vmem:[%s2379_s0 + $0x148] ss:$20 sps:$4 sm:$0xff]  }
  0x25   :  { %823 = vmatprep.mubr.bf16.mxu1 %v1825_v25  ;;  %1621 = vmatprep.subr.bf16.mxu1 %v1830_v26  ;;  %v1905_v25 = vld [vmem:[%s2379_s0 + $0x128] ss:$20 sps:$4 sm:$0xff]  }
  0x26   :  { %v1906_v26 = vld [vmem:[%s2379_s0 + $0x174] ss:$20 sps:$4 sm:$0xff]  }
  0x27   :  { %1723 = vmatpush3.bf16.msra.mxu0 %v1827_v27  ;;  %1622 = vmatpush3.bf16.msra.mxu1 %v1831_v28  ;;  %v1908_v27 = vld [vmem:[%s2379_s0 + $0x170] ss:$20 sps:$4 sm:$0xff]  }
  0x28   :  { %1724 = vmatprep.subr.bf16.mxu0 %v1915_v23  ;;  %1623 = vmatprep.subr.bf16.mxu1 %v1832_v30  ;;  %v1909_v28 = vld [vmem:[%s2379_s0 + $0x150] ss:$20 sps:$4 sm:$0xff]   ;;  %v1912_v30 = vld [vmem:[%s2379_s0 + $0x198] ss:$20 sps:$4 sm:$0xff]  }
  0x2a   :  { %776 = vmatmul.mubr.bf16.gmra.mrb[4].mxu0 %v1828_v29  ;;  %824 = vmatmul.mubr.bf16.gmra.mrb[4].mxu1 %v1829_v31  ;;  %v1910_v29 = vld [vmem:[%s2379_s0 + $0x19c] ss:$20 sps:$4 sm:$0xff]   ;;  %v1913_v31 = vld [vmem:[%s2379_s0 + $0x178] ss:$20 sps:$4 sm:$0xff]  }
  0x2b   :  { %1725 = vmatpush3.bf16.msra.mxu0 %v1833_v32  ;;  %1624 = vmatpush3.bf16.msra.mxu1 %v1834_v33  ;;  %v1914_v32 = vld [vmem:[%s2379_s0 + $0x1a0] ss:$20 sps:$4 sm:$0xff]  }
  0x2c   :  { %783 = vmatprep.mubr.bf16.mxu0 %v1835_v34  ;;  %831 = vmatprep.mubr.bf16.mxu1 %v1837_v35 }
  0x2d   :  { %1625 = vmatprep.subr.bf16.mxu1 %v1841_v36  ;;  %1726 = vmatprep.subr.bf16.mxu0 %v1915_v23 }
  0x2f   :  { %1626 = vmatpush3.bf16.msra.mxu1 %v1842_v37  ;;  %1727 = vmatpush3.bf16.msra.mxu0 %v1843_v38 }
  0x30   :  { %1627 = vmatprep.subr.bf16.mxu1 %v1848_v40  ;;  %1728 = vmatprep.subr.bf16.mxu0 %v1915_v23 }
  0x32   :  { %784 = vmatmul.mubr.bf16.gmra.mrb[8].mxu0 %v1839_v39  ;;  %832 = vmatmul.mubr.bf16.gmra.mrb[8].mxu1 %v1840_v41 }
  0x33   :  { %791 = vmatprep.mubr.bf16.mxu0 %v1844_v42  ;;  %839 = vmatprep.mubr.bf16.mxu1 %v1846_v43 }
  0x34   :  { %1628 = vmatpush3.bf16.msra.mxu1 %v1851_v44  ;;  %1729 = vmatpush3.bf16.msra.mxu0 %v1852_v45 }
  0x35   :  { %1629 = vmatprep.subr.bf16.mxu1 %v1853_v46  ;;  %1730 = vmatprep.subr.bf16.mxu0 %v1915_v23 }
  0x38   :  { %1630 = vmatpush3.bf16.msra.mxu1 %v1854_v47  ;;  %1731 = vmatpush3.bf16.msra.mxu0 %v1859_v49 }
  0x39   :  { %1631 = vmatprep.subr.bf16.mxu1 %v1862_v50  ;;  %1732 = vmatprep.subr.bf16.mxu0 %v1915_v23 }
  0x3a   :  { %792 = vmatmul.mubr.bf16.gmra.mrb[12].mxu0 %v1849_v48  ;;  %840 = vmatmul.mubr.bf16.gmra.mrb[12].mxu1 %v1850_v51 }
  0x3b   :  { %799 = vmatprep.mubr.bf16.mxu0 %v1855_v52  ;;  %847 = vmatprep.mubr.bf16.mxu1 %v1857_v53 }
  0x3c   :  { %1632 = vmatpush3.bf16.msra.mxu1 %v1863_v54  ;;  %1733 = vmatpush3.bf16.msra.mxu0 %v1866_v55 }
  0x3d   :  { %1633 = vmatprep.subr.bf16.mxu1 %v1864_v56  ;;  %1734 = vmatprep.subr.bf16.mxu0 %v1915_v23 }
  0x40   :  { %1634 = vmatpush3.bf16.msra.mxu1 %v1865_v57  ;;  %1735 = vmatpush3.bf16.msra.mxu0 %v1873_v58 }
  0x42   :  { %800 = vmatmul.mubr.bf16.gmra.mrb[16].mxu0 %v1860_v59  ;;  %848 = vmatmul.mubr.bf16.gmra.mrb[16].mxu1 %v1861_v60 }
  0x43   :  { %807 = vmatprep.mubr.bf16.mxu0 %v1867_v61  ;;  %888 = vmatprep.mubr.bf16.mxu1 %v1871_v62 }
  0x4a   :  { %808 = vmatmul.mubr.bf16.gmra.mrb[20].mxu0 %v1872_v0  ;;  %889 = vmatmul.mubr.bf16.vlgmr.msra.gmra.mrb[20].mxu1 %v1869_v63 }
  0x4b   :  { %896 = vmatprep.mubr.bf16.mxu1 %v1874_v1  ;;  %1736 = vmatprep.mubr.msk.bf16.mxu0 %vm1916_vm0, %v1915_v23 }
  0x52   :  { %897 = vmatmul.mubr.bf16.gmra.mrb[24].mxu1 %v1876_v2  ;;  %1737 = vmatmul.mubr.bf16.vlgmr.msra.gmra.mrb[24].mxu0 %v1877_v3 }
  0x53   :  { %904 = vmatprep.mubr.bf16.mxu1 %v1878_v4  ;;  %1740 = vmatprep.mubr.msk.bf16.mxu0 %vm1916_vm0, %v1915_v23 }
  0x5a   :  { %905 = vmatmul.mubr.bf16.gmra.mrb[28].mxu1 %v1880_v5  ;;  %1741 = vmatmul.mubr.bf16.gmra.mrb[28].mxu0 %v1881_v6 }
  0x5b   :  { %912 = vmatprep.mubr.bf16.mxu1 %v1882_v7  ;;  %1744 = vmatprep.mubr.msk.bf16.mxu0 %vm1916_vm0, %v1915_v23 }
  0x62   :  { %913 = vmatmul.mubr.bf16.gmra.mrb[32].mxu1 %v1884_v8  ;;  %1745 = vmatmul.mubr.bf16.gmra.mrb[32].mxu0 %v1885_v9 }
  0x63   :  { %920 = vmatprep.mubr.bf16.mxu1 %v1886_v10  ;;  %1748 = vmatprep.mubr.msk.bf16.mxu0 %vm1916_vm0, %v1915_v23 }
  0x6a   :  { %921 = vmatmul.mubr.bf16.gmra.mrb[36].mxu1 %v1888_v11  ;;  %1749 = vmatmul.mubr.bf16.gmra.mrb[36].mxu0 %v1889_v12 }
  0x6b   :  { %928 = vmatprep.mubr.bf16.mxu1 %v1890_v13  ;;  %1752 = vmatprep.mubr.msk.bf16.mxu0 %vm1916_vm0, %v1915_v23 }
  0x72   :  { %929 = vmatmul.mubr.bf16.gmra.mrb[40].mxu1 %v1892_v14  ;;  %1753 = vmatmul.mubr.bf16.gmra.mrb[40].mxu0 %v1893_v15 }
  0x73   :  { %936 = vmatprep.mubr.bf16.mxu1 %v1894_v16  ;;  %1756 = vmatprep.mubr.msk.bf16.mxu0 %vm1916_vm0, %v1915_v23 }
  0x7a   :  { %937 = vmatmul.mubr.bf16.gmra.mrb[44].mxu1 %v1896_v17  ;;  %1757 = vmatmul.mubr.bf16.gmra.mrb[44].mxu0 %v1897_v18 }
  0x7b   :  { %944 = vmatprep.mubr.bf16.mxu1 %v1898_v19  ;;  %1760 = vmatprep.mubr.msk.bf16.mxu0 %vm1916_vm0, %v1915_v23 }
  0x82   :  { %945 = vmatmul.mubr.bf16.gmra.mrb[48].mxu1 %v1900_v20  ;;  %1761 = vmatmul.mubr.bf16.gmra.mrb[48].mxu0 %v1901_v21 }
  0x83   :  { %952 = vmatprep.mubr.bf16.mxu1 %v1902_v22  ;;  %1764 = vmatprep.mubr.msk.bf16.mxu0 %vm1916_vm0, %v1915_v23 }
  0x8a   :  { %953 = vmatmul.mubr.bf16.gmra.mrb[52].mxu1 %v1904_v24  ;;  %1765 = vmatmul.mubr.bf16.gmra.mrb[52].mxu0 %v1905_v25 }
  0x8b   :  { %960 = vmatprep.mubr.bf16.mxu1 %v1906_v26  ;;  %1768 = vmatprep.mubr.msk.bf16.mxu0 %vm1916_vm0, %v1915_v23 }
  0x92   :  { %961 = vmatmul.mubr.bf16.gmra.mrb[56].mxu1 %v1908_v27  ;;  %1769 = vmatmul.mubr.bf16.gmra.mrb[56].mxu0 %v1909_v28 }
  0x93   :  { %968 = vmatprep.mubr.bf16.mxu1 %v1910_v29  ;;  %1772 = vmatprep.mubr.msk.bf16.mxu0 %vm1916_vm0, %v1915_v23 }
  0x9a   :  { %969 = vmatmul.mubr.bf16.gmra.mrb[60].mxu1 %v1912_v30  ;;  %1773 = vmatmul.mubr.bf16.gmra.mrb[60].mxu0 %v1913_v31 }
  0x9b   :  { %1776 = vmatprep.mubr.msk.bf16.mxu0 %vm1916_vm0, %v1915_v23 }
  0xa2   :  { %1777 = vmatmul.mubr.bf16.gmra.mrb[64].mxu0 %v1914_v32 }
  0xf5   :  { %v1553_v33 = vpop.f32.mrb[0].mxu0  ;;  %v1589_v34 = vpop.f32.mrb[0].mxu1 }
  0xf6   :  { %v1554_v35 = vpop.f32.mrb[1].mxu0  ;;  %v1590_v36 = vpop.f32.mrb[1].mxu1 }
  0xf7   :  { %v2252_v37 = vadd.f32 %v1554_v35, %v1553_v33  ;;  %v1556_v38 = vpop.f32.mrb[2].mxu0  ;;  %v2254_v39 = vadd.f32 %v1590_v36, %v1589_v34  ;;  %v1592_v40 = vpop.f32.mrb[2].mxu1 }
  0xf8   :  { %v1557_v41 = vpop.f32.mrb[3].mxu0  ;;  %v1593_v42 = vpop.f32.mrb[3].mxu1 }
  0xf9   :  { %v2256_v43 = vadd.f32 %v1557_v41, %v1556_v38  ;;  %v2258_v23 = vadd.f32 %v1593_v42, %v1592_v40 }
  0xfd   :  { %v1559_v44 = vpop.f32.mrb[4].mxu0  ;;  %v1595_v45 = vpop.f32.mrb[4].mxu1 }
  0xfe   :  { %v1560_v46 = vpop.f32.mrb[5].mxu0  ;;  %v1596_v47 = vpop.f32.mrb[5].mxu1 }
  0xff   :  { %v2260_v48 = vadd.f32 %v1560_v46, %v1559_v44  ;;  %v1562_v49 = vpop.f32.mrb[6].mxu0  ;;  %v2262_v50 = vadd.f32 %v1596_v47, %v1595_v45  ;;  %v1598_v51 = vpop.f32.mrb[6].mxu1 }
 0x100   :  { %v1563_v52 = vpop.f32.mrb[7].mxu0  ;;  %v1599_v53 = vpop.f32.mrb[7].mxu1 }
 0x101   :  { %v2264_v54 = vadd.f32 %v1563_v52, %v1562_v49  ;;  %v2266_v55 = vadd.f32 %v1599_v53, %v1598_v51  ;;  %v2301_v49 = vld [vmem:[%s2380_s2] ss:$0 sm:$0xff] }
 0x105   :  { %v1565_v56 = vpop.f32.mrb[8].mxu0  ;;  %v1601_v57 = vpop.f32.mrb[8].mxu1 }
 0x106   :  { %v1566_v58 = vpop.f32.mrb[9].mxu0  ;;  %v1602_v59 = vpop.f32.mrb[9].mxu1 }
 0x107   :  { %v2268_v60 = vadd.f32 %v1566_v58, %v1565_v56  ;;  %v1568_v61 = vpop.f32.mrb[10].mxu0  ;;  %v2270_v62 = vadd.f32 %v1602_v59, %v1601_v57  ;;  %v1604_v63 = vpop.f32.mrb[10].mxu1 }
 0x108   :  { %v1569_v0 = vpop.f32.mrb[11].mxu0  ;;  %v1605_v1 = vpop.f32.mrb[11].mxu1 }
 0x109   :  { %v2272_v2 = vadd.f32 %v1569_v0, %v1568_v61  ;;  %v2274_v3 = vadd.f32 %v1605_v1, %v1604_v63 }
 0x10d   :  { %v1571_v4 = vpop.f32.mrb[12].mxu0  ;;  %v1607_v5 = vpop.f32.mrb[12].mxu1 }
 0x10e   :  { %v1572_v6 = vpop.f32.mrb[13].mxu0  ;;  %v1608_v7 = vpop.f32.mrb[13].mxu1 }
 0x10f   :  { %v2276_v8 = vadd.f32 %v1572_v6, %v1571_v4  ;;  %v1574_v9 = vpop.f32.mrb[14].mxu0  ;;  %v2278_v10 = vadd.f32 %v1608_v7, %v1607_v5  ;;  %v1610_v11 = vpop.f32.mrb[14].mxu1 }
 0x110   :  { %v1575_v12 = vpop.f32.mrb[15].mxu0  ;;  %v1611_v13 = vpop.f32.mrb[15].mxu1 }
 0x111   :  { %v2280_v14 = vadd.f32 %v1575_v12, %v1574_v9  ;;  %v2282_v15 = vadd.f32 %v1611_v13, %v1610_v11 }
 0x115   :  { %v1577_v16 = vpop.f32.mrb[16].mxu0  ;;  %v1613_v17 = vpop.f32.mrb[16].mxu1 }
 0x116   :  { %v1578_v18 = vpop.f32.mrb[17].mxu0  ;;  %v1614_v19 = vpop.f32.mrb[17].mxu1 }
 0x117   :  { %v2284_v20 = vadd.f32 %v1578_v18, %v1577_v16  ;;  %v1580_v21 = vpop.f32.mrb[18].mxu0  ;;  %v2286_v22 = vadd.f32 %v1614_v19, %v1613_v17  ;;  %v1616_v24 = vpop.f32.mrb[18].mxu1 }
 0x118   :  { %v1581_v25 = vpop.f32.mrb[19].mxu0  ;;  %v1617_v26 = vpop.f32.mrb[19].mxu1 }
 0x119   :  { %v2288_v27 = vadd.f32 %v1581_v25, %v1580_v21  ;;  %v2290_v28 = vadd.f32 %v1617_v26, %v1616_v24 }
 0x11d   :  { %v1583_v29 = vpop.f32.mrb[20].mxu0  ;;  %v1635_v30 = vpop.f32.mrb[20].mxu1 }
 0x11e   :  { %v1584_v31 = vpop.f32.mrb[21].mxu0  ;;  %v1636_v32 = vpop.f32.mrb[21].mxu1 }
 0x11f   :  { %v2292_v33 = vadd.f32 %v1584_v31, %v1583_v29  ;;  %v1637_v34 = vadd.f32 %v1636_v32, %v1635_v30  ;;  %v1586_v35 = vpop.f32.mrb[22].mxu0  ;;  %v1638_v36 = vpop.f32.mrb[22].mxu1 }
 0x120   :  { %v1587_v38 = vpop.f32.mrb[23].mxu0  ;;  %v1639_v40 = vpop.f32.mrb[23].mxu1 }
 0x121   :  { %v2294_v41 = vadd.f32 %v1587_v38, %v1586_v35  ;;  %v1640_v42 = vadd.f32 %v1639_v40, %v1638_v36  ;;  %v891_v44 = vadd.f32 %v1637_v34, %v2252_v37 }
 0x123   :  { %v894_v45 = vadd.f32 %v1640_v42, %v2256_v43 }
 0x125   :  { %v1641_v46 = vpop.f32.mrb[24].mxu1  ;;  %v1011_v47 = vpop.f32.mrb[24].mxu0 }
 0x126   :  { %v1012_v51 = vadd.f32 %v1011_v47, %v891_v44  ;;  %v1642_v52 = vpop.f32.mrb[25].mxu1  ;;  %v1738_v53 = vpop.f32.mrb[25].mxu0 }
 0x127   :  { %v1643_v56 = vadd.f32 %v1642_v52, %v1641_v46  ;;  %v1644_v57 = vpop.f32.mrb[26].mxu1  ;;  %v1014_v58 = vpop.f32.mrb[26].mxu0 }
 0x128   :  { %v1174_v59 = vadd.f32 %v2301_v49, %v1012_v51  ;;  %v1015_v61 = vadd.f32 %v1014_v58, %v894_v45  ;;  %v1645_v63 = vpop.f32.mrb[27].mxu1  ;;  %v1739_v37 = vpop.f32.mrb[27].mxu0 }
 0x129   :  { %v1646_v0 = vadd.f32 %v1645_v63, %v1644_v57  ;;  %v899_v43 = vadd.f32 %v1643_v56, %v2260_v48 }
 0x12a   :  { %v1175_v1 = vadd.f32 %v2301_v49, %v1015_v61  ;;  %v1196_v5 = vmax.f32 %v1174_v59, 0.0 }
 0x12b   :  { %v902_v4 = vadd.f32 %v1646_v0, %v2264_v54 }
 0x12c   :  { %v1197_v6 = vmax.f32 %v1175_v1, 0.0 }
 0x12d   :  { %v1647_v7 = vpop.f32.mrb[28].mxu1  ;;  %v1019_v9 = vpop.f32.mrb[28].mxu0 }
 0x12e   :  { %v1475_v11 = vpack.c.bf16 %v1197_v6, %v1196_v5  ;;  %v1020_v12 = vadd.f32 %v1019_v9, %v899_v43  ;;  %v1648_v13 = vpop.f32.mrb[29].mxu1  ;;  %v1742_v16 = vpop.f32.mrb[29].mxu0 }
 0x12f   :  { %v1649_v17 = vadd.f32 %v1648_v13, %v1647_v7  ;;  %v1650_v18 = vpop.f32.mrb[30].mxu1  ;;  %v1022_v19 = vpop.f32.mrb[30].mxu0 }
 0x130   :  { %1476 = vst [vmem:[%s2381_s3] sm:$0xff] %v1475_v11   ;;  %v1176_v48 = vadd.f32 %v2301_v49, %v1020_v12  ;;  %v1023_v21 = vadd.f32 %v1022_v19, %v902_v4  ;;  %v1651_v24 = vpop.f32.mrb[31].mxu1  ;;  %v1743_v54 = vpop.f32.mrb[31].mxu0 }
 0x131   :  { %v1652_v25 = vadd.f32 %v1651_v24, %v1650_v18  ;;  %v907_v26 = vadd.f32 %v1649_v17, %v2268_v60 }
 0x132   :  { %v1177_v29 = vadd.f32 %v2301_v49, %v1023_v21  ;;  %v1198_v31 = vmax.f32 %v1176_v48, 0.0 }
 0x133   :  { %v910_v30 = vadd.f32 %v1652_v25, %v2272_v2 }
 0x134   :  { %v1199_v32 = vmax.f32 %v1177_v29, 0.0 }
 0x135   :  { %v1653_v34 = vpop.f32.mrb[32].mxu1  ;;  %v1027_v35 = vpop.f32.mrb[32].mxu0 }
 0x136   :  { %v1480_v36 = vpack.c.bf16 %v1199_v32, %v1198_v31  ;;  %v1028_v38 = vadd.f32 %v1027_v35, %v907_v26  ;;  %v1654_v40 = vpop.f32.mrb[33].mxu1  ;;  %v1746_v42 = vpop.f32.mrb[33].mxu0 }
 0x137   :  { %v1655_v44 = vadd.f32 %v1654_v40, %v1653_v34  ;;  %v1656_v45 = vpop.f32.mrb[34].mxu1  ;;  %v1030_v46 = vpop.f32.mrb[34].mxu0 }
 0x138   :  { %1527 = vst [vmem:[%s2381_s3 + $0x8] sm:$0xff] %v1480_v36   ;;  %v1178_v60 = vadd.f32 %v2301_v49, %v1028_v38  ;;  %v1031_v47 = vadd.f32 %v1030_v46, %v910_v30  ;;  %v1657_v51 = vpop.f32.mrb[35].mxu1  ;;  %v1747_v2 = vpop.f32.mrb[35].mxu0 }
 0x139   :  { %v1658_v52 = vadd.f32 %v1657_v51, %v1656_v45  ;;  %v915_v53 = vadd.f32 %v1655_v44, %v2276_v8 }
 0x13a   :  { %v1179_v56 = vadd.f32 %v2301_v49, %v1031_v47  ;;  %v1200_v58 = vmax.f32 %v1178_v60, 0.0 }
 0x13b   :  { %v918_v57 = vadd.f32 %v1658_v52, %v2280_v14 }
 0x13c   :  { %v1201_v59 = vmax.f32 %v1179_v56, 0.0 }
 0x13d   :  { %v1659_v61 = vpop.f32.mrb[36].mxu1  ;;  %v1035_v63 = vpop.f32.mrb[36].mxu0 }
 0x13e   :  { %v1485_v37 = vpack.c.bf16 %v1201_v59, %v1200_v58  ;;  %v1036_v0 = vadd.f32 %v1035_v63, %v915_v53  ;;  %v1660_v43 = vpop.f32.mrb[37].mxu1  ;;  %v1750_v1 = vpop.f32.mrb[37].mxu0 }
 0x13f   :  { %v1661_v4 = vadd.f32 %v1660_v43, %v1659_v61  ;;  %v1662_v5 = vpop.f32.mrb[38].mxu1  ;;  %v1038_v6 = vpop.f32.mrb[38].mxu0 }
 0x140   :  { %1528 = vst [vmem:[%s2381_s3 + $0x10] sm:$0xff] %v1485_v37   ;;  %v1180_v8 = vadd.f32 %v2301_v49, %v1036_v0  ;;  %v1039_v7 = vadd.f32 %v1038_v6, %v918_v57  ;;  %v1663_v9 = vpop.f32.mrb[39].mxu1  ;;  %v1751_v14 = vpop.f32.mrb[39].mxu0 }
 0x141   :  { %v1664_v11 = vadd.f32 %v1663_v9, %v1662_v5  ;;  %v923_v12 = vadd.f32 %v1661_v4, %v2284_v20 }
 0x142   :  { %v1181_v13 = vadd.f32 %v2301_v49, %v1039_v7  ;;  %v1202_v17 = vmax.f32 %v1180_v8, 0.0 }
 0x143   :  { %v926_v16 = vadd.f32 %v1664_v11, %v2288_v27 }
 0x144   :  { %v1203_v18 = vmax.f32 %v1181_v13, 0.0 }
 0x145   :  { %v1665_v19 = vpop.f32.mrb[40].mxu1  ;;  %v1043_v48 = vpop.f32.mrb[40].mxu0 }
 0x146   :  { %v1490_v21 = vpack.c.bf16 %v1203_v18, %v1202_v17  ;;  %v1044_v24 = vadd.f32 %v1043_v48, %v923_v12  ;;  %v1666_v54 = vpop.f32.mrb[41].mxu1  ;;  %v1754_v25 = vpop.f32.mrb[41].mxu0 }
 0x147   :  { %v1667_v26 = vadd.f32 %v1666_v54, %v1665_v19  ;;  %v1668_v29 = vpop.f32.mrb[42].mxu1  ;;  %v1046_v30 = vpop.f32.mrb[42].mxu0 }
 0x148   :  { %1529 = vst [vmem:[%s2381_s3 + $0x18] sm:$0xff] %v1490_v21   ;;  %v1182_v20 = vadd.f32 %v2301_v49, %v1044_v24  ;;  %v1047_v31 = vadd.f32 %v1046_v30, %v926_v16  ;;  %v1669_v32 = vpop.f32.mrb[43].mxu1  ;;  %v1755_v27 = vpop.f32.mrb[43].mxu0 }
 0x149   :  { %v1670_v34 = vadd.f32 %v1669_v32, %v1668_v29  ;;  %v931_v35 = vadd.f32 %v1667_v26, %v2292_v33 }
 0x14a   :  { %v1183_v36 = vadd.f32 %v2301_v49, %v1047_v31  ;;  %v1204_v40 = vmax.f32 %v1182_v20, 0.0 }
 0x14b   :  { %v934_v38 = vadd.f32 %v1670_v34, %v2294_v41 }
 0x14c   :  { %v1205_v42 = vmax.f32 %v1183_v36, 0.0 }
 0x14d   :  { %v1671_v44 = vpop.f32.mrb[44].mxu1  ;;  %v1051_v45 = vpop.f32.mrb[44].mxu0 }
 0x14e   :  { %v1495_v46 = vpack.c.bf16 %v1205_v42, %v1204_v40  ;;  %v1052_v60 = vadd.f32 %v1051_v45, %v931_v35  ;;  %v1672_v47 = vpop.f32.mrb[45].mxu1  ;;  %v1758_v51 = vpop.f32.mrb[45].mxu0 }
 0x14f   :  { %v1673_v2 = vadd.f32 %v1672_v47, %v1671_v44  ;;  %v1674_v52 = vpop.f32.mrb[46].mxu1  ;;  %v1054_v53 = vpop.f32.mrb[46].mxu0 }
 0x150   :  { %1530 = vst [vmem:[%s2381_s3 + $0x20] sm:$0xff] %v1495_v46   ;;  %v1184_v33 = vadd.f32 %v2301_v49, %v1052_v60  ;;  %v1055_v56 = vadd.f32 %v1054_v53, %v934_v38  ;;  %v1675_v57 = vpop.f32.mrb[47].mxu1  ;;  %v1759_v41 = vpop.f32.mrb[47].mxu0 }
 0x151   :  { %v1676_v58 = vadd.f32 %v1675_v57, %v1674_v52  ;;  %v939_v59 = vadd.f32 %v1673_v2, %v2254_v39 }
 0x152   :  { %v1185_v61 = vadd.f32 %v2301_v49, %v1055_v56  ;;  %v1206_v37 = vmax.f32 %v1184_v33, 0.0 }
 0x153   :  { %v942_v63 = vadd.f32 %v1676_v58, %v2258_v23 }
 0x154   :  { %v1207_v0 = vmax.f32 %v1185_v61, 0.0 }
 0x155   :  { %v1677_v43 = vpop.f32.mrb[48].mxu1  ;;  %v1059_v1 = vpop.f32.mrb[48].mxu0 }
 0x156   :  { %v1500_v4 = vpack.c.bf16 %v1207_v0, %v1206_v37  ;;  %v1060_v5 = vadd.f32 %v1059_v1, %v939_v59  ;;  %v1678_v6 = vpop.f32.mrb[49].mxu1  ;;  %v1762_v8 = vpop.f32.mrb[49].mxu0 }
 0x157   :  { %v1679_v7 = vadd.f32 %v1678_v6, %v1677_v43  ;;  %v1680_v9 = vpop.f32.mrb[50].mxu1  ;;  %v1062_v14 = vpop.f32.mrb[50].mxu0 }
 0x158   :  { %1531 = vst [vmem:[%s2381_s3 + $0x28] sm:$0xff] %v1500_v4   ;;  %v1186_v39 = vadd.f32 %v2301_v49, %v1060_v5  ;;  %v1063_v11 = vadd.f32 %v1062_v14, %v942_v63  ;;  %v1681_v12 = vpop.f32.mrb[51].mxu1  ;;  %v1763_v23 = vpop.f32.mrb[51].mxu0 }
 0x159   :  { %v1682_v13 = vadd.f32 %v1681_v12, %v1680_v9  ;;  %v947_v16 = vadd.f32 %v1679_v7, %v2262_v50 }
 0x15a   :  { %v1187_v17 = vadd.f32 %v2301_v49, %v1063_v11  ;;  %v1208_v19 = vmax.f32 %v1186_v39, 0.0 }
 0x15b   :  { %v950_v18 = vadd.f32 %v1682_v13, %v2266_v55 }
 0x15c   :  { %v1209_v48 = vmax.f32 %v1187_v17, 0.0 }
 0x15d   :  { %v1683_v21 = vpop.f32.mrb[52].mxu1  ;;  %v1067_v24 = vpop.f32.mrb[52].mxu0 }
 0x15e   :  { %v1505_v54 = vpack.c.bf16 %v1209_v48, %v1208_v19  ;;  %v1068_v25 = vadd.f32 %v1067_v24, %v947_v16  ;;  %v1684_v26 = vpop.f32.mrb[53].mxu1  ;;  %v1766_v29 = vpop.f32.mrb[53].mxu0 }
 0x15f   :  { %v1685_v30 = vadd.f32 %v1684_v26, %v1683_v21  ;;  %v1686_v20 = vpop.f32.mrb[54].mxu1  ;;  %v1070_v31 = vpop.f32.mrb[54].mxu0 }
 0x160   :  { %1532 = vst [vmem:[%s2381_s3 + $0x30] sm:$0xff] %v1505_v54   ;;  %v1188_v50 = vadd.f32 %v2301_v49, %v1068_v25  ;;  %v1071_v32 = vadd.f32 %v1070_v31, %v950_v18  ;;  %v1687_v27 = vpop.f32.mrb[55].mxu1  ;;  %v1767_v55 = vpop.f32.mrb[55].mxu0 }
 0x161   :  { %v1688_v34 = vadd.f32 %v1687_v27, %v1686_v20  ;;  %v955_v35 = vadd.f32 %v1685_v30, %v2270_v62 }
 0x162   :  { %v1189_v36 = vadd.f32 %v2301_v49, %v1071_v32  ;;  %v1210_v40 = vmax.f32 %v1188_v50, 0.0 }
 0x163   :  { %v958_v38 = vadd.f32 %v1688_v34, %v2274_v3 }
 0x164   :  { %v1211_v42 = vmax.f32 %v1189_v36, 0.0 }
 0x165   :  { %v1689_v44 = vpop.f32.mrb[56].mxu1  ;;  %v1075_v45 = vpop.f32.mrb[56].mxu0 }
 0x166   :  { %v1510_v46 = vpack.c.bf16 %v1211_v42, %v1210_v40  ;;  %v1076_v60 = vadd.f32 %v1075_v45, %v955_v35  ;;  %v1690_v47 = vpop.f32.mrb[57].mxu1  ;;  %v1770_v51 = vpop.f32.mrb[57].mxu0 }
 0x167   :  { %v1691_v2 = vadd.f32 %v1690_v47, %v1689_v44  ;;  %v1692_v52 = vpop.f32.mrb[58].mxu1  ;;  %v1078_v53 = vpop.f32.mrb[58].mxu0 }
 0x168   :  { %1533 = vst [vmem:[%s2381_s3 + $0x38] sm:$0xff] %v1510_v46   ;;  %v1190_v62 = vadd.f32 %v2301_v49, %v1076_v60  ;;  %v1079_v33 = vadd.f32 %v1078_v53, %v958_v38  ;;  %v1693_v56 = vpop.f32.mrb[59].mxu1  ;;  %v1771_v3 = vpop.f32.mrb[59].mxu0 }
 0x169   :  { %v1694_v57 = vadd.f32 %v1693_v56, %v1692_v52  ;;  %v963_v41 = vadd.f32 %v1691_v2, %v2278_v10 }
 0x16a   :  { %v1191_v58 = vadd.f32 %v2301_v49, %v1079_v33  ;;  %v1212_v61 = vmax.f32 %v1190_v62, 0.0 }
 0x16b   :  { %v966_v59 = vadd.f32 %v1694_v57, %v2282_v15 }
 0x16c   :  { %v1213_v63 = vmax.f32 %v1191_v58, 0.0 }
 0x16d   :  { %v1695_v37 = vpop.f32.mrb[60].mxu1  ;;  %v1083_v0 = vpop.f32.mrb[60].mxu0 }
 0x16e   :  { %v1515_v43 = vpack.c.bf16 %v1213_v63, %v1212_v61  ;;  %v1084_v1 = vadd.f32 %v1083_v0, %v963_v41  ;;  %v1696_v4 = vpop.f32.mrb[61].mxu1  ;;  %v1774_v5 = vpop.f32.mrb[61].mxu0 }
 0x16f   :  { %v1697_v6 = vadd.f32 %v1696_v4, %v1695_v37  ;;  %v1698_v8 = vpop.f32.mrb[62].mxu1  ;;  %v1086_v7 = vpop.f32.mrb[62].mxu0 }
 0x170   :  { %1534 = vst [vmem:[%s2381_s3 + $0x40] sm:$0xff] %v1515_v43   ;;  %v1192_v10 = vadd.f32 %v2301_v49, %v1084_v1  ;;  %v1087_v9 = vadd.f32 %v1086_v7, %v966_v59  ;;  %v1699_v14 = vpop.f32.mrb[63].mxu1  ;;  %v1775_v15 = vpop.f32.mrb[63].mxu0 }
 0x171   :  { %v1700_v39 = vadd.f32 %v1699_v14, %v1698_v8  ;;  %v971_v11 = vadd.f32 %v1697_v6, %v2286_v22 }
 0x172   :  { %v1193_v12 = vadd.f32 %v2301_v49, %v1087_v9  ;;  %v1214_v13 = vmax.f32 %v1192_v10, 0.0 }
 0x173   :  { %v974_v23 = vadd.f32 %v1700_v39, %v2290_v28 }
 0x174   :  { %v1215_v16 = vmax.f32 %v1193_v12, 0.0 }
 0x175   :  { %v1091_v17 = vpop.f32.mrb[64].mxu0 }
 0x176   :  { %v1520_v18 = vpack.c.bf16 %v1215_v16, %v1214_v13  ;;  %v1092_v19 = vadd.f32 %v1091_v17, %v971_v11  ;;  %v1778_v48 = vpop.f32.mrb[65].mxu0 }
 0x177   :  { %v1094_v21 = vpop.f32.mrb[66].mxu0 }
 0x178   :  { %1535 = vst [vmem:[%s2381_s3 + $0x48] sm:$0xff] %v1520_v18   ;;  %v1194_v24 = vadd.f32 %v2301_v49, %v1092_v19  ;;  %v1095_v54 = vadd.f32 %v1094_v21, %v974_v23  ;;  %v1779_v25 = vpop.f32.mrb[67].mxu0 }
 0x17a   :  { %v1195_v22 = vadd.f32 %v2301_v49, %v1095_v54  ;;  %v1216_v26 = vmax.f32 %v1194_v24, 0.0 }
 0x17c   :  { %v1217_v29 = vmax.f32 %v1195_v22, 0.0 }
 0x17e   :  { %v1525_v28 = vpack.c.bf16 %v1217_v29, %v1216_v26 }
 0x180   :  { %1536 = vst [vmem:[%s2381_s3 + $0x50] sm:$0xff] %v1525_v28  }

// kernel: nvidia_forward.12
= control target key start
LH: loop header
LB: loop body
LE: loop exit
PB: predicated region body
PF: predicated region fallthrough
CT: control target
= control target key end

     0   :  { %s12831_s12 = smov 0   ;;  %s12833_s13 = smov 0   ;;  %s15008_s0 = inlined_call_operand.vmem [shape: bf16[16,5248], index: 0, kind: input, shape index: {}]   ;;  %s15009_s1 = inlined_call_operand.vmem [shape: bf16[5248,1280], index: 1, kind: input, shape index: {}]   ;;  %s15010_s2 = inlined_call_operand.vmem [shape: f32[1,1280], index: 2, kind: input, shape index: {}]   ;;  %s15011_s3 = inlined_call_operand.vmem [shape: bf16[16,1280], index: 3, kind: output, shape index: {}]  }
   0x1   :  { %s12835_s14 = smov 0   ;;  %s12837_s15 = smov 0  }
   0x2   :  { %s12839_s16 = smov 0  }
   0x3 LB: > { %s28_s17 = sadd.s32 1, %s12804_s15  ;;  %s10884_s18 = sadd.s32 4294967295, %s12808_s16   ;;  %s12808_s16 = sphi %s12839_s16, %s13_s16   ;;  %s12804_s15 = sphi %s12837_s15, %s15016_s15   ;;  %s12800_s14 = sphi %s12835_s14, %s15015_s14   ;;  %s12796_s13 = sphi %s12833_s13, %s15014_s13   ;;  %s12792_s12 = sphi %s12831_s12, %s15013_s12  }
   0x4   : > { %p30_p0 = scmp.ge.s32.totalorder %s28_s17, 5  ;;  %p76_p1 = scmp.ne.s32.totalorder %s12796_s13, %s12792_s12 }
   0x5   : > { %p77_p2 = scmp.eq.s32.totalorder %s12808_s16, 0  ;;  %p134_p4 = scmp.eq.s32.totalorder %s10884_s18, 4 }
   0x6   : > { %s15018_s17 = smov (%p30_p0, %s28_s17), 0  ;;  %s69_s20 = sadd.s32 1, %s12796_s13 }
   0x7   : > { %p78_p3 = por %p77_p2, %p76_p1  ;;  %s65_s19 = ssub.s32 %s12804_s15, %s15018_s17 }
   0x8   : > { %p67_p5 = scmp.eq.s32.totalorder %s65_s19, 0  ;;  %p12866_p6 = por %p134_p4, %p76_p1 }
   0x9   : > { %p10888_p7 = scmp.ge.s32.totalorder %s12808_s16, 5 }
   0xa   : > { %s12871_s22 = scalar_select %p67_p5, %s12796_s13, %s69_s20  }
   0xb   : > { %171 = sbr.rel (%p10888_p7) target bundleno = 351 (0x15f), region = 20 }
  0x12   : > { %174 = sbr.rel (!%p78_p3) target bundleno = 351 (0x15f), region = 24  ;;  %s176_s23 = sand.u32 (%p78_p3), 1, %s12796_s13  }
  0x13   : > { %s11598_s24 = sshll.u32 (%p78_p3), %s12804_s15, 3  ;;  %s11682_s25 = smul.u32 (%p78_p3), 5248, %s176_s23 }
  0x14   : > { %s12879_s28 = scalar_lea.vmem (%p78_p3), %s15009_s1, %s11598_s24 }
  0x15   : > { %v1525_v0 = vld [vmem:[%s12879_s28] sm:$0xff] (%p78_p3)  ;;  %v1527_v1 = vld [vmem:[%s12879_s28 + $0x28] sm:$0xff] (%p78_p3)  ;;  %v1529_v2 = vld [vmem:[%s12879_s28 + $0x50] sm:$0xff] (%p78_p3)  ;;  %s12887_s29 = scalar_lea.vmem (%p78_p3), [#allocation3], %s11682_s25 }
  0x16   : > { %v1531_v3 = vld [vmem:[%s12879_s28 + $0x78] sm:$0xff] (%p78_p3)  ;;  %v1533_v4 = vld [vmem:[%s12879_s28 + $0xa0] sm:$0xff] (%p78_p3)  ;;  %v1535_v5 = vld [vmem:[%s12879_s28 + $0xc8] sm:$0xff] (%p78_p3)  ;;  %1526 = vst [vmem:[%s12887_s29] sm:$0xff] (%p78_p3), %v1525_v0 }
  0x17   : > { %1528 = vst [vmem:[%s12887_s29 + $0x8] sm:$0xff] (%p78_p3), %v1527_v1  ;;  %1530 = vst [vmem:[%s12887_s29 + $0x10] sm:$0xff] (%p78_p3), %v1529_v2  ;;  %v1537_v6 = vld [vmem:[%s12879_s28 + $0xf0] sm:$0xff] (%p78_p3)  ;;  %v1539_v7 = vld [vmem:[%s12879_s28 + $0x118] sm:$0xff] (%p78_p3) }
  0x18   : > { %1532 = vst [vmem:[%s12887_s29 + $0x18] sm:$0xff] (%p78_p3), %v1531_v3  ;;  %1534 = vst [vmem:[%s12887_s29 + $0x20] sm:$0xff] (%p78_p3), %v1533_v4  ;;  %v1541_v8 = vld [vmem:[%s12879_s28 + $0x140] sm:$0xff] (%p78_p3)  ;;  %v1543_v9 = vld [vmem:[%s12879_s28 + $0x168] sm:$0xff] (%p78_p3) }
  0x19   : > { %1536 = vst [vmem:[%s12887_s29 + $0x28] sm:$0xff] %v1535_v5  ;;  %1538 = vst [vmem:[%s12887_s29 + $0x30] sm:$0xff] %v1537_v6  ;;  %v1545_v10 = vld [vmem:[%s12879_s28 + $0x190] sm:$0xff]  ;;  %v1547_v11 = vld [vmem:[%s12879_s28 + $0x1b8] sm:$0xff] }
  0x1a   : > { %1540 = vst [vmem:[%s12887_s29 + $0x38] sm:$0xff] %v1539_v7  ;;  %1542 = vst [vmem:[%s12887_s29 + $0x40] sm:$0xff] %v1541_v8  ;;  %v1549_v12 = vld [vmem:[%s12879_s28 + $0x1e0] sm:$0xff]  ;;  %v1551_v13 = vld [vmem:[%s12879_s28 + $0x208] sm:$0xff] }
  0x1b   : > { %1544 = vst [vmem:[%s12887_s29 + $0x48] sm:$0xff] %v1543_v9  ;;  %1546 = vst [vmem:[%s12887_s29 + $0x50] sm:$0xff] %v1545_v10  ;;  %v1553_v14 = vld [vmem:[%s12879_s28 + $0x230] sm:$0xff]  ;;  %v1555_v15 = vld [vmem:[%s12879_s28 + $0x258] sm:$0xff] }
  0x1c   : > { %1548 = vst [vmem:[%s12887_s29 + $0x58] sm:$0xff] %v1547_v11  ;;  %1550 = vst [vmem:[%s12887_s29 + $0x60] sm:$0xff] %v1549_v12  ;;  %v1557_v16 = vld [vmem:[%s12879_s28 + $0x280] sm:$0xff]  ;;  %v1559_v17 = vld [vmem:[%s12879_s28 + $0x2a8] sm:$0xff] }
  0x1d   : > { %1552 = vst [vmem:[%s12887_s29 + $0x68] sm:$0xff] %v1551_v13  ;;  %1554 = vst [vmem:[%s12887_s29 + $0x70] sm:$0xff] %v1553_v14  ;;  %v1561_v18 = vld [vmem:[%s12879_s28 + $0x2d0] sm:$0xff]  ;;  %v1563_v19 = vld [vmem:[%s12879_s28 + $0x2f8] sm:$0xff] }
  0x1e   : > { %1556 = vst [vmem:[%s12887_s29 + $0x78] sm:$0xff] %v1555_v15  ;;  %1558 = vst [vmem:[%s12887_s29 + $0x80] sm:$0xff] %v1557_v16  ;;  %v1565_v20 = vld [vmem:[%s12879_s28 + $0x320] sm:$0xff]  ;;  %v1567_v21 = vld [vmem:[%s12879_s28 + $0x348] sm:$0xff] }
  0x1f   : > { %1560 = vst [vmem:[%s12887_s29 + $0x88] sm:$0xff] %v1559_v17  ;;  %1562 = vst [vmem:[%s12887_s29 + $0x90] sm:$0xff] %v1561_v18  ;;  %v1569_v22 = vld [vmem:[%s12879_s28 + $0x370] sm:$0xff]  ;;  %v1571_v23 = vld [vmem:[%s12879_s28 + $0x398] sm:$0xff] }
  0x20   : > { %1564 = vst [vmem:[%s12887_s29 + $0x98] sm:$0xff] %v1563_v19  ;;  %1566 = vst [vmem:[%s12887_s29 + $0xa0] sm:$0xff] %v1565_v20  ;;  %v1573_v24 = vld [vmem:[%s12879_s28 + $0x3c0] sm:$0xff]  ;;  %v1575_v25 = vld [vmem:[%s12879_s28 + $0x3e8] sm:$0xff] }
  0x21   : > { %1568 = vst [vmem:[%s12887_s29 + $0xa8] sm:$0xff] %v1567_v21  ;;  %1570 = vst [vmem:[%s12887_s29 + $0xb0] sm:$0xff] %v1569_v22  ;;  %v1577_v26 = vld [vmem:[%s12879_s28 + $0x410] sm:$0xff]  ;;  %v1579_v27 = vld [vmem:[%s12879_s28 + $0x438] sm:$0xff] }
  0x22   : > { %1572 = vst [vmem:[%s12887_s29 + $0xb8] sm:$0xff] %v1571_v23  ;;  %1574 = vst [vmem:[%s12887_s29 + $0xc0] sm:$0xff] %v1573_v24  ;;  %v1581_v28 = vld [vmem:[%s12879_s28 + $0x460] sm:$0xff]  ;;  %v1583_v29 = vld [vmem:[%s12879_s28 + $0x488] sm:$0xff] }
  0x23   : > { %1576 = vst [vmem:[%s12887_s29 + $0xc8] sm:$0xff] %v1575_v25  ;;  %1578 = vst [vmem:[%s12887_s29 + $0xd0] sm:$0xff] %v1577_v26  ;;  %v1585_v30 = vld [vmem:[%s12879_s28 + $0x4b0] sm:$0xff]  ;;  %v1587_v31 = vld [vmem:[%s12879_s28 + $0x4d8] sm:$0xff] }
  0x24   : > { %1580 = vst [vmem:[%s12887_s29 + $0xd8] sm:$0xff] %v1579_v27  ;;  %1582 = vst [vmem:[%s12887_s29 + $0xe0] sm:$0xff] %v1581_v28  ;;  %v1589_v32 = vld [vmem:[%s12879_s28 + $0x500] sm:$0xff]  ;;  %v1591_v33 = vld [vmem:[%s12879_s28 + $0x528] sm:$0xff] }
  0x25   : > { %1584 = vst [vmem:[%s12887_s29 + $0xe8] sm:$0xff] %v1583_v29  ;;  %1586 = vst [vmem:[%s12887_s29 + $0xf0] sm:$0xff] %v1585_v30  ;;  %v1593_v34 = vld [vmem:[%s12879_s28 + $0x550] sm:$0xff]  ;;  %v1595_v35 = vld [vmem:[%s12879_s28 + $0x578] sm:$0xff] }
  0x26   : > { %1588 = vst [vmem:[%s12887_s29 + $0xf8] sm:$0xff] %v1587_v31  ;;  %1590 = vst [vmem:[%s12887_s29 + $0x100] sm:$0xff] %v1589_v32  ;;  %v1597_v36 = vld [vmem:[%s12879_s28 + $0x5a0] sm:$0xff]  ;;  %v1599_v37 = vld [vmem:[%s12879_s28 + $0x5c8] sm:$0xff] }
  0x27   : > { %1592 = vst [vmem:[%s12887_s29 + $0x108] sm:$0xff] %v1591_v33  ;;  %1594 = vst [vmem:[%s12887_s29 + $0x110] sm:$0xff] %v1593_v34  ;;  %v1601_v38 = vld [vmem:[%s12879_s28 + $0x5f0] sm:$0xff]  ;;  %v1603_v39 = vld [vmem:[%s12879_s28 + $0x618] sm:$0xff] }
  0x28   : > { %1596 = vst [vmem:[%s12887_s29 + $0x118] sm:$0xff] %v1595_v35  ;;  %1598 = vst [vmem:[%s12887_s29 + $0x120] sm:$0xff] %v1597_v36  ;;  %v1605_v40 = vld [vmem:[%s12879_s28 + $0x640] sm:$0xff]  ;;  %v1607_v41 = vld [vmem:[%s12879_s28 + $0x668] sm:$0xff] }
  0x29   : > { %1600 = vst [vmem:[%s12887_s29 + $0x128] sm:$0xff] %v1599_v37  ;;  %1602 = vst [vmem:[%s12887_s29 + $0x130] sm:$0xff] %v1601_v38  ;;  %v1609_v42 = vld [vmem:[%s12879_s28 + $0x690] sm:$0xff]  ;;  %v1611_v43 = vld [vmem:[%s12879_s28 + $0x6b8] sm:$0xff] }
  0x2a   : > { %1604 = vst [vmem:[%s12887_s29 + $0x138] sm:$0xff] %v1603_v39  ;;  %1606 = vst [vmem:[%s12887_s29 + $0x140] sm:$0xff] %v1605_v40  ;;  %v1613_v44 = vld [vmem:[%s12879_s28 + $0x6e0] sm:$0xff]  ;;  %v1615_v45 = vld [vmem:[%s12879_s28 + $0x708] sm:$0xff] }
  0x2b   : > { %1608 = vst [vmem:[%s12887_s29 + $0x148] sm:$0xff] %v1607_v41  ;;  %1610 = vst [vmem:[%s12887_s29 + $0x150] sm:$0xff] %v1609_v42  ;;  %v1617_v46 = vld [vmem:[%s12879_s28 + $0x730] sm:$0xff]  ;;  %v1619_v47 = vld [vmem:[%s12879_s28 + $0x758] sm:$0xff] }
  0x2c   : > { %1612 = vst [vmem:[%s12887_s29 + $0x158] sm:$0xff] %v1611_v43  ;;  %1614 = vst [vmem:[%s12887_s29 + $0x160] sm:$0xff] %v1613_v44  ;;  %v1621_v48 = vld [vmem:[%s12879_s28 + $0x780] sm:$0xff]  ;;  %v1623_v49 = vld [vmem:[%s12879_s28 + $0x7a8] sm:$0xff] }
  0x2d   : > { %1616 = vst [vmem:[%s12887_s29 + $0x168] sm:$0xff] %v1615_v45  ;;  %1618 = vst [vmem:[%s12887_s29 + $0x170] sm:$0xff] %v1617_v46  ;;  %v1625_v50 = vld [vmem:[%s12879_s28 + $0x7d0] sm:$0xff]  ;;  %v1627_v51 = vld [vmem:[%s12879_s28 + $0x7f8] sm:$0xff] }
  0x2e   : > { %1620 = vst [vmem:[%s12887_s29 + $0x178] sm:$0xff] %v1619_v47  ;;  %1622 = vst [vmem:[%s12887_s29 + $0x180] sm:$0xff] %v1621_v48  ;;  %v1629_v52 = vld [vmem:[%s12879_s28 + $0x820] sm:$0xff]  ;;  %v1631_v53 = vld [vmem:[%s12879_s28 + $0x848] sm:$0xff] }
  0x2f   : > { %1624 = vst [vmem:[%s12887_s29 + $0x188] sm:$0xff] %v1623_v49  ;;  %1626 = vst [vmem:[%s12887_s29 + $0x190] sm:$0xff] %v1625_v50  ;;  %v1633_v54 = vld [vmem:[%s12879_s28 + $0x870] sm:$0xff]  ;;  %v1635_v55 = vld [vmem:[%s12879_s28 + $0x898] sm:$0xff] }
  0x30   : > { %1628 = vst [vmem:[%s12887_s29 + $0x198] sm:$0xff] %v1627_v51  ;;  %1630 = vst [vmem:[%s12887_s29 + $0x1a0] sm:$0xff] %v1629_v52  ;;  %v1637_v56 = vld [vmem:[%s12879_s28 + $0x8c0] sm:$0xff]  ;;  %v1639_v57 = vld [vmem:[%s12879_s28 + $0x8e8] sm:$0xff] }
  0x31   : > { %1632 = vst [vmem:[%s12887_s29 + $0x1a8] sm:$0xff] %v1631_v53  ;;  %1634 = vst [vmem:[%s12887_s29 + $0x1b0] sm:$0xff] %v1633_v54  ;;  %v1641_v58 = vld [vmem:[%s12879_s28 + $0x910] sm:$0xff]  ;;  %v1643_v59 = vld [vmem:[%s12879_s28 + $0x938] sm:$0xff] }
  0x32   : > { %1636 = vst [vmem:[%s12887_s29 + $0x1b8] sm:$0xff] %v1635_v55  ;;  %1638 = vst [vmem:[%s12887_s29 + $0x1c0] sm:$0xff] %v1637_v56  ;;  %v1645_v60 = vld [vmem:[%s12879_s28 + $0x960] sm:$0xff]  ;;  %v1647_v61 = vld [vmem:[%s12879_s28 + $0x988] sm:$0xff] }
  0x33   : > { %1640 = vst [vmem:[%s12887_s29 + $0x1c8] sm:$0xff] %v1639_v57  ;;  %1642 = vst [vmem:[%s12887_s29 + $0x1d0] sm:$0xff] %v1641_v58  ;;  %v1649_v62 = vld [vmem:[%s12879_s28 + $0x9b0] sm:$0xff]  ;;  %v1651_v63 = vld [vmem:[%s12879_s28 + $0x9d8] sm:$0xff] }
  0x34   : > { %1644 = vst [vmem:[%s12887_s29 + $0x1d8] sm:$0xff] %v1643_v59  ;;  %1646 = vst [vmem:[%s12887_s29 + $0x1e0] sm:$0xff] %v1645_v60  ;;  %v1653_v0 = vld [vmem:[%s12879_s28 + $0xa00] sm:$0xff]  ;;  %v1655_v1 = vld [vmem:[%s12879_s28 + $0xa28] sm:$0xff] }
  0x35   : > { %1648 = vst [vmem:[%s12887_s29 + $0x1e8] sm:$0xff] %v1647_v61  ;;  %1650 = vst [vmem:[%s12887_s29 + $0x1f0] sm:$0xff] %v1649_v62  ;;  %v1657_v2 = vld [vmem:[%s12879_s28 + $0xa50] sm:$0xff]  ;;  %v1659_v3 = vld [vmem:[%s12879_s28 + $0xa78] sm:$0xff] }
  0x36   : > { %1652 = vst [vmem:[%s12887_s29 + $0x1f8] sm:$0xff] %v1651_v63  ;;  %1654 = vst [vmem:[%s12887_s29 + $0x200] sm:$0xff] %v1653_v0  ;;  %v1661_v4 = vld [vmem:[%s12879_s28 + $0xaa0] sm:$0xff]  ;;  %v1663_v5 = vld [vmem:[%s12879_s28 + $0xac8] sm:$0xff] }
  0x37   : > { %1656 = vst [vmem:[%s12887_s29 + $0x208] sm:$0xff] %v1655_v1  ;;  %1658 = vst [vmem:[%s12887_s29 + $0x210] sm:$0xff] %v1657_v2  ;;  %v1665_v6 = vld [vmem:[%s12879_s28 + $0xaf0] sm:$0xff]  ;;  %v1667_v7 = vld [vmem:[%s12879_s28 + $0xb18] sm:$0xff] }
  0x38   : > { %1660 = vst [vmem:[%s12887_s29 + $0x218] sm:$0xff] %v1659_v3  ;;  %1662 = vst [vmem:[%s12887_s29 + $0x220] sm:$0xff] %v1661_v4  ;;  %v1669_v8 = vld [vmem:[%s12879_s28 + $0xb40] sm:$0xff]  ;;  %v1671_v9 = vld [vmem:[%s12879_s28 + $0xb68] sm:$0xff] }
  0x39   : > { %1664 = vst [vmem:[%s12887_s29 + $0x228] sm:$0xff] %v1663_v5  ;;  %1666 = vst [vmem:[%s12887_s29 + $0x230] sm:$0xff] %v1665_v6  ;;  %v1673_v10 = vld [vmem:[%s12879_s28 + $0xb90] sm:$0xff]  ;;  %v1675_v11 = vld [vmem:[%s12879_s28 + $0xbb8] sm:$0xff] }
  0x3a   : > { %1668 = vst [vmem:[%s12887_s29 + $0x238] sm:$0xff] %v1667_v7  ;;  %1670 = vst [vmem:[%s12887_s29 + $0x240] sm:$0xff] %v1669_v8  ;;  %v1677_v12 = vld [vmem:[%s12879_s28 + $0xbe0] sm:$0xff]  ;;  %v1679_v13 = vld [vmem:[%s12879_s28 + $0xc08] sm:$0xff] }
  0x3b   : > { %1672 = vst [vmem:[%s12887_s29 + $0x248] sm:$0xff] %v1671_v9  ;;  %1674 = vst [vmem:[%s12887_s29 + $0x250] sm:$0xff] %v1673_v10  ;;  %v1681_v14 = vld [vmem:[%s12879_s28 + $0xc30] sm:$0xff]  ;;  %v1683_v15 = vld [vmem:[%s12879_s28 + $0xc58] sm:$0xff] }
  0x3c   : > { %1676 = vst [vmem:[%s12887_s29 + $0x258] sm:$0xff] %v1675_v11  ;;  %1678 = vst [vmem:[%s12887_s29 + $0x260] sm:$0xff] %v1677_v12  ;;  %v1685_v16 = vld [vmem:[%s12879_s28 + $0xc80] sm:$0xff]  ;;  %v1687_v17 = vld [vmem:[%s12879_s28 + $0xca8] sm:$0xff] }
  0x3d   : > { %1680 = vst [vmem:[%s12887_s29 + $0x268] sm:$0xff] %v1679_v13  ;;  %1682 = vst [vmem:[%s12887_s29 + $0x270] sm:$0xff] %v1681_v14  ;;  %v1689_v18 = vld [vmem:[%s12879_s28 + $0xcd0] sm:$0xff]  ;;  %v1691_v19 = vld [vmem:[%s12879_s28 + $0xcf8] sm:$0xff] }
  0x3e   : > { %1684 = vst [vmem:[%s12887_s29 + $0x278] sm:$0xff] %v1683_v15  ;;  %1686 = vst [vmem:[%s12887_s29 + $0x280] sm:$0xff] %v1685_v16  ;;  %v1693_v20 = vld [vmem:[%s12879_s28 + $0xd20] sm:$0xff]  ;;  %v1695_v21 = vld [vmem:[%s12879_s28 + $0xd48] sm:$0xff] }
  0x3f   : > { %1688 = vst [vmem:[%s12887_s29 + $0x288] sm:$0xff] %v1687_v17  ;;  %1690 = vst [vmem:[%s12887_s29 + $0x290] sm:$0xff] %v1689_v18  ;;  %v1697_v22 = vld [vmem:[%s12879_s28 + $0xd70] sm:$0xff]  ;;  %v1699_v23 = vld [vmem:[%s12879_s28 + $0xd98] sm:$0xff] }
  0x40   : > { %1692 = vst [vmem:[%s12887_s29 + $0x298] sm:$0xff] %v1691_v19  ;;  %1694 = vst [vmem:[%s12887_s29 + $0x2a0] sm:$0xff] %v1693_v20  ;;  %v1701_v24 = vld [vmem:[%s12879_s28 + $0xdc0] sm:$0xff]  ;;  %v1703_v25 = vld [vmem:[%s12879_s28 + $0xde8] sm:$0xff] }
  0x41   : > { %1696 = vst [vmem:[%s12887_s29 + $0x2a8] sm:$0xff] %v1695_v21  ;;  %1698 = vst [vmem:[%s12887_s29 + $0x2b0] sm:$0xff] %v1697_v22  ;;  %v1705_v26 = vld [vmem:[%s12879_s28 + $0xe10] sm:$0xff]  ;;  %v1707_v27 = vld [vmem:[%s12879_s28 + $0xe38] sm:$0xff] }
  0x42   : > { %1700 = vst [vmem:[%s12887_s29 + $0x2b8] sm:$0xff] %v1699_v23  ;;  %1702 = vst [vmem:[%s12887_s29 + $0x2c0] sm:$0xff] %v1701_v24  ;;  %v1709_v28 = vld [vmem:[%s12879_s28 + $0xe60] sm:$0xff]  ;;  %v1711_v29 = vld [vmem:[%s12879_s28 + $0xe88] sm:$0xff] }
  0x43   : > { %1704 = vst [vmem:[%s12887_s29 + $0x2c8] sm:$0xff] %v1703_v25  ;;  %1706 = vst [vmem:[%s12887_s29 + $0x2d0] sm:$0xff] %v1705_v26  ;;  %v1713_v30 = vld [vmem:[%s12879_s28 + $0xeb0] sm:$0xff]  ;;  %v1715_v31 = vld [vmem:[%s12879_s28 + $0xed8] sm:$0xff] }
  0x44   : > { %1708 = vst [vmem:[%s12887_s29 + $0x2d8] sm:$0xff] %v1707_v27  ;;  %1710 = vst [vmem:[%s12887_s29 + $0x2e0] sm:$0xff] %v1709_v28  ;;  %v1717_v32 = vld [vmem:[%s12879_s28 + $0xf00] sm:$0xff]  ;;  %v1719_v33 = vld [vmem:[%s12879_s28 + $0xf28] sm:$0xff] }
  0x45   : > { %1712 = vst [vmem:[%s12887_s29 + $0x2e8] sm:$0xff] %v1711_v29  ;;  %1714 = vst [vmem:[%s12887_s29 + $0x2f0] sm:$0xff] %v1713_v30  ;;  %v1721_v34 = vld [vmem:[%s12879_s28 + $0xf50] sm:$0xff]  ;;  %v1723_v35 = vld [vmem:[%s12879_s28 + $0xf78] sm:$0xff] }
  0x46   : > { %1716 = vst [vmem:[%s12887_s29 + $0x2f8] sm:$0xff] %v1715_v31  ;;  %1718 = vst [vmem:[%s12887_s29 + $0x300] sm:$0xff] %v1717_v32  ;;  %v1725_v36 = vld [vmem:[%s12879_s28 + $0xfa0] sm:$0xff]  ;;  %v1727_v37 = vld [vmem:[%s12879_s28 + $0xfc8] sm:$0xff] }
  0x47   : > { %1720 = vst [vmem:[%s12887_s29 + $0x308] sm:$0xff] %v1719_v33  ;;  %1722 = vst [vmem:[%s12887_s29 + $0x310] sm:$0xff] %v1721_v34  ;;  %v1729_v38 = vld [vmem:[%s12879_s28 + $0xff0] sm:$0xff]  ;;  %v1731_v39 = vld [vmem:[%s12879_s28 + $0x1018] sm:$0xff] }
  0x48   : > { %1724 = vst [vmem:[%s12887_s29 + $0x318] sm:$0xff] %v1723_v35  ;;  %1726 = vst [vmem:[%s12887_s29 + $0x320] sm:$0xff] %v1725_v36  ;;  %v1733_v40 = vld [vmem:[%s12879_s28 + $0x1040] sm:$0xff]  ;;  %v1735_v41 = vld [vmem:[%s12879_s28 + $0x1068] sm:$0xff] }
  0x49   : > { %1728 = vst [vmem:[%s12887_s29 + $0x328] sm:$0xff] %v1727_v37  ;;  %1730 = vst [vmem:[%s12887_s29 + $0x330] sm:$0xff] %v1729_v38  ;;  %v1737_v42 = vld [vmem:[%s12879_s28 + $0x1090] sm:$0xff]  ;;  %v1739_v43 = vld [vmem:[%s12879_s28 + $0x10b8] sm:$0xff] }
  0x4a   : > { %1732 = vst [vmem:[%s12887_s29 + $0x338] sm:$0xff] %v1731_v39  ;;  %1734 = vst [vmem:[%s12887_s29 + $0x340] sm:$0xff] %v1733_v40  ;;  %v1741_v44 = vld [vmem:[%s12879_s28 + $0x10e0] sm:$0xff]  ;;  %v1743_v45 = vld [vmem:[%s12879_s28 + $0x1108] sm:$0xff] }
  0x4b   : > { %1736 = vst [vmem:[%s12887_s29 + $0x348] sm:$0xff] %v1735_v41  ;;  %1738 = vst [vmem:[%s12887_s29 + $0x350] sm:$0xff] %v1737_v42  ;;  %v1745_v46 = vld [vmem:[%s12879_s28 + $0x1130] sm:$0xff]  ;;  %v1747_v47 = vld [vmem:[%s12879_s28 + $0x1158] sm:$0xff] }
  0x4c   : > { %1740 = vst [vmem:[%s12887_s29 + $0x358] sm:$0xff] %v1739_v43  ;;  %1742 = vst [vmem:[%s12887_s29 + $0x360] sm:$0xff] %v1741_v44  ;;  %v1749_v48 = vld [vmem:[%s12879_s28 + $0x1180] sm:$0xff]  ;;  %v1751_v49 = vld [vmem:[%s12879_s28 + $0x11a8] sm:$0xff] }
  0x4d   : > { %1744 = vst [vmem:[%s12887_s29 + $0x368] sm:$0xff] %v1743_v45  ;;  %1746 = vst [vmem:[%s12887_s29 + $0x370] sm:$0xff] %v1745_v46  ;;  %v1753_v50 = vld [vmem:[%s12879_s28 + $0x11d0] sm:$0xff]  ;;  %v1755_v51 = vld [vmem:[%s12879_s28 + $0x11f8] sm:$0xff] }
  0x4e   : > { %1748 = vst [vmem:[%s12887_s29 + $0x378] sm:$0xff] %v1747_v47  ;;  %1750 = vst [vmem:[%s12887_s29 + $0x380] sm:$0xff] %v1749_v48  ;;  %v1757_v52 = vld [vmem:[%s12879_s28 + $0x1220] sm:$0xff]  ;;  %v1759_v53 = vld [vmem:[%s12879_s28 + $0x1248] sm:$0xff] }
  0x4f   : > { %1752 = vst [vmem:[%s12887_s29 + $0x388] sm:$0xff] %v1751_v49  ;;  %1754 = vst [vmem:[%s12887_s29 + $0x390] sm:$0xff] %v1753_v50  ;;  %v1761_v54 = vld [vmem:[%s12879_s28 + $0x1270] sm:$0xff]  ;;  %v1763_v55 = vld [vmem:[%s12879_s28 + $0x1298] sm:$0xff] }
  0x50   : > { %1756 = vst [vmem:[%s12887_s29 + $0x398] sm:$0xff] %v1755_v51  ;;  %1758 = vst [vmem:[%s12887_s29 + $0x3a0] sm:$0xff] %v1757_v52  ;;  %v1765_v56 = vld [vmem:[%s12879_s28 + $0x12c0] sm:$0xff]  ;;  %v1767_v57 = vld [vmem:[%s12879_s28 + $0x12e8] sm:$0xff] }
  0x51   : > { %1760 = vst [vmem:[%s12887_s29 + $0x3a8] sm:$0xff] %v1759_v53  ;;  %1762 = vst [vmem:[%s12887_s29 + $0x3b0] sm:$0xff] %v1761_v54  ;;  %v1769_v58 = vld [vmem:[%s12879_s28 + $0x1310] sm:$0xff]  ;;  %v1771_v59 = vld [vmem:[%s12879_s28 + $0x1338] sm:$0xff] }
  0x52   : > { %1764 = vst [vmem:[%s12887_s29 + $0x3b8] sm:$0xff] %v1763_v55  ;;  %1766 = vst [vmem:[%s12887_s29 + $0x3c0] sm:$0xff] %v1765_v56  ;;  %v1773_v60 = vld [vmem:[%s12879_s28 + $0x1360] sm:$0xff]  ;;  %v1775_v61 = vld [vmem:[%s12879_s28 + $0x1388] sm:$0xff] }
  0x53   : > { %1768 = vst [vmem:[%s12887_s29 + $0x3c8] sm:$0xff] %v1767_v57  ;;  %1770 = vst [vmem:[%s12887_s29 + $0x3d0] sm:$0xff] %v1769_v58  ;;  %v1777_v62 = vld [vmem:[%s12879_s28 + $0x13b0] sm:$0xff]  ;;  %v1779_v63 = vld [vmem:[%s12879_s28 + $0x13d8] sm:$0xff] }
  0x54   : > { %1772 = vst [vmem:[%s12887_s29 + $0x3d8] sm:$0xff] %v1771_v59  ;;  %1774 = vst [vmem:[%s12887_s29 + $0x3e0] sm:$0xff] %v1773_v60  ;;  %v1781_v0 = vld [vmem:[%s12879_s28 + $0x1400] sm:$0xff]  ;;  %v1783_v1 = vld [vmem:[%s12879_s28 + $0x1428] sm:$0xff] }
  0x55   : > { %1776 = vst [vmem:[%s12887_s29 + $0x3e8] sm:$0xff] %v1775_v61  ;;  %1778 = vst [vmem:[%s12887_s29 + $0x3f0] sm:$0xff] %v1777_v62  ;;  %v1785_v2 = vld [vmem:[%s12879_s28 + $0x1450] sm:$0xff]  ;;  %v1787_v3 = vld [vmem:[%s12879_s28 + $0x1478] sm:$0xff] }
  0x56   : > { %1780 = vst [vmem:[%s12887_s29 + $0x3f8] sm:$0xff] %v1779_v63  ;;  %1782 = vst [vmem:[%s12887_s29 + $0x400] sm:$0xff] %v1781_v0  ;;  %v1789_v4 = vld [vmem:[%s12879_s28 + $0x14a0] sm:$0xff]  ;;  %v1791_v5 = vld [vmem:[%s12879_s28 + $0x14c8] sm:$0xff] }
  0x57   : > { %1784 = vst [vmem:[%s12887_s29 + $0x408] sm:$0xff] %v1783_v1  ;;  %1786 = vst [vmem:[%s12887_s29 + $0x410] sm:$0xff] %v1785_v2  ;;  %v1793_v6 = vld [vmem:[%s12879_s28 + $0x14f0] sm:$0xff]  ;;  %v1795_v7 = vld [vmem:[%s12879_s28 + $0x1518] sm:$0xff] }
  0x58   : > { %1788 = vst [vmem:[%s12887_s29 + $0x418] sm:$0xff] %v1787_v3  ;;  %1790 = vst [vmem:[%s12887_s29 + $0x420] sm:$0xff] %v1789_v4  ;;  %v1797_v8 = vld [vmem:[%s12879_s28 + $0x1540] sm:$0xff]  ;;  %v1799_v9 = vld [vmem:[%s12879_s28 + $0x1568] sm:$0xff] }
  0x59   : > { %1792 = vst [vmem:[%s12887_s29 + $0x428] sm:$0xff] %v1791_v5  ;;  %1794 = vst [vmem:[%s12887_s29 + $0x430] sm:$0xff] %v1793_v6  ;;  %v1801_v10 = vld [vmem:[%s12879_s28 + $0x1590] sm:$0xff]  ;;  %v1803_v11 = vld [vmem:[%s12879_s28 + $0x15b8] sm:$0xff] }
  0x5a   : > { %1796 = vst [vmem:[%s12887_s29 + $0x438] sm:$0xff] %v1795_v7  ;;  %1798 = vst [vmem:[%s12887_s29 + $0x440] sm:$0xff] %v1797_v8  ;;  %v1805_v12 = vld [vmem:[%s12879_s28 + $0x15e0] sm:$0xff]  ;;  %v1807_v13 = vld [vmem:[%s12879_s28 + $0x1608] sm:$0xff] }
  0x5b   : > { %1800 = vst [vmem:[%s12887_s29 + $0x448] sm:$0xff] %v1799_v9  ;;  %1802 = vst [vmem:[%s12887_s29 + $0x450] sm:$0xff] %v1801_v10  ;;  %v1809_v14 = vld [vmem:[%s12879_s28 + $0x1630] sm:$0xff]  ;;  %v1811_v15 = vld [vmem:[%s12879_s28 + $0x1658] sm:$0xff] }
  0x5c   : > { %1804 = vst [vmem:[%s12887_s29 + $0x458] sm:$0xff] %v1803_v11  ;;  %1806 = vst [vmem:[%s12887_s29 + $0x460] sm:$0xff] %v1805_v12  ;;  %v1813_v16 = vld [vmem:[%s12879_s28 + $0x1680] sm:$0xff]  ;;  %v1815_v17 = vld [vmem:[%s12879_s28 + $0x16a8] sm:$0xff] }
  0x5d   : > { %1808 = vst [vmem:[%s12887_s29 + $0x468] sm:$0xff] %v1807_v13  ;;  %1810 = vst [vmem:[%s12887_s29 + $0x470] sm:$0xff] %v1809_v14  ;;  %v1817_v18 = vld [vmem:[%s12879_s28 + $0x16d0] sm:$0xff]  ;;  %v1819_v19 = vld [vmem:[%s12879_s28 + $0x16f8] sm:$0xff] }
  0x5e   : > { %1812 = vst [vmem:[%s12887_s29 + $0x478] sm:$0xff] %v1811_v15  ;;  %1814 = vst [vmem:[%s12887_s29 + $0x480] sm:$0xff] %v1813_v16  ;;  %v1821_v20 = vld [vmem:[%s12879_s28 + $0x1720] sm:$0xff]  ;;  %v1823_v21 = vld [vmem:[%s12879_s28 + $0x1748] sm:$0xff] }
  0x5f   : > { %1816 = vst [vmem:[%s12887_s29 + $0x488] sm:$0xff] %v1815_v17  ;;  %1818 = vst [vmem:[%s12887_s29 + $0x490] sm:$0xff] %v1817_v18  ;;  %v1825_v22 = vld [vmem:[%s12879_s28 + $0x1770] sm:$0xff]  ;;  %v1827_v23 = vld [vmem:[%s12879_s28 + $0x1798] sm:$0xff] }
  0x60   : > { %1820 = vst [vmem:[%s12887_s29 + $0x498] sm:$0xff] %v1819_v19  ;;  %1822 = vst [vmem:[%s12887_s29 + $0x4a0] sm:$0xff] %v1821_v20  ;;  %v1829_v24 = vld [vmem:[%s12879_s28 + $0x17c0] sm:$0xff]  ;;  %v1831_v25 = vld [vmem:[%s12879_s28 + $0x17e8] sm:$0xff] }
  0x61   : > { %1824 = vst [vmem:[%s12887_s29 + $0x4a8] sm:$0xff] %v1823_v21  ;;  %1826 = vst [vmem:[%s12887_s29 + $0x4b0] sm:$0xff] %v1825_v22  ;;  %v1833_v26 = vld [vmem:[%s12879_s28 + $0x1810] sm:$0xff]  ;;  %v1835_v27 = vld [vmem:[%s12879_s28 + $0x1838] sm:$0xff] }
  0x62   : > { %1828 = vst [vmem:[%s12887_s29 + $0x4b8] sm:$0xff] %v1827_v23  ;;  %1830 = vst [vmem:[%s12887_s29 + $0x4c0] sm:$0xff] %v1829_v24  ;;  %v1837_v28 = vld [vmem:[%s12879_s28 + $0x1860] sm:$0xff]  ;;  %v1839_v29 = vld [vmem:[%s12879_s28 + $0x1888] sm:$0xff] }
  0x63   : > { %1832 = vst [vmem:[%s12887_s29 + $0x4c8] sm:$0xff] %v1831_v25  ;;  %1834 = vst [vmem:[%s12887_s29 + $0x4d0] sm:$0xff] %v1833_v26  ;;  %v1841_v30 = vld [vmem:[%s12879_s28 + $0x18b0] sm:$0xff]  ;;  %v1843_v31 = vld [vmem:[%s12879_s28 + $0x18d8] sm:$0xff] }
  0x64   : > { %1836 = vst [vmem:[%s12887_s29 + $0x4d8] sm:$0xff] %v1835_v27  ;;  %1838 = vst [vmem:[%s12887_s29 + $0x4e0] sm:$0xff] %v1837_v28  ;;  %v1845_v32 = vld [vmem:[%s12879_s28 + $0x1900] sm:$0xff]  ;;  %v1847_v33 = vld [vmem:[%s12879_s28 + $0x1928] sm:$0xff] }
  0x65   : > { %1840 = vst [vmem:[%s12887_s29 + $0x4e8] sm:$0xff] %v1839_v29  ;;  %1842 = vst [vmem:[%s12887_s29 + $0x4f0] sm:$0xff] %v1841_v30  ;;  %v1849_v34 = vld [vmem:[%s12879_s28 + $0x1950] sm:$0xff]  ;;  %v1851_v35 = vld [vmem:[%s12879_s28 + $0x1978] sm:$0xff] }
  0x66   : > { %1844 = vst [vmem:[%s12887_s29 + $0x4f8] sm:$0xff] %v1843_v31  ;;  %1846 = vst [vmem:[%s12887_s29 + $0x500] sm:$0xff] %v1845_v32  ;;  %v1853_v36 = vld [vmem:[%s12879_s28 + $0x19a0] sm:$0xff]  ;;  %v1855_v37 = vld [vmem:[%s12879_s28 + $0x19c8] sm:$0xff] }
  0x67   : > { %1848 = vst [vmem:[%s12887_s29 + $0x508] sm:$0xff] %v1847_v33  ;;  %1850 = vst [vmem:[%s12887_s29 + $0x510] sm:$0xff] %v1849_v34  ;;  %v1857_v38 = vld [vmem:[%s12879_s28 + $0x19f0] sm:$0xff]  ;;  %v1859_v39 = vld [vmem:[%s12879_s28 + $0x1a18] sm:$0xff] }
  0x68   : > { %1852 = vst [vmem:[%s12887_s29 + $0x518] sm:$0xff] %v1851_v35  ;;  %1854 = vst [vmem:[%s12887_s29 + $0x520] sm:$0xff] %v1853_v36  ;;  %v1861_v40 = vld [vmem:[%s12879_s28 + $0x1a40] sm:$0xff]  ;;  %v1863_v41 = vld [vmem:[%s12879_s28 + $0x1a68] sm:$0xff] }
  0x69   : > { %1856 = vst [vmem:[%s12887_s29 + $0x528] sm:$0xff] %v1855_v37  ;;  %1858 = vst [vmem:[%s12887_s29 + $0x530] sm:$0xff] %v1857_v38  ;;  %v1865_v42 = vld [vmem:[%s12879_s28 + $0x1a90] sm:$0xff]  ;;  %v1867_v43 = vld [vmem:[%s12879_s28 + $0x1ab8] sm:$0xff] }
  0x6a   : > { %1860 = vst [vmem:[%s12887_s29 + $0x538] sm:$0xff] %v1859_v39  ;;  %1862 = vst [vmem:[%s12887_s29 + $0x540] sm:$0xff] %v1861_v40  ;;  %v1869_v44 = vld [vmem:[%s12879_s28 + $0x1ae0] sm:$0xff]  ;;  %v1871_v45 = vld [vmem:[%s12879_s28 + $0x1b08] sm:$0xff] }
  0x6b   : > { %1864 = vst [vmem:[%s12887_s29 + $0x548] sm:$0xff] %v1863_v41  ;;  %1866 = vst [vmem:[%s12887_s29 + $0x550] sm:$0xff] %v1865_v42  ;;  %v1873_v46 = vld [vmem:[%s12879_s28 + $0x1b30] sm:$0xff]  ;;  %v1875_v47 = vld [vmem:[%s12879_s28 + $0x1b58] sm:$0xff] }
  0x6c   : > { %1868 = vst [vmem:[%s12887_s29 + $0x558] sm:$0xff] %v1867_v43  ;;  %1870 = vst [vmem:[%s12887_s29 + $0x560] sm:$0xff] %v1869_v44  ;;  %v1877_v48 = vld [vmem:[%s12879_s28 + $0x1b80] sm:$0xff]  ;;  %v1879_v49 = vld [vmem:[%s12879_s28 + $0x1ba8] sm:$0xff] }
  0x6d   : > { %1872 = vst [vmem:[%s12887_s29 + $0x568] sm:$0xff] %v1871_v45  ;;  %1874 = vst [vmem:[%s12887_s29 + $0x570] sm:$0xff] %v1873_v46  ;;  %v1881_v50 = vld [vmem:[%s12879_s28 + $0x1bd0] sm:$0xff]  ;;  %v1883_v51 = vld [vmem:[%s12879_s28 + $0x1bf8] sm:$0xff] }
  0x6e   : > { %1876 = vst [vmem:[%s12887_s29 + $0x578] sm:$0xff] %v1875_v47  ;;  %1878 = vst [vmem:[%s12887_s29 + $0x580] sm:$0xff] %v1877_v48  ;;  %v1885_v52 = vld [vmem:[%s12879_s28 + $0x1c20] sm:$0xff]  ;;  %v1887_v53 = vld [vmem:[%s12879_s28 + $0x1c48] sm:$0xff] }
  0x6f   : > { %1880 = vst [vmem:[%s12887_s29 + $0x588] sm:$0xff] %v1879_v49  ;;  %1882 = vst [vmem:[%s12887_s29 + $0x590] sm:$0xff] %v1881_v50  ;;  %v1889_v54 = vld [vmem:[%s12879_s28 + $0x1c70] sm:$0xff]  ;;  %v1891_v55 = vld [vmem:[%s12879_s28 + $0x1c98] sm:$0xff] }
  0x70   : > { %1884 = vst [vmem:[%s12887_s29 + $0x598] sm:$0xff] %v1883_v51  ;;  %1886 = vst [vmem:[%s12887_s29 + $0x5a0] sm:$0xff] %v1885_v52  ;;  %v1893_v56 = vld [vmem:[%s12879_s28 + $0x1cc0] sm:$0xff]  ;;  %v1895_v57 = vld [vmem:[%s12879_s28 + $0x1ce8] sm:$0xff] }
  0x71   : > { %1888 = vst [vmem:[%s12887_s29 + $0x5a8] sm:$0xff] %v1887_v53  ;;  %1890 = vst [vmem:[%s12887_s29 + $0x5b0] sm:$0xff] %v1889_v54  ;;  %v1897_v58 = vld [vmem:[%s12879_s28 + $0x1d10] sm:$0xff]  ;;  %v1899_v59 = vld [vmem:[%s12879_s28 + $0x1d38] sm:$0xff] }
  0x72   : > { %1892 = vst [vmem:[%s12887_s29 + $0x5b8] sm:$0xff] %v1891_v55  ;;  %1894 = vst [vmem:[%s12887_s29 + $0x5c0] sm:$0xff] %v1893_v56  ;;  %v1901_v60 = vld [vmem:[%s12879_s28 + $0x1d60] sm:$0xff]  ;;  %v1903_v61 = vld [vmem:[%s12879_s28 + $0x1d88] sm:$0xff] }
  0x73   : > { %1896 = vst [vmem:[%s12887_s29 + $0x5c8] sm:$0xff] %v1895_v57  ;;  %1898 = vst [vmem:[%s12887_s29 + $0x5d0] sm:$0xff] %v1897_v58  ;;  %v1905_v62 = vld [vmem:[%s12879_s28 + $0x1db0] sm:$0xff]  ;;  %v1907_v63 = vld [vmem:[%s12879_s28 + $0x1dd8] sm:$0xff] }
  0x74   : > { %1900 = vst [vmem:[%s12887_s29 + $0x5d8] sm:$0xff] %v1899_v59  ;;  %1902 = vst [vmem:[%s12887_s29 + $0x5e0] sm:$0xff] %v1901_v60  ;;  %v1909_v0 = vld [vmem:[%s12879_s28 + $0x1e00] sm:$0xff]  ;;  %v1911_v1 = vld [vmem:[%s12879_s28 + $0x1e28] sm:$0xff] }
  0x75   : > { %1904 = vst [vmem:[%s12887_s29 + $0x5e8] sm:$0xff] %v1903_v61  ;;  %1906 = vst [vmem:[%s12887_s29 + $0x5f0] sm:$0xff] %v1905_v62  ;;  %v1913_v2 = vld [vmem:[%s12879_s28 + $0x1e50] sm:$0xff]  ;;  %v1915_v3 = vld [vmem:[%s12879_s28 + $0x1e78] sm:$0xff] }
  0x76   : > { %1908 = vst [vmem:[%s12887_s29 + $0x5f8] sm:$0xff] %v1907_v63  ;;  %1910 = vst [vmem:[%s12887_s29 + $0x600] sm:$0xff] %v1909_v0  ;;  %v1917_v4 = vld [vmem:[%s12879_s28 + $0x1ea0] sm:$0xff]  ;;  %v1919_v5 = vld [vmem:[%s12879_s28 + $0x1ec8] sm:$0xff] }
  0x77   : > { %1912 = vst [vmem:[%s12887_s29 + $0x608] sm:$0xff] %v1911_v1  ;;  %1914 = vst [vmem:[%s12887_s29 + $0x610] sm:$0xff] %v1913_v2  ;;  %v1921_v6 = vld [vmem:[%s12879_s28 + $0x1ef0] sm:$0xff]  ;;  %v1923_v7 = vld [vmem:[%s12879_s28 + $0x1f18] sm:$0xff] }
  0x78   : > { %1916 = vst [vmem:[%s12887_s29 + $0x618] sm:$0xff] %v1915_v3  ;;  %1918 = vst [vmem:[%s12887_s29 + $0x620] sm:$0xff] %v1917_v4  ;;  %v1925_v8 = vld [vmem:[%s12879_s28 + $0x1f40] sm:$0xff]  ;;  %v1927_v9 = vld [vmem:[%s12879_s28 + $0x1f68] sm:$0xff] }
  0x79   : > { %1920 = vst [vmem:[%s12887_s29 + $0x628] sm:$0xff] %v1919_v5  ;;  %1922 = vst [vmem:[%s12887_s29 + $0x630] sm:$0xff] %v1921_v6  ;;  %v1929_v10 = vld [vmem:[%s12879_s28 + $0x1f90] sm:$0xff]  ;;  %v1931_v11 = vld [vmem:[%s12879_s28 + $0x1fb8] sm:$0xff] }
  0x7a   : > { %1924 = vst [vmem:[%s12887_s29 + $0x638] sm:$0xff] %v1923_v7  ;;  %1926 = vst [vmem:[%s12887_s29 + $0x640] sm:$0xff] %v1925_v8  ;;  %v1933_v12 = vld [vmem:[%s12879_s28 + $0x1fe0] sm:$0xff]  ;;  %v1935_v13 = vld [vmem:[%s12879_s28 + $0x2008] sm:$0xff] }
  0x7b   : > { %1928 = vst [vmem:[%s12887_s29 + $0x648] sm:$0xff] %v1927_v9  ;;  %1930 = vst [vmem:[%s12887_s29 + $0x650] sm:$0xff] %v1929_v10  ;;  %v1937_v14 = vld [vmem:[%s12879_s28 + $0x2030] sm:$0xff]  ;;  %v1939_v15 = vld [vmem:[%s12879_s28 + $0x2058] sm:$0xff] }
  0x7c   : > { %1932 = vst [vmem:[%s12887_s29 + $0x658] sm:$0xff] %v1931_v11  ;;  %1934 = vst [vmem:[%s12887_s29 + $0x660] sm:$0xff] %v1933_v12  ;;  %v1941_v16 = vld [vmem:[%s12879_s28 + $0x2080] sm:$0xff]  ;;  %v1943_v17 = vld [vmem:[%s12879_s28 + $0x20a8] sm:$0xff] }
  0x7d   : > { %1936 = vst [vmem:[%s12887_s29 + $0x668] sm:$0xff] %v1935_v13  ;;  %1938 = vst [vmem:[%s12887_s29 + $0x670] sm:$0xff] %v1937_v14  ;;  %v1945_v18 = vld [vmem:[%s12879_s28 + $0x20d0] sm:$0xff]  ;;  %v1947_v19 = vld [vmem:[%s12879_s28 + $0x20f8] sm:$0xff] }
  0x7e   : > { %1940 = vst [vmem:[%s12887_s29 + $0x678] sm:$0xff] %v1939_v15  ;;  %1942 = vst [vmem:[%s12887_s29 + $0x680] sm:$0xff] %v1941_v16  ;;  %v1949_v20 = vld [vmem:[%s12879_s28 + $0x2120] sm:$0xff]  ;;  %v1951_v21 = vld [vmem:[%s12879_s28 + $0x2148] sm:$0xff] }
  0x7f   : > { %1944 = vst [vmem:[%s12887_s29 + $0x688] sm:$0xff] %v1943_v17  ;;  %1946 = vst [vmem:[%s12887_s29 + $0x690] sm:$0xff] %v1945_v18  ;;  %v1953_v22 = vld [vmem:[%s12879_s28 + $0x2170] sm:$0xff]  ;;  %v1955_v23 = vld [vmem:[%s12879_s28 + $0x2198] sm:$0xff] }
  0x80   : > { %1948 = vst [vmem:[%s12887_s29 + $0x698] sm:$0xff] %v1947_v19  ;;  %1950 = vst [vmem:[%s12887_s29 + $0x6a0] sm:$0xff] %v1949_v20  ;;  %v1957_v24 = vld [vmem:[%s12879_s28 + $0x21c0] sm:$0xff]  ;;  %v1959_v25 = vld [vmem:[%s12879_s28 + $0x21e8] sm:$0xff] }
  0x81   : > { %1952 = vst [vmem:[%s12887_s29 + $0x6a8] sm:$0xff] %v1951_v21  ;;  %1954 = vst [vmem:[%s12887_s29 + $0x6b0] sm:$0xff] %v1953_v22  ;;  %v1961_v26 = vld [vmem:[%s12879_s28 + $0x2210] sm:$0xff]  ;;  %v1963_v27 = vld [vmem:[%s12879_s28 + $0x2238] sm:$0xff] }
  0x82   : > { %1956 = vst [vmem:[%s12887_s29 + $0x6b8] sm:$0xff] %v1955_v23  ;;  %1958 = vst [vmem:[%s12887_s29 + $0x6c0] sm:$0xff] %v1957_v24  ;;  %v1965_v28 = vld [vmem:[%s12879_s28 + $0x2260] sm:$0xff]  ;;  %v1967_v29 = vld [vmem:[%s12879_s28 + $0x2288] sm:$0xff] }
  0x83   : > { %1960 = vst [vmem:[%s12887_s29 + $0x6c8] sm:$0xff] %v1959_v25  ;;  %1962 = vst [vmem:[%s12887_s29 + $0x6d0] sm:$0xff] %v1961_v26  ;;  %v1969_v30 = vld [vmem:[%s12879_s28 + $0x22b0] sm:$0xff]  ;;  %v1971_v31 = vld [vmem:[%s12879_s28 + $0x22d8] sm:$0xff] }
  0x84   : > { %1964 = vst [vmem:[%s12887_s29 + $0x6d8] sm:$0xff] %v1963_v27  ;;  %1966 = vst [vmem:[%s12887_s29 + $0x6e0] sm:$0xff] %v1965_v28  ;;  %v1973_v32 = vld [vmem:[%s12879_s28 + $0x2300] sm:$0xff]  ;;  %v1975_v33 = vld [vmem:[%s12879_s28 + $0x2328] sm:$0xff] }
  0x85   : > { %1968 = vst [vmem:[%s12887_s29 + $0x6e8] sm:$0xff] %v1967_v29  ;;  %1970 = vst [vmem:[%s12887_s29 + $0x6f0] sm:$0xff] %v1969_v30  ;;  %v1977_v34 = vld [vmem:[%s12879_s28 + $0x2350] sm:$0xff]  ;;  %v1979_v35 = vld [vmem:[%s12879_s28 + $0x2378] sm:$0xff] }
  0x86   : > { %1972 = vst [vmem:[%s12887_s29 + $0x6f8] sm:$0xff] %v1971_v31  ;;  %1974 = vst [vmem:[%s12887_s29 + $0x700] sm:$0xff] %v1973_v32  ;;  %v1981_v36 = vld [vmem:[%s12879_s28 + $0x23a0] sm:$0xff]  ;;  %v1983_v37 = vld [vmem:[%s12879_s28 + $0x23c8] sm:$0xff] }
  0x87   : > { %1976 = vst [vmem:[%s12887_s29 + $0x708] sm:$0xff] %v1975_v33  ;;  %1978 = vst [vmem:[%s12887_s29 + $0x710] sm:$0xff] %v1977_v34  ;;  %v1985_v38 = vld [vmem:[%s12879_s28 + $0x23f0] sm:$0xff]  ;;  %v1987_v39 = vld [vmem:[%s12879_s28 + $0x2418] sm:$0xff] }
  0x88   : > { %1980 = vst [vmem:[%s12887_s29 + $0x718] sm:$0xff] %v1979_v35  ;;  %1982 = vst [vmem:[%s12887_s29 + $0x720] sm:$0xff] %v1981_v36  ;;  %v1989_v40 = vld [vmem:[%s12879_s28 + $0x2440] sm:$0xff]  ;;  %v1991_v41 = vld [vmem:[%s12879_s28 + $0x2468] sm:$0xff] }
  0x89   : > { %1984 = vst [vmem:[%s12887_s29 + $0x728] sm:$0xff] %v1983_v37  ;;  %1986 = vst [vmem:[%s12887_s29 + $0x730] sm:$0xff] %v1985_v38  ;;  %v1993_v42 = vld [vmem:[%s12879_s28 + $0x2490] sm:$0xff]  ;;  %v1995_v43 = vld [vmem:[%s12879_s28 + $0x24b8] sm:$0xff] }
  0x8a   : > { %1988 = vst [vmem:[%s12887_s29 + $0x738] sm:$0xff] %v1987_v39  ;;  %1990 = vst [vmem:[%s12887_s29 + $0x740] sm:$0xff] %v1989_v40  ;;  %v1997_v44 = vld [vmem:[%s12879_s28 + $0x24e0] sm:$0xff]  ;;  %v1999_v45 = vld [vmem:[%s12879_s28 + $0x2508] sm:$0xff] }
  0x8b   : > { %1992 = vst [vmem:[%s12887_s29 + $0x748] sm:$0xff] %v1991_v41  ;;  %1994 = vst [vmem:[%s12887_s29 + $0x750] sm:$0xff] %v1993_v42  ;;  %v2001_v46 = vld [vmem:[%s12879_s28 + $0x2530] sm:$0xff]  ;;  %v2003_v47 = vld [vmem:[%s12879_s28 + $0x2558] sm:$0xff] }
  0x8c   : > { %1996 = vst [vmem:[%s12887_s29 + $0x758] sm:$0xff] %v1995_v43  ;;  %1998 = vst [vmem:[%s12887_s29 + $0x760] sm:$0xff] %v1997_v44  ;;  %v2005_v48 = vld [vmem:[%s12879_s28 + $0x2580] sm:$0xff]  ;;  %v2007_v49 = vld [vmem:[%s12879_s28 + $0x25a8] sm:$0xff] }
  0x8d   : > { %2000 = vst [vmem:[%s12887_s29 + $0x768] sm:$0xff] %v1999_v45  ;;  %2002 = vst [vmem:[%s12887_s29 + $0x770] sm:$0xff] %v2001_v46  ;;  %v2009_v50 = vld [vmem:[%s12879_s28 + $0x25d0] sm:$0xff]  ;;  %v2011_v51 = vld [vmem:[%s12879_s28 + $0x25f8] sm:$0xff] }
  0x8e   : > { %2004 = vst [vmem:[%s12887_s29 + $0x778] sm:$0xff] %v2003_v47  ;;  %2006 = vst [vmem:[%s12887_s29 + $0x780] sm:$0xff] %v2005_v48  ;;  %v2013_v52 = vld [vmem:[%s12879_s28 + $0x2620] sm:$0xff]  ;;  %v2015_v53 = vld [vmem:[%s12879_s28 + $0x2648] sm:$0xff] }
  0x8f   : > { %2008 = vst [vmem:[%s12887_s29 + $0x788] sm:$0xff] %v2007_v49  ;;  %2010 = vst [vmem:[%s12887_s29 + $0x790] sm:$0xff] %v2009_v50  ;;  %v2017_v54 = vld [vmem:[%s12879_s28 + $0x2670] sm:$0xff]  ;;  %v2019_v55 = vld [vmem:[%s12879_s28 + $0x2698] sm:$0xff] }
  0x90   : > { %2012 = vst [vmem:[%s12887_s29 + $0x798] sm:$0xff] %v2011_v51  ;;  %2014 = vst [vmem:[%s12887_s29 + $0x7a0] sm:$0xff] %v2013_v52  ;;  %v2021_v56 = vld [vmem:[%s12879_s28 + $0x26c0] sm:$0xff]  ;;  %v2023_v57 = vld [vmem:[%s12879_s28 + $0x26e8] sm:$0xff] }
  0x91   : > { %2016 = vst [vmem:[%s12887_s29 + $0x7a8] sm:$0xff] %v2015_v53  ;;  %2018 = vst [vmem:[%s12887_s29 + $0x7b0] sm:$0xff] %v2017_v54  ;;  %v2025_v58 = vld [vmem:[%s12879_s28 + $0x2710] sm:$0xff]  ;;  %v2027_v59 = vld [vmem:[%s12879_s28 + $0x2738] sm:$0xff] }
  0x92   : > { %2020 = vst [vmem:[%s12887_s29 + $0x7b8] sm:$0xff] %v2019_v55  ;;  %2022 = vst [vmem:[%s12887_s29 + $0x7c0] sm:$0xff] %v2021_v56  ;;  %v2029_v60 = vld [vmem:[%s12879_s28 + $0x2760] sm:$0xff]  ;;  %v2031_v61 = vld [vmem:[%s12879_s28 + $0x2788] sm:$0xff] }
  0x93   : > { %2024 = vst [vmem:[%s12887_s29 + $0x7c8] sm:$0xff] %v2023_v57  ;;  %2026 = vst [vmem:[%s12887_s29 + $0x7d0] sm:$0xff] %v2025_v58  ;;  %v2033_v62 = vld [vmem:[%s12879_s28 + $0x27b0] sm:$0xff]  ;;  %v2035_v63 = vld [vmem:[%s12879_s28 + $0x27d8] sm:$0xff] }
  0x94   : > { %2028 = vst [vmem:[%s12887_s29 + $0x7d8] sm:$0xff] %v2027_v59  ;;  %2030 = vst [vmem:[%s12887_s29 + $0x7e0] sm:$0xff] %v2029_v60  ;;  %v2037_v0 = vld [vmem:[%s12879_s28 + $0x2800] sm:$0xff]  ;;  %v2039_v1 = vld [vmem:[%s12879_s28 + $0x2828] sm:$0xff] }
  0x95   : > { %2032 = vst [vmem:[%s12887_s29 + $0x7e8] sm:$0xff] %v2031_v61  ;;  %2034 = vst [vmem:[%s12887_s29 + $0x7f0] sm:$0xff] %v2033_v62  ;;  %v2041_v2 = vld [vmem:[%s12879_s28 + $0x2850] sm:$0xff]  ;;  %v2043_v3 = vld [vmem:[%s12879_s28 + $0x2878] sm:$0xff] }
  0x96   : > { %2036 = vst [vmem:[%s12887_s29 + $0x7f8] sm:$0xff] %v2035_v63  ;;  %2038 = vst [vmem:[%s12887_s29 + $0x800] sm:$0xff] %v2037_v0  ;;  %v2045_v4 = vld [vmem:[%s12879_s28 + $0x28a0] sm:$0xff]  ;;  %v2047_v5 = vld [vmem:[%s12879_s28 + $0x28c8] sm:$0xff] }
  0x97   : > { %2040 = vst [vmem:[%s12887_s29 + $0x808] sm:$0xff] %v2039_v1  ;;  %2042 = vst [vmem:[%s12887_s29 + $0x810] sm:$0xff] %v2041_v2  ;;  %v2049_v6 = vld [vmem:[%s12879_s28 + $0x28f0] sm:$0xff]  ;;  %v2051_v7 = vld [vmem:[%s12879_s28 + $0x2918] sm:$0xff] }
  0x98   : > { %2044 = vst [vmem:[%s12887_s29 + $0x818] sm:$0xff] %v2043_v3  ;;  %2046 = vst [vmem:[%s12887_s29 + $0x820] sm:$0xff] %v2045_v4  ;;  %v2053_v8 = vld [vmem:[%s12879_s28 + $0x2940] sm:$0xff]  ;;  %v2055_v9 = vld [vmem:[%s12879_s28 + $0x2968] sm:$0xff] }
  0x99   : > { %2048 = vst [vmem:[%s12887_s29 + $0x828] sm:$0xff] %v2047_v5  ;;  %2050 = vst [vmem:[%s12887_s29 + $0x830] sm:$0xff] %v2049_v6  ;;  %v2057_v10 = vld [vmem:[%s12879_s28 + $0x2990] sm:$0xff]  ;;  %v2059_v11 = vld [vmem:[%s12879_s28 + $0x29b8] sm:$0xff] }
  0x9a   : > { %2052 = vst [vmem:[%s12887_s29 + $0x838] sm:$0xff] %v2051_v7  ;;  %2054 = vst [vmem:[%s12887_s29 + $0x840] sm:$0xff] %v2053_v8  ;;  %v2061_v12 = vld [vmem:[%s12879_s28 + $0x29e0] sm:$0xff]  ;;  %v2063_v13 = vld [vmem:[%s12879_s28 + $0x2a08] sm:$0xff] }
  0x9b   : > { %2056 = vst [vmem:[%s12887_s29 + $0x848] sm:$0xff] %v2055_v9  ;;  %2058 = vst [vmem:[%s12887_s29 + $0x850] sm:$0xff] %v2057_v10  ;;  %v2065_v14 = vld [vmem:[%s12879_s28 + $0x2a30] sm:$0xff]  ;;  %v2067_v15 = vld [vmem:[%s12879_s28 + $0x2a58] sm:$0xff] }
  0x9c   : > { %2060 = vst [vmem:[%s12887_s29 + $0x858] sm:$0xff] %v2059_v11  ;;  %2062 = vst [vmem:[%s12887_s29 + $0x860] sm:$0xff] %v2061_v12  ;;  %v2069_v16 = vld [vmem:[%s12879_s28 + $0x2a80] sm:$0xff]  ;;  %v2071_v17 = vld [vmem:[%s12879_s28 + $0x2aa8] sm:$0xff] }
  0x9d   : > { %2064 = vst [vmem:[%s12887_s29 + $0x868] sm:$0xff] %v2063_v13  ;;  %2066 = vst [vmem:[%s12887_s29 + $0x870] sm:$0xff] %v2065_v14  ;;  %v2073_v18 = vld [vmem:[%s12879_s28 + $0x2ad0] sm:$0xff]  ;;  %v2075_v19 = vld [vmem:[%s12879_s28 + $0x2af8] sm:$0xff] }
  0x9e   : > { %2068 = vst [vmem:[%s12887_s29 + $0x878] sm:$0xff] %v2067_v15  ;;  %2070 = vst [vmem:[%s12887_s29 + $0x880] sm:$0xff] %v2069_v16  ;;  %v2077_v20 = vld [vmem:[%s12879_s28 + $0x2b20] sm:$0xff]  ;;  %v2079_v21 = vld [vmem:[%s12879_s28 + $0x2b48] sm:$0xff] }
  0x9f   : > { %2072 = vst [vmem:[%s12887_s29 + $0x888] sm:$0xff] %v2071_v17  ;;  %2074 = vst [vmem:[%s12887_s29 + $0x890] sm:$0xff] %v2073_v18  ;;  %v2081_v22 = vld [vmem:[%s12879_s28 + $0x2b70] sm:$0xff]  ;;  %v2083_v23 = vld [vmem:[%s12879_s28 + $0x2b98] sm:$0xff] }
  0xa0   : > { %2076 = vst [vmem:[%s12887_s29 + $0x898] sm:$0xff] %v2075_v19  ;;  %2078 = vst [vmem:[%s12887_s29 + $0x8a0] sm:$0xff] %v2077_v20  ;;  %v2085_v24 = vld [vmem:[%s12879_s28 + $0x2bc0] sm:$0xff]  ;;  %v2087_v25 = vld [vmem:[%s12879_s28 + $0x2be8] sm:$0xff] }
  0xa1   : > { %2080 = vst [vmem:[%s12887_s29 + $0x8a8] sm:$0xff] %v2079_v21  ;;  %2082 = vst [vmem:[%s12887_s29 + $0x8b0] sm:$0xff] %v2081_v22  ;;  %v2089_v26 = vld [vmem:[%s12879_s28 + $0x2c10] sm:$0xff]  ;;  %v2091_v27 = vld [vmem:[%s12879_s28 + $0x2c38] sm:$0xff] }
  0xa2   : > { %2084 = vst [vmem:[%s12887_s29 + $0x8b8] sm:$0xff] %v2083_v23  ;;  %2086 = vst [vmem:[%s12887_s29 + $0x8c0] sm:$0xff] %v2085_v24  ;;  %v2093_v28 = vld [vmem:[%s12879_s28 + $0x2c60] sm:$0xff]  ;;  %v2095_v29 = vld [vmem:[%s12879_s28 + $0x2c88] sm:$0xff] }
  0xa3   : > { %2088 = vst [vmem:[%s12887_s29 + $0x8c8] sm:$0xff] %v2087_v25  ;;  %2090 = vst [vmem:[%s12887_s29 + $0x8d0] sm:$0xff] %v2089_v26  ;;  %v2097_v30 = vld [vmem:[%s12879_s28 + $0x2cb0] sm:$0xff]  ;;  %v2099_v31 = vld [vmem:[%s12879_s28 + $0x2cd8] sm:$0xff] }
  0xa4   : > { %2092 = vst [vmem:[%s12887_s29 + $0x8d8] sm:$0xff] %v2091_v27  ;;  %2094 = vst [vmem:[%s12887_s29 + $0x8e0] sm:$0xff] %v2093_v28  ;;  %v2101_v32 = vld [vmem:[%s12879_s28 + $0x2d00] sm:$0xff]  ;;  %v2103_v33 = vld [vmem:[%s12879_s28 + $0x2d28] sm:$0xff] }
  0xa5   : > { %2096 = vst [vmem:[%s12887_s29 + $0x8e8] sm:$0xff] %v2095_v29  ;;  %2098 = vst [vmem:[%s12887_s29 + $0x8f0] sm:$0xff] %v2097_v30  ;;  %v2105_v34 = vld [vmem:[%s12879_s28 + $0x2d50] sm:$0xff]  ;;  %v2107_v35 = vld [vmem:[%s12879_s28 + $0x2d78] sm:$0xff] }
  0xa6   : > { %2100 = vst [vmem:[%s12887_s29 + $0x8f8] sm:$0xff] %v2099_v31  ;;  %2102 = vst [vmem:[%s12887_s29 + $0x900] sm:$0xff] %v2101_v32  ;;  %v2109_v36 = vld [vmem:[%s12879_s28 + $0x2da0] sm:$0xff]  ;;  %v2111_v37 = vld [vmem:[%s12879_s28 + $0x2dc8] sm:$0xff] }
  0xa7   : > { %2104 = vst [vmem:[%s12887_s29 + $0x908] sm:$0xff] %v2103_v33  ;;  %2106 = vst [vmem:[%s12887_s29 + $0x910] sm:$0xff] %v2105_v34  ;;  %v2113_v38 = vld [vmem:[%s12879_s28 + $0x2df0] sm:$0xff]  ;;  %v2115_v39 = vld [vmem:[%s12879_s28 + $0x2e18] sm:$0xff] }
  0xa8   : > { %2108 = vst [vmem:[%s12887_s29 + $0x918] sm:$0xff] %v2107_v35  ;;  %2110 = vst [vmem:[%s12887_s29 + $0x920] sm:$0xff] %v2109_v36  ;;  %v2117_v40 = vld [vmem:[%s12879_s28 + $0x2e40] sm:$0xff]  ;;  %v2119_v41 = vld [vmem:[%s12879_s28 + $0x2e68] sm:$0xff] }
  0xa9   : > { %2112 = vst [vmem:[%s12887_s29 + $0x928] sm:$0xff] %v2111_v37  ;;  %2114 = vst [vmem:[%s12887_s29 + $0x930] sm:$0xff] %v2113_v38  ;;  %v2121_v42 = vld [vmem:[%s12879_s28 + $0x2e90] sm:$0xff]  ;;  %v2123_v43 = vld [vmem:[%s12879_s28 + $0x2eb8] sm:$0xff] }
  0xaa   : > { %2116 = vst [vmem:[%s12887_s29 + $0x938] sm:$0xff] %v2115_v39  ;;  %2118 = vst [vmem:[%s12887_s29 + $0x940] sm:$0xff] %v2117_v40  ;;  %v2125_v44 = vld [vmem:[%s12879_s28 + $0x2ee0] sm:$0xff]  ;;  %v2127_v45 = vld [vmem:[%s12879_s28 + $0x2f08] sm:$0xff] }
  0xab   : > { %2120 = vst [vmem:[%s12887_s29 + $0x948] sm:$0xff] %v2119_v41  ;;  %2122 = vst [vmem:[%s12887_s29 + $0x950] sm:$0xff] %v2121_v42  ;;  %v2129_v46 = vld [vmem:[%s12879_s28 + $0x2f30] sm:$0xff]  ;;  %v2131_v47 = vld [vmem:[%s12879_s28 + $0x2f58] sm:$0xff] }
  0xac   : > { %2124 = vst [vmem:[%s12887_s29 + $0x958] sm:$0xff] %v2123_v43  ;;  %2126 = vst [vmem:[%s12887_s29 + $0x960] sm:$0xff] %v2125_v44  ;;  %v2133_v48 = vld [vmem:[%s12879_s28 + $0x2f80] sm:$0xff]  ;;  %v2135_v49 = vld [vmem:[%s12879_s28 + $0x2fa8] sm:$0xff] }
  0xad   : > { %2128 = vst [vmem:[%s12887_s29 + $0x968] sm:$0xff] %v2127_v45  ;;  %2130 = vst [vmem:[%s12887_s29 + $0x970] sm:$0xff] %v2129_v46  ;;  %v2137_v50 = vld [vmem:[%s12879_s28 + $0x2fd0] sm:$0xff]  ;;  %v2139_v51 = vld [vmem:[%s12879_s28 + $0x2ff8] sm:$0xff] }
  0xae   : > { %2132 = vst [vmem:[%s12887_s29 + $0x978] sm:$0xff] %v2131_v47  ;;  %2134 = vst [vmem:[%s12887_s29 + $0x980] sm:$0xff] %v2133_v48  ;;  %v2141_v52 = vld [vmem:[%s12879_s28 + $0x3020] sm:$0xff]  ;;  %v2143_v53 = vld [vmem:[%s12879_s28 + $0x3048] sm:$0xff] }
  0xaf   : > { %2136 = vst [vmem:[%s12887_s29 + $0x988] sm:$0xff] %v2135_v49  ;;  %2138 = vst [vmem:[%s12887_s29 + $0x990] sm:$0xff] %v2137_v50  ;;  %v2145_v54 = vld [vmem:[%s12879_s28 + $0x3070] sm:$0xff]  ;;  %v2147_v55 = vld [vmem:[%s12879_s28 + $0x3098] sm:$0xff] }
  0xb0   : > { %2140 = vst [vmem:[%s12887_s29 + $0x998] sm:$0xff] %v2139_v51  ;;  %2142 = vst [vmem:[%s12887_s29 + $0x9a0] sm:$0xff] %v2141_v52  ;;  %v2149_v56 = vld [vmem:[%s12879_s28 + $0x30c0] sm:$0xff]  ;;  %v2151_v57 = vld [vmem:[%s12879_s28 + $0x30e8] sm:$0xff] }
  0xb1   : > { %2144 = vst [vmem:[%s12887_s29 + $0x9a8] sm:$0xff] %v2143_v53  ;;  %2146 = vst [vmem:[%s12887_s29 + $0x9b0] sm:$0xff] %v2145_v54  ;;  %v2153_v58 = vld [vmem:[%s12879_s28 + $0x3110] sm:$0xff]  ;;  %v2155_v59 = vld [vmem:[%s12879_s28 + $0x3138] sm:$0xff] }
  0xb2   : > { %2148 = vst [vmem:[%s12887_s29 + $0x9b8] sm:$0xff] %v2147_v55  ;;  %2150 = vst [vmem:[%s12887_s29 + $0x9c0] sm:$0xff] %v2149_v56  ;;  %v2157_v60 = vld [vmem:[%s12879_s28 + $0x3160] sm:$0xff]  ;;  %v2159_v61 = vld [vmem:[%s12879_s28 + $0x3188] sm:$0xff] }
  0xb3   : > { %2152 = vst [vmem:[%s12887_s29 + $0x9c8] sm:$0xff] %v2151_v57  ;;  %2154 = vst [vmem:[%s12887_s29 + $0x9d0] sm:$0xff] %v2153_v58  ;;  %v2161_v62 = vld [vmem:[%s12879_s28 + $0x31b0] sm:$0xff]  ;;  %v2163_v63 = vld [vmem:[%s12879_s28 + $0x31d8] sm:$0xff] }
  0xb4   : > { %2156 = vst [vmem:[%s12887_s29 + $0x9d8] sm:$0xff] %v2155_v59  ;;  %2158 = vst [vmem:[%s12887_s29 + $0x9e0] sm:$0xff] %v2157_v60  ;;  %v2165_v0 = vld [vmem:[%s12879_s28 + $0x3200] sm:$0xff]  ;;  %v2167_v1 = vld [vmem:[%s12879_s28 + $0x3228] sm:$0xff] }
  0xb5   : > { %2160 = vst [vmem:[%s12887_s29 + $0x9e8] sm:$0xff] %v2159_v61  ;;  %2162 = vst [vmem:[%s12887_s29 + $0x9f0] sm:$0xff] %v2161_v62  ;;  %v2169_v2 = vld [vmem:[%s12879_s28 + $0x3250] sm:$0xff]  ;;  %v2171_v3 = vld [vmem:[%s12879_s28 + $0x3278] sm:$0xff] }
  0xb6   : > { %2164 = vst [vmem:[%s12887_s29 + $0x9f8] sm:$0xff] %v2163_v63  ;;  %2166 = vst [vmem:[%s12887_s29 + $0xa00] sm:$0xff] %v2165_v0  ;;  %v2173_v4 = vld [vmem:[%s12879_s28 + $0x32a0] sm:$0xff]  ;;  %v2175_v5 = vld [vmem:[%s12879_s28 + $0x32c8] sm:$0xff] }
  0xb7   : > { %2168 = vst [vmem:[%s12887_s29 + $0xa08] sm:$0xff] %v2167_v1  ;;  %2170 = vst [vmem:[%s12887_s29 + $0xa10] sm:$0xff] %v2169_v2  ;;  %v2177_v6 = vld [vmem:[%s12879_s28 + $0x32f0] sm:$0xff]  ;;  %v2179_v7 = vld [vmem:[%s12879_s28 + $0x3318] sm:$0xff] }
  0xb8   : > { %2172 = vst [vmem:[%s12887_s29 + $0xa18] sm:$0xff] %v2171_v3  ;;  %2174 = vst [vmem:[%s12887_s29 + $0xa20] sm:$0xff] %v2173_v4  ;;  %v2181_v8 = vld [vmem:[%s12879_s28 + $0x3340] sm:$0xff]  ;;  %v2183_v9 = vld [vmem:[%s12879_s28 + $0x3368] sm:$0xff] }
  0xb9   : > { %2176 = vst [vmem:[%s12887_s29 + $0xa28] sm:$0xff] %v2175_v5  ;;  %2178 = vst [vmem:[%s12887_s29 + $0xa30] sm:$0xff] %v2177_v6  ;;  %v2185_v10 = vld [vmem:[%s12879_s28 + $0x3390] sm:$0xff]  ;;  %v2187_v11 = vld [vmem:[%s12879_s28 + $0x33b8] sm:$0xff] }
  0xba   : > { %2180 = vst [vmem:[%s12887_s29 + $0xa38] sm:$0xff] %v2179_v7  ;;  %2182 = vst [vmem:[%s12887_s29 + $0xa40] sm:$0xff] %v2181_v8  ;;  %v2189_v12 = vld [vmem:[%s12879_s28 + $0x33e0] sm:$0xff]  ;;  %v2191_v13 = vld [vmem:[%s12879_s28 + $0x3408] sm:$0xff] }
  0xbb   : > { %2184 = vst [vmem:[%s12887_s29 + $0xa48] sm:$0xff] %v2183_v9  ;;  %2186 = vst [vmem:[%s12887_s29 + $0xa50] sm:$0xff] %v2185_v10  ;;  %v2193_v14 = vld [vmem:[%s12879_s28 + $0x3430] sm:$0xff]  ;;  %v2195_v15 = vld [vmem:[%s12879_s28 + $0x3458] sm:$0xff] }
  0xbc   : > { %2188 = vst [vmem:[%s12887_s29 + $0xa58] sm:$0xff] %v2187_v11  ;;  %2190 = vst [vmem:[%s12887_s29 + $0xa60] sm:$0xff] %v2189_v12  ;;  %v2197_v16 = vld [vmem:[%s12879_s28 + $0x3480] sm:$0xff]  ;;  %v2199_v17 = vld [vmem:[%s12879_s28 + $0x34a8] sm:$0xff] }
  0xbd   : > { %2192 = vst [vmem:[%s12887_s29 + $0xa68] sm:$0xff] %v2191_v13  ;;  %2194 = vst [vmem:[%s12887_s29 + $0xa70] sm:$0xff] %v2193_v14  ;;  %v2201_v18 = vld [vmem:[%s12879_s28 + $0x34d0] sm:$0xff]  ;;  %v2203_v19 = vld [vmem:[%s12879_s28 + $0x34f8] sm:$0xff] }
  0xbe   : > { %2196 = vst [vmem:[%s12887_s29 + $0xa78] sm:$0xff] %v2195_v15  ;;  %2198 = vst [vmem:[%s12887_s29 + $0xa80] sm:$0xff] %v2197_v16  ;;  %v2205_v20 = vld [vmem:[%s12879_s28 + $0x3520] sm:$0xff]  ;;  %v2207_v21 = vld [vmem:[%s12879_s28 + $0x3548] sm:$0xff] }
  0xbf   : > { %2200 = vst [vmem:[%s12887_s29 + $0xa88] sm:$0xff] %v2199_v17  ;;  %2202 = vst [vmem:[%s12887_s29 + $0xa90] sm:$0xff] %v2201_v18  ;;  %v2209_v22 = vld [vmem:[%s12879_s28 + $0x3570] sm:$0xff]  ;;  %v2211_v23 = vld [vmem:[%s12879_s28 + $0x3598] sm:$0xff] }
  0xc0   : > { %2204 = vst [vmem:[%s12887_s29 + $0xa98] sm:$0xff] %v2203_v19  ;;  %2206 = vst [vmem:[%s12887_s29 + $0xaa0] sm:$0xff] %v2205_v20  ;;  %v2213_v24 = vld [vmem:[%s12879_s28 + $0x35c0] sm:$0xff]  ;;  %v2215_v25 = vld [vmem:[%s12879_s28 + $0x35e8] sm:$0xff] }
  0xc1   : > { %2208 = vst [vmem:[%s12887_s29 + $0xaa8] sm:$0xff] %v2207_v21  ;;  %2210 = vst [vmem:[%s12887_s29 + $0xab0] sm:$0xff] %v2209_v22  ;;  %v2217_v26 = vld [vmem:[%s12879_s28 + $0x3610] sm:$0xff]  ;;  %v2219_v27 = vld [vmem:[%s12879_s28 + $0x3638] sm:$0xff] }
  0xc2   : > { %2212 = vst [vmem:[%s12887_s29 + $0xab8] sm:$0xff] %v2211_v23  ;;  %2214 = vst [vmem:[%s12887_s29 + $0xac0] sm:$0xff] %v2213_v24  ;;  %v2221_v28 = vld [vmem:[%s12879_s28 + $0x3660] sm:$0xff]  ;;  %v2223_v29 = vld [vmem:[%s12879_s28 + $0x3688] sm:$0xff] }
  0xc3   : > { %2216 = vst [vmem:[%s12887_s29 + $0xac8] sm:$0xff] %v2215_v25  ;;  %2218 = vst [vmem:[%s12887_s29 + $0xad0] sm:$0xff] %v2217_v26  ;;  %v2225_v30 = vld [vmem:[%s12879_s28 + $0x36b0] sm:$0xff]  ;;  %v2227_v31 = vld [vmem:[%s12879_s28 + $0x36d8] sm:$0xff] }
  0xc4   : > { %2220 = vst [vmem:[%s12887_s29 + $0xad8] sm:$0xff] %v2219_v27  ;;  %2222 = vst [vmem:[%s12887_s29 + $0xae0] sm:$0xff] %v2221_v28  ;;  %v2229_v32 = vld [vmem:[%s12879_s28 + $0x3700] sm:$0xff]  ;;  %v2231_v33 = vld [vmem:[%s12879_s28 + $0x3728] sm:$0xff] }
  0xc5   : > { %2224 = vst [vmem:[%s12887_s29 + $0xae8] sm:$0xff] %v2223_v29  ;;  %2226 = vst [vmem:[%s12887_s29 + $0xaf0] sm:$0xff] %v2225_v30  ;;  %v2233_v34 = vld [vmem:[%s12879_s28 + $0x3750] sm:$0xff]  ;;  %v2235_v35 = vld [vmem:[%s12879_s28 + $0x3778] sm:$0xff] }
  0xc6   : > { %2228 = vst [vmem:[%s12887_s29 + $0xaf8] sm:$0xff] %v2227_v31  ;;  %2230 = vst [vmem:[%s12887_s29 + $0xb00] sm:$0xff] %v2229_v32  ;;  %v2237_v36 = vld [vmem:[%s12879_s28 + $0x37a0] sm:$0xff]  ;;  %v2239_v37 = vld [vmem:[%s12879_s28 + $0x37c8] sm:$0xff] }
  0xc7   : > { %2232 = vst [vmem:[%s12887_s29 + $0xb08] sm:$0xff] %v2231_v33  ;;  %2234 = vst [vmem:[%s12887_s29 + $0xb10] sm:$0xff] %v2233_v34  ;;  %v2241_v38 = vld [vmem:[%s12879_s28 + $0x37f0] sm:$0xff]  ;;  %v2243_v39 = vld [vmem:[%s12879_s28 + $0x3818] sm:$0xff] }
  0xc8   : > { %2236 = vst [vmem:[%s12887_s29 + $0xb18] sm:$0xff] %v2235_v35  ;;  %2238 = vst [vmem:[%s12887_s29 + $0xb20] sm:$0xff] %v2237_v36  ;;  %v2245_v40 = vld [vmem:[%s12879_s28 + $0x3840] sm:$0xff]  ;;  %v2247_v41 = vld [vmem:[%s12879_s28 + $0x3868] sm:$0xff] }
  0xc9   : > { %2240 = vst [vmem:[%s12887_s29 + $0xb28] sm:$0xff] %v2239_v37  ;;  %2242 = vst [vmem:[%s12887_s29 + $0xb30] sm:$0xff] %v2241_v38  ;;  %v2249_v42 = vld [vmem:[%s12879_s28 + $0x3890] sm:$0xff]  ;;  %v2251_v43 = vld [vmem:[%s12879_s28 + $0x38b8] sm:$0xff] }
  0xca   : > { %2244 = vst [vmem:[%s12887_s29 + $0xb38] sm:$0xff] %v2243_v39  ;;  %2246 = vst [vmem:[%s12887_s29 + $0xb40] sm:$0xff] %v2245_v40  ;;  %v2253_v44 = vld [vmem:[%s12879_s28 + $0x38e0] sm:$0xff]  ;;  %v2255_v45 = vld [vmem:[%s12879_s28 + $0x3908] sm:$0xff] }
  0xcb   : > { %2248 = vst [vmem:[%s12887_s29 + $0xb48] sm:$0xff] %v2247_v41  ;;  %2250 = vst [vmem:[%s12887_s29 + $0xb50] sm:$0xff] %v2249_v42  ;;  %v2257_v46 = vld [vmem:[%s12879_s28 + $0x3930] sm:$0xff]  ;;  %v2259_v47 = vld [vmem:[%s12879_s28 + $0x3958] sm:$0xff] }
  0xcc   : > { %2252 = vst [vmem:[%s12887_s29 + $0xb58] sm:$0xff] %v2251_v43  ;;  %2254 = vst [vmem:[%s12887_s29 + $0xb60] sm:$0xff] %v2253_v44  ;;  %v2261_v48 = vld [vmem:[%s12879_s28 + $0x3980] sm:$0xff]  ;;  %v2263_v49 = vld [vmem:[%s12879_s28 + $0x39a8] sm:$0xff] }
  0xcd   : > { %2256 = vst [vmem:[%s12887_s29 + $0xb68] sm:$0xff] %v2255_v45  ;;  %2258 = vst [vmem:[%s12887_s29 + $0xb70] sm:$0xff] %v2257_v46  ;;  %v2265_v50 = vld [vmem:[%s12879_s28 + $0x39d0] sm:$0xff]  ;;  %v2267_v51 = vld [vmem:[%s12879_s28 + $0x39f8] sm:$0xff] }
  0xce   : > { %2260 = vst [vmem:[%s12887_s29 + $0xb78] sm:$0xff] %v2259_v47  ;;  %2262 = vst [vmem:[%s12887_s29 + $0xb80] sm:$0xff] %v2261_v48  ;;  %v2269_v52 = vld [vmem:[%s12879_s28 + $0x3a20] sm:$0xff]  ;;  %v2271_v53 = vld [vmem:[%s12879_s28 + $0x3a48] sm:$0xff] }
  0xcf   : > { %2264 = vst [vmem:[%s12887_s29 + $0xb88] sm:$0xff] %v2263_v49  ;;  %2266 = vst [vmem:[%s12887_s29 + $0xb90] sm:$0xff] %v2265_v50  ;;  %v2273_v54 = vld [vmem:[%s12879_s28 + $0x3a70] sm:$0xff]  ;;  %v2275_v55 = vld [vmem:[%s12879_s28 + $0x3a98] sm:$0xff] }
  0xd0   : > { %2268 = vst [vmem:[%s12887_s29 + $0xb98] sm:$0xff] %v2267_v51  ;;  %2270 = vst [vmem:[%s12887_s29 + $0xba0] sm:$0xff] %v2269_v52  ;;  %v2277_v56 = vld [vmem:[%s12879_s28 + $0x3ac0] sm:$0xff]  ;;  %v2279_v57 = vld [vmem:[%s12879_s28 + $0x3ae8] sm:$0xff] }
  0xd1   : > { %2272 = vst [vmem:[%s12887_s29 + $0xba8] sm:$0xff] %v2271_v53  ;;  %2274 = vst [vmem:[%s12887_s29 + $0xbb0] sm:$0xff] %v2273_v54  ;;  %v2281_v58 = vld [vmem:[%s12879_s28 + $0x3b10] sm:$0xff]  ;;  %v2283_v59 = vld [vmem:[%s12879_s28 + $0x3b38] sm:$0xff] }
  0xd2   : > { %2276 = vst [vmem:[%s12887_s29 + $0xbb8] sm:$0xff] %v2275_v55  ;;  %2278 = vst [vmem:[%s12887_s29 + $0xbc0] sm:$0xff] %v2277_v56  ;;  %v2285_v60 = vld [vmem:[%s12879_s28 + $0x3b60] sm:$0xff]  ;;  %v2287_v61 = vld [vmem:[%s12879_s28 + $0x3b88] sm:$0xff] }
  0xd3   : > { %2280 = vst [vmem:[%s12887_s29 + $0xbc8] sm:$0xff] %v2279_v57  ;;  %2282 = vst [vmem:[%s12887_s29 + $0xbd0] sm:$0xff] %v2281_v58  ;;  %v2289_v62 = vld [vmem:[%s12879_s28 + $0x3bb0] sm:$0xff]  ;;  %v2291_v63 = vld [vmem:[%s12879_s28 + $0x3bd8] sm:$0xff] }
  0xd4   : > { %2284 = vst [vmem:[%s12887_s29 + $0xbd8] sm:$0xff] %v2283_v59  ;;  %2286 = vst [vmem:[%s12887_s29 + $0xbe0] sm:$0xff] %v2285_v60  ;;  %v2293_v0 = vld [vmem:[%s12879_s28 + $0x3c00] sm:$0xff]  ;;  %v2295_v1 = vld [vmem:[%s12879_s28 + $0x3c28] sm:$0xff] }
  0xd5   : > { %2288 = vst [vmem:[%s12887_s29 + $0xbe8] sm:$0xff] %v2287_v61  ;;  %2290 = vst [vmem:[%s12887_s29 + $0xbf0] sm:$0xff] %v2289_v62  ;;  %v2297_v2 = vld [vmem:[%s12879_s28 + $0x3c50] sm:$0xff]  ;;  %v2299_v3 = vld [vmem:[%s12879_s28 + $0x3c78] sm:$0xff] }
  0xd6   : > { %2292 = vst [vmem:[%s12887_s29 + $0xbf8] sm:$0xff] %v2291_v63  ;;  %2294 = vst [vmem:[%s12887_s29 + $0xc00] sm:$0xff] %v2293_v0  ;;  %v2301_v4 = vld [vmem:[%s12879_s28 + $0x3ca0] sm:$0xff]  ;;  %v2303_v5 = vld [vmem:[%s12879_s28 + $0x3cc8] sm:$0xff] }
  0xd7   : > { %2296 = vst [vmem:[%s12887_s29 + $0xc08] sm:$0xff] %v2295_v1  ;;  %2298 = vst [vmem:[%s12887_s29 + $0xc10] sm:$0xff] %v2297_v2  ;;  %v2305_v6 = vld [vmem:[%s12879_s28 + $0x3cf0] sm:$0xff]  ;;  %v2307_v7 = vld [vmem:[%s12879_s28 + $0x3d18] sm:$0xff] }
  0xd8   : > { %2300 = vst [vmem:[%s12887_s29 + $0xc18] sm:$0xff] %v2299_v3  ;;  %2302 = vst [vmem:[%s12887_s29 + $0xc20] sm:$0xff] %v2301_v4  ;;  %v2309_v8 = vld [vmem:[%s12879_s28 + $0x3d40] sm:$0xff]  ;;  %v2311_v9 = vld [vmem:[%s12879_s28 + $0x3d68] sm:$0xff] }
  0xd9   : > { %2304 = vst [vmem:[%s12887_s29 + $0xc28] sm:$0xff] %v2303_v5  ;;  %2306 = vst [vmem:[%s12887_s29 + $0xc30] sm:$0xff] %v2305_v6  ;;  %v2313_v10 = vld [vmem:[%s12879_s28 + $0x3d90] sm:$0xff]  ;;  %v2315_v11 = vld [vmem:[%s12879_s28 + $0x3db8] sm:$0xff] }
  0xda   : > { %2308 = vst [vmem:[%s12887_s29 + $0xc38] sm:$0xff] %v2307_v7  ;;  %2310 = vst [vmem:[%s12887_s29 + $0xc40] sm:$0xff] %v2309_v8  ;;  %v2317_v12 = vld [vmem:[%s12879_s28 + $0x3de0] sm:$0xff]  ;;  %v2319_v13 = vld [vmem:[%s12879_s28 + $0x3e08] sm:$0xff] }
  0xdb   : > { %2312 = vst [vmem:[%s12887_s29 + $0xc48] sm:$0xff] %v2311_v9  ;;  %2314 = vst [vmem:[%s12887_s29 + $0xc50] sm:$0xff] %v2313_v10  ;;  %v2321_v14 = vld [vmem:[%s12879_s28 + $0x3e30] sm:$0xff]  ;;  %v2323_v15 = vld [vmem:[%s12879_s28 + $0x3e58] sm:$0xff] }
  0xdc   : > { %2316 = vst [vmem:[%s12887_s29 + $0xc58] sm:$0xff] %v2315_v11  ;;  %2318 = vst [vmem:[%s12887_s29 + $0xc60] sm:$0xff] %v2317_v12  ;;  %v2325_v16 = vld [vmem:[%s12879_s28 + $0x3e80] sm:$0xff]  ;;  %v2327_v17 = vld [vmem:[%s12879_s28 + $0x3ea8] sm:$0xff] }
  0xdd   : > { %2320 = vst [vmem:[%s12887_s29 + $0xc68] sm:$0xff] %v2319_v13  ;;  %2322 = vst [vmem:[%s12887_s29 + $0xc70] sm:$0xff] %v2321_v14  ;;  %v2329_v18 = vld [vmem:[%s12879_s28 + $0x3ed0] sm:$0xff]  ;;  %v2331_v19 = vld [vmem:[%s12879_s28 + $0x3ef8] sm:$0xff] }
  0xde   : > { %2324 = vst [vmem:[%s12887_s29 + $0xc78] sm:$0xff] %v2323_v15  ;;  %2326 = vst [vmem:[%s12887_s29 + $0xc80] sm:$0xff] %v2325_v16  ;;  %v2333_v20 = vld [vmem:[%s12879_s28 + $0x3f20] sm:$0xff]  ;;  %v2335_v21 = vld [vmem:[%s12879_s28 + $0x3f48] sm:$0xff] }
  0xdf   : > { %2328 = vst [vmem:[%s12887_s29 + $0xc88] sm:$0xff] %v2327_v17  ;;  %2330 = vst [vmem:[%s12887_s29 + $0xc90] sm:$0xff] %v2329_v18  ;;  %v2337_v22 = vld [vmem:[%s12879_s28 + $0x3f70] sm:$0xff]  ;;  %v2339_v23 = vld [vmem:[%s12879_s28 + $0x3f98] sm:$0xff] }
  0xe0   : > { %2332 = vst [vmem:[%s12887_s29 + $0xc98] sm:$0xff] %v2331_v19  ;;  %2334 = vst [vmem:[%s12887_s29 + $0xca0] sm:$0xff] %v2333_v20  ;;  %v2341_v24 = vld [vmem:[%s12879_s28 + $0x3fc0] sm:$0xff]  ;;  %v2343_v25 = vld [vmem:[%s12879_s28 + $0x3fe8] sm:$0xff] }
  0xe1   : > { %2336 = vst [vmem:[%s12887_s29 + $0xca8] sm:$0xff] %v2335_v21  ;;  %2338 = vst [vmem:[%s12887_s29 + $0xcb0] sm:$0xff] %v2337_v22  ;;  %v2345_v26 = vld [vmem:[%s12879_s28 + $0x4010] sm:$0xff]  ;;  %v2347_v27 = vld [vmem:[%s12879_s28 + $0x4038] sm:$0xff] }
  0xe2   : > { %2340 = vst [vmem:[%s12887_s29 + $0xcb8] sm:$0xff] %v2339_v23  ;;  %2342 = vst [vmem:[%s12887_s29 + $0xcc0] sm:$0xff] %v2341_v24  ;;  %v2349_v28 = vld [vmem:[%s12879_s28 + $0x4060] sm:$0xff]  ;;  %v2351_v29 = vld [vmem:[%s12879_s28 + $0x4088] sm:$0xff] }
  0xe3   : > { %2344 = vst [vmem:[%s12887_s29 + $0xcc8] sm:$0xff] %v2343_v25  ;;  %2346 = vst [vmem:[%s12887_s29 + $0xcd0] sm:$0xff] %v2345_v26  ;;  %v2353_v30 = vld [vmem:[%s12879_s28 + $0x40b0] sm:$0xff]  ;;  %v2355_v31 = vld [vmem:[%s12879_s28 + $0x40d8] sm:$0xff] }
  0xe4   : > { %2348 = vst [vmem:[%s12887_s29 + $0xcd8] sm:$0xff] %v2347_v27  ;;  %2350 = vst [vmem:[%s12887_s29 + $0xce0] sm:$0xff] %v2349_v28  ;;  %v2357_v32 = vld [vmem:[%s12879_s28 + $0x4100] sm:$0xff]  ;;  %v2359_v33 = vld [vmem:[%s12879_s28 + $0x4128] sm:$0xff] }
  0xe5   : > { %2352 = vst [vmem:[%s12887_s29 + $0xce8] sm:$0xff] %v2351_v29  ;;  %2354 = vst [vmem:[%s12887_s29 + $0xcf0] sm:$0xff] %v2353_v30  ;;  %v2361_v34 = vld [vmem:[%s12879_s28 + $0x4150] sm:$0xff]  ;;  %v2363_v35 = vld [vmem:[%s12879_s28 + $0x4178] sm:$0xff] }
  0xe6   : > { %2356 = vst [vmem:[%s12887_s29 + $0xcf8] sm:$0xff] %v2355_v31  ;;  %2358 = vst [vmem:[%s12887_s29 + $0xd00] sm:$0xff] %v2357_v32  ;;  %v2365_v36 = vld [vmem:[%s12879_s28 + $0x41a0] sm:$0xff]  ;;  %v2367_v37 = vld [vmem:[%s12879_s28 + $0x41c8] sm:$0xff] }
  0xe7   : > { %2360 = vst [vmem:[%s12887_s29 + $0xd08] sm:$0xff] %v2359_v33  ;;  %2362 = vst [vmem:[%s12887_s29 + $0xd10] sm:$0xff] %v2361_v34  ;;  %v2369_v38 = vld [vmem:[%s12879_s28 + $0x41f0] sm:$0xff]  ;;  %v2371_v39 = vld [vmem:[%s12879_s28 + $0x4218] sm:$0xff] }
  0xe8   : > { %2364 = vst [vmem:[%s12887_s29 + $0xd18] sm:$0xff] %v2363_v35  ;;  %2366 = vst [vmem:[%s12887_s29 + $0xd20] sm:$0xff] %v2365_v36  ;;  %v2373_v40 = vld [vmem:[%s12879_s28 + $0x4240] sm:$0xff]  ;;  %v2375_v41 = vld [vmem:[%s12879_s28 + $0x4268] sm:$0xff] }
  0xe9   : > { %2368 = vst [vmem:[%s12887_s29 + $0xd28] sm:$0xff] %v2367_v37  ;;  %2370 = vst [vmem:[%s12887_s29 + $0xd30] sm:$0xff] %v2369_v38  ;;  %v2377_v42 = vld [vmem:[%s12879_s28 + $0x4290] sm:$0xff]  ;;  %v2379_v43 = vld [vmem:[%s12879_s28 + $0x42b8] sm:$0xff] }
  0xea   : > { %2372 = vst [vmem:[%s12887_s29 + $0xd38] sm:$0xff] %v2371_v39  ;;  %2374 = vst [vmem:[%s12887_s29 + $0xd40] sm:$0xff] %v2373_v40  ;;  %v2381_v44 = vld [vmem:[%s12879_s28 + $0x42e0] sm:$0xff]  ;;  %v2383_v45 = vld [vmem:[%s12879_s28 + $0x4308] sm:$0xff] }
  0xeb   : > { %2376 = vst [vmem:[%s12887_s29 + $0xd48] sm:$0xff] %v2375_v41  ;;  %2378 = vst [vmem:[%s12887_s29 + $0xd50] sm:$0xff] %v2377_v42  ;;  %v2385_v46 = vld [vmem:[%s12879_s28 + $0x4330] sm:$0xff]  ;;  %v2387_v47 = vld [vmem:[%s12879_s28 + $0x4358] sm:$0xff] }
  0xec   : > { %2380 = vst [vmem:[%s12887_s29 + $0xd58] sm:$0xff] %v2379_v43  ;;  %2382 = vst [vmem:[%s12887_s29 + $0xd60] sm:$0xff] %v2381_v44  ;;  %v2389_v48 = vld [vmem:[%s12879_s28 + $0x4380] sm:$0xff]  ;;  %v2391_v49 = vld [vmem:[%s12879_s28 + $0x43a8] sm:$0xff] }
  0xed   : > { %2384 = vst [vmem:[%s12887_s29 + $0xd68] sm:$0xff] %v2383_v45  ;;  %2386 = vst [vmem:[%s12887_s29 + $0xd70] sm:$0xff] %v2385_v46  ;;  %v2393_v50 = vld [vmem:[%s12879_s28 + $0x43d0] sm:$0xff]  ;;  %v2395_v51 = vld [vmem:[%s12879_s28 + $0x43f8] sm:$0xff] }
  0xee   : > { %2388 = vst [vmem:[%s12887_s29 + $0xd78] sm:$0xff] %v2387_v47  ;;  %2390 = vst [vmem:[%s12887_s29 + $0xd80] sm:$0xff] %v2389_v48  ;;  %v2397_v52 = vld [vmem:[%s12879_s28 + $0x4420] sm:$0xff]  ;;  %v2399_v53 = vld [vmem:[%s12879_s28 + $0x4448] sm:$0xff] }
  0xef   : > { %2392 = vst [vmem:[%s12887_s29 + $0xd88] sm:$0xff] %v2391_v49  ;;  %2394 = vst [vmem:[%s12887_s29 + $0xd90] sm:$0xff] %v2393_v50  ;;  %v2401_v54 = vld [vmem:[%s12879_s28 + $0x4470] sm:$0xff]  ;;  %v2403_v55 = vld [vmem:[%s12879_s28 + $0x4498] sm:$0xff] }
  0xf0   : > { %2396 = vst [vmem:[%s12887_s29 + $0xd98] sm:$0xff] %v2395_v51  ;;  %2398 = vst [vmem:[%s12887_s29 + $0xda0] sm:$0xff] %v2397_v52  ;;  %v2405_v56 = vld [vmem:[%s12879_s28 + $0x44c0] sm:$0xff]  ;;  %v2407_v57 = vld [vmem:[%s12879_s28 + $0x44e8] sm:$0xff] }
  0xf1   : > { %2400 = vst [vmem:[%s12887_s29 + $0xda8] sm:$0xff] %v2399_v53  ;;  %2402 = vst [vmem:[%s12887_s29 + $0xdb0] sm:$0xff] %v2401_v54  ;;  %v2409_v58 = vld [vmem:[%s12879_s28 + $0x4510] sm:$0xff]  ;;  %v2411_v59 = vld [vmem:[%s12879_s28 + $0x4538] sm:$0xff] }
  0xf2   : > { %2404 = vst [vmem:[%s12887_s29 + $0xdb8] sm:$0xff] %v2403_v55  ;;  %2406 = vst [vmem:[%s12887_s29 + $0xdc0] sm:$0xff] %v2405_v56  ;;  %v2413_v60 = vld [vmem:[%s12879_s28 + $0x4560] sm:$0xff]  ;;  %v2415_v61 = vld [vmem:[%s12879_s28 + $0x4588] sm:$0xff] }
  0xf3   : > { %2408 = vst [vmem:[%s12887_s29 + $0xdc8] sm:$0xff] %v2407_v57  ;;  %2410 = vst [vmem:[%s12887_s29 + $0xdd0] sm:$0xff] %v2409_v58  ;;  %v2417_v62 = vld [vmem:[%s12879_s28 + $0x45b0] sm:$0xff]  ;;  %v2419_v63 = vld [vmem:[%s12879_s28 + $0x45d8] sm:$0xff] }
  0xf4   : > { %2412 = vst [vmem:[%s12887_s29 + $0xdd8] sm:$0xff] %v2411_v59  ;;  %2414 = vst [vmem:[%s12887_s29 + $0xde0] sm:$0xff] %v2413_v60  ;;  %v2421_v0 = vld [vmem:[%s12879_s28 + $0x4600] sm:$0xff]  ;;  %v2423_v1 = vld [vmem:[%s12879_s28 + $0x4628] sm:$0xff] }
  0xf5   : > { %2416 = vst [vmem:[%s12887_s29 + $0xde8] sm:$0xff] %v2415_v61  ;;  %2418 = vst [vmem:[%s12887_s29 + $0xdf0] sm:$0xff] %v2417_v62  ;;  %v2425_v2 = vld [vmem:[%s12879_s28 + $0x4650] sm:$0xff]  ;;  %v2427_v3 = vld [vmem:[%s12879_s28 + $0x4678] sm:$0xff] }
  0xf6   : > { %2420 = vst [vmem:[%s12887_s29 + $0xdf8] sm:$0xff] %v2419_v63  ;;  %2422 = vst [vmem:[%s12887_s29 + $0xe00] sm:$0xff] %v2421_v0  ;;  %v2429_v4 = vld [vmem:[%s12879_s28 + $0x46a0] sm:$0xff]  ;;  %v2431_v5 = vld [vmem:[%s12879_s28 + $0x46c8] sm:$0xff] }
  0xf7   : > { %2424 = vst [vmem:[%s12887_s29 + $0xe08] sm:$0xff] %v2423_v1  ;;  %2426 = vst [vmem:[%s12887_s29 + $0xe10] sm:$0xff] %v2425_v2  ;;  %v2433_v6 = vld [vmem:[%s12879_s28 + $0x46f0] sm:$0xff]  ;;  %v2435_v7 = vld [vmem:[%s12879_s28 + $0x4718] sm:$0xff] }
  0xf8   : > { %2428 = vst [vmem:[%s12887_s29 + $0xe18] sm:$0xff] %v2427_v3  ;;  %2430 = vst [vmem:[%s12887_s29 + $0xe20] sm:$0xff] %v2429_v4  ;;  %v2437_v8 = vld [vmem:[%s12879_s28 + $0x4740] sm:$0xff]  ;;  %v2439_v9 = vld [vmem:[%s12879_s28 + $0x4768] sm:$0xff] }
  0xf9   : > { %2432 = vst [vmem:[%s12887_s29 + $0xe28] sm:$0xff] %v2431_v5  ;;  %2434 = vst [vmem:[%s12887_s29 + $0xe30] sm:$0xff] %v2433_v6  ;;  %v2441_v10 = vld [vmem:[%s12879_s28 + $0x4790] sm:$0xff]  ;;  %v2443_v11 = vld [vmem:[%s12879_s28 + $0x47b8] sm:$0xff] }
  0xfa   : > { %2436 = vst [vmem:[%s12887_s29 + $0xe38] sm:$0xff] %v2435_v7  ;;  %2438 = vst [vmem:[%s12887_s29 + $0xe40] sm:$0xff] %v2437_v8  ;;  %v2445_v12 = vld [vmem:[%s12879_s28 + $0x47e0] sm:$0xff]  ;;  %v2447_v13 = vld [vmem:[%s12879_s28 + $0x4808] sm:$0xff] }
  0xfb   : > { %2440 = vst [vmem:[%s12887_s29 + $0xe48] sm:$0xff] %v2439_v9  ;;  %2442 = vst [vmem:[%s12887_s29 + $0xe50] sm:$0xff] %v2441_v10  ;;  %v2449_v14 = vld [vmem:[%s12879_s28 + $0x4830] sm:$0xff]  ;;  %v2451_v15 = vld [vmem:[%s12879_s28 + $0x4858] sm:$0xff] }
  0xfc   : > { %2444 = vst [vmem:[%s12887_s29 + $0xe58] sm:$0xff] %v2443_v11  ;;  %2446 = vst [vmem:[%s12887_s29 + $0xe60] sm:$0xff] %v2445_v12  ;;  %v2453_v16 = vld [vmem:[%s12879_s28 + $0x4880] sm:$0xff]  ;;  %v2455_v17 = vld [vmem:[%s12879_s28 + $0x48a8] sm:$0xff] }
  0xfd   : > { %2448 = vst [vmem:[%s12887_s29 + $0xe68] sm:$0xff] %v2447_v13  ;;  %2450 = vst [vmem:[%s12887_s29 + $0xe70] sm:$0xff] %v2449_v14  ;;  %v2457_v18 = vld [vmem:[%s12879_s28 + $0x48d0] sm:$0xff]  ;;  %v2459_v19 = vld [vmem:[%s12879_s28 + $0x48f8] sm:$0xff] }
  0xfe   : > { %2452 = vst [vmem:[%s12887_s29 + $0xe78] sm:$0xff] %v2451_v15  ;;  %2454 = vst [vmem:[%s12887_s29 + $0xe80] sm:$0xff] %v2453_v16  ;;  %v2461_v20 = vld [vmem:[%s12879_s28 + $0x4920] sm:$0xff]  ;;  %v2463_v21 = vld [vmem:[%s12879_s28 + $0x4948] sm:$0xff] }
  0xff   : > { %2456 = vst [vmem:[%s12887_s29 + $0xe88] sm:$0xff] %v2455_v17  ;;  %2458 = vst [vmem:[%s12887_s29 + $0xe90] sm:$0xff] %v2457_v18  ;;  %v2465_v22 = vld [vmem:[%s12879_s28 + $0x4970] sm:$0xff]  ;;  %v2467_v23 = vld [vmem:[%s12879_s28 + $0x4998] sm:$0xff] }
 0x100   : > { %2460 = vst [vmem:[%s12887_s29 + $0xe98] sm:$0xff] %v2459_v19  ;;  %2462 = vst [vmem:[%s12887_s29 + $0xea0] sm:$0xff] %v2461_v20  ;;  %v2469_v24 = vld [vmem:[%s12879_s28 + $0x49c0] sm:$0xff]  ;;  %v2471_v25 = vld [vmem:[%s12879_s28 + $0x49e8] sm:$0xff] }
 0x101   : > { %2464 = vst [vmem:[%s12887_s29 + $0xea8] sm:$0xff] %v2463_v21  ;;  %2466 = vst [vmem:[%s12887_s29 + $0xeb0] sm:$0xff] %v2465_v22  ;;  %v2473_v26 = vld [vmem:[%s12879_s28 + $0x4a10] sm:$0xff]  ;;  %v2475_v27 = vld [vmem:[%s12879_s28 + $0x4a38] sm:$0xff] }
 0x102   : > { %2468 = vst [vmem:[%s12887_s29 + $0xeb8] sm:$0xff] %v2467_v23  ;;  %2470 = vst [vmem:[%s12887_s29 + $0xec0] sm:$0xff] %v2469_v24  ;;  %v2477_v28 = vld [vmem:[%s12879_s28 + $0x4a60] sm:$0xff]  ;;  %v2479_v29 = vld [vmem:[%s12879_s28 + $0x4a88] sm:$0xff] }
 0x103   : > { %2472 = vst [vmem:[%s12887_s29 + $0xec8] sm:$0xff] %v2471_v25  ;;  %2474 = vst [vmem:[%s12887_s29 + $0xed0] sm:$0xff] %v2473_v26  ;;  %v2481_v30 = vld [vmem:[%s12879_s28 + $0x4ab0] sm:$0xff]  ;;  %v2483_v31 = vld [vmem:[%s12879_s28 + $0x4ad8] sm:$0xff] }
 0x104   : > { %2476 = vst [vmem:[%s12887_s29 + $0xed8] sm:$0xff] %v2475_v27  ;;  %2478 = vst [vmem:[%s12887_s29 + $0xee0] sm:$0xff] %v2477_v28  ;;  %v2485_v32 = vld [vmem:[%s12879_s28 + $0x4b00] sm:$0xff]  ;;  %v2487_v33 = vld [vmem:[%s12879_s28 + $0x4b28] sm:$0xff] }
 0x105   : > { %2480 = vst [vmem:[%s12887_s29 + $0xee8] sm:$0xff] %v2479_v29  ;;  %2482 = vst [vmem:[%s12887_s29 + $0xef0] sm:$0xff] %v2481_v30  ;;  %v2489_v34 = vld [vmem:[%s12879_s28 + $0x4b50] sm:$0xff]  ;;  %v2491_v35 = vld [vmem:[%s12879_s28 + $0x4b78] sm:$0xff] }
 0x106   : > { %2484 = vst [vmem:[%s12887_s29 + $0xef8] sm:$0xff] %v2483_v31  ;;  %2486 = vst [vmem:[%s12887_s29 + $0xf00] sm:$0xff] %v2485_v32  ;;  %v2493_v36 = vld [vmem:[%s12879_s28 + $0x4ba0] sm:$0xff]  ;;  %v2495_v37 = vld [vmem:[%s12879_s28 + $0x4bc8] sm:$0xff] }
 0x107   : > { %2488 = vst [vmem:[%s12887_s29 + $0xf08] sm:$0xff] %v2487_v33  ;;  %2490 = vst [vmem:[%s12887_s29 + $0xf10] sm:$0xff] %v2489_v34  ;;  %v2497_v38 = vld [vmem:[%s12879_s28 + $0x4bf0] sm:$0xff]  ;;  %v2499_v39 = vld [vmem:[%s12879_s28 + $0x4c18] sm:$0xff] }
 0x108   : > { %2492 = vst [vmem:[%s12887_s29 + $0xf18] sm:$0xff] %v2491_v35  ;;  %2494 = vst [vmem:[%s12887_s29 + $0xf20] sm:$0xff] %v2493_v36  ;;  %v2501_v40 = vld [vmem:[%s12879_s28 + $0x4c40] sm:$0xff]  ;;  %v2503_v41 = vld [vmem:[%s12879_s28 + $0x4c68] sm:$0xff] }
 0x109   : > { %2496 = vst [vmem:[%s12887_s29 + $0xf28] sm:$0xff] %v2495_v37  ;;  %2498 = vst [vmem:[%s12887_s29 + $0xf30] sm:$0xff] %v2497_v38  ;;  %v2505_v42 = vld [vmem:[%s12879_s28 + $0x4c90] sm:$0xff]  ;;  %v2507_v43 = vld [vmem:[%s12879_s28 + $0x4cb8] sm:$0xff] }
 0x10a   : > { %2500 = vst [vmem:[%s12887_s29 + $0xf38] sm:$0xff] %v2499_v39  ;;  %2502 = vst [vmem:[%s12887_s29 + $0xf40] sm:$0xff] %v2501_v40  ;;  %v2509_v44 = vld [vmem:[%s12879_s28 + $0x4ce0] sm:$0xff]  ;;  %v2511_v45 = vld [vmem:[%s12879_s28 + $0x4d08] sm:$0xff] }
 0x10b   : > { %2504 = vst [vmem:[%s12887_s29 + $0xf48] sm:$0xff] %v2503_v41  ;;  %2506 = vst [vmem:[%s12887_s29 + $0xf50] sm:$0xff] %v2505_v42  ;;  %v2513_v46 = vld [vmem:[%s12879_s28 + $0x4d30] sm:$0xff]  ;;  %v2515_v47 = vld [vmem:[%s12879_s28 + $0x4d58] sm:$0xff] }
 0x10c   : > { %2508 = vst [vmem:[%s12887_s29 + $0xf58] sm:$0xff] %v2507_v43  ;;  %2510 = vst [vmem:[%s12887_s29 + $0xf60] sm:$0xff] %v2509_v44  ;;  %v2517_v48 = vld [vmem:[%s12879_s28 + $0x4d80] sm:$0xff]  ;;  %v2519_v49 = vld [vmem:[%s12879_s28 + $0x4da8] sm:$0xff] }
 0x10d   : > { %2512 = vst [vmem:[%s12887_s29 + $0xf68] sm:$0xff] %v2511_v45  ;;  %2514 = vst [vmem:[%s12887_s29 + $0xf70] sm:$0xff] %v2513_v46  ;;  %v2521_v50 = vld [vmem:[%s12879_s28 + $0x4dd0] sm:$0xff]  ;;  %v2523_v51 = vld [vmem:[%s12879_s28 + $0x4df8] sm:$0xff] }
 0x10e   : > { %2516 = vst [vmem:[%s12887_s29 + $0xf78] sm:$0xff] %v2515_v47  ;;  %2518 = vst [vmem:[%s12887_s29 + $0xf80] sm:$0xff] %v2517_v48  ;;  %v2525_v52 = vld [vmem:[%s12879_s28 + $0x4e20] sm:$0xff]  ;;  %v2527_v53 = vld [vmem:[%s12879_s28 + $0x4e48] sm:$0xff] }
 0x10f   : > { %2520 = vst [vmem:[%s12887_s29 + $0xf88] sm:$0xff] %v2519_v49  ;;  %2522 = vst [vmem:[%s12887_s29 + $0xf90] sm:$0xff] %v2521_v50  ;;  %v2529_v54 = vld [vmem:[%s12879_s28 + $0x4e70] sm:$0xff]  ;;  %v2531_v55 = vld [vmem:[%s12879_s28 + $0x4e98] sm:$0xff] }
 0x110   : > { %2524 = vst [vmem:[%s12887_s29 + $0xf98] sm:$0xff] %v2523_v51  ;;  %2526 = vst [vmem:[%s12887_s29 + $0xfa0] sm:$0xff] %v2525_v52  ;;  %v2533_v56 = vld [vmem:[%s12879_s28 + $0x4ec0] sm:$0xff]  ;;  %v2535_v57 = vld [vmem:[%s12879_s28 + $0x4ee8] sm:$0xff] }
 0x111   : > { %2528 = vst [vmem:[%s12887_s29 + $0xfa8] sm:$0xff] %v2527_v53  ;;  %2530 = vst [vmem:[%s12887_s29 + $0xfb0] sm:$0xff] %v2529_v54  ;;  %v2537_v58 = vld [vmem:[%s12879_s28 + $0x4f10] sm:$0xff]  ;;  %v2539_v59 = vld [vmem:[%s12879_s28 + $0x4f38] sm:$0xff] }
 0x112   : > { %2532 = vst [vmem:[%s12887_s29 + $0xfb8] sm:$0xff] %v2531_v55  ;;  %2534 = vst [vmem:[%s12887_s29 + $0xfc0] sm:$0xff] %v2533_v56  ;;  %v2541_v60 = vld [vmem:[%s12879_s28 + $0x4f60] sm:$0xff]  ;;  %v2543_v61 = vld [vmem:[%s12879_s28 + $0x4f88] sm:$0xff] }
 0x113   : > { %2536 = vst [vmem:[%s12887_s29 + $0xfc8] sm:$0xff] %v2535_v57  ;;  %2538 = vst [vmem:[%s12887_s29 + $0xfd0] sm:$0xff] %v2537_v58  ;;  %v2545_v62 = vld [vmem:[%s12879_s28 + $0x4fb0] sm:$0xff]  ;;  %v2547_v63 = vld [vmem:[%s12879_s28 + $0x4fd8] sm:$0xff] }
 0x114   : > { %2540 = vst [vmem:[%s12887_s29 + $0xfd8] sm:$0xff] %v2539_v59  ;;  %2542 = vst [vmem:[%s12887_s29 + $0xfe0] sm:$0xff] %v2541_v60  ;;  %v2549_v0 = vld [vmem:[%s12879_s28 + $0x5000] sm:$0xff]  ;;  %v2551_v1 = vld [vmem:[%s12879_s28 + $0x5028] sm:$0xff] }
 0x115   : > { %2544 = vst [vmem:[%s12887_s29 + $0xfe8] sm:$0xff] %v2543_v61  ;;  %2546 = vst [vmem:[%s12887_s29 + $0xff0] sm:$0xff] %v2545_v62  ;;  %v2553_v2 = vld [vmem:[%s12879_s28 + $0x5050] sm:$0xff]  ;;  %v2555_v3 = vld [vmem:[%s12879_s28 + $0x5078] sm:$0xff] }
 0x116   : > { %2548 = vst [vmem:[%s12887_s29 + $0xff8] sm:$0xff] %v2547_v63  ;;  %2550 = vst [vmem:[%s12887_s29 + $0x1000] sm:$0xff] %v2549_v0  ;;  %v2557_v4 = vld [vmem:[%s12879_s28 + $0x50a0] sm:$0xff]  ;;  %v2559_v5 = vld [vmem:[%s12879_s28 + $0x50c8] sm:$0xff] }
 0x117   : > { %2552 = vst [vmem:[%s12887_s29 + $0x1008] sm:$0xff] %v2551_v1  ;;  %2554 = vst [vmem:[%s12887_s29 + $0x1010] sm:$0xff] %v2553_v2  ;;  %v2561_v6 = vld [vmem:[%s12879_s28 + $0x50f0] sm:$0xff]  ;;  %v2563_v7 = vld [vmem:[%s12879_s28 + $0x5118] sm:$0xff] }
 0x118   : > { %2556 = vst [vmem:[%s12887_s29 + $0x1018] sm:$0xff] %v2555_v3  ;;  %2558 = vst [vmem:[%s12887_s29 + $0x1020] sm:$0xff] %v2557_v4  ;;  %v2565_v8 = vld [vmem:[%s12879_s28 + $0x5140] sm:$0xff]  ;;  %v2567_v9 = vld [vmem:[%s12879_s28 + $0x5168] sm:$0xff] }
 0x119   : > { %2560 = vst [vmem:[%s12887_s29 + $0x1028] sm:$0xff] %v2559_v5  ;;  %2562 = vst [vmem:[%s12887_s29 + $0x1030] sm:$0xff] %v2561_v6  ;;  %v2569_v10 = vld [vmem:[%s12879_s28 + $0x5190] sm:$0xff]  ;;  %v2571_v11 = vld [vmem:[%s12879_s28 + $0x51b8] sm:$0xff] }
 0x11a   : > { %2564 = vst [vmem:[%s12887_s29 + $0x1038] sm:$0xff] %v2563_v7  ;;  %2566 = vst [vmem:[%s12887_s29 + $0x1040] sm:$0xff] %v2565_v8  ;;  %v2573_v12 = vld [vmem:[%s12879_s28 + $0x51e0] sm:$0xff]  ;;  %v2575_v13 = vld [vmem:[%s12879_s28 + $0x5208] sm:$0xff] }
 0x11b   : > { %2568 = vst [vmem:[%s12887_s29 + $0x1048] sm:$0xff] %v2567_v9  ;;  %2570 = vst [vmem:[%s12887_s29 + $0x1050] sm:$0xff] %v2569_v10  ;;  %v2577_v14 = vld [vmem:[%s12879_s28 + $0x5230] sm:$0xff]  ;;  %v2579_v15 = vld [vmem:[%s12879_s28 + $0x5258] sm:$0xff] }
 0x11c   : > { %2572 = vst [vmem:[%s12887_s29 + $0x1058] sm:$0xff] %v2571_v11  ;;  %2574 = vst [vmem:[%s12887_s29 + $0x1060] sm:$0xff] %v2573_v12  ;;  %v2581_v16 = vld [vmem:[%s12879_s28 + $0x5280] sm:$0xff]  ;;  %v2583_v17 = vld [vmem:[%s12879_s28 + $0x52a8] sm:$0xff] }
 0x11d   : > { %2576 = vst [vmem:[%s12887_s29 + $0x1068] sm:$0xff] %v2575_v13  ;;  %2578 = vst [vmem:[%s12887_s29 + $0x1070] sm:$0xff] %v2577_v14  ;;  %v2585_v18 = vld [vmem:[%s12879_s28 + $0x52d0] sm:$0xff]  ;;  %v2587_v19 = vld [vmem:[%s12879_s28 + $0x52f8] sm:$0xff] }
 0x11e   : > { %2580 = vst [vmem:[%s12887_s29 + $0x1078] sm:$0xff] %v2579_v15  ;;  %2582 = vst [vmem:[%s12887_s29 + $0x1080] sm:$0xff] %v2581_v16  ;;  %v2589_v20 = vld [vmem:[%s12879_s28 + $0x5320] sm:$0xff]  ;;  %v2591_v21 = vld [vmem:[%s12879_s28 + $0x5348] sm:$0xff] }
 0x11f   : > { %2584 = vst [vmem:[%s12887_s29 + $0x1088] sm:$0xff] %v2583_v17  ;;  %2586 = vst [vmem:[%s12887_s29 + $0x1090] sm:$0xff] %v2585_v18  ;;  %v2593_v22 = vld [vmem:[%s12879_s28 + $0x5370] sm:$0xff]  ;;  %v2595_v23 = vld [vmem:[%s12879_s28 + $0x5398] sm:$0xff] }
 0x120   : > { %2588 = vst [vmem:[%s12887_s29 + $0x1098] sm:$0xff] %v2587_v19  ;;  %2590 = vst [vmem:[%s12887_s29 + $0x10a0] sm:$0xff] %v2589_v20  ;;  %v2597_v24 = vld [vmem:[%s12879_s28 + $0x53c0] sm:$0xff]  ;;  %v2599_v25 = vld [vmem:[%s12879_s28 + $0x53e8] sm:$0xff] }
 0x121   : > { %2592 = vst [vmem:[%s12887_s29 + $0x10a8] sm:$0xff] %v2591_v21  ;;  %2594 = vst [vmem:[%s12887_s29 + $0x10b0] sm:$0xff] %v2593_v22  ;;  %v2601_v26 = vld [vmem:[%s12879_s28 + $0x5410] sm:$0xff]  ;;  %v2603_v27 = vld [vmem:[%s12879_s28 + $0x5438] sm:$0xff] }
 0x122   : > { %2596 = vst [vmem:[%s12887_s29 + $0x10b8] sm:$0xff] %v2595_v23  ;;  %2598 = vst [vmem:[%s12887_s29 + $0x10c0] sm:$0xff] %v2597_v24  ;;  %v2605_v28 = vld [vmem:[%s12879_s28 + $0x5460] sm:$0xff]  ;;  %v2607_v29 = vld [vmem:[%s12879_s28 + $0x5488] sm:$0xff] }
 0x123   : > { %2600 = vst [vmem:[%s12887_s29 + $0x10c8] sm:$0xff] %v2599_v25  ;;  %2602 = vst [vmem:[%s12887_s29 + $0x10d0] sm:$0xff] %v2601_v26  ;;  %v2609_v30 = vld [vmem:[%s12879_s28 + $0x54b0] sm:$0xff]  ;;  %v2611_v31 = vld [vmem:[%s12879_s28 + $0x54d8] sm:$0xff] }
 0x124   : > { %2604 = vst [vmem:[%s12887_s29 + $0x10d8] sm:$0xff] %v2603_v27  ;;  %2606 = vst [vmem:[%s12887_s29 + $0x10e0] sm:$0xff] %v2605_v28  ;;  %v2613_v32 = vld [vmem:[%s12879_s28 + $0x5500] sm:$0xff]  ;;  %v2615_v33 = vld [vmem:[%s12879_s28 + $0x5528] sm:$0xff] }
 0x125   : > { %2608 = vst [vmem:[%s12887_s29 + $0x10e8] sm:$0xff] %v2607_v29  ;;  %2610 = vst [vmem:[%s12887_s29 + $0x10f0] sm:$0xff] %v2609_v30  ;;  %v2617_v34 = vld [vmem:[%s12879_s28 + $0x5550] sm:$0xff]  ;;  %v2619_v35 = vld [vmem:[%s12879_s28 + $0x5578] sm:$0xff] }
 0x126   : > { %2612 = vst [vmem:[%s12887_s29 + $0x10f8] sm:$0xff] %v2611_v31  ;;  %2614 = vst [vmem:[%s12887_s29 + $0x1100] sm:$0xff] %v2613_v32  ;;  %v2621_v36 = vld [vmem:[%s12879_s28 + $0x55a0] sm:$0xff]  ;;  %v2623_v37 = vld [vmem:[%s12879_s28 + $0x55c8] sm:$0xff] }
 0x127   : > { %2616 = vst [vmem:[%s12887_s29 + $0x1108] sm:$0xff] %v2615_v33  ;;  %2618 = vst [vmem:[%s12887_s29 + $0x1110] sm:$0xff] %v2617_v34  ;;  %v2625_v38 = vld [vmem:[%s12879_s28 + $0x55f0] sm:$0xff]  ;;  %v2627_v39 = vld [vmem:[%s12879_s28 + $0x5618] sm:$0xff] }
 0x128   : > { %2620 = vst [vmem:[%s12887_s29 + $0x1118] sm:$0xff] %v2619_v35  ;;  %2622 = vst [vmem:[%s12887_s29 + $0x1120] sm:$0xff] %v2621_v36  ;;  %v2629_v40 = vld [vmem:[%s12879_s28 + $0x5640] sm:$0xff]  ;;  %v2631_v41 = vld [vmem:[%s12879_s28 + $0x5668] sm:$0xff] }
 0x129   : > { %2624 = vst [vmem:[%s12887_s29 + $0x1128] sm:$0xff] %v2623_v37  ;;  %2626 = vst [vmem:[%s12887_s29 + $0x1130] sm:$0xff] %v2625_v38  ;;  %v2633_v42 = vld [vmem:[%s12879_s28 + $0x5690] sm:$0xff]  ;;  %v2635_v43 = vld [vmem:[%s12879_s28 + $0x56b8] sm:$0xff] }
 0x12a   : > { %2628 = vst [vmem:[%s12887_s29 + $0x1138] sm:$0xff] %v2627_v39  ;;  %2630 = vst [vmem:[%s12887_s29 + $0x1140] sm:$0xff] %v2629_v40  ;;  %v2637_v44 = vld [vmem:[%s12879_s28 + $0x56e0] sm:$0xff]  ;;  %v2639_v45 = vld [vmem:[%s12879_s28 + $0x5708] sm:$0xff] }
 0x12b   : > { %2632 = vst [vmem:[%s12887_s29 + $0x1148] sm:$0xff] %v2631_v41  ;;  %2634 = vst [vmem:[%s12887_s29 + $0x1150] sm:$0xff] %v2633_v42  ;;  %v2641_v46 = vld [vmem:[%s12879_s28 + $0x5730] sm:$0xff]  ;;  %v2643_v47 = vld [vmem:[%s12879_s28 + $0x5758] sm:$0xff] }
 0x12c   : > { %2636 = vst [vmem:[%s12887_s29 + $0x1158] sm:$0xff] %v2635_v43  ;;  %2638 = vst [vmem:[%s12887_s29 + $0x1160] sm:$0xff] %v2637_v44  ;;  %v2645_v48 = vld [vmem:[%s12879_s28 + $0x5780] sm:$0xff]  ;;  %v2647_v49 = vld [vmem:[%s12879_s28 + $0x57a8] sm:$0xff] }
 0x12d   : > { %2640 = vst [vmem:[%s12887_s29 + $0x1168] sm:$0xff] %v2639_v45  ;;  %2642 = vst [vmem:[%s12887_s29 + $0x1170] sm:$0xff] %v2641_v46  ;;  %v2649_v50 = vld [vmem:[%s12879_s28 + $0x57d0] sm:$0xff]  ;;  %v2651_v51 = vld [vmem:[%s12879_s28 + $0x57f8] sm:$0xff] }
 0x12e   : > { %2644 = vst [vmem:[%s12887_s29 + $0x1178] sm:$0xff] %v2643_v47  ;;  %2646 = vst [vmem:[%s12887_s29 + $0x1180] sm:$0xff] %v2645_v48  ;;  %v2653_v52 = vld [vmem:[%s12879_s28 + $0x5820] sm:$0xff]  ;;  %v2655_v53 = vld [vmem:[%s12879_s28 + $0x5848] sm:$0xff] }
 0x12f   : > { %2648 = vst [vmem:[%s12887_s29 + $0x1188] sm:$0xff] %v2647_v49  ;;  %2650 = vst [vmem:[%s12887_s29 + $0x1190] sm:$0xff] %v2649_v50  ;;  %v2657_v54 = vld [vmem:[%s12879_s28 + $0x5870] sm:$0xff]  ;;  %v2659_v55 = vld [vmem:[%s12879_s28 + $0x5898] sm:$0xff] }
 0x130   : > { %2652 = vst [vmem:[%s12887_s29 + $0x1198] sm:$0xff] %v2651_v51  ;;  %2654 = vst [vmem:[%s12887_s29 + $0x11a0] sm:$0xff] %v2653_v52  ;;  %v2661_v56 = vld [vmem:[%s12879_s28 + $0x58c0] sm:$0xff]  ;;  %v2663_v57 = vld [vmem:[%s12879_s28 + $0x58e8] sm:$0xff] }
 0x131   : > { %2656 = vst [vmem:[%s12887_s29 + $0x11a8] sm:$0xff] %v2655_v53  ;;  %2658 = vst [vmem:[%s12887_s29 + $0x11b0] sm:$0xff] %v2657_v54  ;;  %v2665_v58 = vld [vmem:[%s12879_s28 + $0x5910] sm:$0xff]  ;;  %v2667_v59 = vld [vmem:[%s12879_s28 + $0x5938] sm:$0xff] }
 0x132   : > { %2660 = vst [vmem:[%s12887_s29 + $0x11b8] sm:$0xff] %v2659_v55  ;;  %2662 = vst [vmem:[%s12887_s29 + $0x11c0] sm:$0xff] %v2661_v56  ;;  %v2669_v60 = vld [vmem:[%s12879_s28 + $0x5960] sm:$0xff]  ;;  %v2671_v61 = vld [vmem:[%s12879_s28 + $0x5988] sm:$0xff] }
 0x133   : > { %2664 = vst [vmem:[%s12887_s29 + $0x11c8] sm:$0xff] %v2663_v57  ;;  %2666 = vst [vmem:[%s12887_s29 + $0x11d0] sm:$0xff] %v2665_v58  ;;  %v2673_v62 = vld [vmem:[%s12879_s28 + $0x59b0] sm:$0xff]  ;;  %v2675_v63 = vld [vmem:[%s12879_s28 + $0x59d8] sm:$0xff] }
 0x134   : > { %2668 = vst [vmem:[%s12887_s29 + $0x11d8] sm:$0xff] %v2667_v59  ;;  %2670 = vst [vmem:[%s12887_s29 + $0x11e0] sm:$0xff] %v2669_v60  ;;  %v2677_v0 = vld [vmem:[%s12879_s28 + $0x5a00] sm:$0xff]  ;;  %v2679_v1 = vld [vmem:[%s12879_s28 + $0x5a28] sm:$0xff] }
 0x135   : > { %2672 = vst [vmem:[%s12887_s29 + $0x11e8] sm:$0xff] %v2671_v61  ;;  %2674 = vst [vmem:[%s12887_s29 + $0x11f0] sm:$0xff] %v2673_v62  ;;  %v2681_v2 = vld [vmem:[%s12879_s28 + $0x5a50] sm:$0xff]  ;;  %v2683_v3 = vld [vmem:[%s12879_s28 + $0x5a78] sm:$0xff] }
 0x136   : > { %2676 = vst [vmem:[%s12887_s29 + $0x11f8] sm:$0xff] %v2675_v63  ;;  %2678 = vst [vmem:[%s12887_s29 + $0x1200] sm:$0xff] %v2677_v0  ;;  %v2685_v4 = vld [vmem:[%s12879_s28 + $0x5aa0] sm:$0xff]  ;;  %v2687_v5 = vld [vmem:[%s12879_s28 + $0x5ac8] sm:$0xff] }
 0x137   : > { %2680 = vst [vmem:[%s12887_s29 + $0x1208] sm:$0xff] %v2679_v1  ;;  %2682 = vst [vmem:[%s12887_s29 + $0x1210] sm:$0xff] %v2681_v2  ;;  %v2689_v6 = vld [vmem:[%s12879_s28 + $0x5af0] sm:$0xff]  ;;  %v2691_v7 = vld [vmem:[%s12879_s28 + $0x5b18] sm:$0xff] }
 0x138   : > { %2684 = vst [vmem:[%s12887_s29 + $0x1218] sm:$0xff] %v2683_v3  ;;  %2686 = vst [vmem:[%s12887_s29 + $0x1220] sm:$0xff] %v2685_v4  ;;  %v2693_v8 = vld [vmem:[%s12879_s28 + $0x5b40] sm:$0xff]  ;;  %v2695_v9 = vld [vmem:[%s12879_s28 + $0x5b68] sm:$0xff] }
 0x139   : > { %2688 = vst [vmem:[%s12887_s29 + $0x1228] sm:$0xff] %v2687_v5  ;;  %2690 = vst [vmem:[%s12887_s29 + $0x1230] sm:$0xff] %v2689_v6  ;;  %v2697_v10 = vld [vmem:[%s12879_s28 + $0x5b90] sm:$0xff]  ;;  %v2699_v11 = vld [vmem:[%s12879_s28 + $0x5bb8] sm:$0xff] }
 0x13a   : > { %2692 = vst [vmem:[%s12887_s29 + $0x1238] sm:$0xff] %v2691_v7  ;;  %2694 = vst [vmem:[%s12887_s29 + $0x1240] sm:$0xff] %v2693_v8  ;;  %v2701_v12 = vld [vmem:[%s12879_s28 + $0x5be0] sm:$0xff]  ;;  %v2703_v13 = vld [vmem:[%s12879_s28 + $0x5c08] sm:$0xff] }
 0x13b   : > { %2696 = vst [vmem:[%s12887_s29 + $0x1248] sm:$0xff] %v2695_v9  ;;  %2698 = vst [vmem:[%s12887_s29 + $0x1250] sm:$0xff] %v2697_v10  ;;  %v2705_v14 = vld [vmem:[%s12879_s28 + $0x5c30] sm:$0xff]  ;;  %v2707_v15 = vld [vmem:[%s12879_s28 + $0x5c58] sm:$0xff] }
 0x13c   : > { %2700 = vst [vmem:[%s12887_s29 + $0x1258] sm:$0xff] %v2699_v11  ;;  %2702 = vst [vmem:[%s12887_s29 + $0x1260] sm:$0xff] %v2701_v12  ;;  %v2709_v16 = vld [vmem:[%s12879_s28 + $0x5c80] sm:$0xff]  ;;  %v2711_v17 = vld [vmem:[%s12879_s28 + $0x5ca8] sm:$0xff] }
 0x13d   : > { %2704 = vst [vmem:[%s12887_s29 + $0x1268] sm:$0xff] %v2703_v13  ;;  %2706 = vst [vmem:[%s12887_s29 + $0x1270] sm:$0xff] %v2705_v14  ;;  %v2713_v18 = vld [vmem:[%s12879_s28 + $0x5cd0] sm:$0xff]  ;;  %v2715_v19 = vld [vmem:[%s12879_s28 + $0x5cf8] sm:$0xff] }
 0x13e   : > { %2708 = vst [vmem:[%s12887_s29 + $0x1278] sm:$0xff] %v2707_v15  ;;  %2710 = vst [vmem:[%s12887_s29 + $0x1280] sm:$0xff] %v2709_v16  ;;  %v2717_v20 = vld [vmem:[%s12879_s28 + $0x5d20] sm:$0xff]  ;;  %v2719_v21 = vld [vmem:[%s12879_s28 + $0x5d48] sm:$0xff] }
 0x13f   : > { %2712 = vst [vmem:[%s12887_s29 + $0x1288] sm:$0xff] %v2711_v17  ;;  %2714 = vst [vmem:[%s12887_s29 + $0x1290] sm:$0xff] %v2713_v18  ;;  %v2721_v22 = vld [vmem:[%s12879_s28 + $0x5d70] sm:$0xff]  ;;  %v2723_v23 = vld [vmem:[%s12879_s28 + $0x5d98] sm:$0xff] }
 0x140   : > { %2716 = vst [vmem:[%s12887_s29 + $0x1298] sm:$0xff] %v2715_v19  ;;  %2718 = vst [vmem:[%s12887_s29 + $0x12a0] sm:$0xff] %v2717_v20  ;;  %v2725_v24 = vld [vmem:[%s12879_s28 + $0x5dc0] sm:$0xff]  ;;  %v2727_v25 = vld [vmem:[%s12879_s28 + $0x5de8] sm:$0xff] }
 0x141   : > { %2720 = vst [vmem:[%s12887_s29 + $0x12a8] sm:$0xff] %v2719_v21  ;;  %2722 = vst [vmem:[%s12887_s29 + $0x12b0] sm:$0xff] %v2721_v22  ;;  %v2729_v26 = vld [vmem:[%s12879_s28 + $0x5e10] sm:$0xff]  ;;  %v2731_v27 = vld [vmem:[%s12879_s28 + $0x5e38] sm:$0xff] }
 0x142   : > { %2724 = vst [vmem:[%s12887_s29 + $0x12b8] sm:$0xff] %v2723_v23  ;;  %2726 = vst [vmem:[%s12887_s29 + $0x12c0] sm:$0xff] %v2725_v24  ;;  %v2733_v28 = vld [vmem:[%s12879_s28 + $0x5e60] sm:$0xff]  ;;  %v2735_v29 = vld [vmem:[%s12879_s28 + $0x5e88] sm:$0xff] }
 0x143   : > { %2728 = vst [vmem:[%s12887_s29 + $0x12c8] sm:$0xff] %v2727_v25  ;;  %2730 = vst [vmem:[%s12887_s29 + $0x12d0] sm:$0xff] %v2729_v26  ;;  %v2737_v30 = vld [vmem:[%s12879_s28 + $0x5eb0] sm:$0xff]  ;;  %v2739_v31 = vld [vmem:[%s12879_s28 + $0x5ed8] sm:$0xff] }
 0x144   : > { %2732 = vst [vmem:[%s12887_s29 + $0x12d8] sm:$0xff] %v2731_v27  ;;  %2734 = vst [vmem:[%s12887_s29 + $0x12e0] sm:$0xff] %v2733_v28  ;;  %v2741_v32 = vld [vmem:[%s12879_s28 + $0x5f00] sm:$0xff]  ;;  %v2743_v33 = vld [vmem:[%s12879_s28 + $0x5f28] sm:$0xff] }
 0x145   : > { %2736 = vst [vmem:[%s12887_s29 + $0x12e8] sm:$0xff] %v2735_v29  ;;  %2738 = vst [vmem:[%s12887_s29 + $0x12f0] sm:$0xff] %v2737_v30  ;;  %v2745_v34 = vld [vmem:[%s12879_s28 + $0x5f50] sm:$0xff]  ;;  %v2747_v35 = vld [vmem:[%s12879_s28 + $0x5f78] sm:$0xff] }
 0x146   : > { %2740 = vst [vmem:[%s12887_s29 + $0x12f8] sm:$0xff] %v2739_v31  ;;  %2742 = vst [vmem:[%s12887_s29 + $0x1300] sm:$0xff] %v2741_v32  ;;  %v2749_v36 = vld [vmem:[%s12879_s28 + $0x5fa0] sm:$0xff]  ;;  %v2751_v37 = vld [vmem:[%s12879_s28 + $0x5fc8] sm:$0xff] }
 0x147   : > { %2744 = vst [vmem:[%s12887_s29 + $0x1308] sm:$0xff] %v2743_v33  ;;  %2746 = vst [vmem:[%s12887_s29 + $0x1310] sm:$0xff] %v2745_v34  ;;  %v2753_v38 = vld [vmem:[%s12879_s28 + $0x5ff0] sm:$0xff]  ;;  %v2755_v39 = vld [vmem:[%s12879_s28 + $0x6018] sm:$0xff] }
 0x148   : > { %2748 = vst [vmem:[%s12887_s29 + $0x1318] sm:$0xff] %v2747_v35  ;;  %2750 = vst [vmem:[%s12887_s29 + $0x1320] sm:$0xff] %v2749_v36  ;;  %v2757_v40 = vld [vmem:[%s12879_s28 + $0x6040] sm:$0xff]  ;;  %v2759_v41 = vld [vmem:[%s12879_s28 + $0x6068] sm:$0xff] }
 0x149   : > { %2752 = vst [vmem:[%s12887_s29 + $0x1328] sm:$0xff] %v2751_v37  ;;  %2754 = vst [vmem:[%s12887_s29 + $0x1330] sm:$0xff] %v2753_v38  ;;  %v2761_v42 = vld [vmem:[%s12879_s28 + $0x6090] sm:$0xff]  ;;  %v2763_v43 = vld [vmem:[%s12879_s28 + $0x60b8] sm:$0xff] }
 0x14a   : > { %2756 = vst [vmem:[%s12887_s29 + $0x1338] sm:$0xff] %v2755_v39  ;;  %2758 = vst [vmem:[%s12887_s29 + $0x1340] sm:$0xff] %v2757_v40  ;;  %v2765_v44 = vld [vmem:[%s12879_s28 + $0x60e0] sm:$0xff]  ;;  %v2767_v45 = vld [vmem:[%s12879_s28 + $0x6108] sm:$0xff] }
 0x14b   : > { %2760 = vst [vmem:[%s12887_s29 + $0x1348] sm:$0xff] %v2759_v41  ;;  %2762 = vst [vmem:[%s12887_s29 + $0x1350] sm:$0xff] %v2761_v42  ;;  %v2769_v46 = vld [vmem:[%s12879_s28 + $0x6130] sm:$0xff]  ;;  %v2771_v47 = vld [vmem:[%s12879_s28 + $0x6158] sm:$0xff] }
 0x14c   : > { %2764 = vst [vmem:[%s12887_s29 + $0x1358] sm:$0xff] %v2763_v43  ;;  %2766 = vst [vmem:[%s12887_s29 + $0x1360] sm:$0xff] %v2765_v44  ;;  %v2773_v48 = vld [vmem:[%s12879_s28 + $0x6180] sm:$0xff]  ;;  %v2775_v49 = vld [vmem:[%s12879_s28 + $0x61a8] sm:$0xff] }
 0x14d   : > { %2768 = vst [vmem:[%s12887_s29 + $0x1368] sm:$0xff] %v2767_v45  ;;  %2770 = vst [vmem:[%s12887_s29 + $0x1370] sm:$0xff] %v2769_v46  ;;  %v2777_v50 = vld [vmem:[%s12879_s28 + $0x61d0] sm:$0xff]  ;;  %v2779_v51 = vld [vmem:[%s12879_s28 + $0x61f8] sm:$0xff] }
 0x14e   : > { %2772 = vst [vmem:[%s12887_s29 + $0x1378] sm:$0xff] %v2771_v47  ;;  %2774 = vst [vmem:[%s12887_s29 + $0x1380] sm:$0xff] %v2773_v48  ;;  %v2781_v52 = vld [vmem:[%s12879_s28 + $0x6220] sm:$0xff]  ;;  %v2783_v53 = vld [vmem:[%s12879_s28 + $0x6248] sm:$0xff] }
 0x14f   : > { %2776 = vst [vmem:[%s12887_s29 + $0x1388] sm:$0xff] %v2775_v49  ;;  %2778 = vst [vmem:[%s12887_s29 + $0x1390] sm:$0xff] %v2777_v50  ;;  %v2785_v54 = vld [vmem:[%s12879_s28 + $0x6270] sm:$0xff]  ;;  %v2787_v55 = vld [vmem:[%s12879_s28 + $0x6298] sm:$0xff] }
 0x150   : > { %2780 = vst [vmem:[%s12887_s29 + $0x1398] sm:$0xff] %v2779_v51  ;;  %2782 = vst [vmem:[%s12887_s29 + $0x13a0] sm:$0xff] %v2781_v52  ;;  %v2789_v56 = vld [vmem:[%s12879_s28 + $0x62c0] sm:$0xff]  ;;  %v2791_v57 = vld [vmem:[%s12879_s28 + $0x62e8] sm:$0xff] }
 0x151   : > { %2784 = vst [vmem:[%s12887_s29 + $0x13a8] sm:$0xff] %v2783_v53  ;;  %2786 = vst [vmem:[%s12887_s29 + $0x13b0] sm:$0xff] %v2785_v54  ;;  %v2793_v58 = vld [vmem:[%s12879_s28 + $0x6310] sm:$0xff]  ;;  %v2795_v59 = vld [vmem:[%s12879_s28 + $0x6338] sm:$0xff] }
 0x152   : > { %2788 = vst [vmem:[%s12887_s29 + $0x13b8] sm:$0xff] %v2787_v55  ;;  %2790 = vst [vmem:[%s12887_s29 + $0x13c0] sm:$0xff] %v2789_v56  ;;  %v2797_v60 = vld [vmem:[%s12879_s28 + $0x6360] sm:$0xff]  ;;  %v2799_v61 = vld [vmem:[%s12879_s28 + $0x6388] sm:$0xff] }
 0x153   : > { %2792 = vst [vmem:[%s12887_s29 + $0x13c8] sm:$0xff] %v2791_v57  ;;  %2794 = vst [vmem:[%s12887_s29 + $0x13d0] sm:$0xff] %v2793_v58  ;;  %v2801_v62 = vld [vmem:[%s12879_s28 + $0x63b0] sm:$0xff]  ;;  %v2803_v63 = vld [vmem:[%s12879_s28 + $0x63d8] sm:$0xff] }
 0x154   : > { %2796 = vst [vmem:[%s12887_s29 + $0x13d8] sm:$0xff] %v2795_v59  ;;  %2798 = vst [vmem:[%s12887_s29 + $0x13e0] sm:$0xff] %v2797_v60  ;;  %v2805_v0 = vld [vmem:[%s12879_s28 + $0x6400] sm:$0xff]  ;;  %v2807_v1 = vld [vmem:[%s12879_s28 + $0x6428] sm:$0xff] }
 0x155   : > { %2800 = vst [vmem:[%s12887_s29 + $0x13e8] sm:$0xff] %v2799_v61  ;;  %2802 = vst [vmem:[%s12887_s29 + $0x13f0] sm:$0xff] %v2801_v62  ;;  %v2809_v2 = vld [vmem:[%s12879_s28 + $0x6450] sm:$0xff]  ;;  %v2811_v3 = vld [vmem:[%s12879_s28 + $0x6478] sm:$0xff] }
 0x156   : > { %2804 = vst [vmem:[%s12887_s29 + $0x13f8] sm:$0xff] %v2803_v63  ;;  %2806 = vst [vmem:[%s12887_s29 + $0x1400] sm:$0xff] %v2805_v0  ;;  %v2813_v4 = vld [vmem:[%s12879_s28 + $0x64a0] sm:$0xff]  ;;  %v2815_v5 = vld [vmem:[%s12879_s28 + $0x64c8] sm:$0xff] }
 0x157   : > { %2808 = vst [vmem:[%s12887_s29 + $0x1408] sm:$0xff] %v2807_v1  ;;  %2810 = vst [vmem:[%s12887_s29 + $0x1410] sm:$0xff] %v2809_v2  ;;  %v2817_v6 = vld [vmem:[%s12879_s28 + $0x64f0] sm:$0xff]  ;;  %v2819_v7 = vld [vmem:[%s12879_s28 + $0x6518] sm:$0xff] }
 0x158   : > { %2812 = vst [vmem:[%s12887_s29 + $0x1418] sm:$0xff] %v2811_v3  ;;  %2814 = vst [vmem:[%s12887_s29 + $0x1420] sm:$0xff] %v2813_v4  ;;  %v2821_v8 = vld [vmem:[%s12879_s28 + $0x6540] sm:$0xff]  ;;  %v2823_v9 = vld [vmem:[%s12879_s28 + $0x6568] sm:$0xff] }
 0x159   : > { %2816 = vst [vmem:[%s12887_s29 + $0x1428] sm:$0xff] %v2815_v5  ;;  %2818 = vst [vmem:[%s12887_s29 + $0x1430] sm:$0xff] %v2817_v6  ;;  %v2825_v10 = vld [vmem:[%s12879_s28 + $0x6590] sm:$0xff]  ;;  %v2827_v11 = vld [vmem:[%s12879_s28 + $0x65b8] sm:$0xff] }
 0x15a   : > { %2820 = vst [vmem:[%s12887_s29 + $0x1438] sm:$0xff] %v2819_v7  ;;  %2822 = vst [vmem:[%s12887_s29 + $0x1440] sm:$0xff] %v2821_v8  ;;  %v2829_v12 = vld [vmem:[%s12879_s28 + $0x65e0] sm:$0xff]  ;;  %v2831_v13 = vld [vmem:[%s12879_s28 + $0x6608] sm:$0xff] }
 0x15b   : > { %2824 = vst [vmem:[%s12887_s29 + $0x1448] sm:$0xff] %v2823_v9  ;;  %2826 = vst [vmem:[%s12887_s29 + $0x1450] sm:$0xff] %v2825_v10  ;;  %v2833_v14 = vld [vmem:[%s12879_s28 + $0x6630] sm:$0xff]  ;;  %v2835_v15 = vld [vmem:[%s12879_s28 + $0x6658] sm:$0xff] }
 0x15c   : > { %2828 = vst [vmem:[%s12887_s29 + $0x1458] sm:$0xff] %v2827_v11  ;;  %2830 = vst [vmem:[%s12887_s29 + $0x1460] sm:$0xff] %v2829_v12 }
 0x15d   : > { %2832 = vst [vmem:[%s12887_s29 + $0x1468] sm:$0xff] %v2831_v13  ;;  %2834 = vst [vmem:[%s12887_s29 + $0x1470] sm:$0xff] %v2833_v14 }
 0x15e   : > { %2836 = vst [vmem:[%s12887_s29 + $0x1478] sm:$0xff] %v2835_v15 }
 0x15f PF: > { %p10891_p8 = scmp.ge.s32.totalorder %s12808_s16, 1  ;;  %p5509_p9 = scmp.lt.s32.totalorder %s12808_s16, 6 }
 0x161   : > { %p5510_p10 = pnand %p10891_p8, %p5509_p9 }
 0x162   : > { %s5516_s30 = sand.u32 (!%p5510_p10), 1, %s12792_s12   ;;  %v11823_v16 = vld [vmem:[%s15008_s0 + $0x4] ss:$164 sps:$4 sm:$0xff] (!%p5510_p10)   ;;  %v11829_v17 = vld [vmem:[%s15008_s0 + $0x54] ss:$164 sps:$4 sm:$0xff] (!%p5510_p10)   ;;  %s10893_s28 = sshll.u32 (!%p5510_p10), %s12800_s14, 1 }
 0x163   : > { %5513 = sbr.rel (%p5510_p10) target bundleno = 1265 (0x4f1), region = 80  ;;  %9802 = vmatprep.mubr.bf16.mxu1 (!%p5510_p10), %v11823_v16  ;;  %10232 = vmatprep.mubr.bf16.mxu0 (!%p5510_p10), %v11829_v17  ;;  %p5567_p11 = scmp.lt.s32.totalorder (!%p5510_p10), %s10893_s28, 9 }
 0x164   : > { %s11683_s4 = smul.u32 (!%p5510_p10), 5248, %s5516_s30  ;;  %s10892_s5 = sshll.u32 (!%p5510_p10), %s5516_s30, 4 }
 0x165   : > { %s5551_s6 = scalar_lea.vmem (!%p5510_p10), [#allocation4], %s10892_s5 }
 0x166   : > { %s14206_s9 = scalar_lea.vmem (!%p5510_p10), [#allocation3], %s11683_s4 }
 0x167   : > { %v11725_v18 = vld [vmem:[%s14206_s9 + $0x4] ss:$8 sps:$4 sm:$0xff] (!%p5510_p10)   ;;  %v11729_v20 = vld [vmem:[%s14206_s9] ss:$8 sps:$4 sm:$0xff] (!%p5510_p10)   ;;  %v11731_v22 = vld [vmem:[%s14206_s9 + $0x14] ss:$8 sps:$4 sm:$0xff] (!%p5510_p10)  }
 0x168   : > { %v11727_v19 = vld [vmem:[%s14206_s9 + $0xa04] ss:$8 sps:$4 sm:$0xff] (!%p5510_p10)   ;;  %9770 = vmatprep.subr.bf16.mxu1 (!%p5510_p10), %v11725_v18  ;;  %v11730_v21 = vld [vmem:[%s14206_s9 + $0xa00] ss:$8 sps:$4 sm:$0xff] (!%p5510_p10)   ;;  %v11733_v23 = vld [vmem:[%s14206_s9 + $0xa14] ss:$8 sps:$4 sm:$0xff] (!%p5510_p10)  }
 0x169   : > { %10200 = vmatprep.subr.bf16.mxu0 (!%p5510_p10), %v11727_v19  ;;  %9771 = vmatpush1.bf16.msra.mxu1 (!%p5510_p10), %v11729_v20  ;;  %v11735_v24 = vld [vmem:[%s14206_s9 + $0x10] ss:$8 sps:$4 sm:$0xff] (!%p5510_p10)   ;;  %v11737_v26 = vld [vmem:[%s14206_s9 + $0x24] ss:$8 sps:$4 sm:$0xff] (!%p5510_p10)   ;;  %v11741_v28 = vld [vmem:[%s14206_s9 + $0x20] ss:$8 sps:$4 sm:$0xff] (!%p5510_p10)  }
 0x16a   : > { %10201 = vmatpush1.bf16.msra.mxu0 %v11730_v21  ;;  %9772 = vmatprep.subr.bf16.mxu1 %v11731_v22  ;;  %v11736_v25 = vld [vmem:[%s14206_s9 + $0xa10] ss:$8 sps:$4 sm:$0xff]   ;;  %v11739_v27 = vld [vmem:[%s14206_s9 + $0xa24] ss:$8 sps:$4 sm:$0xff]   ;;  %v11742_v29 = vld [vmem:[%s14206_s9 + $0xa20] ss:$8 sps:$4 sm:$0xff]  }
 0x16b   : > { %10202 = vmatprep.subr.bf16.mxu0 %v11733_v23  ;;  %v11743_v30 = vld [vmem:[%s14206_s9 + $0x34] ss:$8 sps:$4 sm:$0xff]   ;;  %v11747_v32 = vld [vmem:[%s14206_s9 + $0x30] ss:$8 sps:$4 sm:$0xff]   ;;  %v11749_v34 = vld [vmem:[%s14206_s9 + $0x44] ss:$8 sps:$4 sm:$0xff]  }
 0x16c   : > { %v11745_v31 = vld [vmem:[%s14206_s9 + $0xa34] ss:$8 sps:$4 sm:$0xff]   ;;  %v11748_v33 = vld [vmem:[%s14206_s9 + $0xa30] ss:$8 sps:$4 sm:$0xff]   ;;  %v11751_v35 = vld [vmem:[%s14206_s9 + $0xa44] ss:$8 sps:$4 sm:$0xff]  }
 0x16d   : > { %9773 = vmatpush1.bf16.msra.mxu1 %v11735_v24  ;;  %v11753_v36 = vld [vmem:[%s14206_s9 + $0x40] ss:$8 sps:$4 sm:$0xff]   ;;  %v11755_v38 = vld [vmem:[%s14206_s9 + $0x54] ss:$8 sps:$4 sm:$0xff]   ;;  %v11759_v40 = vld [vmem:[%s14206_s9 + $0x50] ss:$8 sps:$4 sm:$0xff]  }
 0x16e   : > { %10203 = vmatpush1.bf16.msra.mxu0 %v11736_v25  ;;  %9774 = vmatprep.subr.bf16.mxu1 %v11737_v26  ;;  %v11754_v37 = vld [vmem:[%s14206_s9 + $0xa40] ss:$8 sps:$4 sm:$0xff]   ;;  %v11757_v39 = vld [vmem:[%s14206_s9 + $0xa54] ss:$8 sps:$4 sm:$0xff]   ;;  %v11760_v41 = vld [vmem:[%s14206_s9 + $0xa50] ss:$8 sps:$4 sm:$0xff]  }
 0x16f   : > { %10204 = vmatprep.subr.bf16.mxu0 %v11739_v27  ;;  %v11761_v42 = vld [vmem:[%s14206_s9 + $0x64] ss:$8 sps:$4 sm:$0xff]   ;;  %v11765_v44 = vld [vmem:[%s14206_s9 + $0x60] ss:$8 sps:$4 sm:$0xff]   ;;  %v11767_v46 = vld [vmem:[%s14206_s9 + $0x74] ss:$8 sps:$4 sm:$0xff]  }
 0x170   : > { %v11763_v43 = vld [vmem:[%s14206_s9 + $0xa64] ss:$8 sps:$4 sm:$0xff]   ;;  %v11766_v45 = vld [vmem:[%s14206_s9 + $0xa60] ss:$8 sps:$4 sm:$0xff]   ;;  %v11769_v47 = vld [vmem:[%s14206_s9 + $0xa74] ss:$8 sps:$4 sm:$0xff]  }
 0x171   : > { %9775 = vmatpush1.bf16.msra.mxu1 %v11741_v28  ;;  %v11771_v48 = vld [vmem:[%s14206_s9 + $0x70] ss:$8 sps:$4 sm:$0xff]   ;;  %v11773_v50 = vld [vmem:[%s14206_s9 + $0x84] ss:$8 sps:$4 sm:$0xff]   ;;  %v11777_v52 = vld [vmem:[%s14206_s9 + $0x80] ss:$8 sps:$4 sm:$0xff]  }
 0x172   : > { %10205 = vmatpush1.bf16.msra.mxu0 %v11742_v29  ;;  %9776 = vmatprep.subr.bf16.mxu1 %v11743_v30  ;;  %v11772_v49 = vld [vmem:[%s14206_s9 + $0xa70] ss:$8 sps:$4 sm:$0xff]   ;;  %v11775_v51 = vld [vmem:[%s14206_s9 + $0xa84] ss:$8 sps:$4 sm:$0xff]   ;;  %v11778_v53 = vld [vmem:[%s14206_s9 + $0xa80] ss:$8 sps:$4 sm:$0xff]  }
 0x173   : > { %10206 = vmatprep.subr.bf16.mxu0 %v11745_v31  ;;  %v11779_v54 = vld [vmem:[%s14206_s9 + $0x94] ss:$8 sps:$4 sm:$0xff]   ;;  %v11783_v56 = vld [vmem:[%s14206_s9 + $0x90] ss:$8 sps:$4 sm:$0xff]   ;;  %v11785_v58 = vld [vmem:[%s14206_s9 + $0xa4] ss:$8 sps:$4 sm:$0xff]  }
 0x174   : > { %v11781_v55 = vld [vmem:[%s14206_s9 + $0xa94] ss:$8 sps:$4 sm:$0xff]   ;;  %v11784_v57 = vld [vmem:[%s14206_s9 + $0xa90] ss:$8 sps:$4 sm:$0xff]   ;;  %v11787_v59 = vld [vmem:[%s14206_s9 + $0xaa4] ss:$8 sps:$4 sm:$0xff]  }
 0x175   : > { %9777 = vmatpush1.bf16.msra.mxu1 %v11747_v32  ;;  %v11789_v60 = vld [vmem:[%s14206_s9 + $0xa0] ss:$8 sps:$4 sm:$0xff]   ;;  %v11791_v62 = vld [vmem:[%s14206_s9 + $0xb4] ss:$8 sps:$4 sm:$0xff]   ;;  %v11795_v0 = vld [vmem:[%s14206_s9 + $0xb0] ss:$8 sps:$4 sm:$0xff]  }
 0x176   : > { %10207 = vmatpush1.bf16.msra.mxu0 %v11748_v33  ;;  %9778 = vmatprep.subr.bf16.mxu1 %v11749_v34  ;;  %v11790_v61 = vld [vmem:[%s14206_s9 + $0xaa0] ss:$8 sps:$4 sm:$0xff]   ;;  %v11793_v63 = vld [vmem:[%s14206_s9 + $0xab4] ss:$8 sps:$4 sm:$0xff]   ;;  %v11796_v1 = vld [vmem:[%s14206_s9 + $0xab0] ss:$8 sps:$4 sm:$0xff]  }
 0x177   : > { %10208 = vmatprep.subr.bf16.mxu0 %v11751_v35  ;;  %v11797_v2 = vld [vmem:[%s14206_s9 + $0xc4] ss:$8 sps:$4 sm:$0xff]   ;;  %v11801_v4 = vld [vmem:[%s14206_s9 + $0xc0] ss:$8 sps:$4 sm:$0xff]   ;;  %v11803_v6 = vld [vmem:[%s14206_s9 + $0xd4] ss:$8 sps:$4 sm:$0xff]  }
 0x178   : > { %v11799_v3 = vld [vmem:[%s14206_s9 + $0xac4] ss:$8 sps:$4 sm:$0xff]   ;;  %v11802_v5 = vld [vmem:[%s14206_s9 + $0xac0] ss:$8 sps:$4 sm:$0xff]   ;;  %v11805_v7 = vld [vmem:[%s14206_s9 + $0xad4] ss:$8 sps:$4 sm:$0xff]  }
 0x179   : > { %9779 = vmatpush1.bf16.msra.mxu1 %v11753_v36  ;;  %v11807_v8 = vld [vmem:[%s14206_s9 + $0xd0] ss:$8 sps:$4 sm:$0xff]   ;;  %v11809_v10 = vld [vmem:[%s14206_s9 + $0xe4] ss:$8 sps:$4 sm:$0xff]   ;;  %v11813_v12 = vld [vmem:[%s14206_s9 + $0xe0] ss:$8 sps:$4 sm:$0xff]  }
 0x17a   : > { %10209 = vmatpush1.bf16.msra.mxu0 %v11754_v37  ;;  %9780 = vmatprep.subr.bf16.mxu1 %v11755_v38  ;;  %v11808_v9 = vld [vmem:[%s14206_s9 + $0xad0] ss:$8 sps:$4 sm:$0xff]   ;;  %v11811_v11 = vld [vmem:[%s14206_s9 + $0xae4] ss:$8 sps:$4 sm:$0xff]   ;;  %v11814_v13 = vld [vmem:[%s14206_s9 + $0xae0] ss:$8 sps:$4 sm:$0xff]  }
 0x17b   : > { %10210 = vmatprep.subr.bf16.mxu0 %v11757_v39  ;;  %v11815_v14 = vld [vmem:[%s14206_s9 + $0xf4] ss:$8 sps:$4 sm:$0xff]   ;;  %v11819_v16 = vld [vmem:[%s14206_s9 + $0xf0] ss:$8 sps:$4 sm:$0xff]   ;;  %v11826_v18 = vld [vmem:[%s14206_s9 + $0x104] ss:$8 sps:$4 sm:$0xff]  }
 0x17c   : > { %v11817_v15 = vld [vmem:[%s14206_s9 + $0xaf4] ss:$8 sps:$4 sm:$0xff]   ;;  %v11820_v17 = vld [vmem:[%s14206_s9 + $0xaf0] ss:$8 sps:$4 sm:$0xff]   ;;  %v11832_v19 = vld [vmem:[%s14206_s9 + $0xb04] ss:$8 sps:$4 sm:$0xff]  }
 0x17d   : > { %9781 = vmatpush1.bf16.msra.mxu1 %v11759_v40  ;;  %v11821_v20 = vld [vmem:[%s15008_s0] ss:$164 sps:$4 sm:$0xff]   ;;  %v11827_v21 = vld [vmem:[%s15008_s0 + $0x50] ss:$164 sps:$4 sm:$0xff]   ;;  %s15020_s28 = smov (!%p5567_p11, %s10893_s28), 9  ;;  %s11601_s7 = sshll.u32 (%p12866_p6), %s12800_s14, 3 }
 0x17e   : > { %10211 = vmatpush1.bf16.msra.mxu0 %v11760_v41  ;;  %9782 = vmatprep.subr.bf16.mxu1 %v11761_v42  ;;  %v11824_v22 = vld [vmem:[%s14206_s9 + $0x100] ss:$8 sps:$4 sm:$0xff]   ;;  %v11835_v24 = vld [vmem:[%s14206_s9 + $0x114] ss:$8 sps:$4 sm:$0xff]   ;;  %v11833_v26 = vld [vmem:[%s14206_s9 + $0x110] ss:$8 sps:$4 sm:$0xff]   ;;  %s10734_s8 = scalar_lea.vmem (%p12866_p6), %s15011_s3, %s11601_s7 }
 0x17f   : > { %10212 = vmatprep.subr.bf16.mxu0 %v11763_v43  ;;  %v11830_v23 = vld [vmem:[%s14206_s9 + $0xb00] ss:$8 sps:$4 sm:$0xff]   ;;  %v11838_v25 = vld [vmem:[%s14206_s9 + $0xb14] ss:$8 sps:$4 sm:$0xff]   ;;  %v11836_v27 = vld [vmem:[%s14206_s9 + $0xb10] ss:$8 sps:$4 sm:$0xff]  }
 0x180   : > { %v11841_v28 = vld [vmem:[%s14206_s9 + $0x124] ss:$8 sps:$4 sm:$0xff]   ;;  %v11839_v30 = vld [vmem:[%s14206_s9 + $0x120] ss:$8 sps:$4 sm:$0xff]   ;;  %v11847_v32 = vld [vmem:[%s14206_s9 + $0x134] ss:$8 sps:$4 sm:$0xff]  }
 0x181   : > { %9783 = vmatpush1.bf16.msra.mxu1 %v11765_v44  ;;  %v11844_v29 = vld [vmem:[%s14206_s9 + $0xb24] ss:$8 sps:$4 sm:$0xff]   ;;  %v11842_v31 = vld [vmem:[%s14206_s9 + $0xb20] ss:$8 sps:$4 sm:$0xff]   ;;  %v11850_v33 = vld [vmem:[%s14206_s9 + $0xb34] ss:$8 sps:$4 sm:$0xff]  }
 0x182   : > { %10213 = vmatpush1.bf16.msra.mxu0 %v11766_v45  ;;  %9784 = vmatprep.subr.bf16.mxu1 %v11767_v46  ;;  %v11845_v34 = vld [vmem:[%s14206_s9 + $0x130] ss:$8 sps:$4 sm:$0xff]   ;;  %v11853_v36 = vld [vmem:[%s14206_s9 + $0x144] ss:$8 sps:$4 sm:$0xff]   ;;  %v11851_v38 = vld [vmem:[%s14206_s9 + $0x140] ss:$8 sps:$4 sm:$0xff]  }
 0x183   : > { %10214 = vmatprep.subr.bf16.mxu0 %v11769_v47  ;;  %v11848_v35 = vld [vmem:[%s14206_s9 + $0xb30] ss:$8 sps:$4 sm:$0xff]   ;;  %v11856_v37 = vld [vmem:[%s14206_s9 + $0xb44] ss:$8 sps:$4 sm:$0xff]   ;;  %v11854_v39 = vld [vmem:[%s14206_s9 + $0xb40] ss:$8 sps:$4 sm:$0xff]  }
 0x184   : > { %v11859_v40 = vld [vmem:[%s14206_s9 + $0x154] ss:$8 sps:$4 sm:$0xff]   ;;  %v11857_v42 = vld [vmem:[%s14206_s9 + $0x150] ss:$8 sps:$4 sm:$0xff]   ;;  %v11865_v44 = vld [vmem:[%s14206_s9 + $0x164] ss:$8 sps:$4 sm:$0xff]  }
 0x185   : > { %9785 = vmatpush1.bf16.msra.mxu1 %v11771_v48  ;;  %v11862_v41 = vld [vmem:[%s14206_s9 + $0xb54] ss:$8 sps:$4 sm:$0xff]   ;;  %v11860_v43 = vld [vmem:[%s14206_s9 + $0xb50] ss:$8 sps:$4 sm:$0xff]   ;;  %v11868_v45 = vld [vmem:[%s14206_s9 + $0xb64] ss:$8 sps:$4 sm:$0xff]  }
 0x186   : > { %10215 = vmatpush1.bf16.msra.mxu0 %v11772_v49  ;;  %9786 = vmatprep.subr.bf16.mxu1 %v11773_v50  ;;  %v11925_v46 = vld [vmem:[%s15008_s0 + $0xc] ss:$164 sps:$4 sm:$0xff]   ;;  %v11863_v47 = vld [vmem:[%s14206_s9 + $0x160] ss:$8 sps:$4 sm:$0xff]   ;;  %v11871_v50 = vld [vmem:[%s14206_s9 + $0x174] ss:$8 sps:$4 sm:$0xff]  }
 0x187   : > { %10216 = vmatprep.subr.bf16.mxu0 %v11775_v51  ;;  %v11866_v48 = vld [vmem:[%s14206_s9 + $0xb60] ss:$8 sps:$4 sm:$0xff]   ;;  %v11874_v51 = vld [vmem:[%s14206_s9 + $0xb74] ss:$8 sps:$4 sm:$0xff]  }
 0x188   : > { %v11931_v49 = vld [vmem:[%s15008_s0 + $0x5c] ss:$164 sps:$4 sm:$0xff]  }
 0x189   : > { %9787 = vmatpush1.bf16.msra.mxu1 %v11777_v52  ;;  %v11869_v52 = vld [vmem:[%s14206_s9 + $0x170] ss:$8 sps:$4 sm:$0xff]  }
 0x18a   : > { %10217 = vmatpush1.bf16.msra.mxu0 %v11778_v53  ;;  %9788 = vmatprep.subr.bf16.mxu1 %v11779_v54  ;;  %v11872_v53 = vld [vmem:[%s14206_s9 + $0xb70] ss:$8 sps:$4 sm:$0xff]   ;;  %v11877_v54 = vld [vmem:[%s14206_s9 + $0x184] ss:$8 sps:$4 sm:$0xff]  }
 0x18b   : > { %10218 = vmatprep.subr.bf16.mxu0 %v11781_v55  ;;  %v11880_v55 = vld [vmem:[%s14206_s9 + $0xb84] ss:$8 sps:$4 sm:$0xff]  }
 0x18d   : > { %9789 = vmatpush1.bf16.msra.mxu1 %v11783_v56  ;;  %v11875_v56 = vld [vmem:[%s14206_s9 + $0x180] ss:$8 sps:$4 sm:$0xff]  }
 0x18e   : > { %10219 = vmatpush1.bf16.msra.mxu0 %v11784_v57  ;;  %9790 = vmatprep.subr.bf16.mxu1 %v11785_v58  ;;  %v11878_v57 = vld [vmem:[%s14206_s9 + $0xb80] ss:$8 sps:$4 sm:$0xff]   ;;  %v11883_v58 = vld [vmem:[%s14206_s9 + $0x194] ss:$8 sps:$4 sm:$0xff]  }
 0x18f   : > { %10220 = vmatprep.subr.bf16.mxu0 %v11787_v59  ;;  %v11886_v59 = vld [vmem:[%s14206_s9 + $0xb94] ss:$8 sps:$4 sm:$0xff]  }
 0x191   : > { %9791 = vmatpush1.bf16.msra.mxu1 %v11789_v60  ;;  %v11881_v60 = vld [vmem:[%s14206_s9 + $0x190] ss:$8 sps:$4 sm:$0xff]  }
 0x192   : > { %10221 = vmatpush1.bf16.msra.mxu0 %v11790_v61  ;;  %9792 = vmatprep.subr.bf16.mxu1 %v11791_v62  ;;  %v11884_v61 = vld [vmem:[%s14206_s9 + $0xb90] ss:$8 sps:$4 sm:$0xff]   ;;  %v11889_v62 = vld [vmem:[%s14206_s9 + $0x1a4] ss:$8 sps:$4 sm:$0xff]  }
 0x193   : > { %10222 = vmatprep.subr.bf16.mxu0 %v11793_v63  ;;  %v11892_v63 = vld [vmem:[%s14206_s9 + $0xba4] ss:$8 sps:$4 sm:$0xff]  }
 0x195   : > { %9793 = vmatpush1.bf16.msra.mxu1 %v11795_v0  ;;  %v11887_v0 = vld [vmem:[%s14206_s9 + $0x1a0] ss:$8 sps:$4 sm:$0xff]  }
 0x196   : > { %10223 = vmatpush1.bf16.msra.mxu0 %v11796_v1  ;;  %9794 = vmatprep.subr.bf16.mxu1 %v11797_v2  ;;  %v11890_v1 = vld [vmem:[%s14206_s9 + $0xba0] ss:$8 sps:$4 sm:$0xff]   ;;  %v11895_v2 = vld [vmem:[%s14206_s9 + $0x1b4] ss:$8 sps:$4 sm:$0xff]  }
 0x197   : > { %10224 = vmatprep.subr.bf16.mxu0 %v11799_v3  ;;  %v11898_v3 = vld [vmem:[%s14206_s9 + $0xbb4] ss:$8 sps:$4 sm:$0xff]  }
 0x199   : > { %9795 = vmatpush1.bf16.msra.mxu1 %v11801_v4  ;;  %v11893_v4 = vld [vmem:[%s14206_s9 + $0x1b0] ss:$8 sps:$4 sm:$0xff]  }
 0x19a   : > { %10225 = vmatpush1.bf16.msra.mxu0 %v11802_v5  ;;  %9796 = vmatprep.subr.bf16.mxu1 %v11803_v6  ;;  %v11896_v5 = vld [vmem:[%s14206_s9 + $0xbb0] ss:$8 sps:$4 sm:$0xff]   ;;  %v11901_v6 = vld [vmem:[%s14206_s9 + $0x1c4] ss:$8 sps:$4 sm:$0xff]  }
 0x19b   : > { %10226 = vmatprep.subr.bf16.mxu0 %v11805_v7  ;;  %v11904_v7 = vld [vmem:[%s14206_s9 + $0xbc4] ss:$8 sps:$4 sm:$0xff]  }
 0x19d   : > { %9797 = vmatpush1.bf16.msra.mxu1 %v11807_v8  ;;  %v11899_v8 = vld [vmem:[%s14206_s9 + $0x1c0] ss:$8 sps:$4 sm:$0xff]  }
 0x19e   : > { %10227 = vmatpush1.bf16.msra.mxu0 %v11808_v9  ;;  %9798 = vmatprep.subr.bf16.mxu1 %v11809_v10  ;;  %v11902_v9 = vld [vmem:[%s14206_s9 + $0xbc0] ss:$8 sps:$4 sm:$0xff]   ;;  %v11907_v10 = vld [vmem:[%s14206_s9 + $0x1d4] ss:$8 sps:$4 sm:$0xff]  }
 0x19f   : > { %10228 = vmatprep.subr.bf16.mxu0 %v11811_v11  ;;  %v11910_v11 = vld [vmem:[%s14206_s9 + $0xbd4] ss:$8 sps:$4 sm:$0xff]  }
 0x1a1   : > { %9799 = vmatpush1.bf16.msra.mxu1 %v11813_v12  ;;  %v11905_v12 = vld [vmem:[%s14206_s9 + $0x1d0] ss:$8 sps:$4 sm:$0xff]  }
 0x1a2   : > { %10229 = vmatpush1.bf16.msra.mxu0 %v11814_v13  ;;  %9800 = vmatprep.subr.bf16.mxu1 %v11815_v14  ;;  %v11908_v13 = vld [vmem:[%s14206_s9 + $0xbd0] ss:$8 sps:$4 sm:$0xff]   ;;  %v11913_v14 = vld [vmem:[%s14206_s9 + $0x1e4] ss:$8 sps:$4 sm:$0xff]  }
 0x1a3   : > { %10230 = vmatprep.subr.bf16.mxu0 %v11817_v15  ;;  %v11916_v15 = vld [vmem:[%s14206_s9 + $0xbe4] ss:$8 sps:$4 sm:$0xff]  }
 0x1a5   : > { %9801 = vmatpush1.bf16.msra.mxu1 %v11819_v16  ;;  %v11911_v16 = vld [vmem:[%s14206_s9 + $0x1e0] ss:$8 sps:$4 sm:$0xff]  }
 0x1a6   : > { %10231 = vmatpush1.bf16.msra.mxu0 %v11820_v17  ;;  %9813 = vmatprep.subr.bf16.mxu1 %v11826_v18  ;;  %v11914_v17 = vld [vmem:[%s14206_s9 + $0xbe0] ss:$8 sps:$4 sm:$0xff]   ;;  %v11919_v18 = vld [vmem:[%s14206_s9 + $0x1f4] ss:$8 sps:$4 sm:$0xff]  }
 0x1a7   : > { %10243 = vmatprep.subr.bf16.mxu0 %v11832_v19  ;;  %v11922_v19 = vld [vmem:[%s14206_s9 + $0xbf4] ss:$8 sps:$4 sm:$0xff]  }
 0x1a8   : > { %9803 = vmatmul.mubr.bf16.vlgmr.msra.gmra.mrb[0].mxu1 %v11821_v20  ;;  %v11917_v20 = vld [vmem:[%s14206_s9 + $0x1f0] ss:$8 sps:$4 sm:$0xff]  }
 0x1a9   : > { %10233 = vmatmul.mubr.bf16.vlgmr.msra.gmra.mrb[0].mxu0 %v11827_v21  ;;  %9814 = vmatpush1.bf16.msra.mxu1 %v11824_v22  ;;  %v11920_v21 = vld [vmem:[%s14206_s9 + $0xbf0] ss:$8 sps:$4 sm:$0xff]   ;;  %v11928_v22 = vld [vmem:[%s14206_s9 + $0x204] ss:$8 sps:$4 sm:$0xff]  }
 0x1aa   : > { %10244 = vmatpush1.bf16.msra.mxu0 %v11830_v23  ;;  %9815 = vmatprep.subr.bf16.mxu1 %v11835_v24  ;;  %v11934_v23 = vld [vmem:[%s14206_s9 + $0xc04] ss:$8 sps:$4 sm:$0xff]  }
 0x1ab   : > { %10245 = vmatprep.subr.bf16.mxu0 %v11838_v25  ;;  %9845 = vmatprep.mubr.bf16.mxu1 %v11925_v46  ;;  %v11923_v24 = vld [vmem:[%s15008_s0 + $0x8] ss:$164 sps:$4 sm:$0xff]   ;;  %v11961_v46 = vld [vmem:[%s14206_s9 + $0x254] ss:$8 sps:$4 sm:$0xff]  }
 0x1ac   : > { %10275 = vmatprep.mubr.bf16.mxu0 %v11931_v49  ;;  %v11926_v25 = vld [vmem:[%s14206_s9 + $0x200] ss:$8 sps:$4 sm:$0xff]   ;;  %v11962_v49 = vld [vmem:[%s14206_s9 + $0xc50] ss:$8 sps:$4 sm:$0xff]  }
 0x1ad   : > { %9816 = vmatpush1.bf16.msra.mxu1 %v11833_v26  ;;  %v11929_v26 = vld [vmem:[%s15008_s0 + $0x58] ss:$164 sps:$4 sm:$0xff]  }
 0x1ae   : > { %10246 = vmatpush1.bf16.msra.mxu0 %v11836_v27  ;;  %9817 = vmatprep.subr.bf16.mxu1 %v11841_v28  ;;  %v11932_v27 = vld [vmem:[%s14206_s9 + $0xc00] ss:$8 sps:$4 sm:$0xff]   ;;  %v11937_v28 = vld [vmem:[%s14206_s9 + $0x214] ss:$8 sps:$4 sm:$0xff]  }
 0x1af   : > { %10247 = vmatprep.subr.bf16.mxu0 %v11844_v29  ;;  %v11940_v29 = vld [vmem:[%s14206_s9 + $0xc14] ss:$8 sps:$4 sm:$0xff]  }
 0x1b1   : > { %9818 = vmatpush1.bf16.msra.mxu1 %v11839_v30  ;;  %v11935_v30 = vld [vmem:[%s14206_s9 + $0x210] ss:$8 sps:$4 sm:$0xff]  }
 0x1b2   : > { %10248 = vmatpush1.bf16.msra.mxu0 %v11842_v31  ;;  %9819 = vmatprep.subr.bf16.mxu1 %v11847_v32  ;;  %v12027_v31 = vld [vmem:[%s15008_s0 + $0x14] ss:$164 sps:$4 sm:$0xff]  }
 0x1b3   : > { %10249 = vmatprep.subr.bf16.mxu0 %v11850_v33  ;;  %v11938_v32 = vld [vmem:[%s14206_s9 + $0xc10] ss:$8 sps:$4 sm:$0xff]   ;;  %v11943_v33 = vld [vmem:[%s14206_s9 + $0x224] ss:$8 sps:$4 sm:$0xff]  }
 0x1b5   : > { %9820 = vmatpush1.bf16.msra.mxu1 %v11845_v34  ;;  %v11946_v34 = vld [vmem:[%s14206_s9 + $0xc24] ss:$8 sps:$4 sm:$0xff]  }
 0x1b6   : > { %10250 = vmatpush1.bf16.msra.mxu0 %v11848_v35  ;;  %9821 = vmatprep.subr.bf16.mxu1 %v11853_v36  ;;  %v12033_v35 = vld [vmem:[%s15008_s0 + $0x64] ss:$164 sps:$4 sm:$0xff]  }
 0x1b7   : > { %10251 = vmatprep.subr.bf16.mxu0 %v11856_v37  ;;  %v11941_v36 = vld [vmem:[%s14206_s9 + $0x220] ss:$8 sps:$4 sm:$0xff]  }
 0x1b8   : > { %v11944_v37 = vld [vmem:[%s14206_s9 + $0xc20] ss:$8 sps:$4 sm:$0xff]  }
 0x1b9   : > { %9822 = vmatpush1.bf16.msra.mxu1 %v11851_v38  ;;  %v11949_v38 = vld [vmem:[%s14206_s9 + $0x234] ss:$8 sps:$4 sm:$0xff]  }
 0x1ba   : > { %10252 = vmatpush1.bf16.msra.mxu0 %v11854_v39  ;;  %9823 = vmatprep.subr.bf16.mxu1 %v11859_v40  ;;  %v11952_v39 = vld [vmem:[%s14206_s9 + $0xc34] ss:$8 sps:$4 sm:$0xff]   ;;  %v11947_v40 = vld [vmem:[%s14206_s9 + $0x230] ss:$8 sps:$4 sm:$0xff]  }
 0x1bb   : > { %10253 = vmatprep.subr.bf16.mxu0 %v11862_v41  ;;  %v11950_v41 = vld [vmem:[%s14206_s9 + $0xc30] ss:$8 sps:$4 sm:$0xff]  }
 0x1bd   : > { %9824 = vmatpush1.bf16.msra.mxu1 %v11857_v42  ;;  %v11955_v42 = vld [vmem:[%s14206_s9 + $0x244] ss:$8 sps:$4 sm:$0xff]  }
 0x1be   : > { %10254 = vmatpush1.bf16.msra.mxu0 %v11860_v43  ;;  %9825 = vmatprep.subr.bf16.mxu1 %v11865_v44  ;;  %v11958_v43 = vld [vmem:[%s14206_s9 + $0xc44] ss:$8 sps:$4 sm:$0xff]   ;;  %v11953_v44 = vld [vmem:[%s14206_s9 + $0x240] ss:$8 sps:$4 sm:$0xff]  }
 0x1bf   : > { %10255 = vmatprep.subr.bf16.mxu0 %v11868_v45  ;;  %v11956_v45 = vld [vmem:[%s14206_s9 + $0xc40] ss:$8 sps:$4 sm:$0xff]  }
 0x1c1   : > { %9826 = vmatpush1.bf16.msra.mxu1 %v11863_v47  ;;  %v11964_v47 = vld [vmem:[%s14206_s9 + $0xc54] ss:$8 sps:$4 sm:$0xff]  }
 0x1c2   : > { %10256 = vmatpush1.bf16.msra.mxu0 %v11866_v48  ;;  %9827 = vmatprep.subr.bf16.mxu1 %v11871_v50  ;;  %v11959_v48 = vld [vmem:[%s14206_s9 + $0x250] ss:$8 sps:$4 sm:$0xff]   ;;  %v11967_v50 = vld [vmem:[%s14206_s9 + $0x264] ss:$8 sps:$4 sm:$0xff]  }
 0x1c3   : > { %10257 = vmatprep.subr.bf16.mxu0 %v11874_v51  ;;  %v11970_v51 = vld [vmem:[%s14206_s9 + $0xc64] ss:$8 sps:$4 sm:$0xff]  }
 0x1c5   : > { %9828 = vmatpush1.bf16.msra.mxu1 %v11869_v52  ;;  %v11965_v52 = vld [vmem:[%s14206_s9 + $0x260] ss:$8 sps:$4 sm:$0xff]  }
 0x1c6   : > { %10258 = vmatpush1.bf16.msra.mxu0 %v11872_v53  ;;  %9829 = vmatprep.subr.bf16.mxu1 %v11877_v54  ;;  %v11968_v53 = vld [vmem:[%s14206_s9 + $0xc60] ss:$8 sps:$4 sm:$0xff]   ;;  %v11973_v54 = vld [vmem:[%s14206_s9 + $0x274] ss:$8 sps:$4 sm:$0xff]  }
 0x1c7   : > { %10259 = vmatprep.subr.bf16.mxu0 %v11880_v55  ;;  %v11976_v55 = vld [vmem:[%s14206_s9 + $0xc74] ss:$8 sps:$4 sm:$0xff]  }
 0x1c9   : > { %9830 = vmatpush1.bf16.msra.mxu1 %v11875_v56  ;;  %v11971_v56 = vld [vmem:[%s14206_s9 + $0x270] ss:$8 sps:$4 sm:$0xff]  }
 0x1ca   : > { %10260 = vmatpush1.bf16.msra.mxu0 %v11878_v57  ;;  %9831 = vmatprep.subr.bf16.mxu1 %v11883_v58  ;;  %v11974_v57 = vld [vmem:[%s14206_s9 + $0xc70] ss:$8 sps:$4 sm:$0xff]   ;;  %v11979_v58 = vld [vmem:[%s14206_s9 + $0x284] ss:$8 sps:$4 sm:$0xff]  }
 0x1cb   : > { %10261 = vmatprep.subr.bf16.mxu0 %v11886_v59  ;;  %v11982_v59 = vld [vmem:[%s14206_s9 + $0xc84] ss:$8 sps:$4 sm:$0xff]  }
 0x1cd   : > { %9832 = vmatpush1.bf16.msra.mxu1 %v11881_v60  ;;  %v11977_v60 = vld [vmem:[%s14206_s9 + $0x280] ss:$8 sps:$4 sm:$0xff]  }
 0x1ce   : > { %10262 = vmatpush1.bf16.msra.mxu0 %v11884_v61  ;;  %9833 = vmatprep.subr.bf16.mxu1 %v11889_v62  ;;  %v11980_v61 = vld [vmem:[%s14206_s9 + $0xc80] ss:$8 sps:$4 sm:$0xff]   ;;  %v11985_v62 = vld [vmem:[%s14206_s9 + $0x294] ss:$8 sps:$4 sm:$0xff]  }
 0x1cf   : > { %10263 = vmatprep.subr.bf16.mxu0 %v11892_v63  ;;  %v11988_v63 = vld [vmem:[%s14206_s9 + $0xc94] ss:$8 sps:$4 sm:$0xff]  }
 0x1d1   : > { %9834 = vmatpush1.bf16.msra.mxu1 %v11887_v0  ;;  %v11983_v0 = vld [vmem:[%s14206_s9 + $0x290] ss:$8 sps:$4 sm:$0xff]  }
 0x1d2   : > { %10264 = vmatpush1.bf16.msra.mxu0 %v11890_v1  ;;  %9835 = vmatprep.subr.bf16.mxu1 %v11895_v2  ;;  %v11986_v1 = vld [vmem:[%s14206_s9 + $0xc90] ss:$8 sps:$4 sm:$0xff]   ;;  %v11991_v2 = vld [vmem:[%s14206_s9 + $0x2a4] ss:$8 sps:$4 sm:$0xff]  }
 0x1d3   : > { %10265 = vmatprep.subr.bf16.mxu0 %v11898_v3  ;;  %v11994_v3 = vld [vmem:[%s14206_s9 + $0xca4] ss:$8 sps:$4 sm:$0xff]  }
 0x1d5   : > { %9836 = vmatpush1.bf16.msra.mxu1 %v11893_v4  ;;  %v11989_v4 = vld [vmem:[%s14206_s9 + $0x2a0] ss:$8 sps:$4 sm:$0xff]  }
 0x1d6   : > { %10266 = vmatpush1.bf16.msra.mxu0 %v11896_v5  ;;  %9837 = vmatprep.subr.bf16.mxu1 %v11901_v6  ;;  %v11992_v5 = vld [vmem:[%s14206_s9 + $0xca0] ss:$8 sps:$4 sm:$0xff]   ;;  %v11997_v6 = vld [vmem:[%s14206_s9 + $0x2b4] ss:$8 sps:$4 sm:$0xff]  }
 0x1d7   : > { %10267 = vmatprep.subr.bf16.mxu0 %v11904_v7  ;;  %v12000_v7 = vld [vmem:[%s14206_s9 + $0xcb4] ss:$8 sps:$4 sm:$0xff]  }
 0x1d9   : > { %9838 = vmatpush1.bf16.msra.mxu1 %v11899_v8  ;;  %v11995_v8 = vld [vmem:[%s14206_s9 + $0x2b0] ss:$8 sps:$4 sm:$0xff]  }
 0x1da   : > { %10268 = vmatpush1.bf16.msra.mxu0 %v11902_v9  ;;  %9839 = vmatprep.subr.bf16.mxu1 %v11907_v10  ;;  %v11998_v9 = vld [vmem:[%s14206_s9 + $0xcb0] ss:$8 sps:$4 sm:$0xff]   ;;  %v12003_v10 = vld [vmem:[%s14206_s9 + $0x2c4] ss:$8 sps:$4 sm:$0xff]  }
 0x1db   : > { %10269 = vmatprep.subr.bf16.mxu0 %v11910_v11  ;;  %v12006_v11 = vld [vmem:[%s14206_s9 + $0xcc4] ss:$8 sps:$4 sm:$0xff]  }
 0x1dd   : > { %9840 = vmatpush1.bf16.msra.mxu1 %v11905_v12  ;;  %v12001_v12 = vld [vmem:[%s14206_s9 + $0x2c0] ss:$8 sps:$4 sm:$0xff]  }
 0x1de   : > { %10270 = vmatpush1.bf16.msra.mxu0 %v11908_v13  ;;  %9841 = vmatprep.subr.bf16.mxu1 %v11913_v14  ;;  %v12004_v13 = vld [vmem:[%s14206_s9 + $0xcc0] ss:$8 sps:$4 sm:$0xff]   ;;  %v12009_v14 = vld [vmem:[%s14206_s9 + $0x2d4] ss:$8 sps:$4 sm:$0xff]  }
 0x1df   : > { %10271 = vmatprep.subr.bf16.mxu0 %v11916_v15  ;;  %v12012_v15 = vld [vmem:[%s14206_s9 + $0xcd4] ss:$8 sps:$4 sm:$0xff]  }
 0x1e1   : > { %9842 = vmatpush1.bf16.msra.mxu1 %v11911_v16  ;;  %v12007_v16 = vld [vmem:[%s14206_s9 + $0x2d0] ss:$8 sps:$4 sm:$0xff]  }
 0x1e2   : > { %10272 = vmatpush1.bf16.msra.mxu0 %v11914_v17  ;;  %9843 = vmatprep.subr.bf16.mxu1 %v11919_v18  ;;  %v12010_v17 = vld [vmem:[%s14206_s9 + $0xcd0] ss:$8 sps:$4 sm:$0xff]   ;;  %v12015_v18 = vld [vmem:[%s14206_s9 + $0x2e4] ss:$8 sps:$4 sm:$0xff]  }
 0x1e3   : > { %10273 = vmatprep.subr.bf16.mxu0 %v11922_v19  ;;  %v12018_v19 = vld [vmem:[%s14206_s9 + $0xce4] ss:$8 sps:$4 sm:$0xff]  }
 0x1e5   : > { %9844 = vmatpush1.bf16.msra.mxu1 %v11917_v20  ;;  %v12013_v20 = vld [vmem:[%s14206_s9 + $0x2e0] ss:$8 sps:$4 sm:$0xff]  }
 0x1e6   : > { %10274 = vmatpush1.bf16.msra.mxu0 %v11920_v21  ;;  %9856 = vmatprep.subr.bf16.mxu1 %v11928_v22  ;;  %v12016_v21 = vld [vmem:[%s14206_s9 + $0xce0] ss:$8 sps:$4 sm:$0xff]   ;;  %v12021_v22 = vld [vmem:[%s14206_s9 + $0x2f4] ss:$8 sps:$4 sm:$0xff]  }
 0x1e7   : > { %10286 = vmatprep.subr.bf16.mxu0 %v11934_v23  ;;  %v12024_v23 = vld [vmem:[%s14206_s9 + $0xcf4] ss:$8 sps:$4 sm:$0xff]  }
 0x1e8   : > { %9846 = vmatmul.mubr.bf16.vlgmr.msra.gmra.mrb[0].mxu1 %v11923_v24  ;;  %v12019_v24 = vld [vmem:[%s14206_s9 + $0x2f0] ss:$8 sps:$4 sm:$0xff]  }
 0x1e9   : > { %10276 = vmatmul.mubr.bf16.vlgmr.msra.gmra.mrb[0].mxu0 %v11929_v26  ;;  %9857 = vmatpush1.bf16.msra.mxu1 %v11926_v25  ;;  %v12022_v25 = vld [vmem:[%s14206_s9 + $0xcf0] ss:$8 sps:$4 sm:$0xff]   ;;  %v12030_v26 = vld [vmem:[%s14206_s9 + $0x304] ss:$8 sps:$4 sm:$0xff]  }
 0x1ea   : > { %10287 = vmatpush1.bf16.msra.mxu0 %v11932_v27  ;;  %9858 = vmatprep.subr.bf16.mxu1 %v11937_v28  ;;  %v12036_v27 = vld [vmem:[%s14206_s9 + $0xd04] ss:$8 sps:$4 sm:$0xff]   ;;  %v12025_v28 = vld [vmem:[%s15008_s0 + $0x10] ss:$164 sps:$4 sm:$0xff]  }
 0x1eb   : > { %10288 = vmatprep.subr.bf16.mxu0 %v11940_v29  ;;  %9888 = vmatprep.mubr.bf16.mxu1 %v12027_v31  ;;  %v12028_v29 = vld [vmem:[%s14206_s9 + $0x300] ss:$8 sps:$4 sm:$0xff]  }
 0x1ec   : > { %10318 = vmatprep.mubr.bf16.mxu0 %v12033_v35  ;;  %v12034_v31 = vld [vmem:[%s14206_s9 + $0xd00] ss:$8 sps:$4 sm:$0xff]   ;;  %v12135_v35 = vld [vmem:[%s15008_s0 + $0x6c] ss:$164 sps:$4 sm:$0xff]  }
 0x1ed   : > { %9859 = vmatpush1.bf16.msra.mxu1 %v11935_v30  ;;  %v12031_v30 = vld [vmem:[%s15008_s0 + $0x60] ss:$164 sps:$4 sm:$0xff]  }
 0x1ee   : > { %10289 = vmatpush1.bf16.msra.mxu0 %v11938_v32  ;;  %9860 = vmatprep.subr.bf16.mxu1 %v11943_v33  ;;  %v12039_v32 = vld [vmem:[%s14206_s9 + $0x314] ss:$8 sps:$4 sm:$0xff]  }
 0x1ef   : > { %10290 = vmatprep.subr.bf16.mxu0 %v11946_v34  ;;  %v12042_v33 = vld [vmem:[%s14206_s9 + $0xd14] ss:$8 sps:$4 sm:$0xff]  }
 0x1f0   : > { %v12129_v34 = vld [vmem:[%s15008_s0 + $0x1c] ss:$164 sps:$4 sm:$0xff]  }
 0x1f1   : > { %9861 = vmatpush1.bf16.msra.mxu1 %v11941_v36  ;;  %v12037_v36 = vld [vmem:[%s14206_s9 + $0x310] ss:$8 sps:$4 sm:$0xff]  }
 0x1f2   : > { %10291 = vmatpush1.bf16.msra.mxu0 %v11944_v37  ;;  %9862 = vmatprep.subr.bf16.mxu1 %v11949_v38  ;;  %v12040_v37 = vld [vmem:[%s14206_s9 + $0xd10] ss:$8 sps:$4 sm:$0xff]   ;;  %v12045_v38 = vld [vmem:[%s14206_s9 + $0x324] ss:$8 sps:$4 sm:$0xff]  }
 0x1f3   : > { %10292 = vmatprep.subr.bf16.mxu0 %v11952_v39  ;;  %v12048_v39 = vld [vmem:[%s14206_s9 + $0xd24] ss:$8 sps:$4 sm:$0xff]  }
 0x1f5   : > { %9863 = vmatpush1.bf16.msra.mxu1 %v11947_v40  ;;  %v12043_v40 = vld [vmem:[%s14206_s9 + $0x320] ss:$8 sps:$4 sm:$0xff]  }
 0x1f6   : > { %10293 = vmatpush1.bf16.msra.mxu0 %v11950_v41  ;;  %9864 = vmatprep.subr.bf16.mxu1 %v11955_v42  ;;  %v12046_v41 = vld [vmem:[%s14206_s9 + $0xd20] ss:$8 sps:$4 sm:$0xff]   ;;  %v12051_v42 = vld [vmem:[%s14206_s9 + $0x334] ss:$8 sps:$4 sm:$0xff]  }
 0x1f7   : > { %10294 = vmatprep.subr.bf16.mxu0 %v11958_v43  ;;  %v12054_v43 = vld [vmem:[%s14206_s9 + $0xd34] ss:$8 sps:$4 sm:$0xff]  }
 0x1f9   : > { %9865 = vmatpush1.bf16.msra.mxu1 %v11953_v44  ;;  %v12049_v44 = vld [vmem:[%s14206_s9 + $0x330] ss:$8 sps:$4 sm:$0xff]  }
 0x1fa   : > { %10295 = vmatpush1.bf16.msra.mxu0 %v11956_v45  ;;  %9866 = vmatprep.subr.bf16.mxu1 %v11961_v46  ;;  %v12052_v45 = vld [vmem:[%s14206_s9 + $0xd30] ss:$8 sps:$4 sm:$0xff]   ;;  %v12057_v46 = vld [vmem:[%s14206_s9 + $0x344] ss:$8 sps:$4 sm:$0xff]  }
 0x1fb   : > { %10296 = vmatprep.subr.bf16.mxu0 %v11964_v47  ;;  %v12060_v47 = vld [vmem:[%s14206_s9 + $0xd44] ss:$8 sps:$4 sm:$0xff]  }
 0x1fd   : > { %9867 = vmatpush1.bf16.msra.mxu1 %v11959_v48  ;;  %v12055_v48 = vld [vmem:[%s14206_s9 + $0x340] ss:$8 sps:$4 sm:$0xff]  }
 0x1fe   : > { %10297 = vmatpush1.bf16.msra.mxu0 %v11962_v49  ;;  %9868 = vmatprep.subr.bf16.mxu1 %v11967_v50  ;;  %v12058_v49 = vld [vmem:[%s14206_s9 + $0xd40] ss:$8 sps:$4 sm:$0xff]   ;;  %v12063_v50 = vld [vmem:[%s14206_s9 + $0x354] ss:$8 sps:$4 sm:$0xff]  }
 0x1ff   : > { %10298 = vmatprep.subr.bf16.mxu0 %v11970_v51  ;;  %v12066_v51 = vld [vmem:[%s14206_s9 + $0xd54] ss:$8 sps:$4 sm:$0xff]  }
 0x201   : > { %9869 = vmatpush1.bf16.msra.mxu1 %v11965_v52  ;;  %v12061_v52 = vld [vmem:[%s14206_s9 + $0x350] ss:$8 sps:$4 sm:$0xff]  }
 0x202   : > { %10299 = vmatpush1.bf16.msra.mxu0 %v11968_v53  ;;  %9870 = vmatprep.subr.bf16.mxu1 %v11973_v54  ;;  %v12064_v53 = vld [vmem:[%s14206_s9 + $0xd50] ss:$8 sps:$4 sm:$0xff]   ;;  %v12069_v54 = vld [vmem:[%s14206_s9 + $0x364] ss:$8 sps:$4 sm:$0xff]  }
 0x203   : > { %10300 = vmatprep.subr.bf16.mxu0 %v11976_v55  ;;  %v12072_v55 = vld [vmem:[%s14206_s9 + $0xd64] ss:$8 sps:$4 sm:$0xff]  }
 0x205   : > { %9871 = vmatpush1.bf16.msra.mxu1 %v11971_v56  ;;  %v12067_v56 = vld [vmem:[%s14206_s9 + $0x360] ss:$8 sps:$4 sm:$0xff]  }
 0x206   : > { %10301 = vmatpush1.bf16.msra.mxu0 %v11974_v57  ;;  %9872 = vmatprep.subr.bf16.mxu1 %v11979_v58  ;;  %v12070_v57 = vld [vmem:[%s14206_s9 + $0xd60] ss:$8 sps:$4 sm:$0xff]   ;;  %v12075_v58 = vld [vmem:[%s14206_s9 + $0x374] ss:$8 sps:$4 sm:$0xff]  }
 0x207   : > { %10302 = vmatprep.subr.bf16.mxu0 %v11982_v59  ;;  %v12078_v59 = vld [vmem:[%s14206_s9 + $0xd74] ss:$8 sps:$4 sm:$0xff]  }
 0x209   : > { %9873 = vmatpush1.bf16.msra.mxu1 %v11977_v60  ;;  %v12073_v60 = vld [vmem:[%s14206_s9 + $0x370] ss:$8 sps:$4 sm:$0xff]  }
 0x20a   : > { %10303 = vmatpush1.bf16.msra.mxu0 %v11980_v61  ;;  %9874 = vmatprep.subr.bf16.mxu1 %v11985_v62  ;;  %v12076_v61 = vld [vmem:[%s14206_s9 + $0xd70] ss:$8 sps:$4 sm:$0xff]   ;;  %v12081_v62 = vld [vmem:[%s14206_s9 + $0x384] ss:$8 sps:$4 sm:$0xff]  }
 0x20b   : > { %10304 = vmatprep.subr.bf16.mxu0 %v11988_v63  ;;  %v12084_v63 = vld [vmem:[%s14206_s9 + $0xd84] ss:$8 sps:$4 sm:$0xff]  }
 0x20d   : > { %9875 = vmatpush1.bf16.msra.mxu1 %v11983_v0  ;;  %v12079_v0 = vld [vmem:[%s14206_s9 + $0x380] ss:$8 sps:$4 sm:$0xff]  }
 0x20e   : > { %10305 = vmatpush1.bf16.msra.mxu0 %v11986_v1  ;;  %9876 = vmatprep.subr.bf16.mxu1 %v11991_v2  ;;  %v12082_v1 = vld [vmem:[%s14206_s9 + $0xd80] ss:$8 sps:$4 sm:$0xff]   ;;  %v12087_v2 = vld [vmem:[%s14206_s9 + $0x394] ss:$8 sps:$4 sm:$0xff]  }
 0x20f   : > { %10306 = vmatprep.subr.bf16.mxu0 %v11994_v3  ;;  %v12090_v3 = vld [vmem:[%s14206_s9 + $0xd94] ss:$8 sps:$4 sm:$0xff]  }
 0x211   : > { %9877 = vmatpush1.bf16.msra.mxu1 %v11989_v4  ;;  %v12085_v4 = vld [vmem:[%s14206_s9 + $0x390] ss:$8 sps:$4 sm:$0xff]  }
 0x212   : > { %10307 = vmatpush1.bf16.msra.mxu0 %v11992_v5  ;;  %9878 = vmatprep.subr.bf16.mxu1 %v11997_v6  ;;  %v12088_v5 = vld [vmem:[%s14206_s9 + $0xd90] ss:$8 sps:$4 sm:$0xff]   ;;  %v12093_v6 = vld [vmem:[%s14206_s9 + $0x3a4] ss:$8 sps:$4 sm:$0xff]  }
 0x213   : > { %10308 = vmatprep.subr.bf16.mxu0 %v12000_v7  ;;  %v12096_v7 = vld [vmem:[%s14206_s9 + $0xda4] ss:$8 sps:$4 sm:$0xff]  }
 0x215   : > { %9879 = vmatpush1.bf16.msra.mxu1 %v11995_v8  ;;  %v12091_v8 = vld [vmem:[%s14206_s9 + $0x3a0] ss:$8 sps:$4 sm:$0xff]  }
 0x216   : > { %10309 = vmatpush1.bf16.msra.mxu0 %v11998_v9  ;;  %9880 = vmatprep.subr.bf16.mxu1 %v12003_v10  ;;  %v12094_v9 = vld [vmem:[%s14206_s9 + $0xda0] ss:$8 sps:$4 sm:$0xff]   ;;  %v12099_v10 = vld [vmem:[%s14206_s9 + $0x3b4] ss:$8 sps:$4 sm:$0xff]  }
 0x217   : > { %10310 = vmatprep.subr.bf16.mxu0 %v12006_v11  ;;  %v12102_v11 = vld [vmem:[%s14206_s9 + $0xdb4] ss:$8 sps:$4 sm:$0xff]  }
 0x219   : > { %9881 = vmatpush1.bf16.msra.mxu1 %v12001_v12  ;;  %v12097_v12 = vld [vmem:[%s14206_s9 + $0x3b0] ss:$8 sps:$4 sm:$0xff]  }
 0x21a   : > { %10311 = vmatpush1.bf16.msra.mxu0 %v12004_v13  ;;  %9882 = vmatprep.subr.bf16.mxu1 %v12009_v14  ;;  %v12100_v13 = vld [vmem:[%s14206_s9 + $0xdb0] ss:$8 sps:$4 sm:$0xff]   ;;  %v12105_v14 = vld [vmem:[%s14206_s9 + $0x3c4] ss:$8 sps:$4 sm:$0xff]  }
 0x21b   : > { %10312 = vmatprep.subr.bf16.mxu0 %v12012_v15  ;;  %v12108_v15 = vld [vmem:[%s14206_s9 + $0xdc4] ss:$8 sps:$4 sm:$0xff]  }
 0x21d   : > { %9883 = vmatpush1.bf16.msra.mxu1 %v12007_v16  ;;  %v12103_v16 = vld [vmem:[%s14206_s9 + $0x3c0] ss:$8 sps:$4 sm:$0xff]  }
 0x21e   : > { %10313 = vmatpush1.bf16.msra.mxu0 %v12010_v17  ;;  %9884 = vmatprep.subr.bf16.mxu1 %v12015_v18  ;;  %v12106_v17 = vld [vmem:[%s14206_s9 + $0xdc0] ss:$8 sps:$4 sm:$0xff]   ;;  %v12111_v18 = vld [vmem:[%s14206_s9 + $0x3d4] ss:$8 sps:$4 sm:$0xff]  }
 0x21f   : > { %10314 = vmatprep.subr.bf16.mxu0 %v12018_v19  ;;  %v12114_v19 = vld [vmem:[%s14206_s9 + $0xdd4] ss:$8 sps:$4 sm:$0xff]  }
 0x221   : > { %9885 = vmatpush1.bf16.msra.mxu1 %v12013_v20  ;;  %v12109_v20 = vld [vmem:[%s14206_s9 + $0x3d0] ss:$8 sps:$4 sm:$0xff]  }
 0x222   : > { %10315 = vmatpush1.bf16.msra.mxu0 %v12016_v21  ;;  %9886 = vmatprep.subr.bf16.mxu1 %v12021_v22  ;;  %v12112_v21 = vld [vmem:[%s14206_s9 + $0xdd0] ss:$8 sps:$4 sm:$0xff]   ;;  %v12117_v22 = vld [vmem:[%s14206_s9 + $0x3e4] ss:$8 sps:$4 sm:$0xff]  }
 0x223   : > { %10316 = vmatprep.subr.bf16.mxu0 %v12024_v23  ;;  %v12120_v23 = vld [vmem:[%s14206_s9 + $0xde4] ss:$8 sps:$4 sm:$0xff]  }
 0x225   : > { %9887 = vmatpush1.bf16.msra.mxu1 %v12019_v24  ;;  %v12115_v24 = vld [vmem:[%s14206_s9 + $0x3e0] ss:$8 sps:$4 sm:$0xff]  }
 0x226   : > { %10317 = vmatpush1.bf16.msra.mxu0 %v12022_v25  ;;  %9899 = vmatprep.subr.bf16.mxu1 %v12030_v26  ;;  %v12118_v25 = vld [vmem:[%s14206_s9 + $0xde0] ss:$8 sps:$4 sm:$0xff]   ;;  %v12123_v26 = vld [vmem:[%s14206_s9 + $0x3f4] ss:$8 sps:$4 sm:$0xff]  }
 0x227   : > { %10329 = vmatprep.subr.bf16.mxu0 %v12036_v27  ;;  %v12126_v27 = vld [vmem:[%s14206_s9 + $0xdf4] ss:$8 sps:$4 sm:$0xff]  }
 0x228   : > { %9889 = vmatmul.mubr.bf16.vlgmr.msra.gmra.mrb[0].mxu1 %v12025_v28  ;;  %v12121_v28 = vld [vmem:[%s14206_s9 + $0x3f0] ss:$8 sps:$4 sm:$0xff]  }
 0x229   : > { %10319 = vmatmul.mubr.bf16.vlgmr.msra.gmra.mrb[0].mxu0 %v12031_v30  ;;  %9900 = vmatpush1.bf16.msra.mxu1 %v12028_v29  ;;  %v12124_v29 = vld [vmem:[%s14206_s9 + $0xdf0] ss:$8 sps:$4 sm:$0xff]   ;;  %v12132_v30 = vld [vmem:[%s14206_s9 + $0x404] ss:$8 sps:$4 sm:$0xff]  }
 0x22a   : > { %10330 = vmatpush1.bf16.msra.mxu0 %v12034_v31  ;;  %9901 = vmatprep.subr.bf16.mxu1 %v12039_v32  ;;  %v12138_v31 = vld [vmem:[%s14206_s9 + $0xe04] ss:$8 sps:$4 sm:$0xff]   ;;  %v12127_v32 = vld [vmem:[%s15008_s0 + $0x18] ss:$164 sps:$4 sm:$0xff]  }
 0x22b   : > { %10331 = vmatprep.subr.bf16.mxu0 %v12042_v33  ;;  %9931 = vmatprep.mubr.bf16.mxu1 %v12129_v34  ;;  %v12130_v33 = vld [vmem:[%s14206_s9 + $0x400] ss:$8 sps:$4 sm:$0xff]  }
 0x22c   : > { %10361 = vmatprep.mubr.bf16.mxu0 %v12135_v35  ;;  %v12133_v34 = vld [vmem:[%s15008_s0 + $0x68] ss:$164 sps:$4 sm:$0xff]  }
 0x22d   : > { %9902 = vmatpush1.bf16.msra.mxu1 %v12037_v36  ;;  %v12136_v35 = vld [vmem:[%s14206_s9 + $0xe00] ss:$8 sps:$4 sm:$0xff]   ;;  %v12141_v36 = vld [vmem:[%s14206_s9 + $0x414] ss:$8 sps:$4 sm:$0xff]  }
 0x22e   : > { %10332 = vmatpush1.bf16.msra.mxu0 %v12040_v37  ;;  %9903 = vmatprep.subr.bf16.mxu1 %v12045_v38  ;;  %v12144_v37 = vld [vmem:[%s14206_s9 + $0xe14] ss:$8 sps:$4 sm:$0xff]   ;;  %v12231_v38 = vld [vmem:[%s15008_s0 + $0x24] ss:$164 sps:$4 sm:$0xff]  }
 0x22f   : > { %10333 = vmatprep.subr.bf16.mxu0 %v12048_v39  ;;  %v12237_v39 = vld [vmem:[%s15008_s0 + $0x74] ss:$164 sps:$4 sm:$0xff]  }
 0x231   : > { %9904 = vmatpush1.bf16.msra.mxu1 %v12043_v40  ;;  %v12139_v40 = vld [vmem:[%s14206_s9 + $0x410] ss:$8 sps:$4 sm:$0xff]  }
 0x232   : > { %10334 = vmatpush1.bf16.msra.mxu0 %v12046_v41  ;;  %9905 = vmatprep.subr.bf16.mxu1 %v12051_v42  ;;  %v12142_v41 = vld [vmem:[%s14206_s9 + $0xe10] ss:$8 sps:$4 sm:$0xff]   ;;  %v12147_v42 = vld [vmem:[%s14206_s9 + $0x424] ss:$8 sps:$4 sm:$0xff]  }
 0x233   : > { %10335 = vmatprep.subr.bf16.mxu0 %v12054_v43  ;;  %v12150_v43 = vld [vmem:[%s14206_s9 + $0xe24] ss:$8 sps:$4 sm:$0xff]  }
 0x235   : > { %9906 = vmatpush1.bf16.msra.mxu1 %v12049_v44  ;;  %v12145_v44 = vld [vmem:[%s14206_s9 + $0x420] ss:$8 sps:$4 sm:$0xff]  }
 0x236   : > { %10336 = vmatpush1.bf16.msra.mxu0 %v12052_v45  ;;  %9907 = vmatprep.subr.bf16.mxu1 %v12057_v46  ;;  %v12148_v45 = vld [vmem:[%s14206_s9 + $0xe20] ss:$8 sps:$4 sm:$0xff]   ;;  %v12153_v46 = vld [vmem:[%s14206_s9 + $0x434] ss:$8 sps:$4 sm:$0xff]  }
 0x237   : > { %10337 = vmatprep.subr.bf16.mxu0 %v12060_v47  ;;  %v12156_v47 = vld [vmem:[%s14206_s9 + $0xe34] ss:$8 sps:$4 sm:$0xff]  }
 0x239   : > { %9908 = vmatpush1.bf16.msra.mxu1 %v12055_v48  ;;  %v12151_v48 = vld [vmem:[%s14206_s9 + $0x430] ss:$8 sps:$4 sm:$0xff]  }
 0x23a   : > { %10338 = vmatpush1.bf16.msra.mxu0 %v12058_v49  ;;  %9909 = vmatprep.subr.bf16.mxu1 %v12063_v50  ;;  %v12154_v49 = vld [vmem:[%s14206_s9 + $0xe30] ss:$8 sps:$4 sm:$0xff]   ;;  %v12159_v50 = vld [vmem:[%s14206_s9 + $0x444] ss:$8 sps:$4 sm:$0xff]  }
 0x23b   : > { %10339 = vmatprep.subr.bf16.mxu0 %v12066_v51  ;;  %v12162_v51 = vld [vmem:[%s14206_s9 + $0xe44] ss:$8 sps:$4 sm:$0xff]  }
 0x23d   : > { %9910 = vmatpush1.bf16.msra.mxu1 %v12061_v52  ;;  %v12157_v52 = vld [vmem:[%s14206_s9 + $0x440] ss:$8 sps:$4 sm:$0xff]  }
 0x23e   : > { %10340 = vmatpush1.bf16.msra.mxu0 %v12064_v53  ;;  %9911 = vmatprep.subr.bf16.mxu1 %v12069_v54  ;;  %v12160_v53 = vld [vmem:[%s14206_s9 + $0xe40] ss:$8 sps:$4 sm:$0xff]   ;;  %v12165_v54 = vld [vmem:[%s14206_s9 + $0x454] ss:$8 sps:$4 sm:$0xff]  }
 0x23f   : > { %10341 = vmatprep.subr.bf16.mxu0 %v12072_v55  ;;  %v12168_v55 = vld [vmem:[%s14206_s9 + $0xe54] ss:$8 sps:$4 sm:$0xff]  }
 0x241   : > { %9912 = vmatpush1.bf16.msra.mxu1 %v12067_v56  ;;  %v12163_v56 = vld [vmem:[%s14206_s9 + $0x450] ss:$8 sps:$4 sm:$0xff]  }
 0x242   : > { %10342 = vmatpush1.bf16.msra.mxu0 %v12070_v57  ;;  %9913 = vmatprep.subr.bf16.mxu1 %v12075_v58  ;;  %v12166_v57 = vld [vmem:[%s14206_s9 + $0xe50] ss:$8 sps:$4 sm:$0xff]   ;;  %v12171_v58 = vld [vmem:[%s14206_s9 + $0x464] ss:$8 sps:$4 sm:$0xff]  }
 0x243   : > { %10343 = vmatprep.subr.bf16.mxu0 %v12078_v59  ;;  %v12174_v59 = vld [vmem:[%s14206_s9 + $0xe64] ss:$8 sps:$4 sm:$0xff]  }
 0x245   : > { %9914 = vmatpush1.bf16.msra.mxu1 %v12073_v60  ;;  %v12169_v60 = vld [vmem:[%s14206_s9 + $0x460] ss:$8 sps:$4 sm:$0xff]  }
 0x246   : > { %10344 = vmatpush1.bf16.msra.mxu0 %v12076_v61  ;;  %9915 = vmatprep.subr.bf16.mxu1 %v12081_v62  ;;  %v12172_v61 = vld [vmem:[%s14206_s9 + $0xe60] ss:$8 sps:$4 sm:$0xff]   ;;  %v12177_v62 = vld [vmem:[%s14206_s9 + $0x474] ss:$8 sps:$4 sm:$0xff]  }
 0x247   : > { %10345 = vmatprep.subr.bf16.mxu0 %v12084_v63  ;;  %v12180_v63 = vld [vmem:[%s14206_s9 + $0xe74] ss:$8 sps:$4 sm:$0xff]  }
 0x249   : > { %9916 = vmatpush1.bf16.msra.mxu1 %v12079_v0  ;;  %v12175_v0 = vld [vmem:[%s14206_s9 + $0x470] ss:$8 sps:$4 sm:$0xff]  }
 0x24a   : > { %10346 = vmatpush1.bf16.msra.mxu0 %v12082_v1  ;;  %9917 = vmatprep.subr.bf16.mxu1 %v12087_v2  ;;  %v12178_v1 = vld [vmem:[%s14206_s9 + $0xe70] ss:$8 sps:$4 sm:$0xff]   ;;  %v12183_v2 = vld [vmem:[%s14206_s9 + $0x484] ss:$8 sps:$4 sm:$0xff]  }
 0x24b   : > { %10347 = vmatprep.subr.bf16.mxu0 %v12090_v3  ;;  %v12186_v3 = vld [vmem:[%s14206_s9 + $0xe84] ss:$8 sps:$4 sm:$0xff]  }
 0x24d   : > { %9918 = vmatpush1.bf16.msra.mxu1 %v12085_v4  ;;  %v12181_v4 = vld [vmem:[%s14206_s9 + $0x480] ss:$8 sps:$4 sm:$0xff]  }
 0x24e   : > { %10348 = vmatpush1.bf16.msra.mxu0 %v12088_v5  ;;  %9919 = vmatprep.subr.bf16.mxu1 %v12093_v6  ;;  %v12184_v5 = vld [vmem:[%s14206_s9 + $0xe80] ss:$8 sps:$4 sm:$0xff]   ;;  %v12189_v6 = vld [vmem:[%s14206_s9 + $0x494] ss:$8 sps:$4 sm:$0xff]  }
 0x24f   : > { %10349 = vmatprep.subr.bf16.mxu0 %v12096_v7  ;;  %v12192_v7 = vld [vmem:[%s14206_s9 + $0xe94] ss:$8 sps:$4 sm:$0xff]  }
 0x251   : > { %9920 = vmatpush1.bf16.msra.mxu1 %v12091_v8  ;;  %v12187_v8 = vld [vmem:[%s14206_s9 + $0x490] ss:$8 sps:$4 sm:$0xff]  }
 0x252   : > { %10350 = vmatpush1.bf16.msra.mxu0 %v12094_v9  ;;  %9921 = vmatprep.subr.bf16.mxu1 %v12099_v10  ;;  %v12190_v9 = vld [vmem:[%s14206_s9 + $0xe90] ss:$8 sps:$4 sm:$0xff]   ;;  %v12195_v10 = vld [vmem:[%s14206_s9 + $0x4a4] ss:$8 sps:$4 sm:$0xff]  }
 0x253   : > { %10351 = vmatprep.subr.bf16.mxu0 %v12102_v11  ;;  %v12198_v11 = vld [vmem:[%s14206_s9 + $0xea4] ss:$8 sps:$4 sm:$0xff]  }
 0x255   : > { %9922 = vmatpush1.bf16.msra.mxu1 %v12097_v12  ;;  %v12193_v12 = vld [vmem:[%s14206_s9 + $0x4a0] ss:$8 sps:$4 sm:$0xff]  }
 0x256   : > { %10352 = vmatpush1.bf16.msra.mxu0 %v12100_v13  ;;  %9923 = vmatprep.subr.bf16.mxu1 %v12105_v14  ;;  %v12196_v13 = vld [vmem:[%s14206_s9 + $0xea0] ss:$8 sps:$4 sm:$0xff]   ;;  %v12201_v14 = vld [vmem:[%s14206_s9 + $0x4b4] ss:$8 sps:$4 sm:$0xff]  }
 0x257   : > { %10353 = vmatprep.subr.bf16.mxu0 %v12108_v15  ;;  %v12204_v15 = vld [vmem:[%s14206_s9 + $0xeb4] ss:$8 sps:$4 sm:$0xff]  }
 0x259   : > { %9924 = vmatpush1.bf16.msra.mxu1 %v12103_v16  ;;  %v12199_v16 = vld [vmem:[%s14206_s9 + $0x4b0] ss:$8 sps:$4 sm:$0xff]  }
 0x25a   : > { %10354 = vmatpush1.bf16.msra.mxu0 %v12106_v17  ;;  %9925 = vmatprep.subr.bf16.mxu1 %v12111_v18  ;;  %v12202_v17 = vld [vmem:[%s14206_s9 + $0xeb0] ss:$8 sps:$4 sm:$0xff]   ;;  %v12207_v18 = vld [vmem:[%s14206_s9 + $0x4c4] ss:$8 sps:$4 sm:$0xff]  }
 0x25b   : > { %10355 = vmatprep.subr.bf16.mxu0 %v12114_v19  ;;  %v12210_v19 = vld [vmem:[%s14206_s9 + $0xec4] ss:$8 sps:$4 sm:$0xff]  }
 0x25d   : > { %9926 = vmatpush1.bf16.msra.mxu1 %v12109_v20  ;;  %v12205_v20 = vld [vmem:[%s14206_s9 + $0x4c0] ss:$8 sps:$4 sm:$0xff]  }
 0x25e   : > { %10356 = vmatpush1.bf16.msra.mxu0 %v12112_v21  ;;  %9927 = vmatprep.subr.bf16.mxu1 %v12117_v22  ;;  %v12208_v21 = vld [vmem:[%s14206_s9 + $0xec0] ss:$8 sps:$4 sm:$0xff]   ;;  %v12213_v22 = vld [vmem:[%s14206_s9 + $0x4d4] ss:$8 sps:$4 sm:$0xff]  }
 0x25f   : > { %10357 = vmatprep.subr.bf16.mxu0 %v12120_v23  ;;  %v12216_v23 = vld [vmem:[%s14206_s9 + $0xed4] ss:$8 sps:$4 sm:$0xff]  }
 0x261   : > { %9928 = vmatpush1.bf16.msra.mxu1 %v12115_v24  ;;  %v12211_v24 = vld [vmem:[%s14206_s9 + $0x4d0] ss:$8 sps:$4 sm:$0xff]  }
 0x262   : > { %10358 = vmatpush1.bf16.msra.mxu0 %v12118_v25  ;;  %9929 = vmatprep.subr.bf16.mxu1 %v12123_v26  ;;  %v12214_v25 = vld [vmem:[%s14206_s9 + $0xed0] ss:$8 sps:$4 sm:$0xff]   ;;  %v12219_v26 = vld [vmem:[%s14206_s9 + $0x4e4] ss:$8 sps:$4 sm:$0xff]  }
 0x263   : > { %10359 = vmatprep.subr.bf16.mxu0 %v12126_v27  ;;  %v12222_v27 = vld [vmem:[%s14206_s9 + $0xee4] ss:$8 sps:$4 sm:$0xff]  }
 0x265   : > { %9930 = vmatpush1.bf16.msra.mxu1 %v12121_v28  ;;  %v12217_v28 = vld [vmem:[%s14206_s9 + $0x4e0] ss:$8 sps:$4 sm:$0xff]  }
 0x266   : > { %10360 = vmatpush1.bf16.msra.mxu0 %v12124_v29  ;;  %9942 = vmatprep.subr.bf16.mxu1 %v12132_v30  ;;  %v12220_v29 = vld [vmem:[%s14206_s9 + $0xee0] ss:$8 sps:$4 sm:$0xff]   ;;  %v12225_v30 = vld [vmem:[%s14206_s9 + $0x4f4] ss:$8 sps:$4 sm:$0xff]  }
 0x267   : > { %10372 = vmatprep.subr.bf16.mxu0 %v12138_v31  ;;  %v12228_v31 = vld [vmem:[%s14206_s9 + $0xef4] ss:$8 sps:$4 sm:$0xff]  }
 0x268   : > { %9932 = vmatmul.mubr.bf16.vlgmr.msra.gmra.mrb[0].mxu1 %v12127_v32  ;;  %v12223_v32 = vld [vmem:[%s14206_s9 + $0x4f0] ss:$8 sps:$4 sm:$0xff]  }
 0x269   : > { %10362 = vmatmul.mubr.bf16.vlgmr.msra.gmra.mrb[0].mxu0 %v12133_v34  ;;  %9943 = vmatpush1.bf16.msra.mxu1 %v12130_v33  ;;  %v12226_v33 = vld [vmem:[%s14206_s9 + $0xef0] ss:$8 sps:$4 sm:$0xff]   ;;  %v12234_v34 = vld [vmem:[%s14206_s9 + $0x504] ss:$8 sps:$4 sm:$0xff]  }
 0x26a   : > { %10373 = vmatpush1.bf16.msra.mxu0 %v12136_v35  ;;  %9944 = vmatprep.subr.bf16.mxu1 %v12141_v36  ;;  %v12229_v35 = vld [vmem:[%s15008_s0 + $0x20] ss:$164 sps:$4 sm:$0xff]   ;;  %v12235_v36 = vld [vmem:[%s15008_s0 + $0x70] ss:$164 sps:$4 sm:$0xff]  }
 0x26b   : > { %10374 = vmatprep.subr.bf16.mxu0 %v12144_v37  ;;  %9974 = vmatprep.mubr.bf16.mxu1 %v12231_v38  ;;  %v12240_v37 = vld [vmem:[%s14206_s9 + $0xf04] ss:$8 sps:$4 sm:$0xff]   ;;  %v12232_v38 = vld [vmem:[%s14206_s9 + $0x500] ss:$8 sps:$4 sm:$0xff]  }
 0x26c   : > { %10404 = vmatprep.mubr.bf16.mxu0 %v12237_v39  ;;  %v12238_v39 = vld [vmem:[%s14206_s9 + $0xf00] ss:$8 sps:$4 sm:$0xff]  }
 0x26d   : > { %9945 = vmatpush1.bf16.msra.mxu1 %v12139_v40  ;;  %v12243_v40 = vld [vmem:[%s14206_s9 + $0x514] ss:$8 sps:$4 sm:$0xff]  }
 0x26e   : > { %10375 = vmatpush1.bf16.msra.mxu0 %v12142_v41  ;;  %9946 = vmatprep.subr.bf16.mxu1 %v12147_v42  ;;  %v12246_v41 = vld [vmem:[%s14206_s9 + $0xf14] ss:$8 sps:$4 sm:$0xff]   ;;  %v12333_v42 = vld [vmem:[%s15008_s0 + $0x2c] ss:$164 sps:$4 sm:$0xff]  }
 0x26f   : > { %10376 = vmatprep.subr.bf16.mxu0 %v12150_v43  ;;  %v12339_v43 = vld [vmem:[%s15008_s0 + $0x7c] ss:$164 sps:$4 sm:$0xff]  }
 0x271   : > { %9947 = vmatpush1.bf16.msra.mxu1 %v12145_v44  ;;  %v12241_v44 = vld [vmem:[%s14206_s9 + $0x510] ss:$8 sps:$4 sm:$0xff]  }
 0x272   : > { %10377 = vmatpush1.bf16.msra.mxu0 %v12148_v45  ;;  %9948 = vmatprep.subr.bf16.mxu1 %v12153_v46  ;;  %v12244_v45 = vld [vmem:[%s14206_s9 + $0xf10] ss:$8 sps:$4 sm:$0xff]   ;;  %v12249_v46 = vld [vmem:[%s14206_s9 + $0x524] ss:$8 sps:$4 sm:$0xff]  }
 0x273   : > { %10378 = vmatprep.subr.bf16.mxu0 %v12156_v47  ;;  %v12252_v47 = vld [vmem:[%s14206_s9 + $0xf24] ss:$8 sps:$4 sm:$0xff]  }
 0x275   : > { %9949 = vmatpush1.bf16.msra.mxu1 %v12151_v48  ;;  %v12247_v48 = vld [vmem:[%s14206_s9 + $0x520] ss:$8 sps:$4 sm:$0xff]  }
 0x276   : > { %10379 = vmatpush1.bf16.msra.mxu0 %v12154_v49  ;;  %9950 = vmatprep.subr.bf16.mxu1 %v12159_v50  ;;  %v12250_v49 = vld [vmem:[%s14206_s9 + $0xf20] ss:$8 sps:$4 sm:$0xff]   ;;  %v12255_v50 = vld [vmem:[%s14206_s9 + $0x534] ss:$8 sps:$4 sm:$0xff]  }
 0x277   : > { %10380 = vmatprep.subr.bf16.mxu0 %v12162_v51  ;;  %v12258_v51 = vld [vmem:[%s14206_s9 + $0xf34] ss:$8 sps:$4 sm:$0xff]  }
 0x279   : > { %9951 = vmatpush1.bf16.msra.mxu1 %v12157_v52  ;;  %v12253_v52 = vld [vmem:[%s14206_s9 + $0x530] ss:$8 sps:$4 sm:$0xff]  }
 0x27a   : > { %10381 = vmatpush1.bf16.msra.mxu0 %v12160_v53  ;;  %9952 = vmatprep.subr.bf16.mxu1 %v12165_v54  ;;  %v12256_v53 = vld [vmem:[%s14206_s9 + $0xf30] ss:$8 sps:$4 sm:$0xff]   ;;  %v12261_v54 = vld [vmem:[%s14206_s9 + $0x544] ss:$8 sps:$4 sm:$0xff]  }
 0x27b   : > { %10382 = vmatprep.subr.bf16.mxu0 %v12168_v55  ;;  %v12264_v55 = vld [vmem:[%s14206_s9 + $0xf44] ss:$8 sps:$4 sm:$0xff]  }
 0x27d   : > { %9953 = vmatpush1.bf16.msra.mxu1 %v12163_v56  ;;  %v12259_v56 = vld [vmem:[%s14206_s9 + $0x540] ss:$8 sps:$4 sm:$0xff]  }
 0x27e   : > { %10383 = vmatpush1.bf16.msra.mxu0 %v12166_v57  ;;  %9954 = vmatprep.subr.bf16.mxu1 %v12171_v58  ;;  %v12262_v57 = vld [vmem:[%s14206_s9 + $0xf40] ss:$8 sps:$4 sm:$0xff]   ;;  %v12267_v58 = vld [vmem:[%s14206_s9 + $0x554] ss:$8 sps:$4 sm:$0xff]  }
 0x27f   : > { %10384 = vmatprep.subr.bf16.mxu0 %v12174_v59  ;;  %v12270_v59 = vld [vmem:[%s14206_s9 + $0xf54] ss:$8 sps:$4 sm:$0xff]  }
 0x281   : > { %9955 = vmatpush1.bf16.msra.mxu1 %v12169_v60  ;;  %v12265_v60 = vld [vmem:[%s14206_s9 + $0x550] ss:$8 sps:$4 sm:$0xff]  }
 0x282   : > { %10385 = vmatpush1.bf16.msra.mxu0 %v12172_v61  ;;  %9956 = vmatprep.subr.bf16.mxu1 %v12177_v62  ;;  %v12268_v61 = vld [vmem:[%s14206_s9 + $0xf50] ss:$8 sps:$4 sm:$0xff]   ;;  %v12273_v62 = vld [vmem:[%s14206_s9 + $0x564] ss:$8 sps:$4 sm:$0xff]  }
 0x283   : > { %10386 = vmatprep.subr.bf16.mxu0 %v12180_v63  ;;  %v12276_v63 = vld [vmem:[%s14206_s9 + $0xf64] ss:$8 sps:$4 sm:$0xff]  }
 0x285   : > { %9957 = vmatpush1.bf16.msra.mxu1 %v12175_v0  ;;  %v12271_v0 = vld [vmem:[%s14206_s9 + $0x560] ss:$8 sps:$4 sm:$0xff]  }
 0x286   : > { %10387 = vmatpush1.bf16.msra.mxu0 %v12178_v1  ;;  %9958 = vmatprep.subr.bf16.mxu1 %v12183_v2  ;;  %v12274_v1 = vld [vmem:[%s14206_s9 + $0xf60] ss:$8 sps:$4 sm:$0xff]   ;;  %v12279_v2 = vld [vmem:[%s14206_s9 + $0x574] ss:$8 sps:$4 sm:$0xff]  }
 0x287   : > { %10388 = vmatprep.subr.bf16.mxu0 %v12186_v3  ;;  %v12282_v3 = vld [vmem:[%s14206_s9 + $0xf74] ss:$8 sps:$4 sm:$0xff]  }
 0x289   : > { %9959 = vmatpush1.bf16.msra.mxu1 %v12181_v4  ;;  %v12277_v4 = vld [vmem:[%s14206_s9 + $0x570] ss:$8 sps:$4 sm:$0xff]  }
 0x28a   : > { %10389 = vmatpush1.bf16.msra.mxu0 %v12184_v5  ;;  %9960 = vmatprep.subr.bf16.mxu1 %v12189_v6  ;;  %v12280_v5 = vld [vmem:[%s14206_s9 + $0xf70] ss:$8 sps:$4 sm:$0xff]   ;;  %v12285_v6 = vld [vmem:[%s14206_s9 + $0x584] ss:$8 sps:$4 sm:$0xff]  }
 0x28b   : > { %10390 = vmatprep.subr.bf16.mxu0 %v12192_v7  ;;  %v12288_v7 = vld [vmem:[%s14206_s9 + $0xf84] ss:$8 sps:$4 sm:$0xff]  }
 0x28d   : > { %9961 = vmatpush1.bf16.msra.mxu1 %v12187_v8  ;;  %v12283_v8 = vld [vmem:[%s14206_s9 + $0x580] ss:$8 sps:$4 sm:$0xff]  }
 0x28e   : > { %10391 = vmatpush1.bf16.msra.mxu0 %v12190_v9  ;;  %9962 = vmatprep.subr.bf16.mxu1 %v12195_v10  ;;  %v12286_v9 = vld [vmem:[%s14206_s9 + $0xf80] ss:$8 sps:$4 sm:$0xff]   ;;  %v12291_v10 = vld [vmem:[%s14206_s9 + $0x594] ss:$8 sps:$4 sm:$0xff]  }
 0x28f   : > { %10392 = vmatprep.subr.bf16.mxu0 %v12198_v11  ;;  %v12294_v11 = vld [vmem:[%s14206_s9 + $0xf94] ss:$8 sps:$4 sm:$0xff]  }
 0x291   : > { %9963 = vmatpush1.bf16.msra.mxu1 %v12193_v12  ;;  %v12289_v12 = vld [vmem:[%s14206_s9 + $0x590] ss:$8 sps:$4 sm:$0xff]  }
 0x292   : > { %10393 = vmatpush1.bf16.msra.mxu0 %v12196_v13  ;;  %9964 = vmatprep.subr.bf16.mxu1 %v12201_v14  ;;  %v12292_v13 = vld [vmem:[%s14206_s9 + $0xf90] ss:$8 sps:$4 sm:$0xff]   ;;  %v12297_v14 = vld [vmem:[%s14206_s9 + $0x5a4] ss:$8 sps:$4 sm:$0xff]  }
 0x293   : > { %10394 = vmatprep.subr.bf16.mxu0 %v12204_v15  ;;  %v12300_v15 = vld [vmem:[%s14206_s9 + $0xfa4] ss:$8 sps:$4 sm:$0xff]  }
 0x295   : > { %9965 = vmatpush1.bf16.msra.mxu1 %v12199_v16  ;;  %v12295_v16 = vld [vmem:[%s14206_s9 + $0x5a0] ss:$8 sps:$4 sm:$0xff]  }
 0x296   : > { %10395 = vmatpush1.bf16.msra.mxu0 %v12202_v17  ;;  %9966 = vmatprep.subr.bf16.mxu1 %v12207_v18  ;;  %v12298_v17 = vld [vmem:[%s14206_s9 + $0xfa0] ss:$8 sps:$4 sm:$0xff]   ;;  %v12303_v18 = vld [vmem:[%s14206_s9 + $0x5b4] ss:$8 sps:$4 sm:$0xff]  }
 0x297   : > { %10396 = vmatprep.subr.bf16.mxu0 %v12210_v19  ;;  %v12306_v19 = vld [vmem:[%s14206_s9 + $0xfb4] ss:$8 sps:$4 sm:$0xff]  }
 0x299   : > { %9967 = vmatpush1.bf16.msra.mxu1 %v12205_v20  ;;  %v12301_v20 = vld [vmem:[%s14206_s9 + $0x5b0] ss:$8 sps:$4 sm:$0xff]  }
 0x29a   : > { %10397 = vmatpush1.bf16.msra.mxu0 %v12208_v21  ;;  %9968 = vmatprep.subr.bf16.mxu1 %v12213_v22  ;;  %v12304_v21 = vld [vmem:[%s14206_s9 + $0xfb0] ss:$8 sps:$4 sm:$0xff]   ;;  %v12309_v22 = vld [vmem:[%s14206_s9 + $0x5c4] ss:$8 sps:$4 sm:$0xff]  }
 0x29b   : > { %10398 = vmatprep.subr.bf16.mxu0 %v12216_v23  ;;  %v12312_v23 = vld [vmem:[%s14206_s9 + $0xfc4] ss:$8 sps:$4 sm:$0xff]  }
 0x29d   : > { %9969 = vmatpush1.bf16.msra.mxu1 %v12211_v24  ;;  %v12307_v24 = vld [vmem:[%s14206_s9 + $0x5c0] ss:$8 sps:$4 sm:$0xff]  }
 0x29e   : > { %10399 = vmatpush1.bf16.msra.mxu0 %v12214_v25  ;;  %9970 = vmatprep.subr.bf16.mxu1 %v12219_v26  ;;  %v12310_v25 = vld [vmem:[%s14206_s9 + $0xfc0] ss:$8 sps:$4 sm:$0xff]   ;;  %v12315_v26 = vld [vmem:[%s14206_s9 + $0x5d4] ss:$8 sps:$4 sm:$0xff]  }
 0x29f   : > { %10400 = vmatprep.subr.bf16.mxu0 %v12222_v27  ;;  %v12318_v27 = vld [vmem:[%s14206_s9 + $0xfd4] ss:$8 sps:$4 sm:$0xff]  }
 0x2a1   : > { %9971 = vmatpush1.bf16.msra.mxu1 %v12217_v28  ;;  %v12313_v28 = vld [vmem:[%s14206_s9 + $0x5d0] ss:$8 sps:$4 sm:$0xff]  }
 0x2a2   : > { %10401 = vmatpush1.bf16.msra.mxu0 %v12220_v29  ;;  %9972 = vmatprep.subr.bf16.mxu1 %v12225_v30  ;;  %v12316_v29 = vld [vmem:[%s14206_s9 + $0xfd0] ss:$8 sps:$4 sm:$0xff]   ;;  %v12321_v30 = vld [vmem:[%s14206_s9 + $0x5e4] ss:$8 sps:$4 sm:$0xff]  }
 0x2a3   : > { %10402 = vmatprep.subr.bf16.mxu0 %v12228_v31  ;;  %v12324_v31 = vld [vmem:[%s14206_s9 + $0xfe4] ss:$8 sps:$4 sm:$0xff]  }
 0x2a5   : > { %9973 = vmatpush1.bf16.msra.mxu1 %v12223_v32  ;;  %v12319_v32 = vld [vmem:[%s14206_s9 + $0x5e0] ss:$8 sps:$4 sm:$0xff]  }
 0x2a6   : > { %10403 = vmatpush1.bf16.msra.mxu0 %v12226_v33  ;;  %9985 = vmatprep.subr.bf16.mxu1 %v12234_v34  ;;  %v12322_v33 = vld [vmem:[%s14206_s9 + $0xfe0] ss:$8 sps:$4 sm:$0xff]   ;;  %v12327_v34 = vld [vmem:[%s14206_s9 + $0x5f4] ss:$8 sps:$4 sm:$0xff]  }
 0x2a7   : > { %10415 = vmatprep.subr.bf16.mxu0 %v12240_v37  ;;  %v12328_v37 = vld [vmem:[%s14206_s9 + $0xff0] ss:$8 sps:$4 sm:$0xff]  }
 0x2a8   : > { %9975 = vmatmul.mubr.bf16.vlgmr.msra.gmra.mrb[0].mxu1 %v12229_v35  ;;  %v12330_v35 = vld [vmem:[%s14206_s9 + $0xff4] ss:$8 sps:$4 sm:$0xff]  }
 0x2a9   : > { %10405 = vmatmul.mubr.bf16.vlgmr.msra.gmra.mrb[0].mxu0 %v12235_v36  ;;  %9986 = vmatpush1.bf16.msra.mxu1 %v12232_v38  ;;  %v12325_v36 = vld [vmem:[%s14206_s9 + $0x5f0] ss:$8 sps:$4 sm:$0xff]   ;;  %v12336_v38 = vld [vmem:[%s14206_s9 + $0x604] ss:$8 sps:$4 sm:$0xff]  }
 0x2aa   : > { %10416 = vmatpush1.bf16.msra.mxu0 %v12238_v39  ;;  %9987 = vmatprep.subr.bf16.mxu1 %v12243_v40  ;;  %v12331_v39 = vld [vmem:[%s15008_s0 + $0x28] ss:$164 sps:$4 sm:$0xff]   ;;  %v12337_v40 = vld [vmem:[%s15008_s0 + $0x78] ss:$164 sps:$4 sm:$0xff]  }
 0x2ab   : > { %10417 = vmatprep.subr.bf16.mxu0 %v12246_v41  ;;  %10017 = vmatprep.mubr.bf16.mxu1 %v12333_v42  ;;  %v12342_v41 = vld [vmem:[%s14206_s9 + $0x1004] ss:$8 sps:$4 sm:$0xff]   ;;  %v12334_v42 = vld [vmem:[%s14206_s9 + $0x600] ss:$8 sps:$4 sm:$0xff]  }
 0x2ac   : > { %10447 = vmatprep.mubr.bf16.mxu0 %v12339_v43  ;;  %v12340_v43 = vld [vmem:[%s14206_s9 + $0x1000] ss:$8 sps:$4 sm:$0xff]  }
 0x2ad   : > { %9988 = vmatpush1.bf16.msra.mxu1 %v12241_v44  ;;  %v12345_v44 = vld [vmem:[%s14206_s9 + $0x614] ss:$8 sps:$4 sm:$0xff]  }
 0x2ae   : > { %10418 = vmatpush1.bf16.msra.mxu0 %v12244_v45  ;;  %9989 = vmatprep.subr.bf16.mxu1 %v12249_v46  ;;  %v12348_v45 = vld [vmem:[%s14206_s9 + $0x1014] ss:$8 sps:$4 sm:$0xff]  }
 0x2af   : > { %10419 = vmatprep.subr.bf16.mxu0 %v12252_v47  ;;  %v12435_v46 = vld [vmem:[%s15008_s0 + $0x34] ss:$164 sps:$4 sm:$0xff]   ;;  %v12441_v47 = vld [vmem:[%s15008_s0 + $0x84] ss:$164 sps:$4 sm:$0xff]  }
 0x2b1   : > { %9990 = vmatpush1.bf16.msra.mxu1 %v12247_v48  ;;  %v12343_v48 = vld [vmem:[%s14206_s9 + $0x610] ss:$8 sps:$4 sm:$0xff]  }
 0x2b2   : > { %10420 = vmatpush1.bf16.msra.mxu0 %v12250_v49  ;;  %9991 = vmatprep.subr.bf16.mxu1 %v12255_v50  ;;  %v12346_v49 = vld [vmem:[%s14206_s9 + $0x1010] ss:$8 sps:$4 sm:$0xff]   ;;  %v12351_v50 = vld [vmem:[%s14206_s9 + $0x624] ss:$8 sps:$4 sm:$0xff]  }
 0x2b3   : > { %10421 = vmatprep.subr.bf16.mxu0 %v12258_v51  ;;  %v12354_v51 = vld [vmem:[%s14206_s9 + $0x1024] ss:$8 sps:$4 sm:$0xff]  }
 0x2b5   : > { %9992 = vmatpush1.bf16.msra.mxu1 %v12253_v52  ;;  %v12349_v52 = vld [vmem:[%s14206_s9 + $0x620] ss:$8 sps:$4 sm:$0xff]  }
 0x2b6   : > { %10422 = vmatpush1.bf16.msra.mxu0 %v12256_v53  ;;  %9993 = vmatprep.subr.bf16.mxu1 %v12261_v54  ;;  %v12352_v53 = vld [vmem:[%s14206_s9 + $0x1020] ss:$8 sps:$4 sm:$0xff]   ;;  %v12357_v54 = vld [vmem:[%s14206_s9 + $0x634] ss:$8 sps:$4 sm:$0xff]  }
 0x2b7   : > { %10423 = vmatprep.subr.bf16.mxu0 %v12264_v55  ;;  %v12360_v55 = vld [vmem:[%s14206_s9 + $0x1034] ss:$8 sps:$4 sm:$0xff]  }
 0x2b9   : > { %9994 = vmatpush1.bf16.msra.mxu1 %v12259_v56  ;;  %v12355_v56 = vld [vmem:[%s14206_s9 + $0x630] ss:$8 sps:$4 sm:$0xff]  }
 0x2ba   : > { %10424 = vmatpush1.bf16.msra.mxu0 %v12262_v57  ;;  %9995 = vmatprep.subr.bf16.mxu1 %v12267_v58  ;;  %v12358_v57 = vld [vmem:[%s14206_s9 + $0x1030] ss:$8 sps:$4 sm:$0xff]   ;;  %v12363_v58 = vld [vmem:[%s14206_s9 + $0x644] ss:$8 sps:$4 sm:$0xff]  }
 0x2bb   : > { %10425 = vmatprep.subr.bf16.mxu0 %v12270_v59  ;;  %v12366_v59 = vld [vmem:[%s14206_s9 + $0x1044] ss:$8 sps:$4 sm:$0xff]  }
 0x2bd   : > { %9996 = vmatpush1.bf16.msra.mxu1 %v12265_v60  ;;  %v12361_v60 = vld [vmem:[%s14206_s9 + $0x640] ss:$8 sps:$4 sm:$0xff]  }
 0x2be   : > { %10426 = vmatpush1.bf16.msra.mxu0 %v12268_v61  ;;  %9997 = vmatprep.subr.bf16.mxu1 %v12273_v62  ;;  %v12364_v61 = vld [vmem:[%s14206_s9 + $0x1040] ss:$8 sps:$4 sm:$0xff]   ;;  %v12369_v62 = vld [vmem:[%s14206_s9 + $0x654] ss:$8 sps:$4 sm:$0xff]  }
 0x2bf   : > { %10427 = vmatprep.subr.bf16.mxu0 %v12276_v63  ;;  %v12372_v63 = vld [vmem:[%s14206_s9 + $0x1054] ss:$8 sps:$4 sm:$0xff]  }
 0x2c1   : > { %9998 = vmatpush1.bf16.msra.mxu1 %v12271_v0  ;;  %v12367_v0 = vld [vmem:[%s14206_s9 + $0x650] ss:$8 sps:$4 sm:$0xff]  }
 0x2c2   : > { %10428 = vmatpush1.bf16.msra.mxu0 %v12274_v1  ;;  %9999 = vmatprep.subr.bf16.mxu1 %v12279_v2  ;;  %v12370_v1 = vld [vmem:[%s14206_s9 + $0x1050] ss:$8 sps:$4 sm:$0xff]   ;;  %v12375_v2 = vld [vmem:[%s14206_s9 + $0x664] ss:$8 sps:$4 sm:$0xff]  }
 0x2c3   : > { %10429 = vmatprep.subr.bf16.mxu0 %v12282_v3  ;;  %v12378_v3 = vld [vmem:[%s14206_s9 + $0x1064] ss:$8 sps:$4 sm:$0xff]  }
 0x2c5   : > { %10000 = vmatpush1.bf16.msra.mxu1 %v12277_v4  ;;  %v12373_v4 = vld [vmem:[%s14206_s9 + $0x660] ss:$8 sps:$4 sm:$0xff]  }
 0x2c6   : > { %10430 = vmatpush1.bf16.msra.mxu0 %v12280_v5  ;;  %10001 = vmatprep.subr.bf16.mxu1 %v12285_v6  ;;  %v12376_v5 = vld [vmem:[%s14206_s9 + $0x1060] ss:$8 sps:$4 sm:$0xff]   ;;  %v12381_v6 = vld [vmem:[%s14206_s9 + $0x674] ss:$8 sps:$4 sm:$0xff]  }
 0x2c7   : > { %10431 = vmatprep.subr.bf16.mxu0 %v12288_v7  ;;  %v12384_v7 = vld [vmem:[%s14206_s9 + $0x1074] ss:$8 sps:$4 sm:$0xff]  }
 0x2c9   : > { %10002 = vmatpush1.bf16.msra.mxu1 %v12283_v8  ;;  %v12379_v8 = vld [vmem:[%s14206_s9 + $0x670] ss:$8 sps:$4 sm:$0xff]  }
 0x2ca   : > { %10432 = vmatpush1.bf16.msra.mxu0 %v12286_v9  ;;  %10003 = vmatprep.subr.bf16.mxu1 %v12291_v10  ;;  %v12382_v9 = vld [vmem:[%s14206_s9 + $0x1070] ss:$8 sps:$4 sm:$0xff]   ;;  %v12387_v10 = vld [vmem:[%s14206_s9 + $0x684] ss:$8 sps:$4 sm:$0xff]  }
 0x2cb   : > { %10433 = vmatprep.subr.bf16.mxu0 %v12294_v11  ;;  %v12390_v11 = vld [vmem:[%s14206_s9 + $0x1084] ss:$8 sps:$4 sm:$0xff]  }
 0x2cd   : > { %10004 = vmatpush1.bf16.msra.mxu1 %v12289_v12  ;;  %v12385_v12 = vld [vmem:[%s14206_s9 + $0x680] ss:$8 sps:$4 sm:$0xff]  }
 0x2ce   : > { %10434 = vmatpush1.bf16.msra.mxu0 %v12292_v13  ;;  %10005 = vmatprep.subr.bf16.mxu1 %v12297_v14  ;;  %v12388_v13 = vld [vmem:[%s14206_s9 + $0x1080] ss:$8 sps:$4 sm:$0xff]   ;;  %v12393_v14 = vld [vmem:[%s14206_s9 + $0x694] ss:$8 sps:$4 sm:$0xff]  }
 0x2cf   : > { %10435 = vmatprep.subr.bf16.mxu0 %v12300_v15  ;;  %v12396_v15 = vld [vmem:[%s14206_s9 + $0x1094] ss:$8 sps:$4 sm:$0xff]  }
 0x2d1   : > { %10006 = vmatpush1.bf16.msra.mxu1 %v12295_v16  ;;  %v12391_v16 = vld [vmem:[%s14206_s9 + $0x690] ss:$8 sps:$4 sm:$0xff]  }
 0x2d2   : > { %10436 = vmatpush1.bf16.msra.mxu0 %v12298_v17  ;;  %10007 = vmatprep.subr.bf16.mxu1 %v12303_v18  ;;  %v12394_v17 = vld [vmem:[%s14206_s9 + $0x1090] ss:$8 sps:$4 sm:$0xff]   ;;  %v12399_v18 = vld [vmem:[%s14206_s9 + $0x6a4] ss:$8 sps:$4 sm:$0xff]  }
 0x2d3   : > { %10437 = vmatprep.subr.bf16.mxu0 %v12306_v19  ;;  %v12402_v19 = vld [vmem:[%s14206_s9 + $0x10a4] ss:$8 sps:$4 sm:$0xff]  }
 0x2d5   : > { %10008 = vmatpush1.bf16.msra.mxu1 %v12301_v20  ;;  %v12397_v20 = vld [vmem:[%s14206_s9 + $0x6a0] ss:$8 sps:$4 sm:$0xff]  }
 0x2d6   : > { %10438 = vmatpush1.bf16.msra.mxu0 %v12304_v21  ;;  %10009 = vmatprep.subr.bf16.mxu1 %v12309_v22  ;;  %v12400_v21 = vld [vmem:[%s14206_s9 + $0x10a0] ss:$8 sps:$4 sm:$0xff]   ;;  %v12405_v22 = vld [vmem:[%s14206_s9 + $0x6b4] ss:$8 sps:$4 sm:$0xff]  }
 0x2d7   : > { %10439 = vmatprep.subr.bf16.mxu0 %v12312_v23  ;;  %v12408_v23 = vld [vmem:[%s14206_s9 + $0x10b4] ss:$8 sps:$4 sm:$0xff]  }
 0x2d9   : > { %10010 = vmatpush1.bf16.msra.mxu1 %v12307_v24  ;;  %v12403_v24 = vld [vmem:[%s14206_s9 + $0x6b0] ss:$8 sps:$4 sm:$0xff]  }
 0x2da   : > { %10440 = vmatpush1.bf16.msra.mxu0 %v12310_v25  ;;  %10011 = vmatprep.subr.bf16.mxu1 %v12315_v26  ;;  %v12406_v25 = vld [vmem:[%s14206_s9 + $0x10b0] ss:$8 sps:$4 sm:$0xff]   ;;  %v12411_v26 = vld [vmem:[%s14206_s9 + $0x6c4] ss:$8 sps:$4 sm:$0xff]  }
 0x2db   : > { %10441 = vmatprep.subr.bf16.mxu0 %v12318_v27  ;;  %v12414_v27 = vld [vmem:[%s14206_s9 + $0x10c4] ss:$8 sps:$4 sm:$0xff]  }
 0x2dd   : > { %10012 = vmatpush1.bf16.msra.mxu1 %v12313_v28  ;;  %v12409_v28 = vld [vmem:[%s14206_s9 + $0x6c0] ss:$8 sps:$4 sm:$0xff]  }
 0x2de   : > { %10442 = vmatpush1.bf16.msra.mxu0 %v12316_v29  ;;  %10013 = vmatprep.subr.bf16.mxu1 %v12321_v30  ;;  %v12412_v29 = vld [vmem:[%s14206_s9 + $0x10c0] ss:$8 sps:$4 sm:$0xff]   ;;  %v12417_v30 = vld [vmem:[%s14206_s9 + $0x6d4] ss:$8 sps:$4 sm:$0xff]  }
 0x2df   : > { %10443 = vmatprep.subr.bf16.mxu0 %v12324_v31  ;;  %v12420_v31 = vld [vmem:[%s14206_s9 + $0x10d4] ss:$8 sps:$4 sm:$0xff]  }
 0x2e1   : > { %10014 = vmatpush1.bf16.msra.mxu1 %v12319_v32  ;;  %v12415_v32 = vld [vmem:[%s14206_s9 + $0x6d0] ss:$8 sps:$4 sm:$0xff]  }
 0x2e2   : > { %10444 = vmatpush1.bf16.msra.mxu0 %v12322_v33  ;;  %10015 = vmatprep.subr.bf16.mxu1 %v12327_v34  ;;  %v12418_v33 = vld [vmem:[%s14206_s9 + $0x10d0] ss:$8 sps:$4 sm:$0xff]   ;;  %v12423_v34 = vld [vmem:[%s14206_s9 + $0x6e4] ss:$8 sps:$4 sm:$0xff]  }
 0x2e3   : > { %10445 = vmatprep.subr.bf16.mxu0 %v12330_v35  ;;  %v12426_v35 = vld [vmem:[%s14206_s9 + $0x10e4] ss:$8 sps:$4 sm:$0xff]  }
 0x2e5   : > { %10016 = vmatpush1.bf16.msra.mxu1 %v12325_v36  ;;  %v12421_v36 = vld [vmem:[%s14206_s9 + $0x6e0] ss:$8 sps:$4 sm:$0xff]  }
 0x2e6   : > { %10446 = vmatpush1.bf16.msra.mxu0 %v12328_v37  ;;  %10028 = vmatprep.subr.bf16.mxu1 %v12336_v38  ;;  %v12424_v37 = vld [vmem:[%s14206_s9 + $0x10e0] ss:$8 sps:$4 sm:$0xff]   ;;  %v12429_v38 = vld [vmem:[%s14206_s9 + $0x6f4] ss:$8 sps:$4 sm:$0xff]  }
 0x2e7   : > { %10458 = vmatprep.subr.bf16.mxu0 %v12342_v41  ;;  %v12430_v41 = vld [vmem:[%s14206_s9 + $0x10f0] ss:$8 sps:$4 sm:$0xff]  }
 0x2e8   : > { %10018 = vmatmul.mubr.bf16.vlgmr.msra.gmra.mrb[0].mxu1 %v12331_v39  ;;  %v12432_v39 = vld [vmem:[%s14206_s9 + $0x10f4] ss:$8 sps:$4 sm:$0xff]  }
 0x2e9   : > { %10448 = vmatmul.mubr.bf16.vlgmr.msra.gmra.mrb[0].mxu0 %v12337_v40  ;;  %10029 = vmatpush1.bf16.msra.mxu1 %v12334_v42  ;;  %v12427_v40 = vld [vmem:[%s14206_s9 + $0x6f0] ss:$8 sps:$4 sm:$0xff]   ;;  %v12438_v42 = vld [vmem:[%s14206_s9 + $0x704] ss:$8 sps:$4 sm:$0xff]  }
 0x2ea   : > { %10459 = vmatpush1.bf16.msra.mxu0 %v12340_v43  ;;  %10030 = vmatprep.subr.bf16.mxu1 %v12345_v44  ;;  %v12444_v43 = vld [vmem:[%s14206_s9 + $0x1104] ss:$8 sps:$4 sm:$0xff]   ;;  %v12433_v44 = vld [vmem:[%s15008_s0 + $0x30] ss:$164 sps:$4 sm:$0xff]  }
 0x2eb   : > { %10460 = vmatprep.subr.bf16.mxu0 %v12348_v45  ;;  %10060 = vmatprep.mubr.bf16.mxu1 %v12435_v46  ;;  %v12439_v45 = vld [vmem:[%s15008_s0 + $0x80] ss:$164 sps:$4 sm:$0xff]  }
 0x2ec   : > { %10490 = vmatprep.mubr.bf16.mxu0 %v12441_v47  ;;  %v12436_v46 = vld [vmem:[%s14206_s9 + $0x700] ss:$8 sps:$4 sm:$0xff]  }
 0x2ed   : > { %10031 = vmatpush1.bf16.msra.mxu1 %v12343_v48  ;;  %v12442_v47 = vld [vmem:[%s14206_s9 + $0x1100] ss:$8 sps:$4 sm:$0xff]   ;;  %v12447_v48 = vld [vmem:[%s14206_s9 + $0x714] ss:$8 sps:$4 sm:$0xff]  }
 0x2ee   : > { %10461 = vmatpush1.bf16.msra.mxu0 %v12346_v49  ;;  %10032 = vmatprep.subr.bf16.mxu1 %v12351_v50  ;;  %v12450_v49 = vld [vmem:[%s14206_s9 + $0x1114] ss:$8 sps:$4 sm:$0xff]  }
 0x2ef   : > { %10462 = vmatprep.subr.bf16.mxu0 %v12354_v51  ;;  %v12537_v50 = vld [vmem:[%s15008_s0 + $0x3c] ss:$164 sps:$4 sm:$0xff]   ;;  %v12543_v51 = vld [vmem:[%s15008_s0 + $0x8c] ss:$164 sps:$4 sm:$0xff]  }
 0x2f1   : > { %10033 = vmatpush1.bf16.msra.mxu1 %v12349_v52  ;;  %v12445_v52 = vld [vmem:[%s14206_s9 + $0x710] ss:$8 sps:$4 sm:$0xff]  }
 0x2f2   : > { %10463 = vmatpush1.bf16.msra.mxu0 %v12352_v53  ;;  %10034 = vmatprep.subr.bf16.mxu1 %v12357_v54  ;;  %v12448_v53 = vld [vmem:[%s14206_s9 + $0x1110] ss:$8 sps:$4 sm:$0xff]   ;;  %v12453_v54 = vld [vmem:[%s14206_s9 + $0x724] ss:$8 sps:$4 sm:$0xff]  }
 0x2f3   : > { %10464 = vmatprep.subr.bf16.mxu0 %v12360_v55  ;;  %v12456_v55 = vld [vmem:[%s14206_s9 + $0x1124] ss:$8 sps:$4 sm:$0xff]  }
 0x2f5   : > { %10035 = vmatpush1.bf16.msra.mxu1 %v12355_v56  ;;  %v12451_v56 = vld [vmem:[%s14206_s9 + $0x720] ss:$8 sps:$4 sm:$0xff]  }
 0x2f6   : > { %10465 = vmatpush1.bf16.msra.mxu0 %v12358_v57  ;;  %10036 = vmatprep.subr.bf16.mxu1 %v12363_v58  ;;  %v12454_v57 = vld [vmem:[%s14206_s9 + $0x1120] ss:$8 sps:$4 sm:$0xff]   ;;  %v12459_v58 = vld [vmem:[%s14206_s9 + $0x734] ss:$8 sps:$4 sm:$0xff]  }
 0x2f7   : > { %10466 = vmatprep.subr.bf16.mxu0 %v12366_v59  ;;  %v12462_v59 = vld [vmem:[%s14206_s9 + $0x1134] ss:$8 sps:$4 sm:$0xff]  }
 0x2f9   : > { %10037 = vmatpush1.bf16.msra.mxu1 %v12361_v60  ;;  %v12457_v60 = vld [vmem:[%s14206_s9 + $0x730] ss:$8 sps:$4 sm:$0xff]  }
 0x2fa   : > { %10467 = vmatpush1.bf16.msra.mxu0 %v12364_v61  ;;  %10038 = vmatprep.subr.bf16.mxu1 %v12369_v62  ;;  %v12460_v61 = vld [vmem:[%s14206_s9 + $0x1130] ss:$8 sps:$4 sm:$0xff]   ;;  %v12465_v62 = vld [vmem:[%s14206_s9 + $0x744] ss:$8 sps:$4 sm:$0xff]  }
 0x2fb   : > { %10468 = vmatprep.subr.bf16.mxu0 %v12372_v63  ;;  %v12468_v63 = vld [vmem:[%s14206_s9 + $0x1144] ss:$8 sps:$4 sm:$0xff]  }
 0x2fd   : > { %10039 = vmatpush1.bf16.msra.mxu1 %v12367_v0  ;;  %v12463_v0 = vld [vmem:[%s14206_s9 + $0x740] ss:$8 sps:$4 sm:$0xff]  }
 0x2fe   : > { %10469 = vmatpush1.bf16.msra.mxu0 %v12370_v1  ;;  %10040 = vmatprep.subr.bf16.mxu1 %v12375_v2  ;;  %v12466_v1 = vld [vmem:[%s14206_s9 + $0x1140] ss:$8 sps:$4 sm:$0xff]   ;;  %v12471_v2 = vld [vmem:[%s14206_s9 + $0x754] ss:$8 sps:$4 sm:$0xff]  }
 0x2ff   : > { %10470 = vmatprep.subr.bf16.mxu0 %v12378_v3  ;;  %v12474_v3 = vld [vmem:[%s14206_s9 + $0x1154] ss:$8 sps:$4 sm:$0xff]  }
 0x301   : > { %10041 = vmatpush1.bf16.msra.mxu1 %v12373_v4  ;;  %v12469_v4 = vld [vmem:[%s14206_s9 + $0x750] ss:$8 sps:$4 sm:$0xff]  }
 0x302   : > { %10471 = vmatpush1.bf16.msra.mxu0 %v12376_v5  ;;  %10042 = vmatprep.subr.bf16.mxu1 %v12381_v6  ;;  %v12472_v5 = vld [vmem:[%s14206_s9 + $0x1150] ss:$8 sps:$4 sm:$0xff]   ;;  %v12477_v6 = vld [vmem:[%s14206_s9 + $0x764] ss:$8 sps:$4 sm:$0xff]  }
 0x303   : > { %10472 = vmatprep.subr.bf16.mxu0 %v12384_v7  ;;  %v12480_v7 = vld [vmem:[%s14206_s9 + $0x1164] ss:$8 sps:$4 sm:$0xff]  }
 0x305   : > { %10043 = vmatpush1.bf16.msra.mxu1 %v12379_v8  ;;  %v12475_v8 = vld [vmem:[%s14206_s9 + $0x760] ss:$8 sps:$4 sm:$0xff]  }
 0x306   : > { %10473 = vmatpush1.bf16.msra.mxu0 %v12382_v9  ;;  %10044 = vmatprep.subr.bf16.mxu1 %v12387_v10  ;;  %v12478_v9 = vld [vmem:[%s14206_s9 + $0x1160] ss:$8 sps:$4 sm:$0xff]   ;;  %v12483_v10 = vld [vmem:[%s14206_s9 + $0x774] ss:$8 sps:$4 sm:$0xff]  }
 0x307   : > { %10474 = vmatprep.subr.bf16.mxu0 %v12390_v11  ;;  %v12486_v11 = vld [vmem:[%s14206_s9 + $0x1174] ss:$8 sps:$4 sm:$0xff]  }
 0x309   : > { %10045 = vmatpush1.bf16.msra.mxu1 %v12385_v12  ;;  %v12481_v12 = vld [vmem:[%s14206_s9 + $0x770] ss:$8 sps:$4 sm:$0xff]  }
 0x30a   : > { %10475 = vmatpush1.bf16.msra.mxu0 %v12388_v13  ;;  %10046 = vmatprep.subr.bf16.mxu1 %v12393_v14  ;;  %v12484_v13 = vld [vmem:[%s14206_s9 + $0x1170] ss:$8 sps:$4 sm:$0xff]   ;;  %v12489_v14 = vld [vmem:[%s14206_s9 + $0x784] ss:$8 sps:$4 sm:$0xff]  }
 0x30b   : > { %10476 = vmatprep.subr.bf16.mxu0 %v12396_v15  ;;  %v12492_v15 = vld [vmem:[%s14206_s9 + $0x1184] ss:$8 sps:$4 sm:$0xff]  }
 0x30d   : > { %10047 = vmatpush1.bf16.msra.mxu1 %v12391_v16  ;;  %v12487_v16 = vld [vmem:[%s14206_s9 + $0x780] ss:$8 sps:$4 sm:$0xff]  }
 0x30e   : > { %10477 = vmatpush1.bf16.msra.mxu0 %v12394_v17  ;;  %10048 = vmatprep.subr.bf16.mxu1 %v12399_v18  ;;  %v12490_v17 = vld [vmem:[%s14206_s9 + $0x1180] ss:$8 sps:$4 sm:$0xff]   ;;  %v12495_v18 = vld [vmem:[%s14206_s9 + $0x794] ss:$8 sps:$4 sm:$0xff]  }
 0x30f   : > { %10478 = vmatprep.subr.bf16.mxu0 %v12402_v19  ;;  %v12498_v19 = vld [vmem:[%s14206_s9 + $0x1194] ss:$8 sps:$4 sm:$0xff]  }
 0x311   : > { %10049 = vmatpush1.bf16.msra.mxu1 %v12397_v20  ;;  %v12493_v20 = vld [vmem:[%s14206_s9 + $0x790] ss:$8 sps:$4 sm:$0xff]  }
 0x312   : > { %10479 = vmatpush1.bf16.msra.mxu0 %v12400_v21  ;;  %10050 = vmatprep.subr.bf16.mxu1 %v12405_v22  ;;  %v12496_v21 = vld [vmem:[%s14206_s9 + $0x1190] ss:$8 sps:$4 sm:$0xff]   ;;  %v12501_v22 = vld [vmem:[%s14206_s9 + $0x7a4] ss:$8 sps:$4 sm:$0xff]  }
 0x313   : > { %10480 = vmatprep.subr.bf16.mxu0 %v12408_v23  ;;  %v12504_v23 = vld [vmem:[%s14206_s9 + $0x11a4] ss:$8 sps:$4 sm:$0xff]  }
 0x315   : > { %10051 = vmatpush1.bf16.msra.mxu1 %v12403_v24  ;;  %v12499_v24 = vld [vmem:[%s14206_s9 + $0x7a0] ss:$8 sps:$4 sm:$0xff]  }
 0x316   : > { %10481 = vmatpush1.bf16.msra.mxu0 %v12406_v25  ;;  %10052 = vmatprep.subr.bf16.mxu1 %v12411_v26  ;;  %v12502_v25 = vld [vmem:[%s14206_s9 + $0x11a0] ss:$8 sps:$4 sm:$0xff]   ;;  %v12507_v26 = vld [vmem:[%s14206_s9 + $0x7b4] ss:$8 sps:$4 sm:$0xff]  }
 0x317   : > { %10482 = vmatprep.subr.bf16.mxu0 %v12414_v27  ;;  %v12510_v27 = vld [vmem:[%s14206_s9 + $0x11b4] ss:$8 sps:$4 sm:$0xff]  }
 0x319   : > { %10053 = vmatpush1.bf16.msra.mxu1 %v12409_v28  ;;  %v12505_v28 = vld [vmem:[%s14206_s9 + $0x7b0] ss:$8 sps:$4 sm:$0xff]  }
 0x31a   : > { %10483 = vmatpush1.bf16.msra.mxu0 %v12412_v29  ;;  %10054 = vmatprep.subr.bf16.mxu1 %v12417_v30  ;;  %v12508_v29 = vld [vmem:[%s14206_s9 + $0x11b0] ss:$8 sps:$4 sm:$0xff]   ;;  %v12513_v30 = vld [vmem:[%s14206_s9 + $0x7c4] ss:$8 sps:$4 sm:$0xff]  }
 0x31b   : > { %10484 = vmatprep.subr.bf16.mxu0 %v12420_v31  ;;  %v12516_v31 = vld [vmem:[%s14206_s9 + $0x11c4] ss:$8 sps:$4 sm:$0xff]  }
 0x31d   : > { %10055 = vmatpush1.bf16.msra.mxu1 %v12415_v32  ;;  %v12511_v32 = vld [vmem:[%s14206_s9 + $0x7c0] ss:$8 sps:$4 sm:$0xff]  }
 0x31e   : > { %10485 = vmatpush1.bf16.msra.mxu0 %v12418_v33  ;;  %10056 = vmatprep.subr.bf16.mxu1 %v12423_v34  ;;  %v12514_v33 = vld [vmem:[%s14206_s9 + $0x11c0] ss:$8 sps:$4 sm:$0xff]   ;;  %v12519_v34 = vld [vmem:[%s14206_s9 + $0x7d4] ss:$8 sps:$4 sm:$0xff]  }
 0x31f   : > { %10486 = vmatprep.subr.bf16.mxu0 %v12426_v35  ;;  %v12522_v35 = vld [vmem:[%s14206_s9 + $0x11d4] ss:$8 sps:$4 sm:$0xff]  }
 0x321   : > { %10057 = vmatpush1.bf16.msra.mxu1 %v12421_v36  ;;  %v12517_v36 = vld [vmem:[%s14206_s9 + $0x7d0] ss:$8 sps:$4 sm:$0xff]  }
 0x322   : > { %10487 = vmatpush1.bf16.msra.mxu0 %v12424_v37  ;;  %10058 = vmatprep.subr.bf16.mxu1 %v12429_v38  ;;  %v12520_v37 = vld [vmem:[%s14206_s9 + $0x11d0] ss:$8 sps:$4 sm:$0xff]   ;;  %v12525_v38 = vld [vmem:[%s14206_s9 + $0x7e4] ss:$8 sps:$4 sm:$0xff]  }
 0x323   : > { %10488 = vmatprep.subr.bf16.mxu0 %v12432_v39  ;;  %v12528_v39 = vld [vmem:[%s14206_s9 + $0x11e4] ss:$8 sps:$4 sm:$0xff]  }
 0x325   : > { %10059 = vmatpush1.bf16.msra.mxu1 %v12427_v40  ;;  %v12523_v40 = vld [vmem:[%s14206_s9 + $0x7e0] ss:$8 sps:$4 sm:$0xff]  }
 0x326   : > { %10489 = vmatpush1.bf16.msra.mxu0 %v12430_v41  ;;  %10071 = vmatprep.subr.bf16.mxu1 %v12438_v42  ;;  %v12526_v41 = vld [vmem:[%s14206_s9 + $0x11e0] ss:$8 sps:$4 sm:$0xff]   ;;  %v12531_v42 = vld [vmem:[%s14206_s9 + $0x7f4] ss:$8 sps:$4 sm:$0xff]  }
 0x327   : > { %10501 = vmatprep.subr.bf16.mxu0 %v12444_v43  ;;  %v12534_v43 = vld [vmem:[%s14206_s9 + $0x11f4] ss:$8 sps:$4 sm:$0xff]  }
 0x328   : > { %10061 = vmatmul.mubr.bf16.vlgmr.msra.gmra.mrb[0].mxu1 %v12433_v44  ;;  %v12529_v44 = vld [vmem:[%s14206_s9 + $0x7f0] ss:$8 sps:$4 sm:$0xff]  }
 0x329   : > { %10491 = vmatmul.mubr.bf16.vlgmr.msra.gmra.mrb[0].mxu0 %v12439_v45  ;;  %10072 = vmatpush1.bf16.msra.mxu1 %v12436_v46  ;;  %v12532_v45 = vld [vmem:[%s14206_s9 + $0x11f0] ss:$8 sps:$4 sm:$0xff]   ;;  %v12540_v46 = vld [vmem:[%s14206_s9 + $0x804] ss:$8 sps:$4 sm:$0xff]  }
 0x32a   : > { %10502 = vmatpush1.bf16.msra.mxu0 %v12442_v47  ;;  %10073 = vmatprep.subr.bf16.mxu1 %v12447_v48  ;;  %v12546_v47 = vld [vmem:[%s14206_s9 + $0x1204] ss:$8 sps:$4 sm:$0xff]   ;;  %v12535_v48 = vld [vmem:[%s15008_s0 + $0x38] ss:$164 sps:$4 sm:$0xff]  }
 0x32b   : > { %10503 = vmatprep.subr.bf16.mxu0 %v12450_v49  ;;  %10103 = vmatprep.mubr.bf16.mxu1 %v12537_v50  ;;  %v12541_v49 = vld [vmem:[%s15008_s0 + $0x88] ss:$164 sps:$4 sm:$0xff]  }
 0x32c   : > { %10533 = vmatprep.mubr.bf16.mxu0 %v12543_v51  ;;  %v12538_v50 = vld [vmem:[%s14206_s9 + $0x800] ss:$8 sps:$4 sm:$0xff]  }
 0x32d   : > { %10074 = vmatpush1.bf16.msra.mxu1 %v12445_v52  ;;  %v12544_v51 = vld [vmem:[%s14206_s9 + $0x1200] ss:$8 sps:$4 sm:$0xff]   ;;  %v12549_v52 = vld [vmem:[%s14206_s9 + $0x814] ss:$8 sps:$4 sm:$0xff]  }
 0x32e   : > { %10504 = vmatpush1.bf16.msra.mxu0 %v12448_v53  ;;  %10075 = vmatprep.subr.bf16.mxu1 %v12453_v54  ;;  %v12552_v53 = vld [vmem:[%s14206_s9 + $0x1214] ss:$8 sps:$4 sm:$0xff]   ;;  %v12639_v54 = vld [vmem:[%s15008_s0 + $0x44] ss:$164 sps:$4 sm:$0xff]  }
 0x32f   : > { %10505 = vmatprep.subr.bf16.mxu0 %v12456_v55  ;;  %v12645_v55 = vld [vmem:[%s15008_s0 + $0x94] ss:$164 sps:$4 sm:$0xff]  }
 0x331   : > { %10076 = vmatpush1.bf16.msra.mxu1 %v12451_v56  ;;  %v12547_v56 = vld [vmem:[%s14206_s9 + $0x810] ss:$8 sps:$4 sm:$0xff]  }
 0x332   : > { %10506 = vmatpush1.bf16.msra.mxu0 %v12454_v57  ;;  %10077 = vmatprep.subr.bf16.mxu1 %v12459_v58  ;;  %v12550_v57 = vld [vmem:[%s14206_s9 + $0x1210] ss:$8 sps:$4 sm:$0xff]   ;;  %v12555_v58 = vld [vmem:[%s14206_s9 + $0x824] ss:$8 sps:$4 sm:$0xff]  }
 0x333   : > { %10507 = vmatprep.subr.bf16.mxu0 %v12462_v59  ;;  %v12558_v59 = vld [vmem:[%s14206_s9 + $0x1224] ss:$8 sps:$4 sm:$0xff]  }
 0x335   : > { %10078 = vmatpush1.bf16.msra.mxu1 %v12457_v60  ;;  %v12553_v60 = vld [vmem:[%s14206_s9 + $0x820] ss:$8 sps:$4 sm:$0xff]  }
 0x336   : > { %10508 = vmatpush1.bf16.msra.mxu0 %v12460_v61  ;;  %10079 = vmatprep.subr.bf16.mxu1 %v12465_v62  ;;  %v12556_v61 = vld [vmem:[%s14206_s9 + $0x1220] ss:$8 sps:$4 sm:$0xff]   ;;  %v12561_v62 = vld [vmem:[%s14206_s9 + $0x834] ss:$8 sps:$4 sm:$0xff]  }
 0x337   : > { %10509 = vmatprep.subr.bf16.mxu0 %v12468_v63  ;;  %v12564_v63 = vld [vmem:[%s14206_s9 + $0x1234] ss:$8 sps:$4 sm:$0xff]  }
 0x339   : > { %10080 = vmatpush1.bf16.msra.mxu1 %v12463_v0  ;;  %v12559_v0 = vld [vmem:[%s14206_s9 + $0x830] ss:$8 sps:$4 sm:$0xff]  }
 0x33a   : > { %10510 = vmatpush1.bf16.msra.mxu0 %v12466_v1  ;;  %10081 = vmatprep.subr.bf16.mxu1 %v12471_v2  ;;  %v12562_v1 = vld [vmem:[%s14206_s9 + $0x1230] ss:$8 sps:$4 sm:$0xff]   ;;  %v12567_v2 = vld [vmem:[%s14206_s9 + $0x844] ss:$8 sps:$4 sm:$0xff]  }
 0x33b   : > { %10511 = vmatprep.subr.bf16.mxu0 %v12474_v3  ;;  %v12570_v3 = vld [vmem:[%s14206_s9 + $0x1244] ss:$8 sps:$4 sm:$0xff]  }
 0x33d   : > { %10082 = vmatpush1.bf16.msra.mxu1 %v12469_v4  ;;  %v12565_v4 = vld [vmem:[%s14206_s9 + $0x840] ss:$8 sps:$4 sm:$0xff]  }
 0x33e   : > { %10512 = vmatpush1.bf16.msra.mxu0 %v12472_v5  ;;  %10083 = vmatprep.subr.bf16.mxu1 %v12477_v6  ;;  %v12568_v5 = vld [vmem:[%s14206_s9 + $0x1240] ss:$8 sps:$4 sm:$0xff]   ;;  %v12573_v6 = vld [vmem:[%s14206_s9 + $0x854] ss:$8 sps:$4 sm:$0xff]  }
 0x33f   : > { %10513 = vmatprep.subr.bf16.mxu0 %v12480_v7  ;;  %v12576_v7 = vld [vmem:[%s14206_s9 + $0x1254] ss:$8 sps:$4 sm:$0xff]  }
 0x341   : > { %10084 = vmatpush1.bf16.msra.mxu1 %v12475_v8  ;;  %v12571_v8 = vld [vmem:[%s14206_s9 + $0x850] ss:$8 sps:$4 sm:$0xff]  }
 0x342   : > { %10514 = vmatpush1.bf16.msra.mxu0 %v12478_v9  ;;  %10085 = vmatprep.subr.bf16.mxu1 %v12483_v10  ;;  %v12574_v9 = vld [vmem:[%s14206_s9 + $0x1250] ss:$8 sps:$4 sm:$0xff]   ;;  %v12579_v10 = vld [vmem:[%s14206_s9 + $0x864] ss:$8 sps:$4 sm:$0xff]  }
 0x343   : > { %10515 = vmatprep.subr.bf16.mxu0 %v12486_v11  ;;  %v12582_v11 = vld [vmem:[%s14206_s9 + $0x1264] ss:$8 sps:$4 sm:$0xff]  }
 0x345   : > { %10086 = vmatpush1.bf16.msra.mxu1 %v12481_v12  ;;  %v12577_v12 = vld [vmem:[%s14206_s9 + $0x860] ss:$8 sps:$4 sm:$0xff]  }
 0x346   : > { %10516 = vmatpush1.bf16.msra.mxu0 %v12484_v13  ;;  %10087 = vmatprep.subr.bf16.mxu1 %v12489_v14  ;;  %v12580_v13 = vld [vmem:[%s14206_s9 + $0x1260] ss:$8 sps:$4 sm:$0xff]   ;;  %v12585_v14 = vld [vmem:[%s14206_s9 + $0x874] ss:$8 sps:$4 sm:$0xff]  }
 0x347   : > { %10517 = vmatprep.subr.bf16.mxu0 %v12492_v15  ;;  %v12588_v15 = vld [vmem:[%s14206_s9 + $0x1274] ss:$8 sps:$4 sm:$0xff]  }
 0x349   : > { %10088 = vmatpush1.bf16.msra.mxu1 %v12487_v16  ;;  %v12583_v16 = vld [vmem:[%s14206_s9 + $0x870] ss:$8 sps:$4 sm:$0xff]  }
 0x34a   : > { %10518 = vmatpush1.bf16.msra.mxu0 %v12490_v17  ;;  %10089 = vmatprep.subr.bf16.mxu1 %v12495_v18  ;;  %v12586_v17 = vld [vmem:[%s14206_s9 + $0x1270] ss:$8 sps:$4 sm:$0xff]   ;;  %v12591_v18 = vld [vmem:[%s14206_s9 + $0x884] ss:$8 sps:$4 sm:$0xff]  }
 0x34b   : > { %10519 = vmatprep.subr.bf16.mxu0 %v12498_v19  ;;  %v12594_v19 = vld [vmem:[%s14206_s9 + $0x1284] ss:$8 sps:$4 sm:$0xff]  }
 0x34d   : > { %10090 = vmatpush1.bf16.msra.mxu1 %v12493_v20  ;;  %v12589_v20 = vld [vmem:[%s14206_s9 + $0x880] ss:$8 sps:$4 sm:$0xff]  }
 0x34e   : > { %10520 = vmatpush1.bf16.msra.mxu0 %v12496_v21  ;;  %10091 = vmatprep.subr.bf16.mxu1 %v12501_v22  ;;  %v12592_v21 = vld [vmem:[%s14206_s9 + $0x1280] ss:$8 sps:$4 sm:$0xff]   ;;  %v12597_v22 = vld [vmem:[%s14206_s9 + $0x894] ss:$8 sps:$4 sm:$0xff]  }
 0x34f   : > { %10521 = vmatprep.subr.bf16.mxu0 %v12504_v23  ;;  %v12600_v23 = vld [vmem:[%s14206_s9 + $0x1294] ss:$8 sps:$4 sm:$0xff]  }
 0x351   : > { %10092 = vmatpush1.bf16.msra.mxu1 %v12499_v24  ;;  %v12595_v24 = vld [vmem:[%s14206_s9 + $0x890] ss:$8 sps:$4 sm:$0xff]  }
 0x352   : > { %10522 = vmatpush1.bf16.msra.mxu0 %v12502_v25  ;;  %10093 = vmatprep.subr.bf16.mxu1 %v12507_v26  ;;  %v12598_v25 = vld [vmem:[%s14206_s9 + $0x1290] ss:$8 sps:$4 sm:$0xff]   ;;  %v12603_v26 = vld [vmem:[%s14206_s9 + $0x8a4] ss:$8 sps:$4 sm:$0xff]  }
 0x353   : > { %10523 = vmatprep.subr.bf16.mxu0 %v12510_v27  ;;  %v12606_v27 = vld [vmem:[%s14206_s9 + $0x12a4] ss:$8 sps:$4 sm:$0xff]  }
 0x355   : > { %10094 = vmatpush1.bf16.msra.mxu1 %v12505_v28  ;;  %v12601_v28 = vld [vmem:[%s14206_s9 + $0x8a0] ss:$8 sps:$4 sm:$0xff]  }
 0x356   : > { %10524 = vmatpush1.bf16.msra.mxu0 %v12508_v29  ;;  %10095 = vmatprep.subr.bf16.mxu1 %v12513_v30  ;;  %v12604_v29 = vld [vmem:[%s14206_s9 + $0x12a0] ss:$8 sps:$4 sm:$0xff]   ;;  %v12609_v30 = vld [vmem:[%s14206_s9 + $0x8b4] ss:$8 sps:$4 sm:$0xff]  }
 0x357   : > { %10525 = vmatprep.subr.bf16.mxu0 %v12516_v31  ;;  %v12612_v31 = vld [vmem:[%s14206_s9 + $0x12b4] ss:$8 sps:$4 sm:$0xff]  }
 0x359   : > { %10096 = vmatpush1.bf16.msra.mxu1 %v12511_v32  ;;  %v12607_v32 = vld [vmem:[%s14206_s9 + $0x8b0] ss:$8 sps:$4 sm:$0xff]  }
 0x35a   : > { %10526 = vmatpush1.bf16.msra.mxu0 %v12514_v33  ;;  %10097 = vmatprep.subr.bf16.mxu1 %v12519_v34  ;;  %v12610_v33 = vld [vmem:[%s14206_s9 + $0x12b0] ss:$8 sps:$4 sm:$0xff]   ;;  %v12615_v34 = vld [vmem:[%s14206_s9 + $0x8c4] ss:$8 sps:$4 sm:$0xff]  }
 0x35b   : > { %10527 = vmatprep.subr.bf16.mxu0 %v12522_v35  ;;  %v12618_v35 = vld [vmem:[%s14206_s9 + $0x12c4] ss:$8 sps:$4 sm:$0xff]  }
 0x35d   : > { %10098 = vmatpush1.bf16.msra.mxu1 %v12517_v36  ;;  %v12613_v36 = vld [vmem:[%s14206_s9 + $0x8c0] ss:$8 sps:$4 sm:$0xff]  }
 0x35e   : > { %10528 = vmatpush1.bf16.msra.mxu0 %v12520_v37  ;;  %10099 = vmatprep.subr.bf16.mxu1 %v12525_v38  ;;  %v12616_v37 = vld [vmem:[%s14206_s9 + $0x12c0] ss:$8 sps:$4 sm:$0xff]   ;;  %v12621_v38 = vld [vmem:[%s14206_s9 + $0x8d4] ss:$8 sps:$4 sm:$0xff]  }
 0x35f   : > { %10529 = vmatprep.subr.bf16.mxu0 %v12528_v39  ;;  %v12624_v39 = vld [vmem:[%s14206_s9 + $0x12d4] ss:$8 sps:$4 sm:$0xff]  }
 0x361   : > { %10100 = vmatpush1.bf16.msra.mxu1 %v12523_v40  ;;  %v12619_v40 = vld [vmem:[%s14206_s9 + $0x8d0] ss:$8 sps:$4 sm:$0xff]  }
 0x362   : > { %10530 = vmatpush1.bf16.msra.mxu0 %v12526_v41  ;;  %10101 = vmatprep.subr.bf16.mxu1 %v12531_v42  ;;  %v12622_v41 = vld [vmem:[%s14206_s9 + $0x12d0] ss:$8 sps:$4 sm:$0xff]   ;;  %v12627_v42 = vld [vmem:[%s14206_s9 + $0x8e4] ss:$8 sps:$4 sm:$0xff]  }
 0x363   : > { %10531 = vmatprep.subr.bf16.mxu0 %v12534_v43  ;;  %v12630_v43 = vld [vmem:[%s14206_s9 + $0x12e4] ss:$8 sps:$4 sm:$0xff]  }
 0x365   : > { %10102 = vmatpush1.bf16.msra.mxu1 %v12529_v44  ;;  %v12625_v44 = vld [vmem:[%s14206_s9 + $0x8e0] ss:$8 sps:$4 sm:$0xff]  }
 0x366   : > { %10532 = vmatpush1.bf16.msra.mxu0 %v12532_v45  ;;  %10114 = vmatprep.subr.bf16.mxu1 %v12540_v46  ;;  %v12628_v45 = vld [vmem:[%s14206_s9 + $0x12e0] ss:$8 sps:$4 sm:$0xff]   ;;  %v12633_v46 = vld [vmem:[%s14206_s9 + $0x8f4] ss:$8 sps:$4 sm:$0xff]  }
 0x367   : > { %10544 = vmatprep.subr.bf16.mxu0 %v12546_v47  ;;  %v12636_v47 = vld [vmem:[%s14206_s9 + $0x12f4] ss:$8 sps:$4 sm:$0xff]  }
 0x368   : > { %10104 = vmatmul.mubr.bf16.vlgmr.msra.gmra.mrb[0].mxu1 %v12535_v48  ;;  %v12631_v48 = vld [vmem:[%s14206_s9 + $0x8f0] ss:$8 sps:$4 sm:$0xff]  }
 0x369   : > { %10534 = vmatmul.mubr.bf16.vlgmr.msra.gmra.mrb[0].mxu0 %v12541_v49  ;;  %10115 = vmatpush1.bf16.msra.mxu1 %v12538_v50  ;;  %v12634_v49 = vld [vmem:[%s14206_s9 + $0x12f0] ss:$8 sps:$4 sm:$0xff]   ;;  %v12642_v50 = vld [vmem:[%s14206_s9 + $0x904] ss:$8 sps:$4 sm:$0xff]  }
 0x36a   : > { %10545 = vmatpush1.bf16.msra.mxu0 %v12544_v51  ;;  %10116 = vmatprep.subr.bf16.mxu1 %v12549_v52  ;;  %v12648_v51 = vld [vmem:[%s14206_s9 + $0x1304] ss:$8 sps:$4 sm:$0xff]  }
 0x36b   : > { %10546 = vmatprep.subr.bf16.mxu0 %v12552_v53  ;;  %10146 = vmatprep.mubr.bf16.mxu1 %v12639_v54  ;;  %v12637_v52 = vld [vmem:[%s15008_s0 + $0x40] ss:$164 sps:$4 sm:$0xff]   ;;  %v12643_v53 = vld [vmem:[%s15008_s0 + $0x90] ss:$164 sps:$4 sm:$0xff]  }
 0x36c   : > { %10576 = vmatprep.mubr.bf16.mxu0 %v12645_v55  ;;  %v12640_v54 = vld [vmem:[%s14206_s9 + $0x900] ss:$8 sps:$4 sm:$0xff]  }
 0x36d   : > { %10117 = vmatpush1.bf16.msra.mxu1 %v12547_v56  ;;  %v12646_v55 = vld [vmem:[%s14206_s9 + $0x1300] ss:$8 sps:$4 sm:$0xff]   ;;  %v12651_v56 = vld [vmem:[%s14206_s9 + $0x914] ss:$8 sps:$4 sm:$0xff]  }
 0x36e   : > { %10547 = vmatpush1.bf16.msra.mxu0 %v12550_v57  ;;  %10118 = vmatprep.subr.bf16.mxu1 %v12555_v58  ;;  %v12654_v57 = vld [vmem:[%s14206_s9 + $0x1314] ss:$8 sps:$4 sm:$0xff]   ;;  %v12741_v58 = vld [vmem:[%s15008_s0 + $0x4c] ss:$164 sps:$4 sm:$0xff]  }
 0x36f   : > { %10548 = vmatprep.subr.bf16.mxu0 %v12558_v59  ;;  %v12744_v59 = vld [vmem:[%s15008_s0 + $0x9c] ss:$164 sps:$4 sm:$0xff]  }
 0x371   : > { %10119 = vmatpush1.bf16.msra.mxu1 %v12553_v60  ;;  %v12649_v60 = vld [vmem:[%s14206_s9 + $0x910] ss:$8 sps:$4 sm:$0xff]  }
 0x372   : > { %10549 = vmatpush1.bf16.msra.mxu0 %v12556_v61  ;;  %10120 = vmatprep.subr.bf16.mxu1 %v12561_v62  ;;  %v12652_v61 = vld [vmem:[%s14206_s9 + $0x1310] ss:$8 sps:$4 sm:$0xff]   ;;  %v12657_v62 = vld [vmem:[%s14206_s9 + $0x924] ss:$8 sps:$4 sm:$0xff]  }
 0x373   : > { %10550 = vmatprep.subr.bf16.mxu0 %v12564_v63  ;;  %v12660_v63 = vld [vmem:[%s14206_s9 + $0x1324] ss:$8 sps:$4 sm:$0xff]  }
 0x375   : > { %10121 = vmatpush1.bf16.msra.mxu1 %v12559_v0  ;;  %v12655_v0 = vld [vmem:[%s14206_s9 + $0x920] ss:$8 sps:$4 sm:$0xff]  }
 0x376   : > { %10551 = vmatpush1.bf16.msra.mxu0 %v12562_v1  ;;  %10122 = vmatprep.subr.bf16.mxu1 %v12567_v2  ;;  %v12658_v1 = vld [vmem:[%s14206_s9 + $0x1320] ss:$8 sps:$4 sm:$0xff]   ;;  %v12663_v2 = vld [vmem:[%s14206_s9 + $0x934] ss:$8 sps:$4 sm:$0xff]  }
 0x377   : > { %10552 = vmatprep.subr.bf16.mxu0 %v12570_v3  ;;  %v12666_v3 = vld [vmem:[%s14206_s9 + $0x1334] ss:$8 sps:$4 sm:$0xff]  }
 0x379   : > { %10123 = vmatpush1.bf16.msra.mxu1 %v12565_v4  ;;  %v12661_v4 = vld [vmem:[%s14206_s9 + $0x930] ss:$8 sps:$4 sm:$0xff]  }
 0x37a   : > { %10553 = vmatpush1.bf16.msra.mxu0 %v12568_v5  ;;  %10124 = vmatprep.subr.bf16.mxu1 %v12573_v6  ;;  %v12664_v5 = vld [vmem:[%s14206_s9 + $0x1330] ss:$8 sps:$4 sm:$0xff]   ;;  %v12669_v6 = vld [vmem:[%s14206_s9 + $0x944] ss:$8 sps:$4 sm:$0xff]  }
 0x37b   : > { %10554 = vmatprep.subr.bf16.mxu0 %v12576_v7  ;;  %v12672_v7 = vld [vmem:[%s14206_s9 + $0x1344] ss:$8 sps:$4 sm:$0xff]  }
 0x37d   : > { %10125 = vmatpush1.bf16.msra.mxu1 %v12571_v8  ;;  %v12667_v8 = vld [vmem:[%s14206_s9 + $0x940] ss:$8 sps:$4 sm:$0xff]  }
 0x37e   : > { %10555 = vmatpush1.bf16.msra.mxu0 %v12574_v9  ;;  %10126 = vmatprep.subr.bf16.mxu1 %v12579_v10  ;;  %v12670_v9 = vld [vmem:[%s14206_s9 + $0x1340] ss:$8 sps:$4 sm:$0xff]   ;;  %v12675_v10 = vld [vmem:[%s14206_s9 + $0x954] ss:$8 sps:$4 sm:$0xff]  }
 0x37f   : > { %10556 = vmatprep.subr.bf16.mxu0 %v12582_v11  ;;  %v12678_v11 = vld [vmem:[%s14206_s9 + $0x1354] ss:$8 sps:$4 sm:$0xff]  }
 0x381   : > { %10127 = vmatpush1.bf16.msra.mxu1 %v12577_v12  ;;  %v12673_v12 = vld [vmem:[%s14206_s9 + $0x950] ss:$8 sps:$4 sm:$0xff]  }
 0x382   : > { %10557 = vmatpush1.bf16.msra.mxu0 %v12580_v13  ;;  %10128 = vmatprep.subr.bf16.mxu1 %v12585_v14  ;;  %v12676_v13 = vld [vmem:[%s14206_s9 + $0x1350] ss:$8 sps:$4 sm:$0xff]   ;;  %v12681_v14 = vld [vmem:[%s14206_s9 + $0x964] ss:$8 sps:$4 sm:$0xff]  }
 0x383   : > { %10558 = vmatprep.subr.bf16.mxu0 %v12588_v15  ;;  %v12684_v15 = vld [vmem:[%s14206_s9 + $0x1364] ss:$8 sps:$4 sm:$0xff]  }
 0x385   : > { %10129 = vmatpush1.bf16.msra.mxu1 %v12583_v16  ;;  %v12679_v16 = vld [vmem:[%s14206_s9 + $0x960] ss:$8 sps:$4 sm:$0xff]  }
 0x386   : > { %10559 = vmatpush1.bf16.msra.mxu0 %v12586_v17  ;;  %10130 = vmatprep.subr.bf16.mxu1 %v12591_v18  ;;  %v12682_v17 = vld [vmem:[%s14206_s9 + $0x1360] ss:$8 sps:$4 sm:$0xff]   ;;  %v12687_v18 = vld [vmem:[%s14206_s9 + $0x974] ss:$8 sps:$4 sm:$0xff]  }
 0x387   : > { %10560 = vmatprep.subr.bf16.mxu0 %v12594_v19  ;;  %v12690_v19 = vld [vmem:[%s14206_s9 + $0x1374] ss:$8 sps:$4 sm:$0xff]  }
 0x389   : > { %10131 = vmatpush1.bf16.msra.mxu1 %v12589_v20  ;;  %v12685_v20 = vld [vmem:[%s14206_s9 + $0x970] ss:$8 sps:$4 sm:$0xff]  }
 0x38a   : > { %10561 = vmatpush1.bf16.msra.mxu0 %v12592_v21  ;;  %10132 = vmatprep.subr.bf16.mxu1 %v12597_v22  ;;  %v12688_v21 = vld [vmem:[%s14206_s9 + $0x1370] ss:$8 sps:$4 sm:$0xff]   ;;  %v12693_v22 = vld [vmem:[%s14206_s9 + $0x984] ss:$8 sps:$4 sm:$0xff]  }
 0x38b   : > { %10562 = vmatprep.subr.bf16.mxu0 %v12600_v23  ;;  %v12696_v23 = vld [vmem:[%s14206_s9 + $0x1384] ss:$8 sps:$4 sm:$0xff]  }
 0x38d   : > { %10133 = vmatpush1.bf16.msra.mxu1 %v12595_v24  ;;  %v12691_v24 = vld [vmem:[%s14206_s9 + $0x980] ss:$8 sps:$4 sm:$0xff]  }
 0x38e   : > { %10563 = vmatpush1.bf16.msra.mxu0 %v12598_v25  ;;  %10134 = vmatprep.subr.bf16.mxu1 %v12603_v26  ;;  %v12694_v25 = vld [vmem:[%s14206_s9 + $0x1380] ss:$8 sps:$4 sm:$0xff]   ;;  %v12699_v26 = vld [vmem:[%s14206_s9 + $0x994] ss:$8 sps:$4 sm:$0xff]  }
 0x38f   : > { %10564 = vmatprep.subr.bf16.mxu0 %v12606_v27  ;;  %v12702_v27 = vld [vmem:[%s14206_s9 + $0x1394] ss:$8 sps:$4 sm:$0xff]  }
 0x391   : > { %10135 = vmatpush1.bf16.msra.mxu1 %v12601_v28  ;;  %v12697_v28 = vld [vmem:[%s14206_s9 + $0x990] ss:$8 sps:$4 sm:$0xff]  }
 0x392   : > { %10565 = vmatpush1.bf16.msra.mxu0 %v12604_v29  ;;  %10136 = vmatprep.subr.bf16.mxu1 %v12609_v30  ;;  %v12700_v29 = vld [vmem:[%s14206_s9 + $0x1390] ss:$8 sps:$4 sm:$0xff]   ;;  %v12705_v30 = vld [vmem:[%s14206_s9 + $0x9a4] ss:$8 sps:$4 sm:$0xff]  }
 0x393   : > { %10566 = vmatprep.subr.bf16.mxu0 %v12612_v31  ;;  %v12708_v31 = vld [vmem:[%s14206_s9 + $0x13a4] ss:$8 sps:$4 sm:$0xff]  }
 0x395   : > { %10137 = vmatpush1.bf16.msra.mxu1 %v12607_v32  ;;  %v12703_v32 = vld [vmem:[%s14206_s9 + $0x9a0] ss:$8 sps:$4 sm:$0xff]  }
 0x396   : > { %10567 = vmatpush1.bf16.msra.mxu0 %v12610_v33  ;;  %10138 = vmatprep.subr.bf16.mxu1 %v12615_v34  ;;  %v12706_v33 = vld [vmem:[%s14206_s9 + $0x13a0] ss:$8 sps:$4 sm:$0xff]   ;;  %v12711_v34 = vld [vmem:[%s14206_s9 + $0x9b4] ss:$8 sps:$4 sm:$0xff]  }
 0x397   : > { %10568 = vmatprep.subr.bf16.mxu0 %v12618_v35  ;;  %v12714_v35 = vld [vmem:[%s14206_s9 + $0x13b4] ss:$8 sps:$4 sm:$0xff]  }
 0x399   : > { %10139 = vmatpush1.bf16.msra.mxu1 %v12613_v36  ;;  %v12709_v36 = vld [vmem:[%s14206_s9 + $0x9b0] ss:$8 sps:$4 sm:$0xff]  }
 0x39a   : > { %10569 = vmatpush1.bf16.msra.mxu0 %v12616_v37  ;;  %10140 = vmatprep.subr.bf16.mxu1 %v12621_v38  ;;  %v12712_v37 = vld [vmem:[%s14206_s9 + $0x13b0] ss:$8 sps:$4 sm:$0xff]   ;;  %v12717_v38 = vld [vmem:[%s14206_s9 + $0x9c4] ss:$8 sps:$4 sm:$0xff]  }
 0x39b   : > { %10570 = vmatprep.subr.bf16.mxu0 %v12624_v39  ;;  %v12720_v39 = vld [vmem:[%s14206_s9 + $0x13c4] ss:$8 sps:$4 sm:$0xff]  }
 0x39d   : > { %10141 = vmatpush1.bf16.msra.mxu1 %v12619_v40  ;;  %v12715_v40 = vld [vmem:[%s14206_s9 + $0x9c0] ss:$8 sps:$4 sm:$0xff]  }
 0x39e   : > { %10571 = vmatpush1.bf16.msra.mxu0 %v12622_v41  ;;  %10142 = vmatprep.subr.bf16.mxu1 %v12627_v42  ;;  %v12718_v41 = vld [vmem:[%s14206_s9 + $0x13c0] ss:$8 sps:$4 sm:$0xff]   ;;  %v12723_v42 = vld [vmem:[%s14206_s9 + $0x9d4] ss:$8 sps:$4 sm:$0xff]  }
 0x39f   : > { %10572 = vmatprep.subr.bf16.mxu0 %v12630_v43  ;;  %v12726_v43 = vld [vmem:[%s14206_s9 + $0x13d4] ss:$8 sps:$4 sm:$0xff]  }
 0x3a1   : > { %10143 = vmatpush1.bf16.msra.mxu1 %v12625_v44  ;;  %v12721_v44 = vld [vmem:[%s14206_s9 + $0x9d0] ss:$8 sps:$4 sm:$0xff]  }
 0x3a2   : > { %10573 = vmatpush1.bf16.msra.mxu0 %v12628_v45  ;;  %10144 = vmatprep.subr.bf16.mxu1 %v12633_v46  ;;  %v12724_v45 = vld [vmem:[%s14206_s9 + $0x13d0] ss:$8 sps:$4 sm:$0xff]   ;;  %v12729_v46 = vld [vmem:[%s14206_s9 + $0x9e4] ss:$8 sps:$4 sm:$0xff]  }
 0x3a3   : > { %10574 = vmatprep.subr.bf16.mxu0 %v12636_v47  ;;  %v12732_v47 = vld [vmem:[%s14206_s9 + $0x13e4] ss:$8 sps:$4 sm:$0xff]  }
 0x3a5   : > { %10145 = vmatpush1.bf16.msra.mxu1 %v12631_v48  ;;  %v12727_v48 = vld [vmem:[%s14206_s9 + $0x9e0] ss:$8 sps:$4 sm:$0xff]  }
 0x3a6   : > { %10575 = vmatpush1.bf16.msra.mxu0 %v12634_v49  ;;  %10157 = vmatprep.subr.bf16.mxu1 %v12642_v50  ;;  %v12730_v49 = vld [vmem:[%s14206_s9 + $0x13e0] ss:$8 sps:$4 sm:$0xff]   ;;  %v12735_v50 = vld [vmem:[%s14206_s9 + $0x9f4] ss:$8 sps:$4 sm:$0xff]  }
 0x3a7   : > { %10587 = vmatprep.subr.bf16.mxu0 %v12648_v51  ;;  %v12738_v51 = vld [vmem:[%s14206_s9 + $0x13f4] ss:$8 sps:$4 sm:$0xff]  }
 0x3a8   : > { %10147 = vmatmul.mubr.bf16.vlgmr.msra.gmra.mrb[0].mxu1 %v12637_v52  ;;  %v12733_v52 = vld [vmem:[%s14206_s9 + $0x9f0] ss:$8 sps:$4 sm:$0xff]  }
 0x3a9   : > { %10577 = vmatmul.mubr.bf16.vlgmr.msra.gmra.mrb[0].mxu0 %v12643_v53  ;;  %10158 = vmatpush1.bf16.msra.mxu1 %v12640_v54  ;;  %v12736_v53 = vld [vmem:[%s14206_s9 + $0x13f0] ss:$8 sps:$4 sm:$0xff]   ;;  %v12747_v54 = vld [vmem:[%s14206_s9 + $0x1404] ss:$8 sps:$4 sm:$0xff]  }
 0x3aa   : > { %10588 = vmatpush1.bf16.msra.mxu0 %v12646_v55  ;;  %10159 = vmatprep.subr.bf16.mxu1 %v12651_v56  ;;  %v12739_v55 = vld [vmem:[%s15008_s0 + $0x48] ss:$164 sps:$4 sm:$0xff]   ;;  %v12742_v56 = vld [vmem:[%s15008_s0 + $0x98] ss:$164 sps:$4 sm:$0xff]  }
 0x3ab   : > { %10589 = vmatprep.subr.bf16.mxu0 %v12654_v57  ;;  %10189 = vmatprep.mubr.bf16.mxu1 %v12741_v58  ;;  %v12745_v57 = vld [vmem:[%s14206_s9 + $0x1400] ss:$8 sps:$4 sm:$0xff]   ;;  %v12750_v58 = vld [vmem:[%s14206_s9 + $0x1414] ss:$8 sps:$4 sm:$0xff]  }
 0x3ac   : > { %10619 = vmatprep.mubr.bf16.mxu0 %v12744_v59  ;;  %v12748_v59 = vld [vmem:[%s14206_s9 + $0x1410] ss:$8 sps:$4 sm:$0xff]  }
 0x3ad   : > { %10160 = vmatpush1.bf16.msra.mxu1 %v12649_v60  ;;  %v12810_v60 = vmov 0  }
 0x3ae   : > { %10590 = vmatpush1.bf16.msra.mxu0 %v12652_v61  ;;  %10161 = vmatprep.subr.bf16.mxu1 %v12657_v62  ;;  %v12753_v61 = vld [vmem:[%s14206_s9 + $0x1424] ss:$8 sps:$4 sm:$0xff]   ;;  %v12751_v62 = vld [vmem:[%s14206_s9 + $0x1420] ss:$8 sps:$4 sm:$0xff]  }
 0x3af   : > { %10591 = vmatprep.subr.bf16.mxu0 %v12660_v63  ;;  %v12756_v63 = vld [vmem:[%s14206_s9 + $0x1434] ss:$8 sps:$4 sm:$0xff]  }
 0x3b1   : > { %10162 = vmatpush1.bf16.msra.mxu1 %v12655_v0  ;;  %v12754_v0 = vld [vmem:[%s14206_s9 + $0x1430] ss:$8 sps:$4 sm:$0xff]  }
 0x3b2   : > { %10592 = vmatpush1.bf16.msra.mxu0 %v12658_v1  ;;  %10163 = vmatprep.subr.bf16.mxu1 %v12663_v2  ;;  %v12759_v1 = vld [vmem:[%s14206_s9 + $0x1444] ss:$8 sps:$4 sm:$0xff]   ;;  %v12757_v2 = vld [vmem:[%s14206_s9 + $0x1440] ss:$8 sps:$4 sm:$0xff]  }
 0x3b3   : > { %10593 = vmatprep.subr.bf16.mxu0 %v12666_v3  ;;  %v12762_v3 = vld [vmem:[%s14206_s9 + $0x1454] ss:$8 sps:$4 sm:$0xff]  }
 0x3b5   : > { %10164 = vmatpush1.bf16.msra.mxu1 %v12661_v4  ;;  %v12760_v4 = vld [vmem:[%s14206_s9 + $0x1450] ss:$8 sps:$4 sm:$0xff]  }
 0x3b6   : > { %10594 = vmatpush1.bf16.msra.mxu0 %v12664_v5  ;;  %10165 = vmatprep.subr.bf16.mxu1 %v12669_v6  ;;  %v12765_v5 = vld [vmem:[%s14206_s9 + $0x1464] ss:$8 sps:$4 sm:$0xff]   ;;  %v12763_v6 = vld [vmem:[%s14206_s9 + $0x1460] ss:$8 sps:$4 sm:$0xff]  }
 0x3b7   : > { %10595 = vmatprep.subr.bf16.mxu0 %v12672_v7  ;;  %v12768_v7 = vld [vmem:[%s14206_s9 + $0x1474] ss:$8 sps:$4 sm:$0xff]  }
 0x3b9   : > { %10166 = vmatpush1.bf16.msra.mxu1 %v12667_v8  ;;  %v12766_v8 = vld [vmem:[%s14206_s9 + $0x1470] ss:$8 sps:$4 sm:$0xff]   ;;  %s5569_s9 = scalar_lea.vmem %s15010_s2, %s15020_s28 }
 0x3ba   : > { %10596 = vmatpush1.bf16.msra.mxu0 %v12670_v9  ;;  %10167 = vmatprep.subr.bf16.mxu1 %v12675_v10  ;;  %v12769_v9 = vld [vmem:[%s15008_s0 + $0xa0] ss:$164 sps:$4 sm:$0xff]  }
 0x3bb   : > { %10597 = vmatprep.subr.bf16.mxu0 %v12678_v11 }
 0x3bd   : > { %10168 = vmatpush1.bf16.msra.mxu1 %v12673_v12 }
 0x3be   : > { %10598 = vmatpush1.bf16.msra.mxu0 %v12676_v13  ;;  %10169 = vmatprep.subr.bf16.mxu1 %v12681_v14  ;;  %v10690_v14 = vlaneseq }
 0x3bf   : > { %10599 = vmatprep.subr.bf16.mxu0 %v12684_v15 }
 0x3c0   : > { %v10691_v15 = vshrl.u32 %v10690_v14, 7 }
 0x3c1   : > { %10170 = vmatpush1.bf16.msra.mxu1 %v12679_v16 }
 0x3c2   : > { %10600 = vmatpush1.bf16.msra.mxu0 %v12682_v17  ;;  %10171 = vmatprep.subr.bf16.mxu1 %v12687_v18  ;;  %v10692_v16 = vsub.s32 0, %v10691_v15  ;;  %v10688_v17 = vld [vmem:[%s5569_s9] sm:$0x3]  ;;  %v10696_v18 = vsub.s32 1, %v10691_v15 }
 0x3c3   : > { %10601 = vmatprep.subr.bf16.mxu0 %v12690_v19 }
 0x3c4   : > { %v10693_v19 = vrot.slane %v10688_v17, %v10692_v16 }
 0x3c5   : > { %10172 = vmatpush1.bf16.msra.mxu1 %v12685_v20 }
 0x3c6   : > { %10602 = vmatpush1.bf16.msra.mxu0 %v12688_v21  ;;  %10173 = vmatprep.subr.bf16.mxu1 %v12693_v22  ;;  %v10697_v21 = vrot.slane %v10688_v17, %v10696_v18 }
 0x3c7   : > { %10603 = vmatprep.subr.bf16.mxu0 %v12696_v23 }
 0x3c9   : > { %10174 = vmatpush1.bf16.msra.mxu1 %v12691_v24 }
 0x3ca   : > { %10604 = vmatpush1.bf16.msra.mxu0 %v12694_v25  ;;  %10175 = vmatprep.subr.bf16.mxu1 %v12699_v26 }
 0x3cb   : > { %10605 = vmatprep.subr.bf16.mxu0 %v12702_v27 }
 0x3cd   : > { %10176 = vmatpush1.bf16.msra.mxu1 %v12697_v28 }
 0x3ce   : > { %10606 = vmatpush1.bf16.msra.mxu0 %v12700_v29  ;;  %10177 = vmatprep.subr.bf16.mxu1 %v12705_v30 }
 0x3cf   : > { %10607 = vmatprep.subr.bf16.mxu0 %v12708_v31 }
 0x3d1   : > { %10178 = vmatpush1.bf16.msra.mxu1 %v12703_v32 }
 0x3d2   : > { %10608 = vmatpush1.bf16.msra.mxu0 %v12706_v33  ;;  %10179 = vmatprep.subr.bf16.mxu1 %v12711_v34 }
 0x3d3   : > { %10609 = vmatprep.subr.bf16.mxu0 %v12714_v35 }
 0x3d5   : > { %10180 = vmatpush1.bf16.msra.mxu1 %v12709_v36 }
 0x3d6   : > { %10610 = vmatpush1.bf16.msra.mxu0 %v12712_v37  ;;  %10181 = vmatprep.subr.bf16.mxu1 %v12717_v38 }
 0x3d7   : > { %10611 = vmatprep.subr.bf16.mxu0 %v12720_v39 }
 0x3d9   : > { %10182 = vmatpush1.bf16.msra.mxu1 %v12715_v40 }
 0x3da   : > { %10612 = vmatpush1.bf16.msra.mxu0 %v12718_v41  ;;  %10183 = vmatprep.subr.bf16.mxu1 %v12723_v42 }
 0x3db   : > { %10613 = vmatprep.subr.bf16.mxu0 %v12726_v43 }
 0x3dd   : > { %10184 = vmatpush1.bf16.msra.mxu1 %v12721_v44 }
 0x3de   : > { %10614 = vmatpush1.bf16.msra.mxu0 %v12724_v45  ;;  %10185 = vmatprep.subr.bf16.mxu1 %v12729_v46 }
 0x3df   : > { %10615 = vmatprep.subr.bf16.mxu0 %v12732_v47 }
 0x3e1   : > { %10186 = vmatpush1.bf16.msra.mxu1 %v12727_v48 }
 0x3e2   : > { %10616 = vmatpush1.bf16.msra.mxu0 %v12730_v49  ;;  %10187 = vmatprep.subr.bf16.mxu1 %v12735_v50 }
 0x3e3   : > { %10617 = vmatprep.subr.bf16.mxu0 %v12738_v51 }
 0x3e5   : > { %10188 = vmatpush1.bf16.msra.mxu1 %v12733_v52 }
 0x3e6   : > { %10618 = vmatpush1.bf16.msra.mxu0 %v12736_v53 }
 0x3e7   : > { %10630 = vmatprep.subr.bf16.mxu0 %v12747_v54 }
 0x3e8   : > { %10190 = vmatmul.mubr.bf16.vlgmr.msra.gmra.mrb[0].mxu1 %v12739_v55 }
 0x3e9   : > { %10620 = vmatmul.mubr.bf16.vlgmr.msra.gmra.mrb[0].mxu0 %v12742_v56 }
 0x3ea   : > { %10631 = vmatpush1.bf16.msra.mxu0 %v12745_v57  ;;  %10662 = vmatprep.mubr.bf16.mxu0 %v12810_v60 }
 0x3eb   : > { %10632 = vmatprep.subr.bf16.mxu0 %v12750_v58 }
 0x3ee   : > { %10633 = vmatpush1.bf16.msra.mxu0 %v12748_v59 }
 0x3ef   : > { %10634 = vmatprep.subr.bf16.mxu0 %v12753_v61 }
 0x3f2   : > { %10635 = vmatpush1.bf16.msra.mxu0 %v12751_v62 }
 0x3f3   : > { %10636 = vmatprep.subr.bf16.mxu0 %v12756_v63 }
 0x3f6   : > { %10637 = vmatpush1.bf16.msra.mxu0 %v12754_v0 }
 0x3f7   : > { %10638 = vmatprep.subr.bf16.mxu0 %v12759_v1 }
 0x3fa   : > { %10639 = vmatpush1.bf16.msra.mxu0 %v12757_v2 }
 0x3fb   : > { %10640 = vmatprep.subr.bf16.mxu0 %v12762_v3 }
 0x3fe   : > { %10641 = vmatpush1.bf16.msra.mxu0 %v12760_v4 }
 0x3ff   : > { %10642 = vmatprep.subr.bf16.mxu0 %v12765_v5 }
 0x402   : > { %10643 = vmatpush1.bf16.msra.mxu0 %v12763_v6 }
 0x403   : > { %10644 = vmatprep.subr.bf16.mxu0 %v12768_v7 }
 0x406   : > { %10645 = vmatpush1.bf16.msra.mxu0 %v12766_v8 }
 0x409   : > { %10663 = vmatmul.mubr.bf16.vlgmr.msra.gmra.mrb[0].mxu0 %v12769_v9 }
 0x4bb   : > { %v10191_v10 = vpop.f32.mrb[0].mxu1 }
 0x4bc   : > { %v10193_v11 = vpop.f32.mrb[1].mxu1 }
 0x4bd   : > { %v10195_v12 = vpop.f32.mrb[2].mxu1 }
 0x4be   : > { %v10197_v13 = vpop.f32.mrb[3].mxu1 }
 0x4dc   : > { %v10664_v20 = vpop.f32.mrb[0].mxu0 }
 0x4dd   : > { %v11602_v22 = vadd.f32 %v10664_v20, %v10191_v10  ;;  %v10666_v23 = vpop.f32.mrb[1].mxu0 }
 0x4de   : > { %v11603_v24 = vadd.f32 %v10666_v23, %v10193_v11  ;;  %v10668_v25 = vpop.f32.mrb[2].mxu0 }
 0x4df   : > { %v10700_v26 = vadd.f32 %v11602_v22, %v10693_v19  ;;  %v11604_v27 = vadd.f32 %v10668_v25, %v10195_v12  ;;  %v10670_v28 = vpop.f32.mrb[3].mxu0 }
 0x4e0   : > { %v10701_v29 = vadd.f32 %v11603_v24, %v10697_v21  ;;  %v11605_v30 = vadd.f32 %v10670_v28, %v10197_v13 }
 0x4e1   : > { %v10704_v31 = vmax.f32 %v10700_v26, 0.0  ;;  %v10702_v32 = vadd.f32 %v11604_v27, %v10693_v19 }
 0x4e2   : > { %v10705_v33 = vmax.f32 %v10701_v29, 0.0  ;;  %v10703_v34 = vadd.f32 %v11605_v30, %v10697_v21  ;;  %10728 = sbr.rel (!%p12866_p6) target bundleno = 1265 (0x4f1), region = 96 }
 0x4e3   : > { %v10706_v35 = vmax.f32 %v10702_v32, 0.0 }
 0x4e4   : > { %v11599_v36 = vpack.c.bf16 %v10705_v33, %v10704_v31  ;;  %v10707_v37 = vmax.f32 %v10703_v34, 0.0 }
 0x4e6   : > { %10720 = vst [vmem:[%s5551_s6] sm:$0xff] %v11599_v36  ;;  %v11600_v38 = vpack.c.bf16 %v10707_v37, %v10706_v35 }
 0x4e8   : > { %10721 = vst [vmem:[%s5551_s6 + $0x8] sm:$0xff] %v11600_v38 }
 0x4ed   : > { %v10764_v39 = vld [vmem:[%s5551_s6] sm:$0xff] }
 0x4ee   : > { %10765 = vst [vmem:[%s10734_s8] sm:$0xff] %v10764_v39 }
 0x4ef   : > { %v10766_v40 = vld [vmem:[%s5551_s6 + $0x8] sm:$0xff] }
 0x4f0   : > { %10767 = vst [vmem:[%s10734_s8 + $0x28] sm:$0xff] %v10766_v40 }
 0x4f1 PF: > { %s13_s16 = sadd.s32 1, %s12808_s16   ;;  %s15013_s12 = smov %s12796_s13 }
 0x4f2   : > { %p10_p12 = scmp.ge.s32.totalorder %s13_s16, 7   ;;  %s15014_s13 = smov %s12871_s22 }
 0x4f3   : > { %s15015_s14 = smov %s12804_s15  ;;  %s15016_s15 = smov %s15018_s17 }
 0x4f4   :  { %12 = sbr.rel (!%p10_p12) target bundleno = 3 (0x3), region = 177 }

// kernel: nvidia_forward.13
= control target key start
LH: loop header
LB: loop body
LE: loop exit
PB: predicated region body
PF: predicated region fallthrough
CT: control target
= control target key end

     0   :  { %s2242_s0 = inlined_call_operand.vmem [shape: bf16[16,1280], index: 0, kind: input, shape index: {}]   ;;  %s2243_s1 = inlined_call_operand.vmem [shape: bf16[1280,128], index: 1, kind: input, shape index: {}]   ;;  %s2244_s2 = inlined_call_operand.vmem [shape: f32[1,128], index: 2, kind: input, shape index: {}]   ;;  %s2245_s3 = inlined_call_operand.vmem [shape: bf16[128,128], index: 3, kind: input, shape index: {}]   ;;  %s2246_s4 = inlined_call_operand.vmem [shape: f32[1,128], index: 4, kind: input, shape index: {}]   ;;  %s2247_s5 = inlined_call_operand.vmem [shape: bf16[128,128], index: 5, kind: input, shape index: {}]   ;;  %s2248_s6 = inlined_call_operand.vmem [shape: f32[1,128], index: 6, kind: input, shape index: {}]   ;;  %s2249_s7 = inlined_call_operand.vmem [shape: bf16[128,128], index: 7, kind: input, shape index: {}]   ;;  %s2250_s8 = inlined_call_operand.vmem [shape: f32[1,128], index: 8, kind: input, shape index: {}]   ;;  %s2251_s9 = inlined_call_operand.hbm [shape: f32[16,128], index: 9, kind: output, shape index: {0}]   ;;  %s2252_s10 = inlined_call_operand.vmem [shape: f32[16,128], index: 10, kind: output, shape index: {1}]  }
   0x1   :  { %v1637_v0 = vld [vmem:[%s2243_s1 + $0x40] sm:$0xff]   ;;  %v1641_v4 = vld [vmem:[%s2243_s1 + $0x48] sm:$0xff]   ;;  %v1645_v8 = vld [vmem:[%s2243_s1 + $0x50] sm:$0xff]  }
   0x2   :  { %v1638_v1 = vld [vmem:[%s2243_s1] sm:$0xff]   ;;  %1435 = vmatprep.subr.bf16.mxu0 %v1637_v0  ;;  %v1642_v5 = vld [vmem:[%s2243_s1 + $0x8] sm:$0xff]   ;;  %v1646_v9 = vld [vmem:[%s2243_s1 + $0x10] sm:$0xff]  }
   0x3   :  { %v1639_v2 = vld [vmem:[%s2243_s1 + $0xc0] sm:$0xff]   ;;  %1436 = vmatpush3.bf16.msra.mxu0 %v1638_v1  ;;  %v1643_v6 = vld [vmem:[%s2243_s1 + $0xc8] sm:$0xff]   ;;  %v1647_v10 = vld [vmem:[%s2243_s1 + $0xd0] sm:$0xff]  }
   0x4   :  { %v1640_v3 = vld [vmem:[%s2243_s1 + $0x80] sm:$0xff]   ;;  %1457 = vmatprep.subr.bf16.mxu1 %v1639_v2  ;;  %1437 = vmatprep.subr.bf16.mxu0 %v1641_v4  ;;  %v1644_v7 = vld [vmem:[%s2243_s1 + $0x88] sm:$0xff]   ;;  %v1648_v11 = vld [vmem:[%s2243_s1 + $0x90] sm:$0xff]  }
   0x5   :  { %1458 = vmatpush3.bf16.msra.mxu1 %v1640_v3  ;;  %v1649_v12 = vld [vmem:[%s2243_s1 + $0x58] sm:$0xff]   ;;  %v1653_v16 = vld [vmem:[%s2243_s1 + $0x60] sm:$0xff]   ;;  %v1657_v20 = vld [vmem:[%s2243_s1 + $0x68] sm:$0xff]  }
   0x6   :  { %1459 = vmatprep.subr.bf16.mxu1 %v1643_v6  ;;  %v1650_v13 = vld [vmem:[%s2243_s1 + $0x18] sm:$0xff]   ;;  %v1654_v17 = vld [vmem:[%s2243_s1 + $0x20] sm:$0xff]   ;;  %v1658_v21 = vld [vmem:[%s2243_s1 + $0x28] sm:$0xff]  }
   0x7   :  { %1438 = vmatpush3.bf16.msra.mxu0 %v1642_v5  ;;  %v1651_v14 = vld [vmem:[%s2243_s1 + $0xd8] sm:$0xff]   ;;  %v1655_v18 = vld [vmem:[%s2243_s1 + $0xe0] sm:$0xff]   ;;  %v1659_v22 = vld [vmem:[%s2243_s1 + $0xe8] sm:$0xff]  }
   0x8   :  { %1439 = vmatprep.subr.bf16.mxu0 %v1645_v8  ;;  %v1652_v15 = vld [vmem:[%s2243_s1 + $0x98] sm:$0xff]   ;;  %v1656_v19 = vld [vmem:[%s2243_s1 + $0xa0] sm:$0xff]   ;;  %v1660_v23 = vld [vmem:[%s2243_s1 + $0xa8] sm:$0xff]  }
   0x9   :  { %1460 = vmatpush3.bf16.msra.mxu1 %v1644_v7  ;;  %v1661_v24 = vld [vmem:[%s2243_s1 + $0x70] sm:$0xff]   ;;  %v1665_v28 = vld [vmem:[%s2243_s1 + $0x78] sm:$0xff]   ;;  %v1668_v31 = vld [vmem:[%s2242_s0] ss:$40 sps:$4 sm:$0xff]  }
   0xa   :  { %1461 = vmatprep.subr.bf16.mxu1 %v1647_v10  ;;  %v1662_v25 = vld [vmem:[%s2243_s1 + $0x30] sm:$0xff]   ;;  %v1666_v29 = vld [vmem:[%s2243_s1 + $0x38] sm:$0xff]   ;;  %v1670_v32 = vld [vmem:[%s2242_s0 + $0x4] ss:$40 sps:$4 sm:$0xff]  }
   0xb   :  { %1440 = vmatpush3.bf16.msra.mxu0 %v1646_v9  ;;  %v1663_v26 = vld [vmem:[%s2243_s1 + $0xf0] sm:$0xff]   ;;  %v1667_v30 = vld [vmem:[%s2243_s1 + $0xf8] sm:$0xff]   ;;  %775 = vmatprep.mubr.bf16.mxu0 %v1670_v32  ;;  %v1672_v34 = vld [vmem:[%s2243_s1 + $0x140] sm:$0xff]  }
   0xc   :  { %1441 = vmatprep.subr.bf16.mxu0 %v1649_v12  ;;  %v1664_v27 = vld [vmem:[%s2243_s1 + $0xb0] sm:$0xff]   ;;  %v1671_v33 = vld [vmem:[%s2243_s1 + $0xb8] sm:$0xff]   ;;  %v1676_v37 = vld [vmem:[%s2243_s1 + $0x100] sm:$0xff]  }
   0xd   :  { %1462 = vmatpush3.bf16.msra.mxu1 %v1648_v11  ;;  %v1673_v35 = vld [vmem:[%s2242_s0 + $0x8] ss:$40 sps:$4 sm:$0xff]   ;;  %v1675_v36 = vld [vmem:[%s2242_s0 + $0xc] ss:$40 sps:$4 sm:$0xff]   ;;  %v1677_v38 = vld [vmem:[%s2243_s1 + $0x1c0] sm:$0xff]  }
   0xe   :  { %1463 = vmatprep.subr.bf16.mxu1 %v1651_v14  ;;  %816 = vmatprep.mubr.bf16.mxu1 %v1675_v36  ;;  %v1678_v39 = vld [vmem:[%s2243_s1 + $0x180] sm:$0xff]   ;;  %v1679_v40 = vld [vmem:[%s2243_s1 + $0x148] sm:$0xff]   ;;  %v1683_v44 = vld [vmem:[%s2243_s1 + $0x150] sm:$0xff]  }
   0xf   :  { %1442 = vmatpush3.bf16.msra.mxu0 %v1650_v13  ;;  %v1680_v41 = vld [vmem:[%s2243_s1 + $0x108] sm:$0xff]   ;;  %v1684_v45 = vld [vmem:[%s2243_s1 + $0x110] sm:$0xff]   ;;  %v1687_v48 = vld [vmem:[%s2243_s1 + $0x158] sm:$0xff]  }
  0x10   :  { %1443 = vmatprep.subr.bf16.mxu0 %v1653_v16  ;;  %v1681_v42 = vld [vmem:[%s2243_s1 + $0x1c8] sm:$0xff]   ;;  %v1685_v46 = vld [vmem:[%s2243_s1 + $0x1d0] sm:$0xff]   ;;  %v1688_v49 = vld [vmem:[%s2243_s1 + $0x118] sm:$0xff]  }
  0x11   :  { %1464 = vmatpush3.bf16.msra.mxu1 %v1652_v15  ;;  %v1682_v43 = vld [vmem:[%s2243_s1 + $0x188] sm:$0xff]   ;;  %v1686_v47 = vld [vmem:[%s2243_s1 + $0x190] sm:$0xff]   ;;  %v1689_v50 = vld [vmem:[%s2243_s1 + $0x1d8] sm:$0xff]  }
  0x12   :  { %1465 = vmatprep.subr.bf16.mxu1 %v1655_v18  ;;  %v1690_v51 = vld [vmem:[%s2243_s1 + $0x198] sm:$0xff]   ;;  %v1691_v52 = vld [vmem:[%s2243_s1 + $0x160] sm:$0xff]   ;;  %v1695_v56 = vld [vmem:[%s2243_s1 + $0x168] sm:$0xff]  }
  0x13   :  { %1444 = vmatpush3.bf16.msra.mxu0 %v1654_v17  ;;  %v1692_v53 = vld [vmem:[%s2243_s1 + $0x120] sm:$0xff]   ;;  %v1696_v57 = vld [vmem:[%s2243_s1 + $0x128] sm:$0xff]   ;;  %v1699_v60 = vld [vmem:[%s2243_s1 + $0x170] sm:$0xff]  }
  0x14   :  { %1445 = vmatprep.subr.bf16.mxu0 %v1657_v20  ;;  %v1693_v54 = vld [vmem:[%s2243_s1 + $0x1e0] sm:$0xff]   ;;  %v1697_v58 = vld [vmem:[%s2243_s1 + $0x1e8] sm:$0xff]   ;;  %v1700_v61 = vld [vmem:[%s2243_s1 + $0x130] sm:$0xff]  }
  0x15   :  { %1466 = vmatpush3.bf16.msra.mxu1 %v1656_v19  ;;  %v1694_v55 = vld [vmem:[%s2243_s1 + $0x1a0] sm:$0xff]   ;;  %v1698_v59 = vld [vmem:[%s2243_s1 + $0x1a8] sm:$0xff]   ;;  %v1701_v62 = vld [vmem:[%s2243_s1 + $0x1f0] sm:$0xff]  }
  0x16   :  { %1467 = vmatprep.subr.bf16.mxu1 %v1659_v22  ;;  %v1702_v63 = vld [vmem:[%s2243_s1 + $0x1b0] sm:$0xff]   ;;  %v1703_v0 = vld [vmem:[%s2243_s1 + $0x178] sm:$0xff]   ;;  %v1710_v6 = vld [vmem:[%s2243_s1 + $0x240] sm:$0xff]  }
  0x17   :  { %1446 = vmatpush3.bf16.msra.mxu0 %v1658_v21  ;;  %v1704_v1 = vld [vmem:[%s2243_s1 + $0x138] sm:$0xff]   ;;  %v1714_v9 = vld [vmem:[%s2243_s1 + $0x200] sm:$0xff]   ;;  %v1715_v10 = vld [vmem:[%s2243_s1 + $0x248] sm:$0xff]  }
  0x18   :  { %1447 = vmatprep.subr.bf16.mxu0 %v1661_v24  ;;  %v1705_v2 = vld [vmem:[%s2243_s1 + $0x1f8] sm:$0xff]   ;;  %v1716_v11 = vld [vmem:[%s2243_s1 + $0x208] sm:$0xff]   ;;  %v1717_v12 = vld [vmem:[%s2243_s1 + $0x250] sm:$0xff]  }
  0x19   :  { %1468 = vmatpush3.bf16.msra.mxu1 %v1660_v23  ;;  %v1706_v3 = vld [vmem:[%s2242_s0 + $0x10] ss:$40 sps:$4 sm:$0xff]   ;;  %v1708_v4 = vld [vmem:[%s2242_s0 + $0x14] ss:$40 sps:$4 sm:$0xff]   ;;  %v1721_v16 = vld [vmem:[%s2243_s1 + $0x260] sm:$0xff]  }
  0x1a   :  { %1469 = vmatprep.subr.bf16.mxu1 %v1663_v26  ;;  %v1709_v5 = vld [vmem:[%s2243_s1 + $0x1b8] sm:$0xff]   ;;  %v1718_v13 = vld [vmem:[%s2243_s1 + $0x210] sm:$0xff]   ;;  %v1722_v17 = vld [vmem:[%s2243_s1 + $0x220] sm:$0xff]  }
  0x1b   :  { %1448 = vmatpush3.bf16.msra.mxu0 %v1662_v25  ;;  %v1711_v7 = vld [vmem:[%s2242_s0 + $0x18] ss:$40 sps:$4 sm:$0xff]   ;;  %v1713_v8 = vld [vmem:[%s2242_s0 + $0x1c] ss:$40 sps:$4 sm:$0xff]   ;;  %v1723_v18 = vld [vmem:[%s2243_s1 + $0x268] sm:$0xff]  }
  0x1c   :  { %1449 = vmatprep.subr.bf16.mxu0 %v1665_v28  ;;  %v1719_v14 = vld [vmem:[%s2243_s1 + $0x258] sm:$0xff]   ;;  %v1731_v19 = vld [vmem:[%s2242_s0 + $0x24] ss:$40 sps:$4 sm:$0xff]   ;;  %v1725_v21 = vld [vmem:[%s2243_s1 + $0x270] sm:$0xff]  }
  0x1d   :  { %1470 = vmatpush3.bf16.msra.mxu1 %v1664_v27  ;;  %v1720_v15 = vld [vmem:[%s2243_s1 + $0x218] sm:$0xff]   ;;  %v1724_v20 = vld [vmem:[%s2243_s1 + $0x228] sm:$0xff]   ;;  %v1726_v22 = vld [vmem:[%s2243_s1 + $0x230] sm:$0xff]  }
  0x1e   :  { %1471 = vmatprep.subr.bf16.mxu1 %v1667_v30  ;;  %v1727_v23 = vld [vmem:[%s2243_s1 + $0x278] sm:$0xff]   ;;  %v1729_v25 = vld [vmem:[%s2242_s0 + $0x20] ss:$40 sps:$4 sm:$0xff]  }
  0x1f   :  { %1450 = vmatpush3.bf16.msra.mxu0 %v1666_v29  ;;  %v1728_v24 = vld [vmem:[%s2243_s1 + $0x238] sm:$0xff]  }
  0x20   :  { %1479 = vmatprep.subr.bf16.mxu0 %v1672_v34 }
  0x21   :  { %1472 = vmatpush3.bf16.msra.mxu1 %v1671_v33 }
  0x22   :  { %776 = vmatmul.mubr.bf16.vlgmr.msra.gmra.mrb[0].mxu0 %v1668_v31  ;;  %1501 = vmatprep.subr.bf16.mxu1 %v1677_v38 }
  0x23   :  { %1480 = vmatpush3.bf16.msra.mxu0 %v1676_v37  ;;  %857 = vmatprep.mubr.bf16.mxu0 %v1708_v4 }
  0x24   :  { %817 = vmatmul.mubr.bf16.vlgmr.msra.gmra.mrb[0].mxu1 %v1673_v35  ;;  %1481 = vmatprep.subr.bf16.mxu0 %v1679_v40 }
  0x25   :  { %1502 = vmatpush3.bf16.msra.mxu1 %v1678_v39  ;;  %898 = vmatprep.mubr.bf16.mxu1 %v1713_v8 }
  0x26   :  { %1503 = vmatprep.subr.bf16.mxu1 %v1681_v42 }
  0x27   :  { %1482 = vmatpush3.bf16.msra.mxu0 %v1680_v41 }
  0x28   :  { %1483 = vmatprep.subr.bf16.mxu0 %v1683_v44 }
  0x29   :  { %1504 = vmatpush3.bf16.msra.mxu1 %v1682_v43 }
  0x2a   :  { %1505 = vmatprep.subr.bf16.mxu1 %v1685_v46 }
  0x2b   :  { %1484 = vmatpush3.bf16.msra.mxu0 %v1684_v45 }
  0x2c   :  { %1485 = vmatprep.subr.bf16.mxu0 %v1687_v48 }
  0x2d   :  { %1506 = vmatpush3.bf16.msra.mxu1 %v1686_v47 }
  0x2e   :  { %1507 = vmatprep.subr.bf16.mxu1 %v1689_v50 }
  0x2f   :  { %1486 = vmatpush3.bf16.msra.mxu0 %v1688_v49 }
  0x30   :  { %1487 = vmatprep.subr.bf16.mxu0 %v1691_v52 }
  0x31   :  { %1508 = vmatpush3.bf16.msra.mxu1 %v1690_v51 }
  0x32   :  { %1509 = vmatprep.subr.bf16.mxu1 %v1693_v54 }
  0x33   :  { %1488 = vmatpush3.bf16.msra.mxu0 %v1692_v53 }
  0x34   :  { %1489 = vmatprep.subr.bf16.mxu0 %v1695_v56 }
  0x35   :  { %1510 = vmatpush3.bf16.msra.mxu1 %v1694_v55 }
  0x36   :  { %1511 = vmatprep.subr.bf16.mxu1 %v1697_v58 }
  0x37   :  { %1490 = vmatpush3.bf16.msra.mxu0 %v1696_v57 }
  0x38   :  { %1491 = vmatprep.subr.bf16.mxu0 %v1699_v60 }
  0x39   :  { %1512 = vmatpush3.bf16.msra.mxu1 %v1698_v59 }
  0x3a   :  { %1513 = vmatprep.subr.bf16.mxu1 %v1701_v62 }
  0x3b   :  { %1492 = vmatpush3.bf16.msra.mxu0 %v1700_v61 }
  0x3c   :  { %1493 = vmatprep.subr.bf16.mxu0 %v1703_v0 }
  0x3d   :  { %1514 = vmatpush3.bf16.msra.mxu1 %v1702_v63 }
  0x3e   :  { %1515 = vmatprep.subr.bf16.mxu1 %v1705_v2 }
  0x3f   :  { %1494 = vmatpush3.bf16.msra.mxu0 %v1704_v1 }
  0x40   :  { %1523 = vmatprep.subr.bf16.mxu0 %v1710_v6 }
  0x41   :  { %1516 = vmatpush3.bf16.msra.mxu1 %v1709_v5 }
  0x42   :  { %858 = vmatmul.mubr.bf16.vlgmr.msra.gmra.mrb[4].mxu0 %v1706_v3 }
  0x43   :  { %1524 = vmatpush3.bf16.msra.mxu0 %v1714_v9  ;;  %939 = vmatprep.mubr.bf16.mxu0 %v1731_v19 }
  0x44   :  { %899 = vmatmul.mubr.bf16.vlgmr.msra.gmra.mrb[4].mxu1 %v1711_v7  ;;  %1525 = vmatprep.subr.bf16.mxu0 %v1715_v10 }
  0x47   :  { %1526 = vmatpush3.bf16.msra.mxu0 %v1716_v11 }
  0x48   :  { %1527 = vmatprep.subr.bf16.mxu0 %v1717_v12 }
  0x4b   :  { %1528 = vmatpush3.bf16.msra.mxu0 %v1718_v13 }
  0x4c   :  { %1529 = vmatprep.subr.bf16.mxu0 %v1719_v14 }
  0x4f   :  { %1530 = vmatpush3.bf16.msra.mxu0 %v1720_v15 }
  0x50   :  { %1531 = vmatprep.subr.bf16.mxu0 %v1721_v16 }
  0x53   :  { %1532 = vmatpush3.bf16.msra.mxu0 %v1722_v17 }
  0x54   :  { %1533 = vmatprep.subr.bf16.mxu0 %v1723_v18 }
  0x57   :  { %1534 = vmatpush3.bf16.msra.mxu0 %v1724_v20 }
  0x58   :  { %1535 = vmatprep.subr.bf16.mxu0 %v1725_v21 }
  0x5b   :  { %1536 = vmatpush3.bf16.msra.mxu0 %v1726_v22 }
  0x5c   :  { %1537 = vmatprep.subr.bf16.mxu0 %v1727_v23 }
  0x5f   :  { %1538 = vmatpush3.bf16.msra.mxu0 %v1728_v24 }
  0x60   :  { %16 = vsyncpa [#allocation3], 0  ;;  %v1732_v26 = vld [vmem:[%s2245_s3] sm:$0xff]   ;;  %v1780_v27 = vmov 0.0   ;;  %v1733_v28 = vld [vmem:[%s2245_s3 + $0x8] sm:$0xff]   ;;  %vm1781_vm0 = vmmov 0  }
  0x61   :  { %1572 = vmatprep.subr.bf16.mxu1 %v1780_v27  ;;  %1592 = vmatprep.subr.bf16.mxu0 %v1780_v27  ;;  %v1734_v29 = vld [vmem:[%s2245_s3 + $0x10] sm:$0xff]   ;;  %v1735_v30 = vld [vmem:[%s2245_s3 + $0x18] sm:$0xff]   ;;  %v1736_v31 = vld [vmem:[%s2245_s3 + $0x20] sm:$0xff]   ;;  %s1782_s16 = smov [#allocation2]  }
  0x62   :  { %940 = vmatmul.mubr.bf16.vlgmr.msra.gmra.mrb[8].mxu0 %v1729_v25  ;;  %1573 = vmatpush3.bf16.msra.mxu1 %v1732_v26  ;;  %v1737_v32 = vld [vmem:[%s2245_s3 + $0x28] sm:$0xff]   ;;  %v1738_v33 = vld [vmem:[%s2245_s3 + $0x30] sm:$0xff]   ;;  %v1739_v34 = vld [vmem:[%s2245_s3 + $0x38] sm:$0xff]   ;;  %s1302_s17 = sshll.u32 %s1782_s16, 4  ;;  %s1303_s17 = int_to_ptr.vmem [resolvable:$true] %s1302_s17 }
  0x63   :  { %1574 = vmatprep.subr.bf16.mxu1 %v1780_v27  ;;  %1588 = vmatprep.mubr.msk.bf16.mxu1 %vm1781_vm0, %v1780_v27  ;;  %v1740_v35 = vld [vmem:[%s2247_s5] sm:$0xff]   ;;  %v1741_v36 = vld [vmem:[%s2247_s5 + $0x8] sm:$0xff]   ;;  %v1742_v37 = vld [vmem:[%s2247_s5 + $0x10] sm:$0xff]   ;;  %p1761_p1 = scmp.lt.s32.totalorder %s1303_s17, %s1303_s17 }
  0x64   :  { %1608 = vmatprep.mubr.msk.bf16.mxu0 %vm1781_vm0, %v1780_v27  ;;  %1593 = vmatpush3.bf16.msra.mxu0 %v1740_v35  ;;  %v1743_v38 = vld [vmem:[%s2247_s5 + $0x18] sm:$0xff]   ;;  %v1744_v39 = vld [vmem:[%s2247_s5 + $0x20] sm:$0xff]   ;;  %v1745_v40 = vld [vmem:[%s2247_s5 + $0x28] sm:$0xff]  }
  0x65   :  { %1594 = vmatprep.subr.bf16.mxu0 %v1780_v27  ;;  %v1317_v42 = vld [vmem:[%s2244_s2] ss:$0 sm:$0xff]  ;;  %v1746_v21 = vld [vmem:[%s2247_s5 + $0x30] sm:$0xff]   ;;  %v1747_v22 = vld [vmem:[%s2247_s5 + $0x38] sm:$0xff]  }
  0x66   :  { %1575 = vmatpush3.bf16.msra.mxu1 %v1733_v28  ;;  %v1748_v23 = vld [vmem:[%s2249_s7] sm:$0xff]   ;;  %v1749_v24 = vld [vmem:[%s2249_s7 + $0x8] sm:$0xff]   ;;  %v1750_v25 = vld [vmem:[%s2249_s7 + $0x10] sm:$0xff]  }
  0x67   :  { %1576 = vmatprep.subr.bf16.mxu1 %v1780_v27  ;;  %v1751_v26 = vld [vmem:[%s2249_s7 + $0x18] sm:$0xff]   ;;  %v1752_v28 = vld [vmem:[%s2249_s7 + $0x20] sm:$0xff]  }
  0x68   :  { %1595 = vmatpush3.bf16.msra.mxu0 %v1741_v36 }
  0x69   :  { %1596 = vmatprep.subr.bf16.mxu0 %v1780_v27 }
  0x6a   :  { %1577 = vmatpush3.bf16.msra.mxu1 %v1734_v29  ;;  %v1753_v29 = vld [vmem:[%s2249_s7 + $0x28] sm:$0xff]  }
  0x6b   :  { %1578 = vmatprep.subr.bf16.mxu1 %v1780_v27 }
  0x6c   :  { %1597 = vmatpush3.bf16.msra.mxu0 %v1742_v37 }
  0x6d   :  { %1598 = vmatprep.subr.bf16.mxu0 %v1780_v27 }
  0x6e   :  { %1579 = vmatpush3.bf16.msra.mxu1 %v1735_v30  ;;  %v1408_v30 = vld [vmem:[%s2246_s4] ss:$0 sm:$0xff] }
  0x6f   :  { %1580 = vmatprep.subr.bf16.mxu1 %v1780_v27 }
  0x70   :  { %1599 = vmatpush3.bf16.msra.mxu0 %v1743_v38 }
  0x71   :  { %1600 = vmatprep.subr.bf16.mxu0 %v1780_v27 }
  0x72   :  { %1581 = vmatpush3.bf16.msra.mxu1 %v1736_v31 }
  0x73   :  { %1582 = vmatprep.subr.bf16.mxu1 %v1780_v27 }
  0x74   :  { %1601 = vmatpush3.bf16.msra.mxu0 %v1744_v39 }
  0x75   :  { %1602 = vmatprep.subr.bf16.mxu0 %v1780_v27 }
  0x76   :  { %1583 = vmatpush3.bf16.msra.mxu1 %v1737_v32 }
  0x77   :  { %1584 = vmatprep.subr.bf16.mxu1 %v1780_v27 }
  0x78   :  { %1603 = vmatpush3.bf16.msra.mxu0 %v1745_v40  ;;  %v1754_v40 = vld [vmem:[%s2249_s7 + $0x30] sm:$0xff]  }
  0x79   :  { %1604 = vmatprep.subr.bf16.mxu0 %v1780_v27 }
  0x7a   :  { %1585 = vmatpush3.bf16.msra.mxu1 %v1738_v33 }
  0x7b   :  { %1586 = vmatprep.subr.bf16.mxu1 %v1780_v27 }
  0x7c   :  { %1605 = vmatpush3.bf16.msra.mxu0 %v1746_v21 }
  0x7d   :  { %1606 = vmatprep.subr.bf16.mxu0 %v1780_v27 }
  0x7e   :  { %1587 = vmatpush3.bf16.msra.mxu1 %v1739_v34 }
  0x7f   :  { %1612 = vmatprep.subr.bf16.mxu1 %v1780_v27 }
  0x80   :  { %1607 = vmatpush3.bf16.msra.mxu0 %v1747_v22 }
  0xf5   :  { %v1451_v41 = vpop.f32.mrb[0].mxu0 }
  0xf6   :  { %v1452_v43 = vpop.f32.mrb[1].mxu0 }
  0xf7   :  { %v1453_v44 = vadd.f32 %v1452_v43, %v1451_v41  ;;  %v1454_v45 = vpop.f32.mrb[2].mxu0  ;;  %v1473_v46 = vpop.f32.mrb[0].mxu1  ;;  %v1755_v41 = vld [vmem:[%s2249_s7 + $0x38] sm:$0xff]   ;;  %s1756_s7 = scalar_lea.vmem %s1303_s17, 256 }
  0xf8   :  { %v1455_v47 = vpop.f32.mrb[3].mxu0  ;;  %v1474_v50 = vpop.f32.mrb[1].mxu1  ;;  %p1757_p0 = scmp.ne.s32.totalorder %s1303_s17, %s1756_s7  ;;  %p1762_p2 = scmp.lt.s32.totalorder %s1756_s7, %s1756_s7 }
  0xf9   :  { %v778_v48 = vadd.f32 %v1453_v44, %v1317_v42  ;;  %v1456_v49 = vadd.f32 %v1455_v47, %v1454_v45  ;;  %v1475_v51 = vadd.f32 %v1474_v50, %v1473_v46  ;;  %v1476_v52 = vpop.f32.mrb[2].mxu1 }
  0xfa   :  { %v1477_v54 = vpop.f32.mrb[3].mxu1  ;;  %p1763_p3 = por %p1762_p2, %p1761_p1 }
  0xfb   :  { %v781_v53 = vadd.f32 %v1456_v49, %v1317_v42  ;;  %v819_v55 = vadd.f32 %v1475_v51, %v778_v48  ;;  %v1478_v56 = vadd.f32 %v1477_v54, %v1476_v52  ;;  %v1417_v42 = vld [vmem:[%s2248_s6] ss:$0 sm:$0xff] }
  0xfc   :  { %p1764_p4 = pnand %p1763_p3, %p1757_p0 }
  0xfd   :  { %v822_v57 = vadd.f32 %v1478_v56, %v781_v53 }
 0x115   :  { %v1495_v58 = vpop.f32.mrb[4].mxu0 }
 0x116   :  { %v1496_v59 = vpop.f32.mrb[5].mxu0 }
 0x117   :  { %v1497_v60 = vadd.f32 %v1496_v59, %v1495_v58  ;;  %v1498_v61 = vpop.f32.mrb[6].mxu0  ;;  %v1517_v0 = vpop.f32.mrb[4].mxu1 }
 0x118   :  { %v1499_v62 = vpop.f32.mrb[7].mxu0  ;;  %v1518_v2 = vpop.f32.mrb[5].mxu1 }
 0x119   :  { %v860_v63 = vadd.f32 %v1497_v60, %v819_v55  ;;  %v1500_v1 = vadd.f32 %v1499_v62, %v1498_v61  ;;  %v1519_v4 = vadd.f32 %v1518_v2, %v1517_v0  ;;  %v1520_v5 = vpop.f32.mrb[6].mxu1 }
 0x11a   :  { %v1521_v6 = vpop.f32.mrb[7].mxu1 }
 0x11b   :  { %v863_v3 = vadd.f32 %v1500_v1, %v822_v57  ;;  %v901_v7 = vadd.f32 %v1519_v4, %v860_v63  ;;  %v1522_v8 = vadd.f32 %v1521_v6, %v1520_v5 }
 0x11d   :  { %v904_v9 = vadd.f32 %v1522_v8, %v863_v3 }
 0x135   :  { %v1539_v10 = vpop.f32.mrb[8].mxu0 }
 0x136   :  { %v1540_v11 = vpop.f32.mrb[9].mxu0 }
 0x137   :  { %v1541_v12 = vadd.f32 %v1540_v11, %v1539_v10  ;;  %v1542_v13 = vpop.f32.mrb[10].mxu0 }
 0x138   :  { %v1543_v14 = vpop.f32.mrb[11].mxu0 }
 0x139   :  { %v942_v15 = vadd.f32 %v1541_v12, %v901_v7  ;;  %v1544_v16 = vadd.f32 %v1543_v14, %v1542_v13 }
 0x13b   :  { %v945_v17 = vadd.f32 %v1544_v16, %v904_v9  ;;  %v948_v18 = vmax.f32 %v942_v15, 0.0 }
 0x13d   :  { %v949_v19 = vmax.f32 %v945_v17, 0.0 }
 0x13f   :  { %v950_v20 = vpack.c.bf16 %v949_v19, %v948_v18 }
 0x141   :  { %1589 = vmatmul.mubr.bf16.vlgmr.msra.gmra.mrb[8].mxu1 %v950_v20 }
 0x142   :  { %1628 = vmatprep.mubr.msk.bf16.mxu1 %vm1781_vm0, %v1780_v27  ;;  %1613 = vmatpush3.bf16.msra.mxu1 %v1748_v23 }
 0x143   :  { %1614 = vmatprep.subr.bf16.mxu1 %v1780_v27 }
 0x146   :  { %1615 = vmatpush3.bf16.msra.mxu1 %v1749_v24 }
 0x147   :  { %1616 = vmatprep.subr.bf16.mxu1 %v1780_v27 }
 0x14a   :  { %1617 = vmatpush3.bf16.msra.mxu1 %v1750_v25 }
 0x14b   :  { %1618 = vmatprep.subr.bf16.mxu1 %v1780_v27 }
 0x14e   :  { %1619 = vmatpush3.bf16.msra.mxu1 %v1751_v26 }
 0x14f   :  { %1620 = vmatprep.subr.bf16.mxu1 %v1780_v27 }
 0x152   :  { %1621 = vmatpush3.bf16.msra.mxu1 %v1752_v28 }
 0x153   :  { %1622 = vmatprep.subr.bf16.mxu1 %v1780_v27 }
 0x156   :  { %1623 = vmatpush3.bf16.msra.mxu1 %v1753_v29 }
 0x157   :  { %1624 = vmatprep.subr.bf16.mxu1 %v1780_v27 }
 0x15a   :  { %1625 = vmatpush3.bf16.msra.mxu1 %v1754_v40 }
 0x15b   :  { %1626 = vmatprep.subr.bf16.mxu1 %v1780_v27 }
 0x15e   :  { %1627 = vmatpush3.bf16.msra.mxu1 %v1755_v41 }
 0x214   :  { %v1056_v31 = vpop.f32.mrb[8].mxu1 }
 0x215   :  { %v1057_v32 = vadd.f32 %v1408_v30, %v1056_v31  ;;  %v1590_v33 = vpop.f32.mrb[9].mxu1 }
 0x216   :  { %v1059_v34 = vpop.f32.mrb[10].mxu1 }
 0x217   :  { %v1060_v35 = vadd.f32 %v1408_v30, %v1059_v34  ;;  %v1591_v36 = vpop.f32.mrb[11].mxu1  ;;  %v1063_v37 = vmax.f32 %v1057_v32, 0.0 }
 0x219   :  { %v1064_v38 = vmax.f32 %v1060_v35, 0.0 }
 0x21b   :  { %v1065_v39 = vpack.c.bf16 %v1064_v38, %v1063_v37 }
 0x21d   :  { %1609 = vmatmul.mubr.bf16.vlgmr.msra.gmra.mrb[12].mxu0 %v1065_v39 }
 0x2f0   :  { %v1171_v43 = vpop.f32.mrb[12].mxu0 }
 0x2f1   :  { %v1172_v44 = vadd.f32 %v1417_v42, %v1171_v43  ;;  %v1610_v45 = vpop.f32.mrb[13].mxu0 }
 0x2f2   :  { %v1174_v46 = vpop.f32.mrb[14].mxu0 }
 0x2f3   :  { %v1178_v47 = vmax.f32 %v1172_v44, 0.0  ;;  %v1175_v48 = vadd.f32 %v1417_v42, %v1174_v46  ;;  %v1611_v49 = vpop.f32.mrb[15].mxu0 }
 0x2f5   :  { %1180 = vst [vmem:[#allocation2] sm:$0xff] %v1178_v47  ;;  %v1179_v50 = vmax.f32 %v1175_v48, 0.0 }
 0x2f7   :  { %1181 = vst [vmem:[#allocation2 + $0x8] sm:$0xff] %v1179_v50  ;;  %v1182_v27 = vpack.c.bf16 %v1179_v50, %v1178_v47 }
 0x2f9   :  { %1629 = vmatmul.mubr.bf16.vlgmr.msra.gmra.mrb[12].mxu1 %v1182_v27 }
 0x2fa   :  { %1767 = shalt.err (!%p1764_p4)
}
 0x2fb   :  { %s1768_s18 = scalar_lea.hbm %s2251_s9, 256 }
 0x2fc   :  { %p1769_p5 = scmp.ne.s32.totalorder %s2251_s9, %s1768_s18  ;;  %p1772_p6 = scmp.lt.u32.totalorder %s1768_s18, %s2251_s9 }
 0x2fe   :  { %p1774_p7 = pnand %p1772_p6, %p1769_p5 }
 0x300   :  { %1777 = shalt.err (!%p1774_p7)
}
 0x301   :  { %s1783_s23 = smov 128   ;;  %s1784_s24 = smov 8   ;;  %v1426_v51 = vld [vmem:[%s2250_s8] ss:$0 sm:$0xff] }
 0x302   :  { %1308 = dma.vmem_to_hbm [thread:$0]  %s1303_s17, 256, %s2251_s9, [#allocation3], %s1783_s23, %s1783_s23, %s1784_s24  }
 0x3cc   :  { %v1288_v52 = vpop.f32.mrb[12].mxu1 }
 0x3cd   :  { %v1289_v53 = vadd.f32 %v1426_v51, %v1288_v52  ;;  %v1630_v54 = vpop.f32.mrb[13].mxu1 }
 0x3ce   :  { %v1291_v55 = vpop.f32.mrb[14].mxu1 }
 0x3cf   :  { %1295 = vst [vmem:[%s2252_s10] sm:$0xff] %v1289_v53  ;;  %v1292_v56 = vadd.f32 %v1426_v51, %v1291_v55  ;;  %v1631_v57 = vpop.f32.mrb[15].mxu1 }
 0x3d1   :  { %1296 = vst [vmem:[%s2252_s10 + $0x8] sm:$0xff] %v1292_v56 }
 0x3d2   :  { %1778 = dma.done.wait [#allocation3], 256  }
 0x3d3   :  { %1779 = vsyncadd [#allocation3], 4294967040 }
 0x3d4   :  { %1316 = vsyncpa [#allocation3], 1 }

</bundles_post_ra>
